<compile_context>
chip_gen: v5e
topology: v5e:2x2
jax: 0.10.0
libtpu: 0.0.40
codegen_flags: <defaults>
</compile_context>

<pallas_src>
import functools

import jax
import jax.numpy as jnp
from jax.experimental import pallas as pl
from jax.experimental.pallas import tpu as pltpu

_EPS = 1e-5
_VMEM_LIMIT = 32 * 1024 * 1024  # explicit scoped-VMEM limit; safe on v5e/v6e/v7x


def _round_up(x, m):
    return ((x + m - 1) // m) * m


def _pick_row_tile(n):
    """Row tile: >=128 (MXU-aligned), up to 512 (~85% of HBM roofline) while
    keeping double-buffered int8 A tiles comfortably inside v7x's 64 MiB VMEM."""
    if n < 128:
        return _round_up(max(n, 8), 8)
    for cand in (512, 256):
        if n >= cand:
            return cand
    return 128


# ---------------------------------------------------------------------------
# Pass 1: per row-tile   h_pre = A_hat @ X @ W1 + b1   (+ BN partial stats)
# ---------------------------------------------------------------------------
def _gcn_layer1_kernel(a_ref, xs_ref, w1_ref, b1_ref, dinv_ref, mask_ref,
                       h_ref, st_ref):
    # a_ref:   (TM, Np)  int8  0/1 adjacency (A+I) row tile
    # xs_ref:  (Np, Ci)  bf16  D^-1/2 X (pre-scaled, resident)
    # w1_ref:  (Ci, Ch)  bf16
    # b1_ref:  (1, Ch)   f32
    # dinv_ref:(TM, 1)   f32   row D^-1/2
    # mask_ref:(TM, 1)   f32   1 for real rows, 0 for padded rows
    # h_ref:   (TM, Ch)  f32   pre-BN activations
    # st_ref:  (8, Ch)   f32   row0=sum, row1=sumsq, rest 0
    a_bf = a_ref[...].astype(jnp.bfloat16)          # 8-bit HBM -> bf16 for MXU
    ax = jnp.dot(a_bf, xs_ref[...], preferred_element_type=jnp.float32)
    ax = ax * dinv_ref[...]                         # -> A_hat X
    h = jnp.dot(ax.astype(jnp.bfloat16), w1_ref[...],
                preferred_element_type=jnp.float32)
    h = (h + b1_ref[...]) * mask_ref[...]           # + b1, zero padded rows
    h_ref[...] = h

    s = jnp.sum(h, axis=0, keepdims=True)
    q = jnp.sum(h * h, axis=0, keepdims=True)
    rows = jax.lax.broadcasted_iota(jnp.int32, st_ref.shape, 0)
    st_ref[...] = jnp.where(
        rows == 0, jnp.broadcast_to(s, st_ref.shape),
        jnp.where(rows == 1, jnp.broadcast_to(q, st_ref.shape), 0.0))


# ---------------------------------------------------------------------------
# Pass 2: per row-tile   z = (D^-1/2 * ReLU(BN(h_pre))) @ W2
# ---------------------------------------------------------------------------
def _bn_relu_w2_kernel(h_ref, st_ref, gb_ref, dinv_ref, w2_ref, z_ref, *, inv_n):
    mean = st_ref[0:1, :] * inv_n
    var = jnp.maximum(st_ref[1:2, :] * inv_n - mean * mean, 0.0)
    hn = (h_ref[...] - mean) * jax.lax.rsqrt(var + _EPS)
    h1 = jnp.maximum(hn * gb_ref[0:1, :] + gb_ref[1:2, :], 0.0)
    z = jnp.dot((h1 * dinv_ref[...]).astype(jnp.bfloat16), w2_ref[...],
                preferred_element_type=jnp.float32)
    z_ref[...] = z.astype(z_ref.dtype)


# ---------------------------------------------------------------------------
# Pass 3: per row-tile   y = D^-1/2 * (A @ z) + b2
# ---------------------------------------------------------------------------
def _gcn_layer2_kernel(a_ref, z_ref, dinv_ref, b2_ref, o_ref):
    a_bf = a_ref[...].astype(jnp.bfloat16)
    y = jnp.dot(a_bf, z_ref[...], preferred_element_type=jnp.float32)
    o_ref[...] = (y * dinv_ref[...] + b2_ref[...]).astype(o_ref.dtype)


# ---------------------------------------------------------------------------
# Graph preprocessing (do ONCE per static graph; pure XLA glue)
# ---------------------------------------------------------------------------
def build_graph(edge_index, num_nodes, tile_rows):
    n = num_nodes
    n_pad = _round_up(n, tile_rows)
    src, dst = edge_index[0], edge_index[1]
    a = jnp.zeros((n, n), jnp.float32).at[src, dst].max(1.0)
    a = jnp.maximum(a, a.T)
    a = jnp.maximum(a, jnp.eye(n, dtype=jnp.float32))           # self-loops
    dinv = jax.lax.rsqrt(a.sum(axis=1, keepdims=True))          # deg >= 1
    a_i8 = jnp.zeros((n_pad, n_pad), jnp.int8).at[:n, :n].set(a.astype(jnp.int8))
    dinv_p = jnp.zeros((n_pad, 1), jnp.float32).at[:n].set(dinv)
    mask_p = jnp.zeros((n_pad, 1), jnp.float32).at[:n].set(1.0)
    return a_i8, dinv_p, mask_p


# ---------------------------------------------------------------------------
# Forward
# ---------------------------------------------------------------------------
def gcn_with_dhla_forward(x, graph, params, *, tile_rows):
    a_i8, dinv_p, mask_p = graph
    n, in_dim = x.shape
    n_pad = a_i8.shape[0]
    tm = tile_rows
    n_tiles = n_pad // tm
    hid = params["w1"].shape[1]
    out_dim = params["w2"].shape[1]
    ci = _round_up(in_dim, 128)
    ch = _round_up(hid, 128)
    co = _round_up(out_dim, 128)

    # lane-dense (128-padded) parameters / inputs; zero-padding is exact
    x_p = jnp.zeros((n_pad, ci), jnp.float32).at[:n, :in_dim].set(x)
    xs = (x_p * dinv_p).astype(jnp.bfloat16)                    # D^-1/2 X once
    w1 = jnp.zeros((ci, ch), jnp.bfloat16).at[:in_dim, :hid].set(
        params["w1"].astype(jnp.bfloat16))
    b1 = jnp.zeros((1, ch), jnp.float32).at[0, :hid].set(params["b1"])
    gb = (jnp.zeros((2, ch), jnp.float32)
          .at[0, :hid].set(params["gamma1"])
          .at[1, :hid].set(params["beta1"]))
    w2 = jnp.zeros((ch, co), jnp.bfloat16).at[:hid, :out_dim].set(
        params["w2"].astype(jnp.bfloat16))
    b2 = jnp.zeros((1, co), jnp.float32).at[0, :out_dim].set(params["b2"])

    cparams = pltpu.CompilerParams(dimension_semantics=("parallel",),
                                   vmem_limit_bytes=_VMEM_LIMIT)

    # -------- pass 1: layer-1 matmuls + BN partial stats --------------------
    flops1 = 2 * n_pad * n_pad * ci + 2 * n_pad * ci * ch
    bytes1 = (n_pad * n_pad + n_pad * ci * 2 + ci * ch * 2
              + n_pad * ch * 4 + n_tiles * 8 * ch * 4)
    h_pre, pstats = pl.pallas_call(
        _gcn_layer1_kernel,
        out_shape=(jax.ShapeDtypeStruct((n_pad, ch), jnp.float32),
                   jax.ShapeDtypeStruct((n_tiles * 8, ch), jnp.float32)),
        grid=(n_tiles,),
        in_specs=[
            pl.BlockSpec((tm, n_pad), lambda i: (i, 0)),   # A row tile (int8)
            pl.BlockSpec((n_pad, ci), lambda i: (0, 0)),   # D^-1/2 X (resident)
            pl.BlockSpec((ci, ch), lambda i: (0, 0)),
            pl.BlockSpec((1, ch), lambda i: (0, 0)),
            pl.BlockSpec((tm, 1), lambda i: (i, 0)),
            pl.BlockSpec((tm, 1), lambda i: (i, 0)),
        ],
        out_specs=(pl.BlockSpec((tm, ch), lambda i: (i, 0)),
                   pl.BlockSpec((8, ch), lambda i: (i, 0))),
        compiler_params=cparams,
        cost_estimate=pl.CostEstimate(flops=flops1, transcendentals=0,
                                      bytes_accessed=bytes1),
    )(a_i8, xs, w1, b1, dinv_p, mask_p)

    # tiny cross-tile reduction of BN stats (outside the parallel row axis)
    stats = pstats.reshape(n_tiles, 8, ch).sum(axis=0)          # (8, ch)

    # -------- pass 2: BN + ReLU + @W2 ---------------------------------------
    flops2 = 2 * n_pad * ch * co + 6 * n_pad * ch
    bytes2 = n_pad * ch * 4 + ch * co * 2 + n_pad * co * 2
    z = pl.pallas_call(
        functools.partial(_bn_relu_w2_kernel, inv_n=1.0 / n),
        out_shape=jax.ShapeDtypeStruct((n_pad, co), jnp.bfloat16),
        grid=(n_tiles,),
        in_specs=[
            pl.BlockSpec((tm, ch), lambda i: (i, 0)),
            pl.BlockSpec((8, ch), lambda i: (0, 0)),
            pl.BlockSpec((2, ch), lambda i: (0, 0)),
            pl.BlockSpec((tm, 1), lambda i: (i, 0)),
            pl.BlockSpec((ch, co), lambda i: (0, 0)),
        ],
        out_specs=pl.BlockSpec((tm, co), lambda i: (i, 0)),
        compiler_params=cparams,
        cost_estimate=pl.CostEstimate(flops=flops2, transcendentals=ch,
                                      bytes_accessed=bytes2),
    )(h_pre, stats, gb, dinv_p, w2)

    # -------- pass 3: layer-2 aggregation A_hat @ z + b2 --------------------
    flops3 = 2 * n_pad * n_pad * co
    bytes3 = n_pad * n_pad + n_pad * co * 2 + n_pad * co * 4
    y = pl.pallas_call(
        _gcn_layer2_kernel,
        out_shape=jax.ShapeDtypeStruct((n_pad, co), jnp.float32),
        grid=(n_tiles,),
        in_specs=[
            pl.BlockSpec((tm, n_pad), lambda i: (i, 0)),   # A row tile (int8)
            pl.BlockSpec((n_pad, co), lambda i: (0, 0)),   # z (bf16, resident)
            pl.BlockSpec((tm, 1), lambda i: (i, 0)),
            pl.BlockSpec((1, co), lambda i: (0, 0)),
        ],
        out_specs=pl.BlockSpec((tm, co), lambda i: (i, 0)),
        compiler_params=cparams,
        cost_estimate=pl.CostEstimate(flops=flops3, transcendentals=0,
                                      bytes_accessed=bytes3),
    )(a_i8, z, dinv_p, b2)

    return y[:n, :out_dim]


# ---------------------------------------------------------------------------
# Main
# ---------------------------------------------------------------------------
if __name__ == "__main__":
    key = jax.random.PRNGKey(0)
    k_x, k_e1, k_e2, k_w1, k_w2 = jax.random.split(key, 5)

    N, E = 1024, 8192                      # exercises a 2-step row-tiled grid
    in_dim, hidden_dim, out_dim = 16, 32, 16

    x = jax.random.normal(k_x, (N, in_dim), dtype=jnp.float32)
    edge_index = jnp.stack(
        [jax.random.randint(k_e1, (E,), 0, N),
         jax.random.randint(k_e2, (E,), 0, N)], axis=0)

    def glorot(k, shape):
        s = jnp.sqrt(6.0 / (shape[0] + shape[1]))
        return jax.random.uniform(k, shape, jnp.float32, -s, s)

    params = {
        "w1": glorot(k_w1, (in_dim, hidden_dim)),
        "b1": jnp.zeros((hidden_dim,), jnp.float32),
        "gamma1": jnp.ones((hidden_dim,), jnp.float32),
        "beta1": jnp.zeros((hidden_dim,), jnp.float32),
        "w2": glorot(k_w2, (hidden_dim, out_dim)),
        "b2": jnp.zeros((out_dim,), jnp.float32),
    }

    tm = _pick_row_tile(N)
    graph = build_graph(edge_index, N, tm)   # static graph: build/cache ONCE
    fwd = jax.jit(functools.partial(gcn_with_dhla_forward, tile_rows=tm))

    out = jax.block_until_ready(fwd(x, graph, params))
    assert out.shape == (N, out_dim)
    assert bool(jnp.all(jnp.isfinite(out)))
    print("KERNEL_OK")
</pallas_src>

<mosaic_0001>
module attributes {stable_mosaic.version = 11 : i64} {
  func.func @_gcn_layer1_kernel(%arg0: i32, %arg1: memref<512x1024xi8, #tpu.memory_space<vmem>>, %arg2: memref<1024x128xbf16, #tpu.memory_space<vmem>>, %arg3: memref<128x128xbf16, #tpu.memory_space<vmem>>, %arg4: memref<1x128xf32, #tpu.memory_space<vmem>>, %arg5: memref<512x1xf32, #tpu.memory_space<vmem>>, %arg6: memref<512x1xf32, #tpu.memory_space<vmem>>, %arg7: memref<512x128xf32, #tpu.memory_space<vmem>>, %arg8: memref<8x128xf32, #tpu.memory_space<vmem>>) attributes {dimension_semantics = [#tpu.dimension_semantics<parallel>], iteration_bounds = array<i64: 2>, scalar_prefetch = 0 : i64, scratch_operands = 0 : i64, tpu.core_type = #tpu.core_type<tc>, window_params = [{transform_indices = @transform_0, window_bounds = array<i64: 512, 1024>}, {pipeline_mode = #tpu.pipeline_mode<synchronous>, transform_indices = @transform_1, window_bounds = array<i64: 1024, 128>}, {pipeline_mode = #tpu.pipeline_mode<synchronous>, transform_indices = @transform_2, window_bounds = array<i64: 128, 128>}, {pipeline_mode = #tpu.pipeline_mode<synchronous>, transform_indices = @transform_3, window_bounds = array<i64: 1, 128>}, {transform_indices = @transform_4, window_bounds = array<i64: 512, 1>}, {transform_indices = @transform_5, window_bounds = array<i64: 512, 1>}, {transform_indices = @transform_6, window_bounds = array<i64: 512, 128>}, {transform_indices = @transform_7, window_bounds = array<i64: 8, 128>}]} {
    %c0 = arith.constant 0 : index
    %c0_0 = arith.constant 0 : index
    %0 = vector.load %arg1[%c0, %c0_0] : memref<512x1024xi8, #tpu.memory_space<vmem>>, vector<512x1024xi8>
    %1 = arith.sitofp %0 : vector<512x1024xi8> to vector<512x1024xbf16>
    %c0_1 = arith.constant 0 : index
    %c0_2 = arith.constant 0 : index
    %2 = vector.load %arg2[%c0_1, %c0_2] : memref<1024x128xbf16, #tpu.memory_space<vmem>>, vector<1024x128xbf16>
    %cst = arith.constant dense<0.000000e+00> : vector<512x128xf32>
    %3 = tpu.matmul %1, %2, %cst {dimension_numbers = #tpu.dot_dimension_numbers<[1], [0], [0], [1], [0, 0, 1, 1], [], []>} : vector<512x1024xbf16>, vector<1024x128xbf16>, vector<512x128xf32> -> vector<512x128xf32>
    %c0_3 = arith.constant 0 : index
    %c0_4 = arith.constant 0 : index
    %4 = vector.load %arg5[%c0_3, %c0_4] : memref<512x1xf32, #tpu.memory_space<vmem>>, vector<512x1xf32>
    %5 = vector.broadcast %4 : vector<512x1xf32> to vector<512x128xf32>
    %6 = arith.mulf %3, %5 : vector<512x128xf32>
    %7 = arith.truncf %6 : vector<512x128xf32> to vector<512x128xbf16>
    %c0_5 = arith.constant 0 : index
    %c0_6 = arith.constant 0 : index
    %8 = vector.load %arg3[%c0_5, %c0_6] : memref<128x128xbf16, #tpu.memory_space<vmem>>, vector<128x128xbf16>
    %cst_7 = arith.constant dense<0.000000e+00> : vector<512x128xf32>
    %9 = tpu.matmul %7, %8, %cst_7 {dimension_numbers = #tpu.dot_dimension_numbers<[1], [0], [0], [1], [0, 0, 1, 1], [], []>} : vector<512x128xbf16>, vector<128x128xbf16>, vector<512x128xf32> -> vector<512x128xf32>
    %c0_8 = arith.constant 0 : index
    %c0_9 = arith.constant 0 : index
    %10 = vector.load %arg4[%c0_8, %c0_9] : memref<1x128xf32, #tpu.memory_space<vmem>>, vector<1x128xf32>
    %11 = vector.broadcast %10 : vector<1x128xf32> to vector<512x128xf32>
    %12 = arith.addf %9, %11 : vector<512x128xf32>
    %c0_10 = arith.constant 0 : index
    %c0_11 = arith.constant 0 : index
    %13 = vector.load %arg6[%c0_10, %c0_11] : memref<512x1xf32, #tpu.memory_space<vmem>>, vector<512x1xf32>
    %14 = vector.broadcast %13 : vector<512x1xf32> to vector<512x128xf32>
    %15 = arith.mulf %12, %14 : vector<512x128xf32>
    %c0_12 = arith.constant 0 : index
    %c0_13 = arith.constant 0 : index
    %16 = vector.load %arg7[%c0_12, %c0_13] : memref<512x128xf32, #tpu.memory_space<vmem>>, vector<512x128xf32>
    tpu.vector_store %arg7[%c0_12, %c0_13], %15 {strides = array<i32>} : memref<512x128xf32, #tpu.memory_space<vmem>>, vector<512x128xf32>,
    %cst_14 = arith.constant dense<0.000000e+00> : vector<128xf32>
    %17 = vector.multi_reduction <add>, %15, %cst_14 [0] : vector<512x128xf32> to vector<128xf32>
    %18 = vector.shape_cast %17 : vector<128xf32> to vector<1x128xf32>
    %19 = arith.mulf %15, %15 : vector<512x128xf32>
    %cst_15 = arith.constant dense<0.000000e+00> : vector<128xf32>
    %20 = vector.multi_reduction <add>, %19, %cst_15 [0] : vector<512x128xf32> to vector<128xf32>
    %21 = vector.shape_cast %20 : vector<128xf32> to vector<1x128xf32>
    %22 = tpu.iota {dimensions = array<i32: 0>} : vector<8x128xi32>
    %c0_i32 = arith.constant 0 : i32
    %23 = vector.broadcast %c0_i32 : i32 to vector<8x128xi32>
    %24 = arith.cmpi eq, %22, %23 : vector<8x128xi32>
    %25 = vector.shape_cast %18 : vector<1x128xf32> to vector<1x128xf32>
    %26 = vector.broadcast %25 : vector<1x128xf32> to vector<8x128xf32>
    %c1_i32 = arith.constant 1 : i32
    %27 = vector.broadcast %c1_i32 : i32 to vector<8x128xi32>
    %28 = arith.cmpi eq, %22, %27 : vector<8x128xi32>
    %29 = vector.shape_cast %21 : vector<1x128xf32> to vector<1x128xf32>
    %30 = vector.broadcast %29 : vector<1x128xf32> to vector<8x128xf32>
    %cst_16 = arith.constant 0.000000e+00 : f32
    %31 = vector.broadcast %cst_16 : f32 to vector<8x128xf32>
    %32 = arith.select %28, %30, %31 : vector<8x128xi1>, vector<8x128xf32>
    %33 = arith.select %24, %26, %32 : vector<8x128xi1>, vector<8x128xf32>
    %c0_17 = arith.constant 0 : index
    %c0_18 = arith.constant 0 : index
    %34 = vector.load %arg8[%c0_17, %c0_18] : memref<8x128xf32, #tpu.memory_space<vmem>>, vector<8x128xf32>
    tpu.vector_store %arg8[%c0_17, %c0_18], %33 {strides = array<i32>} : memref<8x128xf32, #tpu.memory_space<vmem>>, vector<8x128xf32>,
    return
  }
  func.func @transform_0(%arg0: i32) -> (i32, i32) {
    %c0_i32 = arith.constant 0 : i32
    %c0_i32_0 = arith.constant 0 : i32
    return %arg0, %c0_i32 : i32, i32
  }
  func.func @transform_1(%arg0: i32) -> (i32, i32) {
    %c0_i32 = arith.constant 0 : i32
    %c0_i32_0 = arith.constant 0 : i32
    %c0_i32_1 = arith.constant 0 : i32
    return %c0_i32, %c0_i32_0 : i32, i32
  }
  func.func @transform_2(%arg0: i32) -> (i32, i32) {
    %c0_i32 = arith.constant 0 : i32
    %c0_i32_0 = arith.constant 0 : i32
    %c0_i32_1 = arith.constant 0 : i32
    return %c0_i32, %c0_i32_0 : i32, i32
  }
  func.func @transform_3(%arg0: i32) -> (i32, i32) {
    %c0_i32 = arith.constant 0 : i32
    %c0_i32_0 = arith.constant 0 : i32
    %c0_i32_1 = arith.constant 0 : i32
    return %c0_i32, %c0_i32_0 : i32, i32
  }
  func.func @transform_4(%arg0: i32) -> (i32, i32) {
    %c0_i32 = arith.constant 0 : i32
    %c0_i32_0 = arith.constant 0 : i32
    return %arg0, %c0_i32 : i32, i32
  }
  func.func @transform_5(%arg0: i32) -> (i32, i32) {
    %c0_i32 = arith.constant 0 : i32
    %c0_i32_0 = arith.constant 0 : i32
    return %arg0, %c0_i32 : i32, i32
  }
  func.func @transform_6(%arg0: i32) -> (i32, i32) {
    %c0_i32 = arith.constant 0 : i32
    %c0_i32_0 = arith.constant 0 : i32
    return %arg0, %c0_i32 : i32, i32
  }
  func.func @transform_7(%arg0: i32) -> (i32, i32) {
    %c0_i32 = arith.constant 0 : i32
    %c0_i32_0 = arith.constant 0 : i32
    return %arg0, %c0_i32 : i32, i32
  }
}

module attributes {stable_mosaic.version = 11 : i64} {
  func.func @_bn_relu_w2_kernel(%arg0: i32, %arg1: memref<512x128xf32, #tpu.memory_space<vmem>>, %arg2: memref<8x128xf32, #tpu.memory_space<vmem>>, %arg3: memref<2x128xf32, #tpu.memory_space<vmem>>, %arg4: memref<512x1xf32, #tpu.memory_space<vmem>>, %arg5: memref<128x128xbf16, #tpu.memory_space<vmem>>, %arg6: memref<512x128xbf16, #tpu.memory_space<vmem>>) attributes {dimension_semantics = [#tpu.dimension_semantics<parallel>], iteration_bounds = array<i64: 2>, scalar_prefetch = 0 : i64, scratch_operands = 0 : i64, tpu.core_type = #tpu.core_type<tc>, window_params = [{transform_indices = @transform_0, window_bounds = array<i64: 512, 128>}, {pipeline_mode = #tpu.pipeline_mode<synchronous>, transform_indices = @transform_1, window_bounds = array<i64: 8, 128>}, {pipeline_mode = #tpu.pipeline_mode<synchronous>, transform_indices = @transform_2, window_bounds = array<i64: 2, 128>}, {transform_indices = @transform_3, window_bounds = array<i64: 512, 1>}, {pipeline_mode = #tpu.pipeline_mode<synchronous>, transform_indices = @transform_4, window_bounds = array<i64: 128, 128>}, {transform_indices = @transform_5, window_bounds = array<i64: 512, 128>}]} {
    %c0 = arith.constant 0 : index
    %c0_0 = arith.constant 0 : index
    %0 = vector.load %arg2[%c0, %c0_0] : memref<8x128xf32, #tpu.memory_space<vmem>>, vector<1x128xf32>
    %cst = arith.constant 9.765625E-4 : f32
    %1 = vector.broadcast %cst : f32 to vector<1x128xf32>
    %2 = arith.mulf %0, %1 : vector<1x128xf32>
    %c1 = arith.constant 1 : index
    %c0_1 = arith.constant 0 : index
    %3 = vector.load %arg2[%c1, %c0_1] : memref<8x128xf32, #tpu.memory_space<vmem>>, vector<1x128xf32>
    %cst_2 = arith.constant 9.765625E-4 : f32
    %4 = vector.broadcast %cst_2 : f32 to vector<1x128xf32>
    %5 = arith.mulf %3, %4 : vector<1x128xf32>
    %6 = arith.mulf %2, %2 : vector<1x128xf32>
    %7 = arith.subf %5, %6 : vector<1x128xf32>
    %cst_3 = arith.constant 0.000000e+00 : f32
    %8 = vector.broadcast %cst_3 : f32 to vector<1x128xf32>
    %9 = arith.maximumf %7, %8 : vector<1x128xf32>
    %c0_4 = arith.constant 0 : index
    %c0_5 = arith.constant 0 : index
    %10 = vector.load %arg1[%c0_4, %c0_5] : memref<512x128xf32, #tpu.memory_space<vmem>>, vector<512x128xf32>
    %11 = vector.broadcast %2 : vector<1x128xf32> to vector<512x128xf32>
    %12 = arith.subf %10, %11 : vector<512x128xf32>
    %cst_6 = arith.constant 9.99999974E-6 : f32
    %13 = vector.broadcast %cst_6 : f32 to vector<1x128xf32>
    %14 = arith.addf %9, %13 : vector<1x128xf32>
    %15 = math.rsqrt %14 : vector<1x128xf32>
    %16 = vector.broadcast %15 : vector<1x128xf32> to vector<512x128xf32>
    %17 = arith.mulf %12, %16 : vector<512x128xf32>
    %c0_7 = arith.constant 0 : index
    %c0_8 = arith.constant 0 : index
    %18 = vector.load %arg3[%c0_7, %c0_8] : memref<2x128xf32, #tpu.memory_space<vmem>>, vector<1x128xf32>
    %19 = vector.broadcast %18 : vector<1x128xf32> to vector<512x128xf32>
    %20 = arith.mulf %17, %19 : vector<512x128xf32>
    %c1_9 = arith.constant 1 : index
    %c0_10 = arith.constant 0 : index
    %21 = vector.load %arg3[%c1_9, %c0_10] : memref<2x128xf32, #tpu.memory_space<vmem>>, vector<1x128xf32>
    %22 = vector.broadcast %21 : vector<1x128xf32> to vector<512x128xf32>
    %23 = arith.addf %20, %22 : vector<512x128xf32>
    %cst_11 = arith.constant 0.000000e+00 : f32
    %24 = vector.broadcast %cst_11 : f32 to vector<512x128xf32>
    %25 = arith.maximumf %23, %24 : vector<512x128xf32>
    %c0_12 = arith.constant 0 : index
    %c0_13 = arith.constant 0 : index
    %26 = vector.load %arg4[%c0_12, %c0_13] : memref<512x1xf32, #tpu.memory_space<vmem>>, vector<512x1xf32>
    %27 = vector.broadcast %26 : vector<512x1xf32> to vector<512x128xf32>
    %28 = arith.mulf %25, %27 : vector<512x128xf32>
    %29 = arith.truncf %28 : vector<512x128xf32> to vector<512x128xbf16>
    %c0_14 = arith.constant 0 : index
    %c0_15 = arith.constant 0 : index
    %30 = vector.load %arg5[%c0_14, %c0_15] : memref<128x128xbf16, #tpu.memory_space<vmem>>, vector<128x128xbf16>
    %cst_16 = arith.constant dense<0.000000e+00> : vector<512x128xf32>
    %31 = tpu.matmul %29, %30, %cst_16 {dimension_numbers = #tpu.dot_dimension_numbers<[1], [0], [0], [1], [0, 0, 1, 1], [], []>} : vector<512x128xbf16>, vector<128x128xbf16>, vector<512x128xf32> -> vector<512x128xf32>
    %32 = arith.truncf %31 : vector<512x128xf32> to vector<512x128xbf16>
    %c0_17 = arith.constant 0 : index
    %c0_18 = arith.constant 0 : index
    %33 = vector.load %arg6[%c0_17, %c0_18] : memref<512x128xbf16, #tpu.memory_space<vmem>>, vector<512x128xbf16>
    tpu.vector_store %arg6[%c0_17, %c0_18], %32 {strides = array<i32>} : memref<512x128xbf16, #tpu.memory_space<vmem>>, vector<512x128xbf16>,
    return
  }
  func.func @transform_0(%arg0: i32) -> (i32, i32) {
    %c0_i32 = arith.constant 0 : i32
    %c0_i32_0 = arith.constant 0 : i32
    return %arg0, %c0_i32 : i32, i32
  }
  func.func @transform_1(%arg0: i32) -> (i32, i32) {
    %c0_i32 = arith.constant 0 : i32
    %c0_i32_0 = arith.constant 0 : i32
    %c0_i32_1 = arith.constant 0 : i32
    return %c0_i32, %c0_i32_0 : i32, i32
  }
  func.func @transform_2(%arg0: i32) -> (i32, i32) {
    %c0_i32 = arith.constant 0 : i32
    %c0_i32_0 = arith.constant 0 : i32
    %c0_i32_1 = arith.constant 0 : i32
    return %c0_i32, %c0_i32_0 : i32, i32
  }
  func.func @transform_3(%arg0: i32) -> (i32, i32) {
    %c0_i32 = arith.constant 0 : i32
    %c0_i32_0 = arith.constant 0 : i32
    return %arg0, %c0_i32 : i32, i32
  }
  func.func @transform_4(%arg0: i32) -> (i32, i32) {
    %c0_i32 = arith.constant 0 : i32
    %c0_i32_0 = arith.constant 0 : i32
    %c0_i32_1 = arith.constant 0 : i32
    return %c0_i32, %c0_i32_0 : i32, i32
  }
  func.func @transform_5(%arg0: i32) -> (i32, i32) {
    %c0_i32 = arith.constant 0 : i32
    %c0_i32_0 = arith.constant 0 : i32
    return %arg0, %c0_i32 : i32, i32
  }
}

module attributes {stable_mosaic.version = 11 : i64} {
  func.func @_gcn_layer2_kernel(%arg0: i32, %arg1: memref<512x1024xi8, #tpu.memory_space<vmem>>, %arg2: memref<1024x128xbf16, #tpu.memory_space<vmem>>, %arg3: memref<512x1xf32, #tpu.memory_space<vmem>>, %arg4: memref<1x128xf32, #tpu.memory_space<vmem>>, %arg5: memref<512x128xf32, #tpu.memory_space<vmem>>) attributes {dimension_semantics = [#tpu.dimension_semantics<parallel>], iteration_bounds = array<i64: 2>, scalar_prefetch = 0 : i64, scratch_operands = 0 : i64, tpu.core_type = #tpu.core_type<tc>, window_params = [{transform_indices = @transform_0, window_bounds = array<i64: 512, 1024>}, {pipeline_mode = #tpu.pipeline_mode<synchronous>, transform_indices = @transform_1, window_bounds = array<i64: 1024, 128>}, {transform_indices = @transform_2, window_bounds = array<i64: 512, 1>}, {pipeline_mode = #tpu.pipeline_mode<synchronous>, transform_indices = @transform_3, window_bounds = array<i64: 1, 128>}, {transform_indices = @transform_4, window_bounds = array<i64: 512, 128>}]} {
    %c0 = arith.constant 0 : index
    %c0_0 = arith.constant 0 : index
    %0 = vector.load %arg1[%c0, %c0_0] : memref<512x1024xi8, #tpu.memory_space<vmem>>, vector<512x1024xi8>
    %1 = arith.sitofp %0 : vector<512x1024xi8> to vector<512x1024xbf16>
    %c0_1 = arith.constant 0 : index
    %c0_2 = arith.constant 0 : index
    %2 = vector.load %arg2[%c0_1, %c0_2] : memref<1024x128xbf16, #tpu.memory_space<vmem>>, vector<1024x128xbf16>
    %cst = arith.constant dense<0.000000e+00> : vector<512x128xf32>
    %3 = tpu.matmul %1, %2, %cst {dimension_numbers = #tpu.dot_dimension_numbers<[1], [0], [0], [1], [0, 0, 1, 1], [], []>} : vector<512x1024xbf16>, vector<1024x128xbf16>, vector<512x128xf32> -> vector<512x128xf32>
    %c0_3 = arith.constant 0 : index
    %c0_4 = arith.constant 0 : index
    %4 = vector.load %arg3[%c0_3, %c0_4] : memref<512x1xf32, #tpu.memory_space<vmem>>, vector<512x1xf32>
    %5 = vector.broadcast %4 : vector<512x1xf32> to vector<512x128xf32>
    %6 = arith.mulf %3, %5 : vector<512x128xf32>
    %c0_5 = arith.constant 0 : index
    %c0_6 = arith.constant 0 : index
    %7 = vector.load %arg4[%c0_5, %c0_6] : memref<1x128xf32, #tpu.memory_space<vmem>>, vector<1x128xf32>
    %8 = vector.broadcast %7 : vector<1x128xf32> to vector<512x128xf32>
    %9 = arith.addf %6, %8 : vector<512x128xf32>
    %c0_7 = arith.constant 0 : index
    %c0_8 = arith.constant 0 : index
    %10 = vector.load %arg5[%c0_7, %c0_8] : memref<512x128xf32, #tpu.memory_space<vmem>>, vector<512x128xf32>
    tpu.vector_store %arg5[%c0_7, %c0_8], %9 {strides = array<i32>} : memref<512x128xf32, #tpu.memory_space<vmem>>, vector<512x128xf32>,
    return
  }
  func.func @transform_0(%arg0: i32) -> (i32, i32) {
    %c0_i32 = arith.constant 0 : i32
    %c0_i32_0 = arith.constant 0 : i32
    return %arg0, %c0_i32 : i32, i32
  }
  func.func @transform_1(%arg0: i32) -> (i32, i32) {
    %c0_i32 = arith.constant 0 : i32
    %c0_i32_0 = arith.constant 0 : i32
    %c0_i32_1 = arith.constant 0 : i32
    return %c0_i32, %c0_i32_0 : i32, i32
  }
  func.func @transform_2(%arg0: i32) -> (i32, i32) {
    %c0_i32 = arith.constant 0 : i32
    %c0_i32_0 = arith.constant 0 : i32
    return %arg0, %c0_i32 : i32, i32
  }
  func.func @transform_3(%arg0: i32) -> (i32, i32) {
    %c0_i32 = arith.constant 0 : i32
    %c0_i32_0 = arith.constant 0 : i32
    %c0_i32_1 = arith.constant 0 : i32
    return %c0_i32, %c0_i32_0 : i32, i32
  }
  func.func @transform_4(%arg0: i32) -> (i32, i32) {
    %c0_i32 = arith.constant 0 : i32
    %c0_i32_0 = arith.constant 0 : i32
    return %arg0, %c0_i32 : i32, i32
  }
}

</mosaic_0001>

<bundles_post_ra>
// kernel: gcn_with_dhla_forward.4
= control target key start
LH: loop header
LB: loop body
LE: loop exit
PB: predicated region body
PF: predicated region fallthrough
CT: control target
= control target key end

     0   :  { %s1892_s18 = smov 0   ;;  %s2475_s0 = inlined_call_operand.vmem [shape: f32[1024,128], index: 0, kind: input, shape index: {}]   ;;  %s2476_s1 = inlined_call_operand.vmem [shape: f32[8,128], index: 1, kind: input, shape index: {}]   ;;  %s2477_s2 = inlined_call_operand.vmem [shape: f32[2,128], index: 2, kind: input, shape index: {}]   ;;  %s2478_s3 = inlined_call_operand.vmem [shape: f32[1024,1], index: 3, kind: input, shape index: {}]   ;;  %s2479_s4 = inlined_call_operand.vmem [shape: bf16[128,128], index: 4, kind: input, shape index: {}]   ;;  %s2480_s5 = inlined_call_operand.vmem [shape: bf16[1024,128], index: 5, kind: output, shape index: {}]  }
   0x1 LB: > { %s1567_s19 = sadd.s32 4294967295, %s1859_s18   ;;  %p1571_p0 = scmp.ge.s32.totalorder %s1859_s18, 1  ;;  %s1859_s18 = sphi %s1892_s18, %s15_s18  }
   0x2   : > { %p199_p1 = scmp.lt.s32.totalorder %s1859_s18, 3 }
   0x4   : > { %p200_p2 = pnand %p1571_p0, %p199_p1 }
   0x5   : > { %s1572_s20 = sshll.u32 (!%p200_p2), %s1567_s19, 6 }
   0x6   : > { %203 = sbr.rel (%p200_p2) target bundleno = 441 (0x1b9), region = 40  ;;  %p233_p3 = scmp.lt.s32.totalorder (!%p200_p2), %s1572_s20, 127 }
   0xb   : > { %v1861_v0 = vmov 0   ;;  %s2482_s20 = smov (!%p233_p3, %s1572_s20), 127  ;;  %v250_v22 = vld [vmem:[%s2476_s1] sm:$0x1]  ;;  %v252_v26 = vld [vmem:[%s2476_s1 + $0x1] sm:$0x1] }
   0xc   : > { %1846 = vset.pattern.permute.xlu2 %v1861_v0  ;;  %1845 = vset.pattern.permute.xlu1 %v1861_v0  ;;  %s1573_s21 = sshll.u32 %s2482_s20, 3  ;;  %v1934_v23 = vmul.f32 0.0009765625, %v250_v22  ;;  %v253_v28 = vmul.f32 0.0009765625, %v252_v26  ;;  %v1619_v30 = vld [vmem:[%s2479_s4 + $0x38] sm:$0xff]  ;;  %v1618_v36 = vld [vmem:[%s2479_s4 + $0x30] sm:$0xff]  ;;  %v1617_v40 = vld [vmem:[%s2479_s4 + $0x28] sm:$0xff] }
   0xd   : > { %1844 = vset.pattern.permute.xlu0 %v1861_v0  ;;  %s1908_s24 = scalar_lea.vmem %s2478_s3, %s1573_s21  ;;  %1202 = vmatpush.bf16.msra.mxu0 %v1619_v30  ;;  %v1616_v42 = vld [vmem:[%s2479_s4 + $0x20] sm:$0xff]  ;;  %v1615_v45 = vld [vmem:[%s2479_s4 + $0x18] sm:$0xff]  ;;  %v1614_v49 = vld [vmem:[%s2479_s4 + $0x10] sm:$0xff]  ;;  %s1995_s26 = scalar_lea.vmem %s2475_s0, %s1573_s21 }
   0xe   : > { %v662_v1 = vld [vmem:[%s1908_s24 + $0x20] sm:$0xff]  ;;  %v660_v2 = vld [vmem:[%s1908_s24 + $0x10] sm:$0xff]  ;;  %v663_v4 = vld [vmem:[%s1908_s24 + $0x28] sm:$0xff]  ;;  %v254_v29 = vmul.f32 %v1934_v23, %v1934_v23  ;;  %1812 = vmatpush.bf16.msra.mxu2 %v1619_v30  ;;  %1811 = vmatpush.bf16.msra.mxu1 %v1619_v30  ;;  %v2000_v0 = vperm.slane %v1934_v23, 0  ;;  %s1577_s8 = sshll.u32 %s2482_s20, 2 }
   0xf   : > { %v658_v3 = vld [vmem:[%s1908_s24] sm:$0xff]  ;;  %744 = vperm.xlu2 %1846, %v662_v1   ;;  %734 = vperm.xlu1 %1845, %v660_v2   ;;  %v661_v5 = vld [vmem:[%s1908_s24 + $0x18] sm:$0xff]  ;;  %v659_v6 = vld [vmem:[%s1908_s24 + $0x8] sm:$0xff]  ;;  %s2417_s11 = scalar_lea.vmem %s2480_s5, %s1577_s8 }
  0x10   : > { %724 = vperm.xlu0 %1844, %v658_v3   ;;  %v666_v7 = vld [vmem:[%s1908_s24 + $0x40] sm:$0xff]  ;;  %v665_v8 = vld [vmem:[%s1908_s24 + $0x38] sm:$0xff]  ;;  %v664_v9 = vld [vmem:[%s1908_s24 + $0x30] sm:$0xff]  ;;  %v255_v31 = vsub.f32 %v253_v28, %v254_v29  ;;  %1813 = vmatpush.bf16.msra.mxu3 %v1619_v30 }
  0x11   : > { %v669_v10 = vld [vmem:[%s1908_s24 + $0x58] sm:$0xff]  ;;  %v668_v11 = vld [vmem:[%s1908_s24 + $0x50] sm:$0xff]  ;;  %v667_v12 = vld [vmem:[%s1908_s24 + $0x48] sm:$0xff]  ;;  %1203 = vmatpush.bf16.msra.mxu0 %v1618_v36 }
  0x12   : > { %v672_v13 = vld [vmem:[%s1908_s24 + $0x70] sm:$0xff]  ;;  %v671_v14 = vld [vmem:[%s1908_s24 + $0x68] sm:$0xff]  ;;  %v670_v15 = vld [vmem:[%s1908_s24 + $0x60] sm:$0xff]  ;;  %v256_v35 = vmax.f32 %v255_v31, 0.0  ;;  %1815 = vmatpush.bf16.msra.mxu2 %v1618_v36  ;;  %1814 = vmatpush.bf16.msra.mxu1 %v1618_v36 }
  0x13   : > { %v706_v16 = vld [vmem:[%s1908_s24 + $0x180] sm:$0xff]  ;;  %v691_v17 = vld [vmem:[%s1908_s24 + $0x108] sm:$0xff]  ;;  %v708_v24 = vld [vmem:[%s1908_s24 + $0x190] sm:$0xff] }
  0x14   : > { %v690_v18 = vld [vmem:[%s1908_s24 + $0x100] sm:$0xff]  ;;  %v675_v19 = vld [vmem:[%s1908_s24 + $0x88] sm:$0xff]  ;;  %v693_v25 = vld [vmem:[%s1908_s24 + $0x118] sm:$0xff]  ;;  %v1953_v37 = vadd.f32 1e-05, %v256_v35  ;;  %1816 = vmatpush.bf16.msra.mxu3 %v1618_v36 }
  0x15   : > { %v674_v20 = vld [vmem:[%s1908_s24 + $0x80] sm:$0xff]  ;;  %v707_v21 = vld [vmem:[%s1908_s24 + $0x188] sm:$0xff]  ;;  %v692_v27 = vld [vmem:[%s1908_s24 + $0x110] sm:$0xff]  ;;  %1204 = vmatpush.bf16.msra.mxu0 %v1617_v40 }
  0x16   : > { %v677_v32 = vld [vmem:[%s1908_s24 + $0x98] sm:$0xff]  ;;  %v676_v33 = vld [vmem:[%s1908_s24 + $0x90] sm:$0xff]  ;;  %v710_v38 = vld [vmem:[%s1908_s24 + $0x1a0] sm:$0xff]  ;;  %1849 = vrsqrt.f32 %v1953_v37  ;;  %1818 = vmatpush.bf16.msra.mxu2 %v1617_v40  ;;  %1817 = vmatpush.bf16.msra.mxu1 %v1617_v40  ;;  %vm393_vm0 = vweird.f32 %v1953_v37 }
  0x17   : > { %749 = vperm.xlu2 %1846, %v663_v4   ;;  %739 = vperm.xlu1 %1845, %v661_v5   ;;  %v709_v34 = vld [vmem:[%s1908_s24 + $0x198] sm:$0xff]  ;;  %v695_v39 = vld [vmem:[%s1908_s24 + $0x128] sm:$0xff]  ;;  %v694_v41 = vld [vmem:[%s1908_s24 + $0x120] sm:$0xff] }
  0x18   : > { %729 = vperm.xlu0 %1844, %v659_v6   ;;  %1819 = vmatpush.bf16.msra.mxu3 %v1617_v40  ;;  %v679_v43 = vld [vmem:[%s1908_s24 + $0xa8] sm:$0xff]  ;;  %v678_v44 = vld [vmem:[%s1908_s24 + $0xa0] sm:$0xff]  ;;  %v712_v50 = vld [vmem:[%s1908_s24 + $0x1b0] sm:$0xff] }
  0x19   : > { %1205 = vmatpush.bf16.msra.mxu0 %v1616_v42  ;;  %v711_v47 = vld [vmem:[%s1908_s24 + $0x1a8] sm:$0xff]  ;;  %v697_v51 = vld [vmem:[%s1908_s24 + $0x138] sm:$0xff]  ;;  %v696_v54 = vld [vmem:[%s1908_s24 + $0x130] sm:$0xff] }
  0x1a   : > { %1821 = vmatpush.bf16.msra.mxu2 %v1616_v42  ;;  %1820 = vmatpush.bf16.msra.mxu1 %v1616_v42  ;;  %v1613_v53 = vld [vmem:[%s2479_s4 + $0x8] sm:$0xff]  ;;  %v1612_v57 = vld [vmem:[%s2479_s4] sm:$0xff]  ;;  %v681_v59 = vld [vmem:[%s1908_s24 + $0xb8] sm:$0xff] }
  0x1b   : > { %v680_v60 = vld [vmem:[%s1908_s24 + $0xb0] sm:$0xff]  ;;  %v713_v61 = vld [vmem:[%s1908_s24 + $0x1b8] sm:$0xff]  ;;  %v714_v1 = vld [vmem:[%s1908_s24 + $0x1c0] sm:$0xff] }
  0x1c   : > { %v1850_v46 = vpop.eup %1849  ;;  %1822 = vmatpush.bf16.msra.mxu3 %v1616_v42  ;;  %v699_v3 = vld [vmem:[%s1908_s24 + $0x148] sm:$0xff]  ;;  %v257_v4 = vld [vmem:[%s1995_s26] sm:$0xff]  ;;  %v259_v22 = vld [vmem:[%s1995_s26 + $0x10] sm:$0xff] }
  0x1d   : > { %v388_v48 = vmul.f32 %v1850_v46, %v1953_v37  ;;  %1206 = vmatpush.bf16.msra.mxu0 %v1615_v45  ;;  %vm394_vm1 = vweird.f32 %v1850_v46  ;;  %v258_v5 = vld [vmem:[%s1995_s26 + $0x8] sm:$0xff]  ;;  %v698_v6 = vld [vmem:[%s1908_s24 + $0x140] sm:$0xff]  ;;  %v267_v28 = vld [vmem:[%s1995_s26 + $0x50] sm:$0xff]  ;;  %v324_v31 = vsub.f32 %v259_v22, %v2000_v0 }
  0x1e   : > { %1824 = vmatpush.bf16.msra.mxu2 %v1615_v45  ;;  %1823 = vmatpush.bf16.msra.mxu1 %v1615_v45  ;;  %vm395_vm2 = vmor %vm393_vm0, %vm394_vm1  ;;  %v716_v29 = vld [vmem:[%s1908_s24 + $0x1d0] sm:$0xff]  ;;  %v701_v30 = vld [vmem:[%s1908_s24 + $0x158] sm:$0xff]  ;;  %v332_v35 = vsub.f32 %v267_v28, %v2000_v0 }
  0x1f   : > { %764 = vperm.xlu2 %1846, %v666_v7   ;;  %759 = vperm.xlu1 %1845, %v665_v8   ;;  %v389_v52 = vmul.f32 %v1850_v46, %v388_v48  ;;  %v322_v8 = vsub.f32 %v257_v4, %v2000_v0  ;;  %v685_v48 = vld [vmem:[%s1908_s24 + $0xd8] sm:$0xff]  ;;  %v703_v22 = vld [vmem:[%s1908_s24 + $0x168] sm:$0xff] }
  0x20   : > { %754 = vperm.xlu0 %1844, %v664_v9   ;;  %1825 = vmatpush.bf16.msra.mxu3 %v1615_v45  ;;  %v323_v9 = vsub.f32 %v258_v5, %v2000_v0 }
  0x21   : > { %1207 = vmatpush.bf16.msra.mxu0 %v1614_v49  ;;  %v390_v55 = vmul.f32 0.5, %v389_v52 }
  0x22   : > { %1827 = vmatpush.bf16.msra.mxu2 %v1614_v49  ;;  %1826 = vmatpush.bf16.msra.mxu1 %v1614_v49 }
  0x23   : > { %v391_v58 = vsub.f32 1.5, %v390_v55 }
  0x24   : > { %1828 = vmatpush.bf16.msra.mxu3 %v1614_v49  ;;  %v269_v49 = vld [vmem:[%s1995_s26 + $0x60] sm:$0xff] }
  0x25   : > { %1208 = vmatpush.bf16.msra.mxu0 %v1613_v53  ;;  %v392_v62 = vmul.f32 %v1850_v46, %v391_v58 }
  0x26   : > { %1830 = vmatpush.bf16.msra.mxu2 %v1613_v53  ;;  %1829 = vmatpush.bf16.msra.mxu1 %v1613_v53 }
  0x27   : > { %779 = vperm.xlu2 %1846, %v669_v10   ;;  %774 = vperm.xlu1 %1845, %v668_v11   ;;  %v396_v2 = vsel %vm395_vm2, %v1850_v46, %v392_v62  ;;  %v2016_v11 = vld [vmem:[%s2477_s2] ss:$0 sm:$0xff] }
  0x28   : > { %769 = vperm.xlu0 %1844, %v667_v12   ;;  %1831 = vmatpush.bf16.msra.mxu3 %v1613_v53  ;;  %v2007_v7 = vperm.slane %v396_v2, 0  ;;  %v684_v53 = vld [vmem:[%s1908_s24 + $0xd0] sm:$0xff]  ;;  %v261_v2 = vld [vmem:[%s1995_s26 + $0x20] sm:$0xff] }
  0x29   : > { %1209 = vmatpush.bf16.msra.mxu0 %v1612_v57 }
  0x2a   : > { %1833 = vmatpush.bf16.msra.mxu2 %v1612_v57  ;;  %1832 = vmatpush.bf16.msra.mxu1 %v1612_v57  ;;  %v398_v12 = vmul.f32 %v2007_v7, %v322_v8 }
  0x2c   : > { %1834 = vmatpush.bf16.msra.mxu3 %v1612_v57 }
  0x2f   : > { %794 = vperm.xlu2 %1846, %v672_v13   ;;  %789 = vperm.xlu1 %1845, %v671_v14   ;;  %v399_v13 = vmul.f32 %v2007_v7, %v323_v9  ;;  %v683_v14 = vld [vmem:[%s1908_s24 + $0xc8] sm:$0xff] }
  0x30   : > { %784 = vperm.xlu0 %1844, %v670_v15   ;;  %v682_v15 = vld [vmem:[%s1908_s24 + $0xc0] sm:$0xff] }
  0x37   : > { %964 = vperm.xlu2 %1846, %v706_v16   ;;  %889 = vperm.xlu1 %1845, %v691_v17   ;;  %v715_v16 = vld [vmem:[%s1908_s24 + $0x1c8] sm:$0xff]  ;;  %v2026_v17 = vld [vmem:[%s2477_s2 + $0x1] ss:$0 sm:$0xff] }
  0x38   : > { %884 = vperm.xlu0 %1844, %v690_v18   ;;  %v464_v18 = vmul.f32 %v2016_v11, %v398_v12  ;;  %v290_v12 = vld [vmem:[%s1995_s26 + $0x108] sm:$0xff] }
  0x3a   : > { %v530_v26 = vadd.f32 %v2026_v17, %v464_v18 }
  0x3c   : > { %v594_v36 = vmax.f32 %v530_v26, 0.0 }
  0x3f   : > { %809 = vperm.xlu2 %1846, %v675_v19   ;;  %804 = vperm.xlu1 %1845, %v674_v20   ;;  %v465_v19 = vmul.f32 %v2016_v11, %v399_v13  ;;  %v718_v13 = vld [vmem:[%s1908_s24 + $0x1e0] sm:$0xff] }
  0x40   : > { %969 = vperm.xlu0 %1844, %v707_v21  }
  0x47   : > { %974 = vperm.xlu2 %1846, %v708_v24   ;;  %899 = vperm.xlu1 %1845, %v693_v25   ;;  %v260_v24 = vld [vmem:[%s1995_s26 + $0x18] sm:$0xff] }
  0x48   : > { %894 = vperm.xlu0 %1844, %v692_v27   ;;  %v268_v25 = vld [vmem:[%s1995_s26 + $0x58] sm:$0xff]  ;;  %v531_v27 = vadd.f32 %v2026_v17, %v465_v19 }
  0x4a   : > { %v595_v37 = vmax.f32 %v531_v27, 0.0  ;;  %v355_v27 = vsub.f32 %v290_v12, %v2000_v0 }
  0x4f   : > { %819 = vperm.xlu2 %1846, %v677_v32   ;;  %814 = vperm.xlu1 %1845, %v676_v33   ;;  %v700_v32 = vld [vmem:[%s1908_s24 + $0x150] sm:$0xff]  ;;  %v325_v33 = vsub.f32 %v260_v24, %v2000_v0 }
  0x50   : > { %979 = vperm.xlu0 %1844, %v709_v34   ;;  %v333_v34 = vsub.f32 %v268_v25, %v2000_v0 }
  0x52   : > { %v409_v42 = vmul.f32 %v2007_v7, %v333_v34 }
  0x54   : > { %v475_v55 = vmul.f32 %v2016_v11, %v409_v42  ;;  %v431_v42 = vmul.f32 %v2007_v7, %v355_v27  ;;  %v720_v27 = vld [vmem:[%s1908_s24 + $0x1f0] sm:$0xff] }
  0x56   : > { %v541_v4 = vadd.f32 %v2026_v17, %v475_v55  ;;  %v497_v55 = vmul.f32 %v2016_v11, %v431_v42 }
  0x57   : > { %984 = vperm.xlu2 %1846, %v710_v38   ;;  %909 = vperm.xlu1 %1845, %v695_v39   ;;  %v400_v38 = vmul.f32 %v2007_v7, %v324_v31 }
  0x58   : > { %904 = vperm.xlu0 %1844, %v694_v41   ;;  %v401_v41 = vmul.f32 %v2007_v7, %v325_v33  ;;  %v605_v24 = vmax.f32 %v541_v4, 0.0  ;;  %v264_v4 = vld [vmem:[%s1995_s26 + $0x38] sm:$0xff] }
  0x5f   : > { %829 = vperm.xlu2 %1846, %v679_v43   ;;  %824 = vperm.xlu1 %1845, %v678_v44   ;;  %v408_v44 = vmul.f32 %v2007_v7, %v332_v35 }
  0x60   : > { %989 = vperm.xlu0 %1844, %v711_v47   ;;  %v270_v47 = vld [vmem:[%s1995_s26 + $0x68] sm:$0xff] }
  0x61   : > { %v474_v57 = vmul.f32 %v2016_v11, %v408_v44  ;;  %v335_v58 = vsub.f32 %v270_v47, %v2000_v0  ;;  %v273_v44 = vld [vmem:[%s1995_s26 + $0x80] sm:$0xff] }
  0x63   : > { %v411_v8 = vmul.f32 %v2007_v7, %v335_v58 }
  0x65   : > { %v477_v26 = vmul.f32 %v2016_v11, %v411_v8 }
  0x67   : > { %994 = vperm.xlu2 %1846, %v712_v50   ;;  %919 = vperm.xlu1 %1845, %v697_v51   ;;  %v466_v50 = vmul.f32 %v2016_v11, %v400_v38  ;;  %v467_v51 = vmul.f32 %v2016_v11, %v401_v41  ;;  %v543_v41 = vadd.f32 %v2026_v17, %v477_v26 }
  0x68   : > { %914 = vperm.xlu0 %1844, %v696_v54   ;;  %v717_v54 = vld [vmem:[%s1908_s24 + $0x1d8] sm:$0xff] }
  0x69   : > { %v1981_v56 = vpop.permute.xlu2 %744 }
  0x6f   : > { %839 = vperm.xlu2 %1846, %v681_v59   ;;  %834 = vperm.xlu1 %1845, %v680_v60   ;;  %v334_v59 = vsub.f32 %v269_v49, %v2000_v0  ;;  %v532_v60 = vadd.f32 %v2026_v17, %v466_v50 }
  0x70   : > { %999 = vperm.xlu0 %1844, %v713_v61   ;;  %v533_v61 = vadd.f32 %v2026_v17, %v467_v51  ;;  %v686_v51 = vld [vmem:[%s1908_s24 + $0xe0] sm:$0xff] }
  0x71   : > { %v1997_v63 = vpop.permute.xlu2 %749  ;;  %v410_v9 = vmul.f32 %v2007_v7, %v334_v59  ;;  %v596_v18 = vmax.f32 %v532_v60, 0.0 }
  0x72   : > { %v597_v19 = vmax.f32 %v533_v61, 0.0 }
  0x73   : > { %v476_v28 = vmul.f32 %v2016_v11, %v410_v9 }
  0x77   : > { %1004 = vperm.xlu2 %1846, %v714_v1   ;;  %929 = vperm.xlu1 %1845, %v699_v3   ;;  %v262_v3 = vld [vmem:[%s1995_s26 + $0x28] sm:$0xff] }
  0x78   : > { %924 = vperm.xlu0 %1844, %v698_v6   ;;  %v540_v6 = vadd.f32 %v2026_v17, %v474_v57  ;;  %v338_v57 = vsub.f32 %v273_v44, %v2000_v0 }
  0x79   : > { %v2011_v10 = vpop.permute.xlu2 %764 }
  0x7a   : > { %v604_v25 = vmax.f32 %v540_v6, 0.0  ;;  %v263_v6 = vld [vmem:[%s1995_s26 + $0x30] sm:$0xff] }
  0x7b   : > { %v328_v26 = vsub.f32 %v263_v6, %v2000_v0  ;;  %v308_v6 = vld [vmem:[%s1995_s26 + $0x198] sm:$0xff] }
  0x7f   : > { %849 = vperm.xlu2 %1846, %v683_v14   ;;  %844 = vperm.xlu1 %1845, %v682_v15   ;;  %v289_v14 = vld [vmem:[%s1995_s26 + $0x100] sm:$0xff]  ;;  %v326_v15 = vsub.f32 %v261_v2, %v2000_v0 }
  0x80   : > { %1009 = vperm.xlu0 %1844, %v715_v16   ;;  %v327_v16 = vsub.f32 %v262_v3, %v2000_v0 }
  0x81   : > { %v2030_v20 = vpop.permute.xlu2 %779  ;;  %v2032_v21 = vpop.permute.xlu1 %734 }
  0x82   : > { %v725_v23 = vpop.permute.xlu0 %724  ;;  %v403_v31 = vmul.f32 %v2007_v7, %v327_v16  ;;  %v414_v16 = vmul.f32 %v2007_v7, %v338_v57 }
  0x83   : > { %v1042_v45 = vmul.f32 %v725_v23, %v594_v36  ;;  %v702_v23 = vld [vmem:[%s1908_s24 + $0x160] sm:$0xff]  ;;  %v2095_v36 = vmul.f32 %v2030_v20, %v605_v24  ;;  %v306_v20 = vld [vmem:[%s1995_s26 + $0x188] sm:$0xff]  ;;  %v292_v24 = vld [vmem:[%s1995_s26 + $0x118] sm:$0xff] }
  0x84   : > { %v469_v49 = vmul.f32 %v2016_v11, %v403_v31  ;;  %v371_v61 = vsub.f32 %v306_v20, %v2000_v0  ;;  %v705_v31 = vld [vmem:[%s1908_s24 + $0x178] sm:$0xff]  ;;  %v480_v42 = vmul.f32 %v2016_v11, %v414_v16  ;;  %v404_v20 = vmul.f32 %v2007_v7, %v328_v26  ;;  %v688_v16 = vld [vmem:[%s1908_s24 + $0xf0] sm:$0xff] }
  0x86   : > { %v535_v3 = vadd.f32 %v2026_v17, %v469_v49  ;;  %v546_v57 = vadd.f32 %v2026_v17, %v480_v42 }
  0x87   : > { %1014 = vperm.xlu2 %1846, %v716_v29   ;;  %939 = vperm.xlu1 %1845, %v701_v30   ;;  %v354_v29 = vsub.f32 %v289_v14, %v2000_v0  ;;  %v402_v30 = vmul.f32 %v2007_v7, %v326_v15  ;;  %v563_v15 = vadd.f32 %v2026_v17, %v497_v55 }
  0x88   : > { %934 = vperm.xlu0 %1844, %v700_v32   ;;  %v1044_v32 = vmul.f32 %v2032_v21, %v596_v18  ;;  %v542_v21 = vadd.f32 %v2026_v17, %v476_v28  ;;  %v291_v28 = vld [vmem:[%s1995_s26 + $0x110] sm:$0xff] }
  0x89   : > { %v2048_v39 = vpop.permute.xlu2 %794  ;;  %v740_v40 = vpop.permute.xlu1 %739 }
  0x8a   : > { %v730_v43 = vpop.permute.xlu0 %729  ;;  %v1045_v33 = vmul.f32 %v740_v40, %v597_v19  ;;  %v430_v40 = vmul.f32 %v2007_v7, %v354_v29  ;;  %v606_v59 = vmax.f32 %v542_v21, 0.0 }
  0x8b   : > { %v1043_v46 = vmul.f32 %v730_v43, %v595_v37  ;;  %v274_v43 = vld [vmem:[%s1995_s26 + $0x88] sm:$0xff] }
  0x8c   : > { %v1107_v50 = vpack.c.bf16 %v1045_v33, %v1044_v32  ;;  %v496_v60 = vmul.f32 %v2016_v11, %v430_v40  ;;  %v704_v32 = vld [vmem:[%s1908_s24 + $0x170] sm:$0xff] }
  0x8d   : > { %v1106_v52 = vpack.c.bf16 %v1043_v46, %v1042_v45  ;;  %v305_v45 = vld [vmem:[%s1995_s26 + $0x180] sm:$0xff]  ;;  %v687_v46 = vld [vmem:[%s1908_s24 + $0xe8] sm:$0xff] }
  0x8e   : > { %v370_v58 = vsub.f32 %v305_v45, %v2000_v0  ;;  %v356_v45 = vsub.f32 %v291_v28, %v2000_v0 }
  0x8f   : > { %1210 = vmatmul.bf16.vlgmr.msra.gmra.mxu0 %v1106_v52  ;;  %859 = vperm.xlu2 %1846, %v685_v48   ;;  %v468_v48 = vmul.f32 %v2016_v11, %v402_v30  ;;  %v719_v52 = vld [vmem:[%s1908_s24 + $0x1e8] sm:$0xff]  ;;  %v599_v30 = vmax.f32 %v535_v3, 0.0  ;;  %v470_v3 = vmul.f32 %v2016_v11, %v404_v20 }
  0x90   : > { %854 = vperm.xlu1 %1845, %v684_v53   ;;  %1019 = vperm.xlu0 %1844, %v717_v54   ;;  %v339_v53 = vsub.f32 %v274_v43, %v2000_v0  ;;  %v607_v54 = vmax.f32 %v543_v41, 0.0  ;;  %v446_v18 = vmul.f32 %v2007_v7, %v370_v58  ;;  %v627_v41 = vmax.f32 %v563_v15, 0.0 }
  0x91   : > { %v2066_v62 = vpop.permute.xlu2 %964  ;;  %v2068_v1 = vpop.permute.xlu1 %759  ;;  %v534_v2 = vadd.f32 %v2026_v17, %v468_v48  ;;  %v357_v43 = vsub.f32 %v292_v24, %v2000_v0  ;;  %v1047_v49 = vmul.f32 %v1997_v63, %v599_v30  ;;  %v610_v24 = vmax.f32 %v546_v57, 0.0 }
  0x92   : > { %v2073_v5 = vpop.permute.xlu0 %754  ;;  %v415_v9 = vmul.f32 %v2007_v7, %v339_v53  ;;  %v512_v21 = vmul.f32 %v2016_v11, %v446_v18  ;;  %v276_v53 = vld [vmem:[%s1995_s26 + $0x98] sm:$0xff]  ;;  %v373_v30 = vsub.f32 %v308_v6, %v2000_v0 }
  0x93   : > { %v598_v29 = vmax.f32 %v534_v2, 0.0  ;;  %v433_v58 = vmul.f32 %v2007_v7, %v357_v43  ;;  %v673_v18 = vld [vmem:[%s1908_s24 + $0x78] sm:$0xff] }
  0x95   : > { %v1046_v48 = vmul.f32 %v1981_v56, %v598_v29 }
  0x97   : > { %1024 = vperm.xlu2 %1846, %v718_v13  }
  0x98   : > { %949 = vperm.xlu1 %1845, %v703_v22   ;;  %944 = vperm.xlu0 %1844, %v702_v23   ;;  %v562_v22 = vadd.f32 %v2026_v17, %v496_v60  ;;  %v447_v23 = vmul.f32 %v2007_v7, %v371_v61  ;;  %v432_v60 = vmul.f32 %v2007_v7, %v356_v45  ;;  %v275_v61 = vld [vmem:[%s1995_s26 + $0x90] sm:$0xff] }
  0x99   : > { %v2092_v34 = vpop.permute.xlu2 %809  ;;  %v775_v35 = vpop.permute.xlu1 %774  ;;  %v340_v26 = vsub.f32 %v275_v61, %v2000_v0 }
  0x9a   : > { %v2097_v37 = vmul.f32 %v775_v35, %v604_v25  ;;  %v2099_v38 = vpop.permute.xlu0 %769  ;;  %v329_v25 = vsub.f32 %v264_v4, %v2000_v0  ;;  %v481_v35 = vmul.f32 %v2016_v11, %v415_v9  ;;  %v626_v40 = vmax.f32 %v562_v22, 0.0 }
  0x9b   : > { %v513_v44 = vmul.f32 %v2016_v11, %v447_v23  ;;  %v341_v9 = vsub.f32 %v276_v53, %v2000_v0  ;;  %v721_v23 = vld [vmem:[%s1908_s24 + $0x1f8] sm:$0xff]  ;;  %v498_v29 = vmul.f32 %v2016_v11, %v432_v60  ;;  %v416_v20 = vmul.f32 %v2007_v7, %v340_v26 }
  0x9c   : > { %v1111_v47 = vpack.c.bf16 %v2095_v36, %v2097_v37 }
  0x9d   : > { %v579_v63 = vadd.f32 %v2026_v17, %v513_v44  ;;  %v417_v43 = vmul.f32 %v2007_v7, %v341_v9  ;;  %v482_v61 = vmul.f32 %v2016_v11, %v416_v20 }
  0x9f   : > { %1215 = vmatmul.bf16.gmra.mxu0 %v1107_v50  ;;  %869 = vperm.xlu2 %1846, %v687_v46   ;;  %v405_v46 = vmul.f32 %v2007_v7, %v329_v25  ;;  %v499_v25 = vmul.f32 %v2016_v11, %v433_v58  ;;  %v643_v28 = vmax.f32 %v579_v63, 0.0 }
  0xa0   : > { %864 = vperm.xlu1 %1845, %v686_v51   ;;  %1029 = vperm.xlu0 %1844, %v719_v52   ;;  %v547_v51 = vadd.f32 %v2026_v17, %v481_v35  ;;  %v307_v52 = vld [vmem:[%s1995_s26 + $0x190] sm:$0xff]  ;;  %v536_v35 = vadd.f32 %v2026_v17, %v470_v3 }
  0xa1   : > { %v790_v8 = vpop.permute.xlu1 %789  ;;  %v2127_v12 = vpop.permute.xlu2 %974  ;;  %v471_v2 = vmul.f32 %v2016_v11, %v405_v46  ;;  %v565_v46 = vadd.f32 %v2026_v17, %v499_v25  ;;  %v278_v25 = vld [vmem:[%s1995_s26 + $0xa8] sm:$0xff] }
  0xa2   : > { %v2129_v13 = vmul.f32 %v790_v8, %v607_v54  ;;  %v785_v14 = vpop.permute.xlu0 %784  ;;  %v372_v8 = vsub.f32 %v307_v52, %v2000_v0  ;;  %v611_v22 = vmax.f32 %v547_v51, 0.0  ;;  %v449_v51 = vmul.f32 %v2007_v7, %v373_v30  ;;  %v294_v52 = vld [vmem:[%s1995_s26 + $0x128] sm:$0xff] }
  0xa3   : > { %v2134_v19 = vmul.f32 %v785_v14, %v606_v59  ;;  %v578_v59 = vadd.f32 %v2026_v17, %v512_v21  ;;  %v1108_v14 = vpack.c.bf16 %v1047_v49, %v1046_v48  ;;  %v600_v58 = vmax.f32 %v536_v35, 0.0 }
  0xa4   : > { %v448_v42 = vmul.f32 %v2007_v7, %v372_v8  ;;  %v629_v60 = vmax.f32 %v565_v46, 0.0  ;;  %v515_v8 = vmul.f32 %v2016_v11, %v449_v51 }
  0xa5   : > { %v1112_v33 = vpack.c.bf16 %v2129_v13, %v2134_v19 }
  0xa6   : > { %v514_v3 = vmul.f32 %v2016_v11, %v448_v42  ;;  %v310_v42 = vld [vmem:[%s1995_s26 + $0x1a8] sm:$0xff] }
  0xa7   : > { %1034 = vperm.xlu2 %1846, %v720_v27   ;;  %v642_v27 = vmax.f32 %v578_v59, 0.0 }
  0xa8   : > { %959 = vperm.xlu1 %1845, %v705_v31   ;;  %954 = vperm.xlu0 %1844, %v704_v32   ;;  %v265_v31 = vld [vmem:[%s1995_s26 + $0x40] sm:$0xff]  ;;  %v537_v32 = vadd.f32 %v2026_v17, %v471_v2  ;;  %v359_v2 = vsub.f32 %v294_v52, %v2000_v0  ;;  %v580_v30 = vadd.f32 %v2026_v17, %v514_v3 }
  0xa9   : > { %v890_v50 = vpop.permute.xlu1 %889  ;;  %v2168_v4 = vpop.permute.xlu2 %819  ;;  %v1090_v48 = vmul.f32 %v2066_v62, %v642_v27  ;;  %v330_v53 = vsub.f32 %v265_v31, %v2000_v0  ;;  %v689_v62 = vld [vmem:[%s1908_s24 + $0xf8] sm:$0xff]  ;;  %v375_v52 = vsub.f32 %v310_v42, %v2000_v0 }
  0xaa   : > { %v1075_v54 = vmul.f32 %v890_v50, %v627_v41  ;;  %v885_v55 = vpop.permute.xlu0 %884  ;;  %v266_v41 = vld [vmem:[%s1995_s26 + $0x48] sm:$0xff]  ;;  %v564_v50 = vadd.f32 %v2026_v17, %v498_v29  ;;  %v601_v57 = vmax.f32 %v537_v32, 0.0  ;;  %v435_v29 = vmul.f32 %v2007_v7, %v359_v2  ;;  %v277_v32 = vld [vmem:[%s1995_s26 + $0xa0] sm:$0xff] }
  0xab   : > { %v1074_v56 = vmul.f32 %v885_v55, %v626_v40  ;;  %v1059_v40 = vmul.f32 %v2092_v34, %v611_v22  ;;  %v293_v55 = vld [vmem:[%s1995_s26 + $0x120] sm:$0xff] }
  0xac   : > { %v628_v6 = vmax.f32 %v564_v50, 0.0  ;;  %v358_v9 = vsub.f32 %v293_v55, %v2000_v0  ;;  %v501_v20 = vmul.f32 %v2016_v11, %v435_v29 }
  0xad   : > { %v1122_v15 = vpack.c.bf16 %v1075_v54, %v1074_v56  ;;  %v331_v54 = vsub.f32 %v266_v41, %v2000_v0  ;;  %v483_v56 = vmul.f32 %v2016_v11, %v417_v43 }
  0xaf   : > { %1220 = vmatmul.bf16.gmra.mxu0 %v1108_v14  ;;  %1290 = vmatmul.bf16.vlgmr.msra.gmra.mxu2 %v1122_v15  ;;  %v406_v14 = vmul.f32 %v2007_v7, %v330_v53  ;;  %v407_v15 = vmul.f32 %v2007_v7, %v331_v54 }
  0xb0   : > { %874 = vperm.xlu2 %1846, %v688_v16   ;;  %799 = vperm.xlu1 %1845, %v673_v18   ;;  %v1049_v16 = vmul.f32 %v2068_v1, %v601_v57  ;;  %v1048_v18 = vmul.f32 %v2073_v5, %v600_v58  ;;  %v581_v1 = vadd.f32 %v2026_v17, %v515_v8 }
  0xb1   : > { %1039 = vperm.xlu0 %1844, %v721_v23   ;;  %v805_v21 = vpop.permute.xlu1 %804  ;;  %v2197_v63 = vpop.permute.xlu2 %984  ;;  %v549_v23 = vadd.f32 %v2026_v17, %v483_v56  ;;  %v434_v5 = vmul.f32 %v2007_v7, %v358_v9  ;;  %v472_v35 = vmul.f32 %v2016_v11, %v406_v14  ;;  %v473_v41 = vmul.f32 %v2016_v11, %v407_v15  ;;  %v296_v9 = vld [vmem:[%s1995_s26 + $0x138] sm:$0xff]  ;;  %v295_v15 = vld [vmem:[%s1995_s26 + $0x130] sm:$0xff] }
  0xb2   : > { %v1058_v44 = vmul.f32 %v805_v21, %v610_v24  ;;  %v970_v45 = vpop.permute.xlu0 %969  ;;  %v309_v24 = vld [vmem:[%s1995_s26 + $0x1a0] sm:$0xff]  ;;  %v343_v21 = vsub.f32 %v278_v25, %v2000_v0  ;;  %v645_v50 = vmax.f32 %v581_v1, 0.0  ;;  %v451_v8 = vmul.f32 %v2007_v7, %v375_v52 }
  0xb3   : > { %v1091_v49 = vmul.f32 %v970_v45, %v643_v28  ;;  %v548_v28 = vadd.f32 %v2026_v17, %v482_v61  ;;  %v374_v43 = vsub.f32 %v309_v24, %v2000_v0  ;;  %v613_v45 = vmax.f32 %v549_v23, 0.0 }
  0xb4   : > { %v1114_v34 = vpack.c.bf16 %v1059_v40, %v1058_v44  ;;  %v1109_v40 = vpack.c.bf16 %v1049_v16, %v1048_v18  ;;  %v500_v51 = vmul.f32 %v2016_v11, %v434_v5  ;;  %v538_v54 = vadd.f32 %v2026_v17, %v472_v35  ;;  %v280_v35 = vld [vmem:[%s1995_s26 + $0xb8] sm:$0xff] }
  0xb5   : > { %v1130_v59 = vpack.c.bf16 %v1091_v49, %v1090_v48  ;;  %v612_v46 = vmax.f32 %v548_v28, 0.0  ;;  %v342_v48 = vsub.f32 %v277_v32, %v2000_v0  ;;  %v644_v49 = vmax.f32 %v580_v30, 0.0  ;;  %v311_v32 = vld [vmem:[%s1995_s26 + $0x1b0] sm:$0xff] }
  0xb6   : > { %1250 = vmatmul.bf16.vlgmr.msra.gmra.mxu1 %v1114_v34  ;;  %v539_v34 = vadd.f32 %v2026_v17, %v473_v41  ;;  %v450_v55 = vmul.f32 %v2007_v7, %v374_v43  ;;  %v419_v57 = vmul.f32 %v2007_v7, %v343_v21  ;;  %v602_v16 = vmax.f32 %v538_v54, 0.0 }
  0xb7   : > { %1330 = vmatmul.bf16.vlgmr.msra.gmra.mxu3 %v1130_v59  ;;  %v1061_v59 = vmul.f32 %v2168_v4, %v613_v45  ;;  %v418_v61 = vmul.f32 %v2007_v7, %v342_v48  ;;  %v1092_v2 = vmul.f32 %v2127_v12, %v644_v49  ;;  %v361_v12 = vsub.f32 %v296_v9, %v2000_v0  ;;  %v279_v45 = vld [vmem:[%s1995_s26 + $0xb0] sm:$0xff] }
  0xb8   : > { %v603_v18 = vmax.f32 %v539_v34, 0.0  ;;  %v485_v4 = vmul.f32 %v2016_v11, %v419_v57  ;;  %v516_v25 = vmul.f32 %v2016_v11, %v450_v55  ;;  %v360_v28 = vsub.f32 %v295_v15, %v2000_v0 }
  0xb9   : > { %879 = vperm.xlu0 %1844, %v689_v62   ;;  %v900_v22 = vpop.permute.xlu1 %899  ;;  %v2227_v53 = vpop.permute.xlu2 %829  ;;  %v484_v24 = vmul.f32 %v2016_v11, %v418_v61  ;;  %v1050_v29 = vmul.f32 %v2011_v10, %v602_v16  ;;  %v437_v21 = vmul.f32 %v2007_v7, %v361_v12  ;;  %v345_v48 = vsub.f32 %v280_v35, %v2000_v0 }
  0xba   : > { %v1077_v26 = vmul.f32 %v900_v22, %v629_v60  ;;  %v895_v27 = vpop.permute.xlu0 %894  ;;  %v567_v60 = vadd.f32 %v2026_v17, %v501_v20  ;;  %v1051_v30 = vmul.f32 %v2099_v38, %v603_v18  ;;  %v551_v1 = vadd.f32 %v2026_v17, %v485_v4  ;;  %v298_v18 = vld [vmem:[%s1995_s26 + $0x148] sm:$0xff] }
  0xbb   : > { %v1076_v31 = vmul.f32 %v895_v27, %v628_v6  ;;  %v566_v6 = vadd.f32 %v2026_v17, %v500_v51  ;;  %v517_v27 = vmul.f32 %v2016_v11, %v451_v8  ;;  %v550_v43 = vadd.f32 %v2026_v17, %v484_v24 }
  0xbc   : > { %v631_v23 = vmax.f32 %v567_v60, 0.0  ;;  %v436_v38 = vmul.f32 %v2007_v7, %v360_v28  ;;  %v376_v20 = vsub.f32 %v311_v32, %v2000_v0  ;;  %v1110_v49 = vpack.c.bf16 %v1051_v30, %v1050_v29  ;;  %v282_v32 = vld [vmem:[%s1995_s26 + $0xc8] sm:$0xff] }
  0xbd   : > { %v1123_v44 = vpack.c.bf16 %v1077_v26, %v1076_v31  ;;  %v630_v26 = vmax.f32 %v566_v6, 0.0  ;;  %v583_v10 = vadd.f32 %v2026_v17, %v517_v27  ;;  %v615_v51 = vmax.f32 %v551_v1, 0.0  ;;  %v313_v1 = vld [vmem:[%s1995_s26 + $0x1c0] sm:$0xff] }
  0xbe   : > { %v614_v52 = vmax.f32 %v550_v43, 0.0  ;;  %v503_v54 = vmul.f32 %v2016_v11, %v437_v21  ;;  %v344_v34 = vsub.f32 %v279_v45, %v2000_v0  ;;  %v314_v45 = vld [vmem:[%s1995_s26 + $0x1c8] sm:$0xff] }
  0xbf   : > { %1225 = vmatmul.bf16.gmra.mxu0 %v1109_v40  ;;  %1295 = vmatmul.bf16.gmra.mxu2 %v1123_v44  ;;  %v582_v40 = vadd.f32 %v2026_v17, %v516_v25  ;;  %v647_v57 = vmax.f32 %v583_v10, 0.0  ;;  %v1063_v61 = vmul.f32 %v2227_v53, %v615_v51 }
  0xc0   : > { %v569_v6 = vadd.f32 %v2026_v17, %v503_v54  ;;  %v420_v8 = vmul.f32 %v2007_v7, %v344_v34 }
  0xc1   : > { %v815_v58 = vpop.permute.xlu1 %814  ;;  %v2250_v5 = vpop.permute.xlu2 %994  ;;  %v646_v55 = vmax.f32 %v582_v40, 0.0 }
  0xc2   : > { %v1060_v56 = vmul.f32 %v815_v58, %v612_v46  ;;  %v980_v62 = vpop.permute.xlu0 %979  ;;  %v312_v46 = vld [vmem:[%s1995_s26 + $0x1b8] sm:$0xff]  ;;  %v502_v58 = vmul.f32 %v2016_v11, %v436_v38  ;;  %v633_v12 = vmax.f32 %v569_v6, 0.0  ;;  %v486_v25 = vmul.f32 %v2016_v11, %v420_v8  ;;  %v281_v38 = vld [vmem:[%s1995_s26 + $0xc0] sm:$0xff] }
  0xc3   : > { %v1093_v3 = vmul.f32 %v980_v62, %v645_v50  ;;  %v421_v62 = vmul.f32 %v2007_v7, %v345_v48  ;;  %v1094_v9 = vmul.f32 %v2197_v63, %v646_v55  ;;  %v363_v63 = vsub.f32 %v298_v18, %v2000_v0 }
  0xc4   : > { %v1115_v14 = vpack.c.bf16 %v1061_v59, %v1060_v56  ;;  %v377_v59 = vsub.f32 %v312_v46, %v2000_v0  ;;  %v452_v56 = vmul.f32 %v2007_v7, %v376_v20  ;;  %v568_v15 = vadd.f32 %v2026_v17, %v502_v58 }
  0xc5   : > { %v1131_v22 = vpack.c.bf16 %v1093_v3, %v1092_v2  ;;  %v487_v24 = vmul.f32 %v2016_v11, %v421_v62  ;;  %v439_v43 = vmul.f32 %v2007_v7, %v363_v63  ;;  %v378_v46 = vsub.f32 %v313_v1, %v2000_v0 }
  0xc6   : > { %1255 = vmatmul.bf16.gmra.mxu1 %v1115_v14  ;;  %v453_v16 = vmul.f32 %v2007_v7, %v377_v59  ;;  %v632_v27 = vmax.f32 %v568_v15, 0.0  ;;  %v347_v20 = vsub.f32 %v282_v32, %v2000_v0  ;;  %v346_v54 = vsub.f32 %v281_v38, %v2000_v0  ;;  %v299_v15 = vld [vmem:[%s1995_s26 + $0x150] sm:$0xff] }
  0xc7   : > { %1335 = vmatmul.bf16.gmra.mxu3 %v1131_v22  ;;  %v379_v58 = vsub.f32 %v314_v45, %v2000_v0  ;;  %v454_v59 = vmul.f32 %v2007_v7, %v378_v46 }
  0xc8   : > { %v519_v28 = vmul.f32 %v2016_v11, %v453_v16  ;;  %v422_v36 = vmul.f32 %v2007_v7, %v346_v54 }
  0xc9   : > { %v910_v31 = vpop.permute.xlu1 %909  ;;  %v840_v22 = vpop.permute.xlu2 %839  ;;  %v455_v8 = vmul.f32 %v2007_v7, %v379_v58  ;;  %v520_v16 = vmul.f32 %v2016_v11, %v454_v59 }
  0xca   : > { %v1079_v41 = vmul.f32 %v910_v31, %v631_v23  ;;  %v905_v42 = vpop.permute.xlu0 %904  ;;  %v297_v23 = vld [vmem:[%s1995_s26 + $0x140] sm:$0xff]  ;;  %v553_v31 = vadd.f32 %v2026_v17, %v487_v24 }
  0xcb   : > { %v1078_v44 = vmul.f32 %v905_v42, %v630_v26  ;;  %v518_v26 = vmul.f32 %v2016_v11, %v452_v56  ;;  %v362_v29 = vsub.f32 %v297_v23, %v2000_v0  ;;  %v552_v42 = vadd.f32 %v2026_v17, %v486_v25 }
  0xcc   : > { %v423_v56 = vmul.f32 %v2007_v7, %v347_v20  ;;  %v488_v23 = vmul.f32 %v2016_v11, %v422_v36  ;;  %v521_v24 = vmul.f32 %v2016_v11, %v455_v8  ;;  %v586_v63 = vadd.f32 %v2026_v17, %v520_v16 }
  0xcd   : > { %v1124_v50 = vpack.c.bf16 %v1079_v41, %v1078_v44  ;;  %v584_v21 = vadd.f32 %v2026_v17, %v518_v26  ;;  %v585_v44 = vadd.f32 %v2026_v17, %v519_v28  ;;  %v438_v10 = vmul.f32 %v2007_v7, %v362_v29  ;;  %v315_v28 = vld [vmem:[%s1995_s26 + $0x1d0] sm:$0xff]  ;;  %v284_v29 = vld [vmem:[%s1995_s26 + $0xd8] sm:$0xff] }
  0xce   : > { %v616_v51 = vmax.f32 %v552_v42, 0.0  ;;  %v554_v1 = vadd.f32 %v2026_v17, %v488_v23  ;;  %v650_v38 = vmax.f32 %v586_v63, 0.0 }
  0xcf   : > { %1230 = vmatmul.bf16.gmra.mxu0 %v1110_v49  ;;  %1300 = vmatmul.bf16.gmra.mxu2 %v1124_v50  ;;  %v617_v49 = vmax.f32 %v553_v31, 0.0  ;;  %v648_v34 = vmax.f32 %v584_v21, 0.0  ;;  %v649_v55 = vmax.f32 %v585_v44, 0.0  ;;  %v316_v21 = vld [vmem:[%s1995_s26 + $0x1d8] sm:$0xff]  ;;  %v349_v44 = vsub.f32 %v284_v29, %v2000_v0  ;;  %v317_v29 = vld [vmem:[%s1995_s26 + $0x1e0] sm:$0xff] }
  0xd0   : > { %v618_v46 = vmax.f32 %v554_v1, 0.0 }
  0xd1   : > { %v825_v60 = vpop.permute.xlu1 %824  ;;  %v2295_v50 = vpop.permute.xlu2 %1004  ;;  %v1096_v37 = vmul.f32 %v2250_v5, %v648_v34  ;;  %v425_v34 = vmul.f32 %v2007_v7, %v349_v44 }
  0xd2   : > { %v1062_v2 = vmul.f32 %v825_v60, %v614_v52  ;;  %v990_v3 = vpop.permute.xlu0 %989  ;;  %v505_v52 = vmul.f32 %v2016_v11, %v439_v43  ;;  %v1065_v60 = vmul.f32 %v840_v22, %v617_v49  ;;  %v489_v22 = vmul.f32 %v2016_v11, %v423_v56  ;;  %v283_v43 = vld [vmem:[%s1995_s26 + $0xd0] sm:$0xff] }
  0xd3   : > { %v1095_v14 = vmul.f32 %v990_v3, %v647_v57  ;;  %v504_v57 = vmul.f32 %v2016_v11, %v438_v10  ;;  %v491_v8 = vmul.f32 %v2016_v11, %v425_v34 }
  0xd4   : > { %v1116_v4 = vpack.c.bf16 %v1063_v61, %v1062_v2  ;;  %v571_v3 = vadd.f32 %v2026_v17, %v505_v52  ;;  %v381_v52 = vsub.f32 %v316_v21, %v2000_v0 }
  0xd5   : > { %v1132_v53 = vpack.c.bf16 %v1095_v14, %v1094_v9  ;;  %v570_v6 = vadd.f32 %v2026_v17, %v504_v57  ;;  %v300_v9 = vld [vmem:[%s1995_s26 + $0x158] sm:$0xff]  ;;  %v1098_v57 = vmul.f32 %v2295_v50, %v650_v38 }
  0xd6   : > { %1260 = vmatmul.bf16.gmra.mxu1 %v1116_v4  ;;  %v635_v4 = vmax.f32 %v571_v3, 0.0  ;;  %v365_v5 = vsub.f32 %v300_v9, %v2000_v0 }
  0xd7   : > { %1340 = vmatmul.bf16.gmra.mxu3 %v1132_v53  ;;  %v634_v53 = vmax.f32 %v570_v6, 0.0 }
  0xd8   : > { %v441_v32 = vmul.f32 %v2007_v7, %v365_v5 }
  0xd9   : > { %v920_v30 = vpop.permute.xlu1 %919  ;;  %v850_v25 = vpop.permute.xlu2 %849 }
  0xda   : > { %v1081_v35 = vmul.f32 %v920_v30, %v633_v12  ;;  %v915_v41 = vpop.permute.xlu0 %914  ;;  %v364_v12 = vsub.f32 %v299_v15, %v2000_v0  ;;  %v507_v20 = vmul.f32 %v2016_v11, %v441_v32 }
  0xdb   : > { %v1080_v40 = vmul.f32 %v915_v41, %v632_v27  ;;  %v555_v27 = vadd.f32 %v2026_v17, %v489_v22  ;;  %v587_v41 = vadd.f32 %v2026_v17, %v521_v24  ;;  %v286_v24 = vld [vmem:[%s1995_s26 + $0xe8] sm:$0xff] }
  0xdc   : > { %v440_v42 = vmul.f32 %v2007_v7, %v364_v12  ;;  %v573_v59 = vadd.f32 %v2026_v17, %v507_v20  ;;  %v351_v32 = vsub.f32 %v286_v24, %v2000_v0  ;;  %v320_v24 = vld [vmem:[%s1995_s26 + $0x1f8] sm:$0xff] }
  0xdd   : > { %v1125_v48 = vpack.c.bf16 %v1081_v35, %v1080_v40  ;;  %v380_v40 = vsub.f32 %v315_v28, %v2000_v0  ;;  %v619_v45 = vmax.f32 %v555_v27, 0.0  ;;  %v285_v28 = vld [vmem:[%s1995_s26 + $0xe0] sm:$0xff] }
  0xde   : > { %v506_v49 = vmul.f32 %v2016_v11, %v440_v42  ;;  %v637_v50 = vmax.f32 %v573_v59, 0.0  ;;  %v350_v21 = vsub.f32 %v285_v28, %v2000_v0  ;;  %v2380_v59 = vld [vmem:[%s2477_s2] ss:$0 sm:$0xff] }
  0xdf   : > { %1235 = vmatmul.bf16.gmra.mxu0 %v1111_v47  ;;  %1305 = vmatmul.bf16.gmra.mxu2 %v1125_v48  ;;  %v651_v48 = vmax.f32 %v587_v41, 0.0  ;;  %v456_v54 = vmul.f32 %v2007_v7, %v380_v40  ;;  %v1067_v58 = vmul.f32 %v850_v25, %v619_v45  ;;  %v382_v40 = vsub.f32 %v317_v29, %v2000_v0 }
  0xe0   : > { %v427_v45 = vmul.f32 %v2007_v7, %v351_v32 }
  0xe1   : > { %v835_v62 = vpop.permute.xlu1 %834  ;;  %v1015_v13 = vpop.permute.xlu2 %1014  ;;  %v458_v34 = vmul.f32 %v2007_v7, %v382_v40 }
  0xe2   : > { %v1064_v61 = vmul.f32 %v835_v62, %v616_v51  ;;  %v1000_v2 = vpop.permute.xlu0 %999  ;;  %v348_v51 = vsub.f32 %v283_v43, %v2000_v0  ;;  %v572_v62 = vadd.f32 %v2026_v17, %v506_v49 }
  0xe3   : > { %v1097_v47 = vmul.f32 %v1000_v2, %v649_v55  ;;  %v302_v2 = vld [vmem:[%s1995_s26 + $0x168] sm:$0xff] }
  0xe4   : > { %v1117_v14 = vpack.c.bf16 %v1065_v60, %v1064_v61  ;;  %v424_v60 = vmul.f32 %v2007_v7, %v348_v51  ;;  %v457_v61 = vmul.f32 %v2007_v7, %v381_v52  ;;  %v367_v6 = vsub.f32 %v302_v2, %v2000_v0 }
  0xe5   : > { %v1133_v18 = vpack.c.bf16 %v1097_v47, %v1096_v37  ;;  %v301_v37 = vld [vmem:[%s1995_s26 + $0x160] sm:$0xff]  ;;  %v522_v47 = vmul.f32 %v2016_v11, %v456_v54  ;;  %v636_v9 = vmax.f32 %v572_v62, 0.0  ;;  %v426_v54 = vmul.f32 %v2007_v7, %v350_v21 }
  0xe6   : > { %1265 = vmatmul.bf16.gmra.mxu1 %v1117_v14  ;;  %v490_v14 = vmul.f32 %v2016_v11, %v424_v60  ;;  %v523_v15 = vmul.f32 %v2016_v11, %v457_v61  ;;  %v366_v16 = vsub.f32 %v301_v37, %v2000_v0  ;;  %v443_v5 = vmul.f32 %v2007_v7, %v367_v6 }
  0xe7   : > { %1345 = vmatmul.bf16.gmra.mxu3 %v1133_v18  ;;  %v588_v22 = vadd.f32 %v2026_v17, %v522_v47  ;;  %v524_v61 = vmul.f32 %v2380_v59, %v458_v34  ;;  %v271_v47 = vld [vmem:[%s1995_s26 + $0x70] sm:$0xff]  ;;  %v288_v34 = vld [vmem:[%s1995_s26 + $0xf8] sm:$0xff] }
  0xe8   : > { %v556_v25 = vadd.f32 %v2026_v17, %v490_v14  ;;  %v589_v63 = vadd.f32 %v2026_v17, %v523_v15  ;;  %v442_v27 = vmul.f32 %v2007_v7, %v366_v16 }
  0xe9   : > { %v930_v26 = vpop.permute.xlu1 %929  ;;  %v652_v1 = vmax.f32 %v588_v22, 0.0 }
  0xea   : > { %v1083_v30 = vmul.f32 %v930_v26, %v635_v4  ;;  %v925_v31 = vpop.permute.xlu0 %924  ;;  %v860_v26 = vpop.permute.xlu2 %859  ;;  %v620_v42 = vmax.f32 %v556_v25, 0.0  ;;  %v653_v43 = vmax.f32 %v589_v63, 0.0  ;;  %v508_v44 = vmul.f32 %v2016_v11, %v442_v27 }
  0xeb   : > { %v1082_v35 = vmul.f32 %v925_v31, %v634_v53  ;;  %v557_v53 = vadd.f32 %v2026_v17, %v491_v8  ;;  %v318_v31 = vld [vmem:[%s1995_s26 + $0x1e8] sm:$0xff]  ;;  %v1100_v38 = vmul.f32 %v1015_v13, %v652_v1  ;;  %v319_v8 = vld [vmem:[%s1995_s26 + $0x1f0] sm:$0xff] }
  0xec   : > { %v384_v25 = vsub.f32 %v319_v8, %v2000_v0 }
  0xed   : > { %v1126_v10 = vpack.c.bf16 %v1083_v30, %v1082_v35  ;;  %v509_v35 = vmul.f32 %v2016_v11, %v443_v5  ;;  %v621_v41 = vmax.f32 %v557_v53, 0.0  ;;  %v272_v53 = vld [vmem:[%s1995_s26 + $0x78] sm:$0xff] }
  0xee   : > { %v337_v29 = vsub.f32 %v272_v53, %v2000_v0 }
  0xef   : > { %1240 = vmatmul.bf16.gmra.mxu0 %v1112_v33  ;;  %1310 = vmatmul.bf16.gmra.mxu2 %v1126_v10  ;;  %v383_v10 = vsub.f32 %v318_v31, %v2000_v0  ;;  %v1069_v49 = vmul.f32 %v860_v26, %v621_v41 }
  0xf1   : > { %v845_v55 = vpop.permute.xlu1 %844  ;;  %v459_v11 = vmul.f32 %v2007_v7, %v383_v10 }
  0xf2   : > { %v1066_v19 = vmul.f32 %v845_v55, %v618_v46  ;;  %v1010_v33 = vpop.permute.xlu0 %1009  ;;  %v574_v55 = vadd.f32 %v2026_v17, %v508_v44 }
  0xf3   : > { %v1099_v56 = vmul.f32 %v1010_v33, %v651_v48  ;;  %v575_v48 = vadd.f32 %v2026_v17, %v509_v35  ;;  %v1025_v33 = vpop.permute.xlu2 %1024  ;;  %v492_v17 = vmul.f32 %v2380_v59, %v426_v54  ;;  %v385_v35 = vsub.f32 %v320_v24, %v2000_v0 }
  0xf4   : > { %v1118_v3 = vpack.c.bf16 %v1067_v58, %v1066_v19  ;;  %v303_v19 = vld [vmem:[%s1995_s26 + $0x170] sm:$0xff]  ;;  %v638_v2 = vmax.f32 %v574_v55, 0.0 }
  0xf5   : > { %v1134_v36 = vpack.c.bf16 %v1099_v56, %v1098_v57  ;;  %v304_v57 = vld [vmem:[%s1995_s26 + $0x178] sm:$0xff]  ;;  %v493_v56 = vmul.f32 %v2380_v59, %v427_v45  ;;  %v639_v62 = vmax.f32 %v575_v48, 0.0 }
  0xf6   : > { %1270 = vmatmul.bf16.gmra.mxu1 %v1118_v3  ;;  %v369_v60 = vsub.f32 %v304_v57, %v2000_v0  ;;  %v525_v3 = vmul.f32 %v2380_v59, %v459_v11 }
  0xf7   : > { %1350 = vmatmul.bf16.gmra.mxu3 %v1134_v36  ;;  %v368_v36 = vsub.f32 %v303_v19, %v2000_v0 }
  0xf8   : > { %v445_v16 = vmul.f32 %v2007_v7, %v369_v60 }
  0xf9   : > { %v940_v18 = vpop.permute.xlu1 %939  ;;  %v444_v5 = vmul.f32 %v2007_v7, %v368_v36 }
  0xfa   : > { %v1085_v4 = vmul.f32 %v940_v18, %v637_v50  ;;  %v935_v23 = vpop.permute.xlu0 %934  ;;  %v2392_v50 = vld [vmem:[%s2477_s2 + $0x1] ss:$0 sm:$0xff]  ;;  %v511_v28 = vmul.f32 %v2380_v59, %v445_v16 }
  0xfb   : > { %v1084_v12 = vmul.f32 %v935_v23, %v636_v9  ;;  %v559_v6 = vadd.f32 %v2392_v50, %v493_v56  ;;  %v558_v15 = vadd.f32 %v2392_v50, %v492_v17  ;;  %v590_v18 = vadd.f32 %v2392_v50, %v524_v61  ;;  %v870_v31 = vpop.permute.xlu2 %869 }
  0xfc   : > { %v591_v23 = vadd.f32 %v2392_v50, %v525_v3  ;;  %v510_v32 = vmul.f32 %v2380_v59, %v444_v5  ;;  %v577_v10 = vadd.f32 %v2392_v50, %v511_v28 }
  0xfd   : > { %v1127_v30 = vpack.c.bf16 %v1085_v4, %v1084_v12  ;;  %v336_v12 = vsub.f32 %v271_v47, %v2000_v0  ;;  %v623_v26 = vmax.f32 %v559_v6, 0.0  ;;  %v622_v27 = vmax.f32 %v558_v15, 0.0 }
  0xfe   : > { %v655_v1 = vmax.f32 %v591_v23, 0.0  ;;  %v576_v48 = vadd.f32 %v2392_v50, %v510_v32 }
  0xff   : > { %1315 = vmatmul.bf16.gmra.mxu2 %v1127_v30  ;;  %v654_v30 = vmax.f32 %v590_v18, 0.0  ;;  %v412_v41 = vmul.f32 %v2007_v7, %v336_v12  ;;  %v1071_v21 = vmul.f32 %v870_v31, %v623_v26 }
 0x101   : > { %v1102_v45 = vmul.f32 %v1025_v33, %v654_v30  ;;  %v478_v11 = vmul.f32 %v2380_v59, %v412_v41  ;;  %v640_v33 = vmax.f32 %v576_v48, 0.0 }
 0x102   : > { %v855_v46 = vpop.permute.xlu1 %854  ;;  %v1020_v20 = vpop.permute.xlu0 %1019 }
 0x103   : > { %v1068_v51 = vmul.f32 %v855_v46, %v620_v42  ;;  %v1101_v52 = vmul.f32 %v1020_v20, %v653_v43  ;;  %v460_v42 = vmul.f32 %v2007_v7, %v384_v25  ;;  %v544_v60 = vadd.f32 %v2392_v50, %v478_v11 }
 0x105   : > { %v1119_v58 = vpack.c.bf16 %v1069_v49, %v1068_v51  ;;  %v1135_v13 = vpack.c.bf16 %v1101_v52, %v1100_v38  ;;  %v413_v38 = vmul.f32 %v2007_v7, %v337_v29  ;;  %v461_v49 = vmul.f32 %v2007_v7, %v385_v35  ;;  %v287_v51 = vld [vmem:[%s1995_s26 + $0xf0] sm:$0xff] }
 0x106   : > { %v526_v57 = vmul.f32 %v2380_v59, %v460_v42  ;;  %v352_v19 = vsub.f32 %v287_v51, %v2000_v0  ;;  %v608_v15 = vmax.f32 %v544_v60, 0.0 }
 0x107   : > { %1275 = vmatmul.bf16.gmra.mxu1 %v1119_v58  ;;  %1355 = vmatmul.bf16.gmra.mxu3 %v1135_v13  ;;  %v641_v58 = vmax.f32 %v577_v10, 0.0  ;;  %v479_v13 = vmul.f32 %v2380_v59, %v413_v38  ;;  %v527_v56 = vmul.f32 %v2380_v59, %v461_v49 }
 0x108   : > { %v592_v61 = vadd.f32 %v2392_v50, %v526_v57  ;;  %v1056_v53 = vmul.f32 %v2048_v39, %v608_v15 }
 0x109   : > { %v545_v36 = vadd.f32 %v2392_v50, %v479_v13  ;;  %v593_v8 = vadd.f32 %v2392_v50, %v527_v56 }
 0x10a   : > { %v950_v37 = vpop.permute.xlu1 %949  ;;  %v945_v14 = vpop.permute.xlu0 %944  ;;  %v656_v18 = vmax.f32 %v592_v61, 0.0 }
 0x10b   : > { %v1087_v9 = vmul.f32 %v950_v37, %v639_v62  ;;  %v1086_v22 = vmul.f32 %v945_v14, %v638_v2  ;;  %v353_v62 = vsub.f32 %v288_v34, %v2000_v0  ;;  %v428_v37 = vmul.f32 %v2007_v7, %v352_v19  ;;  %v1035_v0 = vpop.permute.xlu2 %1034 }
 0x10c   : > { %v1211_v4 = vpop.f32.mrf.mxu0  ;;  %v609_v16 = vmax.f32 %v545_v36, 0.0  ;;  %v1104_v25 = vmul.f32 %v1035_v0, %v656_v18 }
 0x10d   : > { %v1128_v63 = vpack.c.bf16 %v1087_v9, %v1086_v22  ;;  %v429_v9 = vmul.f32 %v2007_v7, %v353_v62  ;;  %v494_v22 = vmul.f32 %v2380_v59, %v428_v37 }
 0x10f   : > { %1320 = vmatmul.bf16.gmra.mxu2 %v1128_v63  ;;  %v495_v23 = vmul.f32 %v2380_v59, %v429_v9  ;;  %v560_v7 = vadd.f32 %v2392_v50, %v494_v22 }
 0x111   : > { %v624_v31 = vmax.f32 %v560_v7, 0.0 }
 0x112   : > { %v865_v43 = vpop.permute.xlu1 %864  ;;  %v1030_v44 = vpop.permute.xlu0 %1029 }
 0x113   : > { %v1070_v40 = vmul.f32 %v865_v43, %v622_v27  ;;  %v1103_v46 = vmul.f32 %v1030_v44, %v655_v1  ;;  %v561_v27 = vadd.f32 %v2392_v50, %v495_v23  ;;  %v875_v1 = vpop.permute.xlu2 %874 }
 0x114   : > { %v1213_v20 = vpop.f32.mrf.mxu0  ;;  %v1072_v32 = vmul.f32 %v875_v1, %v624_v31 }
 0x115   : > { %v1623_v52 = vpack.c.bf16 %v1213_v20, %v1211_v4  ;;  %v1120_v54 = vpack.c.bf16 %v1071_v21, %v1070_v40  ;;  %v1136_v55 = vpack.c.bf16 %v1103_v46, %v1102_v45  ;;  %v657_v4 = vmax.f32 %v593_v8, 0.0 }
 0x116   : > { %v625_v59 = vmax.f32 %v561_v27, 0.0 }
 0x117   : > { %1624 = vst [vmem:[%s2417_s11] sm:$0xff] %v1623_v52   ;;  %1280 = vmatmul.bf16.gmra.mxu1 %v1120_v54  ;;  %1360 = vmatmul.bf16.gmra.mxu3 %v1136_v55 }
 0x11a   : > { %v960_v17 = vpop.permute.xlu1 %959  ;;  %v955_v3 = vpop.permute.xlu0 %954 }
 0x11b   : > { %v1089_v2 = vmul.f32 %v960_v17, %v641_v58  ;;  %v1088_v47 = vmul.f32 %v955_v3, %v640_v33 }
 0x11c   : > { %v1216_v6 = vpop.f32.mrf.mxu0 }
 0x11d   : > { %v1129_v14 = vpack.c.bf16 %v1089_v2, %v1088_v47 }
 0x11f   : > { %1325 = vmatmul.bf16.gmra.mxu2 %v1129_v14 }
 0x122   : > { %v800_v5 = vpop.permute.xlu1 %799 }
 0x123   : > { %v1057_v24 = vmul.f32 %v800_v5, %v609_v16  ;;  %v1040_v12 = vpop.permute.xlu0 %1039 }
 0x124   : > { %v1105_v63 = vmul.f32 %v1040_v12, %v657_v4  ;;  %v1218_v26 = vpop.f32.mrf.mxu0 }
 0x125   : > { %v1628_v28 = vpack.c.bf16 %v1218_v26, %v1216_v6  ;;  %v1113_v29 = vpack.c.bf16 %v1057_v24, %v1056_v53 }
 0x126   : > { %v1137_v30 = vpack.c.bf16 %v1105_v63, %v1104_v25 }
 0x127   : > { %1780 = vst [vmem:[%s2417_s11 + $0x8] sm:$0xff] %v1628_v28   ;;  %1245 = vmatmul.bf16.gmra.mxu0 %v1113_v29 }
 0x128   : > { %1365 = vmatmul.bf16.gmra.mxu3 %v1137_v30 }
 0x12b   : > { %v880_v39 = vpop.permute.xlu0 %879 }
 0x12c   : > { %v1073_v35 = vmul.f32 %v880_v39, %v625_v59  ;;  %v1221_v41 = vpop.f32.mrf.mxu0 }
 0x12e   : > { %v1121_v42 = vpack.c.bf16 %v1073_v35, %v1072_v32 }
 0x130   : > { %1285 = vmatmul.bf16.gmra.mxu1 %v1121_v42 }
 0x132   : > { %v1291_v43 = vpop.f32.mrf.mxu2 }
 0x133   : > { %v1251_v50 = vpop.f32.mrf.mxu1 }
 0x134   : > { %v1223_v21 = vpop.f32.mrf.mxu0 }
 0x135   : > { %v1633_v40 = vpack.c.bf16 %v1223_v21, %v1221_v41 }
 0x137   : > { %1781 = vst [vmem:[%s2417_s11 + $0x10] sm:$0xff] %v1633_v40  }
 0x13a   : > { %v1293_v44 = vpop.f32.mrf.mxu2  ;;  %v1331_v10 = vpop.f32.mrf.mxu3 }
 0x13b   : > { %v1703_v38 = vpack.c.bf16 %v1293_v44, %v1291_v43  ;;  %v1253_v45 = vpop.f32.mrf.mxu1 }
 0x13c   : > { %v1226_v46 = vpop.f32.mrf.mxu0  ;;  %v1663_v20 = vpack.c.bf16 %v1253_v45, %v1251_v50 }
 0x13d   : > { %1795 = vst [vmem:[%s2417_s11 + $0x80] sm:$0xff] %v1703_v38  }
 0x13e   : > { %1787 = vst [vmem:[%s2417_s11 + $0x40] sm:$0xff] %v1663_v20  }
 0x142   : > { %v1296_v48 = vpop.f32.mrf.mxu2  ;;  %v1333_v49 = vpop.f32.mrf.mxu3 }
 0x143   : > { %v1743_v51 = vpack.c.bf16 %v1333_v49, %v1331_v10  ;;  %v1256_v52 = vpop.f32.mrf.mxu1 }
 0x144   : > { %v1228_v54 = vpop.f32.mrf.mxu0 }
 0x145   : > { %1803 = vst [vmem:[%s2417_s11 + $0xc0] sm:$0xff] %v1743_v51   ;;  %v1638_v34 = vpack.c.bf16 %v1228_v54, %v1226_v46 }
 0x147   : > { %1782 = vst [vmem:[%s2417_s11 + $0x18] sm:$0xff] %v1638_v34  }
 0x14a   : > { %v1298_v55 = vpop.f32.mrf.mxu2  ;;  %v1336_v11 = vpop.f32.mrf.mxu3 }
 0x14b   : > { %v1708_v57 = vpack.c.bf16 %v1298_v55, %v1296_v48  ;;  %v1258_v58 = vpop.f32.mrf.mxu1 }
 0x14c   : > { %v1231_v13 = vpop.f32.mrf.mxu0  ;;  %v1668_v19 = vpack.c.bf16 %v1258_v58, %v1256_v52 }
 0x14d   : > { %1796 = vst [vmem:[%s2417_s11 + $0x88] sm:$0xff] %v1708_v57  }
 0x14e   : > { %1788 = vst [vmem:[%s2417_s11 + $0x48] sm:$0xff] %v1668_v19  }
 0x152   : > { %v1301_v33 = vpop.f32.mrf.mxu2  ;;  %v1338_v56 = vpop.f32.mrf.mxu3 }
 0x153   : > { %v1748_v62 = vpack.c.bf16 %v1338_v56, %v1336_v11  ;;  %v1261_v17 = vpop.f32.mrf.mxu1 }
 0x154   : > { %v1233_v60 = vpop.f32.mrf.mxu0 }
 0x155   : > { %1804 = vst [vmem:[%s2417_s11 + $0xc8] sm:$0xff] %v1748_v62   ;;  %v1643_v61 = vpack.c.bf16 %v1233_v60, %v1231_v13 }
 0x157   : > { %1783 = vst [vmem:[%s2417_s11 + $0x20] sm:$0xff] %v1643_v61  }
 0x15a   : > { %v1303_v2 = vpop.f32.mrf.mxu2  ;;  %v1341_v3 = vpop.f32.mrf.mxu3 }
 0x15b   : > { %v1713_v36 = vpack.c.bf16 %v1303_v2, %v1301_v33  ;;  %v1263_v37 = vpop.f32.mrf.mxu1 }
 0x15c   : > { %v1236_v47 = vpop.f32.mrf.mxu0  ;;  %v1673_v6 = vpack.c.bf16 %v1263_v37, %v1261_v17 }
 0x15d   : > { %1797 = vst [vmem:[%s2417_s11 + $0x90] sm:$0xff] %v1713_v36  }
 0x15e   : > { %1789 = vst [vmem:[%s2417_s11 + $0x50] sm:$0xff] %v1673_v6  }
 0x162   : > { %v1306_v8 = vpop.f32.mrf.mxu2  ;;  %v1343_v9 = vpop.f32.mrf.mxu3 }
 0x163   : > { %v1753_v14 = vpack.c.bf16 %v1343_v9, %v1341_v3  ;;  %v1266_v15 = vpop.f32.mrf.mxu1 }
 0x164   : > { %v1238_v0 = vpop.f32.mrf.mxu0 }
 0x165   : > { %1805 = vst [vmem:[%s2417_s11 + $0xd0] sm:$0xff] %v1753_v14   ;;  %v1648_v16 = vpack.c.bf16 %v1238_v0, %v1236_v47 }
 0x167   : > { %1784 = vst [vmem:[%s2417_s11 + $0x28] sm:$0xff] %v1648_v16  }
 0x16a   : > { %v1308_v18 = vpop.f32.mrf.mxu2  ;;  %v1346_v22 = vpop.f32.mrf.mxu3 }
 0x16b   : > { %v1718_v4 = vpack.c.bf16 %v1308_v18, %v1306_v8  ;;  %v1268_v23 = vpop.f32.mrf.mxu1 }
 0x16c   : > { %v1241_v5 = vpop.f32.mrf.mxu0  ;;  %v1678_v53 = vpack.c.bf16 %v1268_v23, %v1266_v15 }
 0x16d   : > { %1798 = vst [vmem:[%s2417_s11 + $0x98] sm:$0xff] %v1718_v4  }
 0x16e   : > { %1790 = vst [vmem:[%s2417_s11 + $0x58] sm:$0xff] %v1678_v53  }
 0x172   : > { %v1311_v24 = vpop.f32.mrf.mxu2  ;;  %v1348_v12 = vpop.f32.mrf.mxu3 }
 0x173   : > { %v1758_v25 = vpack.c.bf16 %v1348_v12, %v1346_v22  ;;  %v1271_v7 = vpop.f32.mrf.mxu1 }
 0x174   : > { %v1243_v63 = vpop.f32.mrf.mxu0 }
 0x175   : > { %1806 = vst [vmem:[%s2417_s11 + $0xd8] sm:$0xff] %v1758_v25   ;;  %v1653_v26 = vpack.c.bf16 %v1243_v63, %v1241_v5 }
 0x177   : > { %1785 = vst [vmem:[%s2417_s11 + $0x30] sm:$0xff] %v1653_v26  }
 0x17a   : > { %v1313_v27 = vpop.f32.mrf.mxu2  ;;  %v1351_v28 = vpop.f32.mrf.mxu3 }
 0x17b   : > { %v1723_v29 = vpack.c.bf16 %v1313_v27, %v1311_v24  ;;  %v1273_v30 = vpop.f32.mrf.mxu1 }
 0x17c   : > { %v1683_v31 = vpack.c.bf16 %v1273_v30, %v1271_v7 }
 0x17d   : > { %1799 = vst [vmem:[%s2417_s11 + $0xa0] sm:$0xff] %v1723_v29  }
 0x17e   : > { %1791 = vst [vmem:[%s2417_s11 + $0x60] sm:$0xff] %v1683_v31  }
 0x182   : > { %v1316_v59 = vpop.f32.mrf.mxu2  ;;  %v1353_v1 = vpop.f32.mrf.mxu3 }
 0x183   : > { %v1763_v39 = vpack.c.bf16 %v1353_v1, %v1351_v28 }
 0x184   : > { %v1276_v32 = vpop.f32.mrf.mxu1 }
 0x185   : > { %1807 = vst [vmem:[%s2417_s11 + $0xe0] sm:$0xff] %v1763_v39  }
 0x18a   : > { %v1318_v35 = vpop.f32.mrf.mxu2  ;;  %v1356_v41 = vpop.f32.mrf.mxu3 }
 0x18b   : > { %v1728_v42 = vpack.c.bf16 %v1318_v35, %v1316_v59 }
 0x18c   : > { %v1278_v43 = vpop.f32.mrf.mxu1 }
 0x18d   : > { %1800 = vst [vmem:[%s2417_s11 + $0xa8] sm:$0xff] %v1728_v42   ;;  %v1688_v50 = vpack.c.bf16 %v1278_v43, %v1276_v32 }
 0x18f   : > { %1792 = vst [vmem:[%s2417_s11 + $0x68] sm:$0xff] %v1688_v50  }
 0x192   : > { %v1358_v21 = vpop.f32.mrf.mxu3  ;;  %v1321_v40 = vpop.f32.mrf.mxu2 }
 0x193   : > { %v1768_v44 = vpack.c.bf16 %v1358_v21, %v1356_v41 }
 0x194   : > { %v1281_v10 = vpop.f32.mrf.mxu1 }
 0x195   : > { %1808 = vst [vmem:[%s2417_s11 + $0xe8] sm:$0xff] %v1768_v44  }
 0x19a   : > { %v1323_v38 = vpop.f32.mrf.mxu2  ;;  %v1361_v45 = vpop.f32.mrf.mxu3 }
 0x19b   : > { %v1733_v46 = vpack.c.bf16 %v1323_v38, %v1321_v40 }
 0x19c   : > { %v1283_v20 = vpop.f32.mrf.mxu1 }
 0x19d   : > { %v1693_v48 = vpack.c.bf16 %v1283_v20, %v1281_v10  ;;  %1801 = vst [vmem:[%s2417_s11 + $0xb0] sm:$0xff] %v1733_v46  }
 0x19f   : > { %1793 = vst [vmem:[%s2417_s11 + $0x70] sm:$0xff] %v1693_v48  }
 0x1a2   : > { %v1326_v49 = vpop.f32.mrf.mxu2  ;;  %v1363_v51 = vpop.f32.mrf.mxu3 }
 0x1a3   : > { %v1773_v52 = vpack.c.bf16 %v1363_v51, %v1361_v45 }
 0x1a4   : > { %v1246_v54 = vpop.f32.mrf.mxu0 }
 0x1a5   : > { %1809 = vst [vmem:[%s2417_s11 + $0xf0] sm:$0xff] %v1773_v52  }
 0x1aa   : > { %v1328_v34 = vpop.f32.mrf.mxu2 }
 0x1ab   : > { %v1366_v55 = vpop.f32.mrf.mxu3  ;;  %v1738_v11 = vpack.c.bf16 %v1328_v34, %v1326_v49 }
 0x1ac   : > { %v1248_v57 = vpop.f32.mrf.mxu0 }
 0x1ad   : > { %v1658_v58 = vpack.c.bf16 %v1248_v57, %v1246_v54  ;;  %v1286_v13 = vpop.f32.mrf.mxu1  ;;  %1802 = vst [vmem:[%s2417_s11 + $0xb8] sm:$0xff] %v1738_v11  }
 0x1af   : > { %1786 = vst [vmem:[%s2417_s11 + $0x38] sm:$0xff] %v1658_v58  }
 0x1b3   : > { %v1368_v19 = vpop.f32.mrf.mxu3 }
 0x1b4   : > { %v1778_v33 = vpack.c.bf16 %v1368_v19, %v1366_v55 }
 0x1b5   : > { %v1288_v56 = vpop.f32.mrf.mxu1 }
 0x1b6   : > { %1810 = vst [vmem:[%s2417_s11 + $0xf8] sm:$0xff] %v1778_v33   ;;  %v1698_v62 = vpack.c.bf16 %v1288_v56, %v1286_v13 }
 0x1b8   : > { %1794 = vst [vmem:[%s2417_s11 + $0x78] sm:$0xff] %v1698_v62  }
 0x1b9 PF: > { %s15_s18 = sadd.s32 1, %s1859_s18  }
 0x1ba   : > { %p12_p4 = scmp.ge.s32.totalorder %s15_s18, 4  }
 0x1bc   :  { %14 = sbr.rel (!%p12_p4) target bundleno = 1 (0x1), region = 73 }

// kernel: gcn_with_dhla_forward.5
= control target key start
LH: loop header
LB: loop body
LE: loop exit
PB: predicated region body
PF: predicated region fallthrough
CT: control target
= control target key end

     0   :  { %s4530_s15 = smov 0   ;;  %s5802_s0 = inlined_call_operand.vmem [shape: s8[1024,1024], index: 0, kind: input, shape index: {}]   ;;  %s5803_s1 = inlined_call_operand.vmem [shape: bf16[1024,128], index: 1, kind: input, shape index: {}]   ;;  %s5804_s2 = inlined_call_operand.vmem [shape: f32[1024,1], index: 2, kind: input, shape index: {}]   ;;  %s5805_s3 = inlined_call_operand.vmem [shape: f32[1,128], index: 3, kind: input, shape index: {}]   ;;  %s5806_s4 = inlined_call_operand.vmem [shape: f32[1024,128], index: 4, kind: output, shape index: {}]  }
   0x1 LB: > { %s4146_s16 = sadd.s32 4294967295, %s4502_s15   ;;  %p4150_p0 = scmp.ge.s32.totalorder %s4502_s15, 1  ;;  %s4502_s15 = sphi %s4530_s15, %s14_s15  }
   0x2   : > { %p175_p1 = scmp.lt.s32.totalorder %s4502_s15, 3 }
   0x4   : > { %p176_p2 = pnand %p4150_p0, %p175_p1 }
   0x6   : > { %179 = sbr.rel (%p176_p2) target bundleno = 1202 (0x4b2), region = 36 }
   0xb   : > { %v4424_v0 = vld [vmem:[%s5803_s1 + $0x38] sm:$0xff]  ;;  %s4151_s25 = sshll.u32 %s4146_s16, 4  ;;  %v4423_v4 = vld [vmem:[%s5803_s1 + $0x30] sm:$0xff]  ;;  %v4422_v8 = vld [vmem:[%s5803_s1 + $0x28] sm:$0xff]  ;;  %s4154_s8 = sshll.u32 %s4146_s16, 6 }
   0xc   : > { %v4432_v1 = vld [vmem:[%s5803_s1 + $0x78] sm:$0xff]  ;;  %2146 = vmatpush.bf16.msra.mxu0 %v4424_v0  ;;  %v4431_v5 = vld [vmem:[%s5803_s1 + $0x70] sm:$0xff]  ;;  %p208_p3 = scmp.lt.s32.totalorder %s4151_s25, 31  ;;  %v4430_v9 = vld [vmem:[%s5803_s1 + $0x68] sm:$0xff]  ;;  %p215_p4 = scmp.lt.s32.totalorder %s4154_s8, 127 }
   0xd   : > { %v4440_v2 = vld [vmem:[%s5803_s1 + $0xb8] sm:$0xff]  ;;  %2315 = vmatpush.bf16.msra.mxu1 %v4432_v1  ;;  %v4439_v6 = vld [vmem:[%s5803_s1 + $0xb0] sm:$0xff]  ;;  %v4438_v10 = vld [vmem:[%s5803_s1 + $0xa8] sm:$0xff] }
   0xe   : > { %v4448_v3 = vld [vmem:[%s5803_s1 + $0xf8] sm:$0xff]  ;;  %2484 = vmatpush.bf16.msra.mxu2 %v4440_v2  ;;  %v4447_v7 = vld [vmem:[%s5803_s1 + $0xf0] sm:$0xff]  ;;  %v4446_v11 = vld [vmem:[%s5803_s1 + $0xe8] sm:$0xff]  ;;  %s5872_s25 = smov (!%p208_p3, %s4151_s25), 31  ;;  %s5874_s8 = smov (!%p215_p4, %s4154_s8), 127 }
   0xf   : > { %2653 = vmatpush.bf16.msra.mxu3 %v4448_v3  ;;  %v4421_v12 = vld [vmem:[%s5803_s1 + $0x20] sm:$0xff]  ;;  %s4416_s27 = sshll.u32 %s5872_s25, 6  ;;  %v4420_v16 = vld [vmem:[%s5803_s1 + $0x18] sm:$0xff]  ;;  %v4419_v20 = vld [vmem:[%s5803_s1 + $0x10] sm:$0xff]  ;;  %s4155_s16 = sshll.u32 %s5874_s8, 3 }
  0x10   : > { %2147 = vmatpush.bf16.msra.mxu0 %v4423_v4  ;;  %v4429_v13 = vld [vmem:[%s5803_s1 + $0x60] sm:$0xff]  ;;  %v4428_v17 = vld [vmem:[%s5803_s1 + $0x58] sm:$0xff]  ;;  %s4603_s11 = scalar_lea.vmem %s5802_s0, %s4416_s27  ;;  %v4427_v21 = vld [vmem:[%s5803_s1 + $0x50] sm:$0xff]  ;;  %s5065_s10 = scalar_lea.vmem %s5804_s2, %s4155_s16 }
  0x11   : > { %2316 = vmatpush.bf16.msra.mxu1 %v4431_v5  ;;  %v4437_v14 = vld [vmem:[%s5803_s1 + $0xa0] sm:$0xff]  ;;  %v4436_v18 = vld [vmem:[%s5803_s1 + $0x98] sm:$0xff]  ;;  %v4435_v22 = vld [vmem:[%s5803_s1 + $0x90] sm:$0xff]  ;;  %s5243_s18 = scalar_lea.vmem %s5806_s4, %s4155_s16 }
  0x12   : > { %2485 = vmatpush.bf16.msra.mxu2 %v4439_v6  ;;  %v4445_v15 = vld [vmem:[%s5803_s1 + $0xe0] sm:$0xff]  ;;  %v4444_v19 = vld [vmem:[%s5803_s1 + $0xd8] sm:$0xff]  ;;  %v4618_v24 = vld [vmem:[%s4603_s11 + $0x8] sm:$0xff] }
  0x13   : > { %2654 = vmatpush.bf16.msra.mxu3 %v4447_v7  ;;  %v4615_v23 = vld [vmem:[%s4603_s11] sm:$0xff]  ;;  %v4443_v25 = vld [vmem:[%s5803_s1 + $0xd0] sm:$0xff]  ;;  %v4627_v27 = vld [vmem:[%s4603_s11 + $0x18] sm:$0xff]  ;;  %v355_v30 = vunpack.c.0.s8 %v4618_v24  ;;  %v363_v31 = vunpack.c.1.s8 %v4618_v24  ;;  %v371_v62 = vunpack.c.2.s8 %v4618_v24  ;;  %v379_v63 = vunpack.c.3.s8 %v4618_v24 }
  0x14   : > { %2148 = vmatpush.bf16.msra.mxu0 %v4422_v8  ;;  %v4624_v26 = vld [vmem:[%s4603_s11 + $0x10] sm:$0xff]  ;;  %v354_v28 = vunpack.c.0.s8 %v4615_v23  ;;  %v362_v29 = vunpack.c.1.s8 %v4615_v23  ;;  %v4418_v32 = vld [vmem:[%s5803_s1 + $0x8] sm:$0xff]  ;;  %v357_v36 = vunpack.c.0.s8 %v4627_v27  ;;  %v365_v37 = vunpack.c.1.s8 %v4627_v27  ;;  %v4417_v44 = vld [vmem:[%s5803_s1] sm:$0xff] }
  0x15   : > { %2317 = vmatpush.bf16.msra.mxu1 %v4430_v9  ;;  %v4426_v33 = vld [vmem:[%s5803_s1 + $0x48] sm:$0xff]  ;;  %v356_v34 = vunpack.c.0.s8 %v4624_v26  ;;  %v364_v35 = vunpack.c.1.s8 %v4624_v26  ;;  %v867_v42 = vcvt.s32.f32 %v355_v30  ;;  %v875_v43 = vcvt.s32.f32 %v363_v31  ;;  %v4425_v45 = vld [vmem:[%s5803_s1 + $0x40] sm:$0xff]  ;;  %v4472_v52 = vld [vmem:[%s5803_s1 + $0x1b8] sm:$0xff] }
  0x16   : > { %2486 = vmatpush.bf16.msra.mxu2 %v4438_v10  ;;  %v4434_v38 = vld [vmem:[%s5803_s1 + $0x88] sm:$0xff]  ;;  %v866_v40 = vcvt.s32.f32 %v354_v28  ;;  %v874_v41 = vcvt.s32.f32 %v362_v29  ;;  %v869_v48 = vcvt.s32.f32 %v357_v36  ;;  %v877_v49 = vcvt.s32.f32 %v365_v37  ;;  %v4433_v50 = vld [vmem:[%s5803_s1 + $0x80] sm:$0xff]  ;;  %v4456_v53 = vld [vmem:[%s5803_s1 + $0x138] sm:$0xff] }
  0x17   : > { %2655 = vmatpush.bf16.msra.mxu3 %v4446_v11  ;;  %v4442_v39 = vld [vmem:[%s5803_s1 + $0xc8] sm:$0xff]  ;;  %v868_v46 = vcvt.s32.f32 %v356_v34  ;;  %v876_v47 = vcvt.s32.f32 %v364_v35  ;;  %v4441_v51 = vld [vmem:[%s5803_s1 + $0xc0] sm:$0xff]  ;;  %v1379_v55 = vpack.c.bf16 %v875_v43, %v867_v42  ;;  %v4480_v58 = vld [vmem:[%s5803_s1 + $0x1f8] sm:$0xff]  ;;  %v370_v60 = vunpack.c.2.s8 %v4615_v23 }
  0x18   : > { %2149 = vmatpush.bf16.msra.mxu0 %v4421_v12  ;;  %v1378_v54 = vpack.c.bf16 %v874_v41, %v866_v40  ;;  %v1381_v57 = vpack.c.bf16 %v877_v49, %v869_v48  ;;  %v4464_v59 = vld [vmem:[%s5803_s1 + $0x178] sm:$0xff]  ;;  %v378_v61 = vunpack.c.3.s8 %v4615_v23  ;;  %v372_v0 = vunpack.c.2.s8 %v4624_v26  ;;  %v4471_v40 = vld [vmem:[%s5803_s1 + $0x1b0] sm:$0xff] }
  0x19   : > { %2318 = vmatpush.bf16.msra.mxu1 %v4429_v13  ;;  %v1380_v56 = vpack.c.bf16 %v876_v47, %v868_v46  ;;  %v380_v1 = vunpack.c.3.s8 %v4624_v26  ;;  %v373_v2 = vunpack.c.2.s8 %v4627_v27  ;;  %v381_v3 = vunpack.c.3.s8 %v4627_v27  ;;  %v4455_v41 = vld [vmem:[%s5803_s1 + $0x130] sm:$0xff] }
  0x1a   : > { %2487 = vmatpush.bf16.msra.mxu2 %v4437_v14  ;;  %v882_v4 = vcvt.s32.f32 %v370_v60  ;;  %v890_v5 = vcvt.s32.f32 %v378_v61  ;;  %v883_v6 = vcvt.s32.f32 %v371_v62  ;;  %v891_v7 = vcvt.s32.f32 %v379_v63  ;;  %v4479_v42 = vld [vmem:[%s5803_s1 + $0x1f0] sm:$0xff] }
  0x1b   : > { %2656 = vmatpush.bf16.msra.mxu3 %v4445_v15  ;;  %v884_v8 = vcvt.s32.f32 %v372_v0  ;;  %v892_v9 = vcvt.s32.f32 %v380_v1  ;;  %v885_v10 = vcvt.s32.f32 %v373_v2  ;;  %v893_v11 = vcvt.s32.f32 %v381_v3  ;;  %v4463_v43 = vld [vmem:[%s5803_s1 + $0x170] sm:$0xff]  ;;  %v242_v0 = vld [vmem:[%s4603_s11 + $0x80] sm:$0xff]  ;;  %v243_v1 = vld [vmem:[%s4603_s11 + $0x88] sm:$0xff] }
  0x1c   : > { %2150 = vmatpush.bf16.msra.mxu0 %v4420_v16  ;;  %v1386_v12 = vpack.c.bf16 %v890_v5, %v882_v4  ;;  %v1387_v13 = vpack.c.bf16 %v891_v7, %v883_v6  ;;  %v234_v16 = vld [vmem:[%s4603_s11 + $0x40] sm:$0xff]  ;;  %v244_v2 = vld [vmem:[%s4603_s11 + $0x90] sm:$0xff]  ;;  %v245_v3 = vld [vmem:[%s4603_s11 + $0x98] sm:$0xff]  ;;  %v418_v4 = vunpack.c.0.s8 %v242_v0  ;;  %v426_v5 = vunpack.c.1.s8 %v242_v0 }
  0x1d   : > { %2319 = vmatpush.bf16.msra.mxu1 %v4428_v17  ;;  %v1388_v14 = vpack.c.bf16 %v892_v9, %v884_v8  ;;  %v1389_v15 = vpack.c.bf16 %v893_v11, %v885_v10  ;;  %v235_v17 = vld [vmem:[%s4603_s11 + $0x48] sm:$0xff]  ;;  %v419_v6 = vunpack.c.0.s8 %v243_v1  ;;  %v427_v7 = vunpack.c.1.s8 %v243_v1 }
  0x1e   : > { %2488 = vmatpush.bf16.msra.mxu2 %v4436_v18  ;;  %v236_v18 = vld [vmem:[%s4603_s11 + $0x50] sm:$0xff]  ;;  %v395_v23 = vunpack.c.1.s8 %v235_v17  ;;  %v403_v46 = vunpack.c.2.s8 %v235_v17  ;;  %v411_v47 = vunpack.c.3.s8 %v235_v17  ;;  %v420_v8 = vunpack.c.0.s8 %v244_v2 }
  0x1f   : > { %2657 = vmatpush.bf16.msra.mxu3 %v4444_v19  ;;  %v237_v19 = vld [vmem:[%s4603_s11 + $0x58] sm:$0xff]  ;;  %v388_v24 = vunpack.c.0.s8 %v236_v18  ;;  %v404_v48 = vunpack.c.2.s8 %v236_v18  ;;  %v412_v49 = vunpack.c.3.s8 %v236_v18  ;;  %v428_v9 = vunpack.c.1.s8 %v244_v2 }
  0x20   : > { %2151 = vmatpush.bf16.msra.mxu0 %v4419_v20  ;;  %v386_v20 = vunpack.c.0.s8 %v234_v16  ;;  %v389_v26 = vunpack.c.0.s8 %v237_v19  ;;  %v397_v27 = vunpack.c.1.s8 %v237_v19  ;;  %v907_v31 = vcvt.s32.f32 %v395_v23 }
  0x21   : > { %2320 = vmatpush.bf16.msra.mxu1 %v4427_v21  ;;  %v394_v21 = vunpack.c.1.s8 %v234_v16  ;;  %v421_v10 = vunpack.c.0.s8 %v245_v3  ;;  %v429_v11 = vunpack.c.1.s8 %v245_v3 }
  0x22   : > { %2489 = vmatpush.bf16.msra.mxu2 %v4435_v22  ;;  %v387_v22 = vunpack.c.0.s8 %v235_v17  ;;  %v898_v28 = vcvt.s32.f32 %v386_v20  ;;  %v901_v34 = vcvt.s32.f32 %v389_v26  ;;  %v909_v35 = vcvt.s32.f32 %v397_v27 }
  0x23   : > { %2658 = vmatpush.bf16.msra.mxu3 %v4443_v25  ;;  %v396_v25 = vunpack.c.1.s8 %v236_v18  ;;  %v906_v29 = vcvt.s32.f32 %v394_v21  ;;  %v940_v17 = vcvt.s32.f32 %v428_v9  ;;  %v933_v18 = vcvt.s32.f32 %v421_v10 }
  0x24   : > { %2152 = vmatpush.bf16.msra.mxu0 %v4418_v32  ;;  %v899_v30 = vcvt.s32.f32 %v387_v22  ;;  %v900_v32 = vcvt.s32.f32 %v388_v24  ;;  %v434_v24 = vunpack.c.2.s8 %v242_v0  ;;  %v435_v26 = vunpack.c.2.s8 %v243_v1 }
  0x25   : > { %2321 = vmatpush.bf16.msra.mxu1 %v4426_v33  ;;  %v908_v33 = vcvt.s32.f32 %v396_v25  ;;  %v1394_v36 = vpack.c.bf16 %v906_v29, %v898_v28  ;;  %v442_v25 = vunpack.c.3.s8 %v242_v0  ;;  %v443_v27 = vunpack.c.3.s8 %v243_v1 }
  0x26   : > { %2490 = vmatpush.bf16.msra.mxu2 %v4434_v38  ;;  %v1395_v37 = vpack.c.bf16 %v907_v31, %v899_v30  ;;  %v436_v28 = vunpack.c.2.s8 %v244_v2  ;;  %v444_v29 = vunpack.c.3.s8 %v244_v2  ;;  %v437_v30 = vunpack.c.2.s8 %v245_v3 }
  0x27   : > { %2659 = vmatpush.bf16.msra.mxu3 %v4442_v39  ;;  %v1396_v38 = vpack.c.bf16 %v908_v33, %v900_v32  ;;  %v1397_v39 = vpack.c.bf16 %v909_v35, %v901_v34  ;;  %v445_v31 = vunpack.c.3.s8 %v245_v3  ;;  %v946_v32 = vcvt.s32.f32 %v434_v24 }
  0x28   : > { %2153 = vmatpush.bf16.msra.mxu0 %v4417_v44  ;;  %v402_v44 = vunpack.c.2.s8 %v234_v16  ;;  %v954_v33 = vcvt.s32.f32 %v442_v25  ;;  %v947_v34 = vcvt.s32.f32 %v435_v26  ;;  %v955_v35 = vcvt.s32.f32 %v443_v27 }
  0x29   : > { %2322 = vmatpush.bf16.msra.mxu1 %v4425_v45  ;;  %v410_v45 = vunpack.c.3.s8 %v234_v16  ;;  %v932_v16 = vcvt.s32.f32 %v420_v8 }
  0x2a   : > { %2491 = vmatpush.bf16.msra.mxu2 %v4433_v50  ;;  %v405_v50 = vunpack.c.2.s8 %v237_v19 }
  0x2b   : > { %2660 = vmatpush.bf16.msra.mxu3 %v4441_v51  ;;  %2154 = vmatmul.bf16.vlgmr.msra.gmra.mxu0 %v1378_v54  ;;  %v413_v51 = vunpack.c.3.s8 %v237_v19  ;;  %v915_v54 = vcvt.s32.f32 %v403_v46  ;;  %v941_v19 = vcvt.s32.f32 %v429_v11  ;;  %v1412_v22 = vpack.c.bf16 %v940_v17, %v932_v16  ;;  %v252_v46 = vld [vmem:[%s4603_s11 + $0xd0] sm:$0xff] }
  0x2c   : > { %2822 = vmatpush.bf16.msrb.mxu0 %v4456_v53  ;;  %2323 = vmatmul.bf16.vlgmr.msra.gmra.mxu1 %v1379_v55  ;;  %v922_v53 = vcvt.s32.f32 %v410_v45  ;;  %v923_v55 = vcvt.s32.f32 %v411_v47  ;;  %v251_v45 = vld [vmem:[%s4603_s11 + $0xc8] sm:$0xff]  ;;  %v253_v47 = vld [vmem:[%s4603_s11 + $0xd8] sm:$0xff]  ;;  %v468_v11 = vunpack.c.2.s8 %v252_v46 }
  0x2d   : > { %2492 = vmatmul.bf16.vlgmr.msra.gmra.mxu2 %v1380_v56  ;;  %2991 = vmatpush.bf16.msrb.mxu1 %v4464_v59  ;;  %v916_v56 = vcvt.s32.f32 %v404_v48  ;;  %v925_v59 = vcvt.s32.f32 %v413_v51  ;;  %v1413_v23 = vpack.c.bf16 %v941_v19, %v933_v18  ;;  %v459_v51 = vunpack.c.1.s8 %v251_v45 }
  0x2e   : > { %3160 = vmatpush.bf16.msrb.mxu2 %v4472_v52  ;;  %2661 = vmatmul.bf16.vlgmr.msra.gmra.mxu3 %v1381_v57  ;;  %v914_v52 = vcvt.s32.f32 %v402_v44  ;;  %v924_v57 = vcvt.s32.f32 %v412_v49  ;;  %v1403_v61 = vpack.c.bf16 %v923_v55, %v915_v54  ;;  %v250_v44 = vld [vmem:[%s4603_s11 + $0xc0] sm:$0xff]  ;;  %v453_v54 = vunpack.c.0.s8 %v253_v47 }
  0x2f   : > { %3329 = vmatpush.bf16.msrb.mxu3 %v4480_v58  ;;  %v917_v58 = vcvt.s32.f32 %v405_v50  ;;  %v450_v48 = vunpack.c.0.s8 %v250_v44  ;;  %v458_v49 = vunpack.c.1.s8 %v250_v44  ;;  %v451_v50 = vunpack.c.0.s8 %v251_v45 }
  0x30   : > { %2823 = vmatpush.bf16.msrb.mxu0 %v4455_v41  ;;  %v1402_v60 = vpack.c.bf16 %v922_v53, %v914_v52  ;;  %v1404_v62 = vpack.c.bf16 %v924_v57, %v916_v56  ;;  %v1419_v41 = vpack.c.bf16 %v955_v35, %v947_v34  ;;  %v452_v52 = vunpack.c.0.s8 %v252_v46 }
  0x31   : > { %2992 = vmatpush.bf16.msrb.mxu1 %v4463_v43  ;;  %v1405_v63 = vpack.c.bf16 %v925_v59, %v917_v58  ;;  %v460_v53 = vunpack.c.1.s8 %v252_v46  ;;  %v461_v55 = vunpack.c.1.s8 %v253_v47  ;;  %v962_v56 = vcvt.s32.f32 %v450_v48 }
  0x32   : > { %3161 = vmatpush.bf16.msrb.mxu2 %v4471_v40  ;;  %v1418_v40 = vpack.c.bf16 %v954_v33, %v946_v32  ;;  %v970_v57 = vcvt.s32.f32 %v458_v49  ;;  %v963_v58 = vcvt.s32.f32 %v451_v50  ;;  %v971_v59 = vcvt.s32.f32 %v459_v51 }
  0x33   : > { %3330 = vmatpush.bf16.msrb.mxu3 %v4479_v42  ;;  %v474_v8 = vunpack.c.3.s8 %v250_v44  ;;  %v467_v9 = vunpack.c.2.s8 %v251_v45  ;;  %v475_v10 = vunpack.c.3.s8 %v251_v45 }
  0x34   : > { %v1426_v0 = vpack.c.bf16 %v970_v57, %v962_v56  ;;  %v1427_v1 = vpack.c.bf16 %v971_v59, %v963_v58 }
  0x35   : > { %v986_v17 = vcvt.s32.f32 %v474_v8  ;;  %v979_v18 = vcvt.s32.f32 %v467_v9  ;;  %v987_v19 = vcvt.s32.f32 %v475_v10 }
  0x37   : > { %v1435_v25 = vpack.c.bf16 %v987_v19, %v979_v18 }
  0x3b   : > { %2159 = vmatmul.bf16.gmra.mxu0 %v1386_v12  ;;  %v930_v12 = vcvt.s32.f32 %v418_v4  ;;  %v4470_v4 = vld [vmem:[%s5803_s1 + $0x1a8] sm:$0xff] }
  0x3c   : > { %2328 = vmatmul.bf16.gmra.mxu1 %v1387_v13  ;;  %v938_v13 = vcvt.s32.f32 %v426_v5  ;;  %v4454_v5 = vld [vmem:[%s5803_s1 + $0x128] sm:$0xff]  ;;  %3162 = vmatpush.bf16.msrb.mxu2 %v4470_v4 }
  0x3d   : > { %2497 = vmatmul.bf16.gmra.mxu2 %v1388_v14  ;;  %v931_v14 = vcvt.s32.f32 %v419_v6  ;;  %v4478_v6 = vld [vmem:[%s5803_s1 + $0x1e8] sm:$0xff]  ;;  %2824 = vmatpush.bf16.msrb.mxu0 %v4454_v5 }
  0x3e   : > { %2666 = vmatmul.bf16.gmra.mxu3 %v1389_v15  ;;  %v939_v15 = vcvt.s32.f32 %v427_v7  ;;  %v1410_v20 = vpack.c.bf16 %v938_v13, %v930_v12  ;;  %v466_v7 = vunpack.c.2.s8 %v250_v44  ;;  %v476_v12 = vunpack.c.3.s8 %v252_v46 }
  0x3f   : > { %3331 = vmatpush.bf16.msrb.mxu3 %v4478_v6  ;;  %v469_v13 = vunpack.c.2.s8 %v253_v47 }
  0x40   : > { %v1411_v21 = vpack.c.bf16 %v939_v15, %v931_v14  ;;  %v477_v14 = vunpack.c.3.s8 %v253_v47  ;;  %v4462_v15 = vld [vmem:[%s5803_s1 + $0x168] sm:$0xff]  ;;  %v978_v16 = vcvt.s32.f32 %v466_v7 }
  0x41   : > { %2993 = vmatpush.bf16.msrb.mxu1 %v4462_v15 }
  0x42   : > { %v1434_v24 = vpack.c.bf16 %v986_v17, %v978_v16 }
  0x4b   : > { %2164 = vmatmul.bf16.gmra.mxu0 %v1394_v36  ;;  %v948_v36 = vcvt.s32.f32 %v436_v28  ;;  %v258_v28 = vld [vmem:[%s4603_s11 + $0x100] sm:$0xff] }
  0x4c   : > { %2333 = vmatmul.bf16.gmra.mxu1 %v1395_v37  ;;  %v956_v37 = vcvt.s32.f32 %v444_v29  ;;  %v259_v29 = vld [vmem:[%s4603_s11 + $0x108] sm:$0xff]  ;;  %v482_v32 = vunpack.c.0.s8 %v258_v28  ;;  %v490_v33 = vunpack.c.1.s8 %v258_v28  ;;  %v506_v58 = vunpack.c.3.s8 %v258_v28 }
  0x4d   : > { %2502 = vmatmul.bf16.gmra.mxu2 %v1396_v38  ;;  %v949_v38 = vcvt.s32.f32 %v437_v30  ;;  %v260_v30 = vld [vmem:[%s4603_s11 + $0x110] sm:$0xff]  ;;  %v483_v34 = vunpack.c.0.s8 %v259_v29  ;;  %v491_v35 = vunpack.c.1.s8 %v259_v29  ;;  %v499_v59 = vunpack.c.2.s8 %v259_v29 }
  0x4e   : > { %2671 = vmatmul.bf16.gmra.mxu3 %v1397_v39  ;;  %v957_v39 = vcvt.s32.f32 %v445_v31  ;;  %v1420_v42 = vpack.c.bf16 %v956_v37, %v948_v36  ;;  %v261_v31 = vld [vmem:[%s4603_s11 + $0x118] sm:$0xff]  ;;  %v484_v36 = vunpack.c.0.s8 %v260_v30  ;;  %v492_v37 = vunpack.c.1.s8 %v260_v30 }
  0x4f   : > { %v1018_v7 = vcvt.s32.f32 %v506_v58  ;;  %v1011_v8 = vcvt.s32.f32 %v499_v59 }
  0x50   : > { %v1421_v43 = vpack.c.bf16 %v957_v39, %v949_v38  ;;  %v485_v38 = vunpack.c.0.s8 %v261_v31  ;;  %v493_v39 = vunpack.c.1.s8 %v261_v31  ;;  %v996_v44 = vcvt.s32.f32 %v484_v36 }
  0x51   : > { %v1004_v45 = vcvt.s32.f32 %v492_v37 }
  0x52   : > { %v997_v46 = vcvt.s32.f32 %v485_v38  ;;  %v1005_v47 = vcvt.s32.f32 %v493_v39 }
  0x5b   : > { %2169 = vmatmul.bf16.gmra.mxu0 %v1402_v60  ;;  %v964_v60 = vcvt.s32.f32 %v452_v52  ;;  %v1444_v52 = vpack.c.bf16 %v1004_v45, %v996_v44 }
  0x5c   : > { %2338 = vmatmul.bf16.gmra.mxu1 %v1403_v61  ;;  %v972_v61 = vcvt.s32.f32 %v460_v53  ;;  %v1445_v53 = vpack.c.bf16 %v1005_v47, %v997_v46 }
  0x5d   : > { %2507 = vmatmul.bf16.gmra.mxu2 %v1404_v62  ;;  %v965_v62 = vcvt.s32.f32 %v453_v54 }
  0x5e   : > { %2676 = vmatmul.bf16.gmra.mxu3 %v1405_v63  ;;  %v973_v63 = vcvt.s32.f32 %v461_v55  ;;  %v1428_v2 = vpack.c.bf16 %v972_v61, %v964_v60  ;;  %v498_v55 = vunpack.c.2.s8 %v258_v28  ;;  %v507_v60 = vunpack.c.3.s8 %v259_v29  ;;  %v4735_v28 = vld [vmem:[%s4603_s11 + $0x158] sm:$0xff] }
  0x5f   : > { %v500_v61 = vunpack.c.2.s8 %v260_v30 }
  0x60   : > { %v1429_v3 = vpack.c.bf16 %v973_v63, %v965_v62  ;;  %v1010_v6 = vcvt.s32.f32 %v498_v55  ;;  %v1019_v9 = vcvt.s32.f32 %v507_v60 }
  0x61   : > { %v1012_v10 = vcvt.s32.f32 %v500_v61 }
  0x62   : > { %v1450_v16 = vpack.c.bf16 %v1018_v7, %v1010_v6  ;;  %v1451_v17 = vpack.c.bf16 %v1019_v9, %v1011_v8 }
  0x6b   : > { %2174 = vmatmul.bf16.gmra.mxu0 %v1410_v20  ;;  %v980_v20 = vcvt.s32.f32 %v468_v11 }
  0x6c   : > { %2343 = vmatmul.bf16.gmra.mxu1 %v1411_v21  ;;  %v988_v21 = vcvt.s32.f32 %v476_v12 }
  0x6d   : > { %2512 = vmatmul.bf16.gmra.mxu2 %v1412_v22  ;;  %v981_v22 = vcvt.s32.f32 %v469_v13 }
  0x6e   : > { %2681 = vmatmul.bf16.gmra.mxu3 %v1413_v23  ;;  %v989_v23 = vcvt.s32.f32 %v477_v14  ;;  %v1436_v26 = vpack.c.bf16 %v988_v21, %v980_v20 }
  0x70   : > { %v1437_v27 = vpack.c.bf16 %v989_v23, %v981_v22 }
  0x7b   : > { %2179 = vmatmul.bf16.gmra.mxu0 %v1418_v40  ;;  %v994_v40 = vcvt.s32.f32 %v482_v32 }
  0x7c   : > { %2348 = vmatmul.bf16.gmra.mxu1 %v1419_v41  ;;  %v1002_v41 = vcvt.s32.f32 %v490_v33 }
  0x7d   : > { %2517 = vmatmul.bf16.gmra.mxu2 %v1420_v42  ;;  %v995_v42 = vcvt.s32.f32 %v483_v34 }
  0x7e   : > { %2686 = vmatmul.bf16.gmra.mxu3 %v1421_v43  ;;  %v1003_v43 = vcvt.s32.f32 %v491_v35  ;;  %v1442_v48 = vpack.c.bf16 %v1002_v41, %v994_v40  ;;  %v517_v40 = vunpack.c.0.s8 %v4735_v28  ;;  %v525_v41 = vunpack.c.1.s8 %v4735_v28 }
  0x80   : > { %v1443_v49 = vpack.c.bf16 %v1003_v43, %v995_v42 }
  0x8b   : > { %2184 = vmatmul.bf16.gmra.mxu0 %v1426_v0 }
  0x8c   : > { %2353 = vmatmul.bf16.gmra.mxu1 %v1427_v1  ;;  %v508_v1 = vunpack.c.3.s8 %v260_v30 }
  0x8d   : > { %2522 = vmatmul.bf16.gmra.mxu2 %v1428_v2  ;;  %v501_v2 = vunpack.c.2.s8 %v261_v31 }
  0x8e   : > { %2691 = vmatmul.bf16.gmra.mxu3 %v1429_v3  ;;  %v509_v3 = vunpack.c.3.s8 %v261_v31  ;;  %v1020_v11 = vcvt.s32.f32 %v508_v1  ;;  %v4477_v1 = vld [vmem:[%s5803_s1 + $0x1e0] sm:$0xff] }
  0x8f   : > { %v1013_v12 = vcvt.s32.f32 %v501_v2  ;;  %3332 = vmatpush.bf16.msrb.mxu3 %v4477_v1 }
  0x90   : > { %v1021_v13 = vcvt.s32.f32 %v509_v3  ;;  %v1452_v21 = vpack.c.bf16 %v1020_v11, %v1012_v10 }
  0x92   : > { %v1453_v22 = vpack.c.bf16 %v1021_v13, %v1013_v12 }
  0x9b   : > { %2189 = vmatmul.bf16.gmra.mxu0 %v1434_v24 }
  0x9c   : > { %2358 = vmatmul.bf16.gmra.mxu1 %v1435_v25  ;;  %v4726_v25 = vld [vmem:[%s4603_s11 + $0x140] sm:$0xff] }
  0x9d   : > { %2527 = vmatmul.bf16.gmra.mxu2 %v1436_v26  ;;  %v4729_v26 = vld [vmem:[%s4603_s11 + $0x148] sm:$0xff]  ;;  %v514_v29 = vunpack.c.0.s8 %v4726_v25  ;;  %v522_v32 = vunpack.c.1.s8 %v4726_v25  ;;  %v530_v2 = vunpack.c.2.s8 %v4726_v25  ;;  %v538_v6 = vunpack.c.3.s8 %v4726_v25 }
  0x9e   : > { %2696 = vmatmul.bf16.gmra.mxu3 %v1437_v27  ;;  %v4732_v27 = vld [vmem:[%s4603_s11 + $0x150] sm:$0xff]  ;;  %v515_v33 = vunpack.c.0.s8 %v4729_v26  ;;  %v523_v34 = vunpack.c.1.s8 %v4729_v26  ;;  %v531_v7 = vunpack.c.2.s8 %v4729_v26  ;;  %v539_v8 = vunpack.c.3.s8 %v4729_v26 }
  0x9f   : > { %v516_v35 = vunpack.c.0.s8 %v4732_v27  ;;  %v524_v39 = vunpack.c.1.s8 %v4732_v27  ;;  %v1026_v44 = vcvt.s32.f32 %v514_v29  ;;  %v1034_v45 = vcvt.s32.f32 %v522_v32 }
  0xa0   : > { %v1027_v46 = vcvt.s32.f32 %v515_v33  ;;  %v1035_v47 = vcvt.s32.f32 %v523_v34  ;;  %v532_v9 = vunpack.c.2.s8 %v4732_v27  ;;  %v540_v13 = vunpack.c.3.s8 %v4732_v27 }
  0xa2   : > { %v1459_v55 = vpack.c.bf16 %v1035_v47, %v1027_v46  ;;  %v1052_v25 = vcvt.s32.f32 %v540_v13 }
  0xa8   : > { %v2155_v50 = vpop.f32.mrf.mxu0 }
  0xa9   : > { %v2324_v51 = vpop.f32.mrf.mxu1 }
  0xaa   : > { %v2325_v54 = vadd.f32 %v2324_v51, %v2155_v50  ;;  %v1029_v50 = vcvt.s32.f32 %v517_v40  ;;  %v1037_v51 = vcvt.s32.f32 %v525_v41  ;;  %v275_v40 = vld [vmem:[%s4603_s11 + $0x188] sm:$0xff]  ;;  %v276_v41 = vld [vmem:[%s4603_s11 + $0x190] sm:$0xff] }
  0xab   : > { %2194 = vmatmul.bf16.gmra.mxu0 %v1442_v48  ;;  %v1028_v48 = vcvt.s32.f32 %v516_v35 }
  0xac   : > { %2363 = vmatmul.bf16.gmra.mxu1 %v1443_v49  ;;  %v1036_v49 = vcvt.s32.f32 %v524_v39  ;;  %v1461_v60 = vpack.c.bf16 %v1037_v51, %v1029_v50  ;;  %v274_v39 = vld [vmem:[%s4603_s11 + $0x180] sm:$0xff]  ;;  %v548_v50 = vunpack.c.0.s8 %v276_v41 }
  0xad   : > { %2532 = vmatmul.bf16.gmra.mxu2 %v1444_v52  ;;  %v554_v47 = vunpack.c.1.s8 %v274_v39 }
  0xae   : > { %2701 = vmatmul.bf16.gmra.mxu3 %v1445_v53  ;;  %v1460_v59 = vpack.c.bf16 %v1036_v49, %v1028_v48  ;;  %v547_v48 = vunpack.c.0.s8 %v275_v40  ;;  %v555_v49 = vunpack.c.1.s8 %v275_v40 }
  0xb0   : > { %v2493_v56 = vpop.f32.mrf.mxu2  ;;  %v2157_v63 = vpop.f32.mrf.mxu0 }
  0xb1   : > { %v2662_v57 = vpop.f32.mrf.mxu3  ;;  %v2494_v62 = vadd.f32 %v2493_v56, %v2325_v54  ;;  %v2326_v0 = vpop.f32.mrf.mxu1  ;;  %v1458_v54 = vpack.c.bf16 %v1034_v45, %v1026_v44  ;;  %v546_v44 = vunpack.c.0.s8 %v274_v39 }
  0xb2   : > { %v2327_v4 = vadd.f32 %v2326_v0, %v2157_v63  ;;  %v4469_v63 = vld [vmem:[%s5803_s1 + $0x1a0] sm:$0xff] }
  0xb3   : > { %v4721_v5 = vadd.f32 %v2662_v57, %v2494_v62  ;;  %v4453_v0 = vld [vmem:[%s5803_s1 + $0x120] sm:$0xff]  ;;  %3163 = vmatpush.bf16.msrb.mxu2 %v4469_v63  ;;  %v1067_v63 = vcvt.s32.f32 %v555_v49 }
  0xb4   : > { %2825 = vmatpush.bf16.msrb.mxu0 %v4453_v0  ;;  %v1060_v0 = vcvt.s32.f32 %v548_v50 }
  0xb8   : > { %v2495_v14 = vpop.f32.mrf.mxu2  ;;  %v2160_v19 = vpop.f32.mrf.mxu0 }
  0xb9   : > { %v2664_v15 = vpop.f32.mrf.mxu3  ;;  %v2496_v18 = vadd.f32 %v2495_v14, %v2327_v4  ;;  %v2329_v20 = vpop.f32.mrf.mxu1  ;;  %v533_v14 = vunpack.c.2.s8 %v4735_v28 }
  0xba   : > { %v2330_v23 = vadd.f32 %v2329_v20, %v2160_v19  ;;  %v1042_v19 = vcvt.s32.f32 %v530_v2  ;;  %v1050_v20 = vcvt.s32.f32 %v538_v6 }
  0xbb   : > { %v4723_v24 = vadd.f32 %v2664_v15, %v2496_v18  ;;  %2199 = vmatmul.bf16.gmra.mxu0 %v1450_v16  ;;  %v541_v15 = vunpack.c.3.s8 %v4735_v28  ;;  %v4461_v18 = vld [vmem:[%s5803_s1 + $0x160] sm:$0xff]  ;;  %v1045_v26 = vcvt.s32.f32 %v533_v14 }
  0xbc   : > { %2368 = vmatmul.bf16.gmra.mxu1 %v1451_v17 }
  0xbd   : > { %2537 = vmatmul.bf16.gmra.mxu2 %v1452_v21  ;;  %v1043_v21 = vcvt.s32.f32 %v531_v7  ;;  %v1053_v27 = vcvt.s32.f32 %v541_v15  ;;  %2994 = vmatpush.bf16.msrb.mxu1 %v4461_v18 }
  0xbe   : > { %2706 = vmatmul.bf16.gmra.mxu3 %v1453_v22  ;;  %v1051_v22 = vcvt.s32.f32 %v539_v8 }
  0xc0   : > { %v2498_v30 = vpop.f32.mrf.mxu2  ;;  %v2162_v37 = vpop.f32.mrf.mxu0 }
  0xc1   : > { %v2667_v31 = vpop.f32.mrf.mxu3  ;;  %v2499_v36 = vadd.f32 %v2498_v30, %v2330_v23  ;;  %v2331_v38 = vpop.f32.mrf.mxu1  ;;  %v1044_v23 = vcvt.s32.f32 %v532_v9  ;;  %v1466_v30 = vpack.c.bf16 %v1050_v20, %v1042_v19  ;;  %v570_v20 = vunpack.c.3.s8 %v274_v39 }
  0xc2   : > { %v2332_v42 = vadd.f32 %v2331_v38, %v2162_v37 }
  0xc3   : > { %v4745_v43 = vadd.f32 %v2667_v31, %v2499_v36  ;;  %v1467_v31 = vpack.c.bf16 %v1051_v22, %v1043_v21  ;;  %v1468_v35 = vpack.c.bf16 %v1052_v25, %v1044_v23  ;;  %v1469_v36 = vpack.c.bf16 %v1053_v27, %v1045_v26 }
  0xc4   : > { %v563_v21 = vunpack.c.2.s8 %v275_v40  ;;  %v571_v22 = vunpack.c.3.s8 %v275_v40  ;;  %v564_v23 = vunpack.c.2.s8 %v276_v41 }
  0xc8   : > { %v2500_v52 = vpop.f32.mrf.mxu2  ;;  %v2165_v57 = vpop.f32.mrf.mxu0 }
  0xc9   : > { %v2669_v53 = vpop.f32.mrf.mxu3  ;;  %v2501_v56 = vadd.f32 %v2500_v52, %v2332_v42  ;;  %v2334_v58 = vpop.f32.mrf.mxu1  ;;  %v277_v42 = vld [vmem:[%s4603_s11 + $0x198] sm:$0xff] }
  0xca   : > { %v2335_v61 = vadd.f32 %v2334_v58, %v2165_v57 }
  0xcb   : > { %v4747_v62 = vadd.f32 %v2669_v53, %v2501_v56  ;;  %2204 = vmatmul.bf16.gmra.mxu0 %v1458_v54  ;;  %v556_v54 = vunpack.c.1.s8 %v276_v41  ;;  %v557_v56 = vunpack.c.1.s8 %v277_v42 }
  0xcc   : > { %2373 = vmatmul.bf16.gmra.mxu1 %v1459_v55  ;;  %v549_v55 = vunpack.c.0.s8 %v277_v42 }
  0xcd   : > { %2542 = vmatmul.bf16.gmra.mxu2 %v1460_v59  ;;  %v1058_v59 = vcvt.s32.f32 %v546_v44  ;;  %v1068_v1 = vcvt.s32.f32 %v556_v54  ;;  %v4786_v54 = vld [vmem:[%s4603_s11 + $0x1c0] sm:$0xff] }
  0xce   : > { %2711 = vmatmul.bf16.gmra.mxu3 %v1461_v60  ;;  %v1066_v60 = vcvt.s32.f32 %v554_v47  ;;  %v1061_v2 = vcvt.s32.f32 %v549_v55  ;;  %v4789_v55 = vld [vmem:[%s4603_s11 + $0x1c8] sm:$0xff] }
  0xd0   : > { %v2503_v3 = vpop.f32.mrf.mxu2  ;;  %v2167_v11 = vpop.f32.mrf.mxu0  ;;  %v1474_v7 = vpack.c.bf16 %v1066_v60, %v1058_v59  ;;  %v578_v59 = vunpack.c.0.s8 %v4786_v54 }
  0xd1   : > { %v2672_v4 = vpop.f32.mrf.mxu3  ;;  %v2504_v10 = vadd.f32 %v2503_v3, %v2335_v61  ;;  %v2336_v12 = vpop.f32.mrf.mxu1  ;;  %v1059_v61 = vcvt.s32.f32 %v547_v48  ;;  %v1069_v3 = vcvt.s32.f32 %v557_v56  ;;  %v4792_v56 = vld [vmem:[%s4603_s11 + $0x1d0] sm:$0xff] }
  0xd2   : > { %v2337_v16 = vadd.f32 %v2336_v12, %v2167_v11  ;;  %v1476_v12 = vpack.c.bf16 %v1068_v1, %v1060_v0  ;;  %v579_v0 = vunpack.c.0.s8 %v4789_v55  ;;  %v587_v1 = vunpack.c.1.s8 %v4789_v55 }
  0xd3   : > { %v4766_v17 = vadd.f32 %v2672_v4, %v2504_v10  ;;  %v1475_v8 = vpack.c.bf16 %v1067_v63, %v1059_v61  ;;  %v1477_v13 = vpack.c.bf16 %v1069_v3, %v1061_v2  ;;  %v586_v63 = vunpack.c.1.s8 %v4786_v54 }
  0xd4   : > { %v580_v2 = vunpack.c.0.s8 %v4792_v56 }
  0xd8   : > { %v2505_v29 = vpop.f32.mrf.mxu2  ;;  %v2170_v33 = vpop.f32.mrf.mxu0 }
  0xd9   : > { %v2674_v28 = vpop.f32.mrf.mxu3  ;;  %v2506_v32 = vadd.f32 %v2505_v29, %v2337_v16  ;;  %v2339_v34 = vpop.f32.mrf.mxu1  ;;  %v562_v16 = vunpack.c.2.s8 %v274_v39  ;;  %v572_v29 = vunpack.c.3.s8 %v276_v41 }
  0xda   : > { %v2340_v37 = vadd.f32 %v2339_v34, %v2170_v33  ;;  %v1082_v34 = vcvt.s32.f32 %v570_v20 }
  0xdb   : > { %v4771_v38 = vadd.f32 %v2674_v28, %v2506_v32  ;;  %2209 = vmatmul.bf16.gmra.mxu0 %v1466_v30  ;;  %v565_v28 = vunpack.c.2.s8 %v277_v42  ;;  %v573_v30 = vunpack.c.3.s8 %v277_v42  ;;  %v1074_v33 = vcvt.s32.f32 %v562_v16 }
  0xdc   : > { %2378 = vmatmul.bf16.gmra.mxu1 %v1467_v31  ;;  %v1084_v44 = vcvt.s32.f32 %v572_v29  ;;  %v1099_v16 = vcvt.s32.f32 %v587_v1 }
  0xdd   : > { %2547 = vmatmul.bf16.gmra.mxu2 %v1468_v35  ;;  %v1075_v35 = vcvt.s32.f32 %v563_v21  ;;  %v1077_v39 = vcvt.s32.f32 %v565_v28  ;;  %v1482_v47 = vpack.c.bf16 %v1082_v34, %v1074_v33 }
  0xde   : > { %2716 = vmatmul.bf16.gmra.mxu3 %v1469_v36  ;;  %v1083_v36 = vcvt.s32.f32 %v571_v22 }
  0xe0   : > { %v2508_v45 = vpop.f32.mrf.mxu2  ;;  %v2172_v52 = vpop.f32.mrf.mxu0  ;;  %v1483_v41 = vpack.c.bf16 %v1083_v36, %v1075_v35  ;;  %v4468_v35 = vld [vmem:[%s5803_s1 + $0x198] sm:$0xff] }
  0xe1   : > { %v2677_v46 = vpop.f32.mrf.mxu3  ;;  %v2509_v51 = vadd.f32 %v2508_v45, %v2340_v37  ;;  %v2341_v53 = vpop.f32.mrf.mxu1  ;;  %v1076_v37 = vcvt.s32.f32 %v564_v23  ;;  %v1085_v45 = vcvt.s32.f32 %v573_v30  ;;  %v4452_v36 = vld [vmem:[%s5803_s1 + $0x118] sm:$0xff]  ;;  %3164 = vmatpush.bf16.msrb.mxu2 %v4468_v35 }
  0xe2   : > { %v2342_v57 = vadd.f32 %v2341_v53, %v2172_v52  ;;  %2826 = vmatpush.bf16.msrb.mxu0 %v4452_v36 }
  0xe3   : > { %v4777_v58 = vadd.f32 %v2677_v46, %v2509_v51  ;;  %v1484_v50 = vpack.c.bf16 %v1084_v44, %v1076_v37  ;;  %v1485_v51 = vpack.c.bf16 %v1085_v45, %v1077_v39  ;;  %v4476_v37 = vld [vmem:[%s5803_s1 + $0x1d8] sm:$0xff]  ;;  %v594_v44 = vunpack.c.2.s8 %v4786_v54 }
  0xe4   : > { %3333 = vmatpush.bf16.msrb.mxu3 %v4476_v37 }
  0xe8   : > { %v2510_v4 = vpop.f32.mrf.mxu2  ;;  %v2175_v10 = vpop.f32.mrf.mxu0 }
  0xe9   : > { %v2679_v6 = vpop.f32.mrf.mxu3  ;;  %v2511_v9 = vadd.f32 %v2510_v4, %v2342_v57  ;;  %v2344_v11 = vpop.f32.mrf.mxu1  ;;  %v4795_v57 = vld [vmem:[%s4603_s11 + $0x1d8] sm:$0xff] }
  0xea   : > { %v2345_v14 = vadd.f32 %v2344_v11, %v2175_v10 }
  0xeb   : > { %v4779_v15 = vadd.f32 %v2679_v6, %v2511_v9  ;;  %2214 = vmatmul.bf16.gmra.mxu0 %v1474_v7  ;;  %v588_v7 = vunpack.c.1.s8 %v4792_v56  ;;  %v589_v9 = vunpack.c.1.s8 %v4795_v57 }
  0xec   : > { %2383 = vmatmul.bf16.gmra.mxu1 %v1475_v8  ;;  %v581_v8 = vunpack.c.0.s8 %v4795_v57 }
  0xed   : > { %2552 = vmatmul.bf16.gmra.mxu2 %v1476_v12  ;;  %v1090_v12 = vcvt.s32.f32 %v578_v59  ;;  %v1101_v21 = vcvt.s32.f32 %v589_v9 }
  0xee   : > { %2721 = vmatmul.bf16.gmra.mxu3 %v1477_v13  ;;  %v1098_v13 = vcvt.s32.f32 %v586_v63  ;;  %v1093_v20 = vcvt.s32.f32 %v581_v8 }
  0xf0   : > { %v2513_v18 = vpop.f32.mrf.mxu2  ;;  %v2177_v26 = vpop.f32.mrf.mxu0 }
  0xf1   : > { %v2682_v19 = vpop.f32.mrf.mxu3  ;;  %v2514_v25 = vadd.f32 %v2513_v18, %v2345_v14  ;;  %v2346_v27 = vpop.f32.mrf.mxu1  ;;  %v1091_v14 = vcvt.s32.f32 %v579_v0  ;;  %v1092_v18 = vcvt.s32.f32 %v580_v2 }
  0xf2   : > { %v2347_v31 = vadd.f32 %v2346_v27, %v2177_v26 }
  0xf3   : > { %v4781_v32 = vadd.f32 %v2682_v19, %v2514_v25  ;;  %v1100_v19 = vcvt.s32.f32 %v588_v7  ;;  %v1490_v25 = vpack.c.bf16 %v1098_v13, %v1090_v12  ;;  %v1491_v26 = vpack.c.bf16 %v1099_v16, %v1091_v14 }
  0xf5   : > { %v1492_v30 = vpack.c.bf16 %v1100_v19, %v1092_v18  ;;  %v290_v18 = vld [vmem:[%s4603_s11 + $0x200] sm:$0xff]  ;;  %v291_v19 = vld [vmem:[%s4603_s11 + $0x208] sm:$0xff] }
  0xf8   : > { %v2515_v40 = vpop.f32.mrf.mxu2  ;;  %v2180_v48 = vpop.f32.mrf.mxu0 }
  0xf9   : > { %v2684_v46 = vpop.f32.mrf.mxu3  ;;  %v2516_v42 = vadd.f32 %v2515_v40, %v2347_v31  ;;  %v2349_v49 = vpop.f32.mrf.mxu1  ;;  %v1493_v31 = vpack.c.bf16 %v1101_v21, %v1093_v20  ;;  %v602_v40 = vunpack.c.3.s8 %v4786_v54  ;;  %v4460_v54 = vld [vmem:[%s5803_s1 + $0x158] sm:$0xff]  ;;  %v292_v20 = vld [vmem:[%s4603_s11 + $0x210] sm:$0xff] }
  0xfa   : > { %v2350_v52 = vadd.f32 %v2349_v49, %v2180_v48  ;;  %2995 = vmatpush.bf16.msrb.mxu1 %v4460_v54  ;;  %v293_v21 = vld [vmem:[%s4603_s11 + $0x218] sm:$0xff]  ;;  %v620_v35 = vunpack.c.1.s8 %v292_v20 }
  0xfb   : > { %v4783_v53 = vadd.f32 %v2684_v46, %v2516_v42  ;;  %2219 = vmatmul.bf16.gmra.mxu0 %v1482_v47  ;;  %v595_v46 = vunpack.c.2.s8 %v4789_v55  ;;  %v603_v47 = vunpack.c.3.s8 %v4789_v55  ;;  %v1106_v55 = vcvt.s32.f32 %v594_v44 }
  0xfc   : > { %2388 = vmatmul.bf16.gmra.mxu1 %v1483_v41  ;;  %v596_v41 = vunpack.c.2.s8 %v4792_v56  ;;  %v613_v36 = vunpack.c.0.s8 %v293_v21  ;;  %v621_v37 = vunpack.c.1.s8 %v293_v21 }
  0xfd   : > { %2557 = vmatmul.bf16.gmra.mxu2 %v1484_v50  ;;  %v604_v50 = vunpack.c.3.s8 %v4792_v56  ;;  %v1107_v63 = vcvt.s32.f32 %v595_v46  ;;  %v1115_v0 = vcvt.s32.f32 %v603_v47 }
  0xfe   : > { %2726 = vmatmul.bf16.gmra.mxu3 %v1485_v51  ;;  %v597_v51 = vunpack.c.2.s8 %v4795_v57  ;;  %v1108_v1 = vcvt.s32.f32 %v596_v41 }
  0xff   : > { %v1116_v2 = vcvt.s32.f32 %v604_v50  ;;  %v1499_v7 = vpack.c.bf16 %v1115_v0, %v1107_v63 }
 0x100   : > { %v2518_v60 = vpop.f32.mrf.mxu2  ;;  %v2182_v4 = vpop.f32.mrf.mxu0 }
 0x101   : > { %v2687_v61 = vpop.f32.mrf.mxu3  ;;  %v2519_v3 = vadd.f32 %v2518_v60, %v2350_v52  ;;  %v2351_v6 = vpop.f32.mrf.mxu1  ;;  %v605_v52 = vunpack.c.3.s8 %v4795_v57  ;;  %v1500_v12 = vpack.c.bf16 %v1116_v2, %v1108_v1 }
 0x102   : > { %v2352_v10 = vadd.f32 %v2351_v6, %v2182_v4 }
 0x103   : > { %v4805_v11 = vadd.f32 %v2687_v61, %v2519_v3  ;;  %v1114_v61 = vcvt.s32.f32 %v602_v40  ;;  %v1109_v3 = vcvt.s32.f32 %v597_v51  ;;  %v1117_v56 = vcvt.s32.f32 %v605_v52 }
 0x105   : > { %v1498_v6 = vpack.c.bf16 %v1114_v61, %v1106_v55  ;;  %v1501_v13 = vpack.c.bf16 %v1117_v56, %v1109_v3  ;;  %v626_v3 = vunpack.c.2.s8 %v290_v18 }
 0x108   : > { %v2520_v22 = vpop.f32.mrf.mxu2  ;;  %v2185_v29 = vpop.f32.mrf.mxu0 }
 0x109   : > { %v2689_v23 = vpop.f32.mrf.mxu3  ;;  %v2521_v27 = vadd.f32 %v2520_v22, %v2352_v10  ;;  %v2354_v28 = vpop.f32.mrf.mxu1  ;;  %v610_v22 = vunpack.c.0.s8 %v290_v18 }
 0x10a   : > { %v2355_v33 = vadd.f32 %v2354_v28, %v2185_v29  ;;  %v619_v29 = vunpack.c.1.s8 %v291_v19  ;;  %v612_v28 = vunpack.c.0.s8 %v292_v20 }
 0x10b   : > { %v4807_v34 = vadd.f32 %v2689_v23, %v2521_v27  ;;  %2224 = vmatmul.bf16.gmra.mxu0 %v1490_v25  ;;  %v611_v27 = vunpack.c.0.s8 %v291_v19 }
 0x10c   : > { %2393 = vmatmul.bf16.gmra.mxu1 %v1491_v26  ;;  %v618_v26 = vunpack.c.1.s8 %v290_v18  ;;  %v1131_v47 = vcvt.s32.f32 %v619_v29  ;;  %v1124_v41 = vcvt.s32.f32 %v612_v28 }
 0x10d   : > { %2562 = vmatmul.bf16.gmra.mxu2 %v1492_v30  ;;  %v1123_v46 = vcvt.s32.f32 %v611_v27 }
 0x10e   : > { %2731 = vmatmul.bf16.gmra.mxu3 %v1493_v31  ;;  %v1130_v40 = vcvt.s32.f32 %v618_v26  ;;  %v1138_v26 = vcvt.s32.f32 %v626_v3 }
 0x110   : > { %v2523_v39 = vpop.f32.mrf.mxu2  ;;  %v2187_v48 = vpop.f32.mrf.mxu0 }
 0x111   : > { %v2692_v45 = vpop.f32.mrf.mxu3  ;;  %v2524_v42 = vadd.f32 %v2523_v39, %v2355_v33  ;;  %v2356_v49 = vpop.f32.mrf.mxu1 }
 0x112   : > { %v2357_v59 = vadd.f32 %v2356_v49, %v2187_v48  ;;  %v1125_v48 = vcvt.s32.f32 %v613_v36  ;;  %v1133_v49 = vcvt.s32.f32 %v621_v37 }
 0x113   : > { %v4826_v60 = vadd.f32 %v2692_v45, %v2524_v42  ;;  %v1122_v45 = vcvt.s32.f32 %v610_v22  ;;  %v1132_v42 = vcvt.s32.f32 %v620_v35  ;;  %v637_v22 = vunpack.c.3.s8 %v293_v21 }
 0x114   : > { %v1509_v0 = vpack.c.bf16 %v1133_v49, %v1125_v48  ;;  %v4852_v48 = vld [vmem:[%s4603_s11 + $0x250] sm:$0xff]  ;;  %v4855_v49 = vld [vmem:[%s4603_s11 + $0x258] sm:$0xff] }
 0x115   : > { %v1506_v52 = vpack.c.bf16 %v1130_v40, %v1122_v45  ;;  %v1508_v63 = vpack.c.bf16 %v1132_v42, %v1124_v41  ;;  %v4846_v41 = vld [vmem:[%s4603_s11 + $0x240] sm:$0xff]  ;;  %v4849_v42 = vld [vmem:[%s4603_s11 + $0x248] sm:$0xff]  ;;  %v652_v3 = vunpack.c.1.s8 %v4852_v48 }
 0x118   : > { %v2525_v4 = vpop.f32.mrf.mxu2  ;;  %v2190_v9 = vpop.f32.mrf.mxu0 }
 0x119   : > { %v2694_v57 = vpop.f32.mrf.mxu3  ;;  %v2526_v8 = vadd.f32 %v2525_v4, %v2357_v59  ;;  %v2359_v10 = vpop.f32.mrf.mxu1  ;;  %v1507_v59 = vpack.c.bf16 %v1131_v47, %v1123_v46 }
 0x11a   : > { %v2360_v14 = vadd.f32 %v2359_v10, %v2190_v9 }
 0x11b   : > { %v4831_v16 = vadd.f32 %v2694_v57, %v2526_v8  ;;  %2229 = vmatmul.bf16.gmra.mxu0 %v1498_v6  ;;  %v634_v57 = vunpack.c.3.s8 %v290_v18  ;;  %v627_v6 = vunpack.c.2.s8 %v291_v19  ;;  %v628_v8 = vunpack.c.2.s8 %v292_v20 }
 0x11c   : > { %2398 = vmatmul.bf16.gmra.mxu1 %v1499_v7  ;;  %v635_v7 = vunpack.c.3.s8 %v291_v19 }
 0x11d   : > { %2567 = vmatmul.bf16.gmra.mxu2 %v1500_v12  ;;  %v1146_v27 = vcvt.s32.f32 %v634_v57  ;;  %v1139_v29 = vcvt.s32.f32 %v627_v6 }
 0x11e   : > { %2736 = vmatmul.bf16.gmra.mxu3 %v1501_v13  ;;  %v636_v13 = vunpack.c.3.s8 %v292_v20  ;;  %v1147_v28 = vcvt.s32.f32 %v635_v7 }
 0x11f   : > { %v1514_v36 = vpack.c.bf16 %v1146_v27, %v1138_v26 }
 0x120   : > { %v2528_v23 = vpop.f32.mrf.mxu2  ;;  %v2192_v31 = vpop.f32.mrf.mxu0  ;;  %v1515_v20 = vpack.c.bf16 %v1147_v28, %v1139_v29 }
 0x121   : > { %v2697_v25 = vpop.f32.mrf.mxu3  ;;  %v2529_v30 = vadd.f32 %v2528_v23, %v2360_v14  ;;  %v2361_v33 = vpop.f32.mrf.mxu1  ;;  %v629_v14 = vunpack.c.2.s8 %v293_v21 }
 0x122   : > { %v2362_v44 = vadd.f32 %v2361_v33, %v2192_v31  ;;  %v1148_v31 = vcvt.s32.f32 %v636_v13  ;;  %v1149_v33 = vcvt.s32.f32 %v637_v22  ;;  %v1164_v13 = vcvt.s32.f32 %v652_v3 }
 0x123   : > { %v4837_v39 = vadd.f32 %v2697_v25, %v2529_v30  ;;  %v1140_v30 = vcvt.s32.f32 %v628_v8  ;;  %v1141_v18 = vcvt.s32.f32 %v629_v14 }
 0x125   : > { %v1516_v45 = vpack.c.bf16 %v1148_v31, %v1140_v30  ;;  %v1517_v40 = vpack.c.bf16 %v1149_v33, %v1141_v18 }
 0x128   : > { %v2530_v50 = vpop.f32.mrf.mxu2  ;;  %v2195_v55 = vpop.f32.mrf.mxu0 }
 0x129   : > { %v2699_v51 = vpop.f32.mrf.mxu3  ;;  %v2531_v54 = vadd.f32 %v2530_v50, %v2362_v44  ;;  %v2364_v61 = vpop.f32.mrf.mxu1  ;;  %v642_v50 = vunpack.c.0.s8 %v4846_v41 }
 0x12a   : > { %v2365_v1 = vadd.f32 %v2364_v61, %v2195_v55  ;;  %v651_v55 = vunpack.c.1.s8 %v4849_v42  ;;  %v644_v61 = vunpack.c.0.s8 %v4852_v48 }
 0x12b   : > { %v4839_v2 = vadd.f32 %v2699_v51, %v2531_v54  ;;  %2234 = vmatmul.bf16.gmra.mxu0 %v1506_v52  ;;  %v643_v54 = vunpack.c.0.s8 %v4849_v42  ;;  %v1154_v7 = vcvt.s32.f32 %v642_v50  ;;  %v667_v50 = vunpack.c.3.s8 %v4849_v42 }
 0x12c   : > { %2403 = vmatmul.bf16.gmra.mxu1 %v1507_v59  ;;  %v650_v59 = vunpack.c.1.s8 %v4846_v41 }
 0x12d   : > { %2572 = vmatmul.bf16.gmra.mxu2 %v1508_v63 }
 0x12e   : > { %2741 = vmatmul.bf16.gmra.mxu3 %v1509_v0  ;;  %v1162_v8 = vcvt.s32.f32 %v650_v59 }
 0x130   : > { %v2533_v56 = vpop.f32.mrf.mxu2  ;;  %v2197_v10 = vpop.f32.mrf.mxu0  ;;  %v1522_v27 = vpack.c.bf16 %v1162_v8, %v1154_v7 }
 0x131   : > { %v2702_v4 = vpop.f32.mrf.mxu3  ;;  %v2534_v9 = vadd.f32 %v2533_v56, %v2365_v1  ;;  %v2366_v12 = vpop.f32.mrf.mxu1  ;;  %v645_v56 = vunpack.c.0.s8 %v4855_v49 }
 0x132   : > { %v2367_v23 = vadd.f32 %v2366_v12, %v2197_v10  ;;  %v1163_v10 = vcvt.s32.f32 %v651_v55  ;;  %v1156_v12 = vcvt.s32.f32 %v644_v61  ;;  %v668_v55 = vunpack.c.3.s8 %v4852_v48 }
 0x133   : > { %v4841_v25 = vadd.f32 %v2702_v4, %v2534_v9  ;;  %v653_v4 = vunpack.c.1.s8 %v4855_v49  ;;  %v1155_v9 = vcvt.s32.f32 %v643_v54  ;;  %v1157_v14 = vcvt.s32.f32 %v645_v56 }
 0x134   : > { %v1524_v18 = vpack.c.bf16 %v1164_v13, %v1156_v12  ;;  %v661_v61 = vunpack.c.2.s8 %v4855_v49  ;;  %v1180_v7 = vcvt.s32.f32 %v668_v55 }
 0x135   : > { %v1165_v22 = vcvt.s32.f32 %v653_v4  ;;  %v1523_v29 = vpack.c.bf16 %v1163_v10, %v1155_v9  ;;  %v1179_v4 = vcvt.s32.f32 %v667_v50 }
 0x136   : > { %v1173_v8 = vcvt.s32.f32 %v661_v61 }
 0x137   : > { %v1525_v33 = vpack.c.bf16 %v1165_v22, %v1157_v14 }
 0x138   : > { %v2535_v19 = vpop.f32.mrf.mxu2  ;;  %v2200_v37 = vpop.f32.mrf.mxu0 }
 0x139   : > { %v2704_v35 = vpop.f32.mrf.mxu3  ;;  %v2536_v21 = vadd.f32 %v2535_v19, %v2367_v23  ;;  %v2369_v44 = vpop.f32.mrf.mxu1 }
 0x13a   : > { %v2370_v46 = vadd.f32 %v2369_v44, %v2200_v37  ;;  %v658_v37 = vunpack.c.2.s8 %v4846_v41 }
 0x13b   : > { %v4843_v47 = vadd.f32 %v2704_v35, %v2536_v21  ;;  %2239 = vmatmul.bf16.gmra.mxu0 %v1514_v36  ;;  %v4467_v36 = vld [vmem:[%s5803_s1 + $0x190] sm:$0xff] }
 0x13c   : > { %2408 = vmatmul.bf16.gmra.mxu1 %v1515_v20  ;;  %v4451_v20 = vld [vmem:[%s5803_s1 + $0x110] sm:$0xff]  ;;  %3165 = vmatpush.bf16.msrb.mxu2 %v4467_v36 }
 0x13d   : > { %2577 = vmatmul.bf16.gmra.mxu2 %v1516_v45  ;;  %v4475_v21 = vld [vmem:[%s5803_s1 + $0x1d0] sm:$0xff]  ;;  %2827 = vmatpush.bf16.msrb.mxu0 %v4451_v20 }
 0x13e   : > { %2746 = vmatmul.bf16.gmra.mxu3 %v1517_v40  ;;  %v666_v40 = vunpack.c.3.s8 %v4846_v41  ;;  %v4459_v41 = vld [vmem:[%s5803_s1 + $0x150] sm:$0xff] }
 0x13f   : > { %3334 = vmatpush.bf16.msrb.mxu3 %v4475_v21  ;;  %2996 = vmatpush.bf16.msrb.mxu1 %v4459_v41 }
 0x140   : > { %v2538_v51 = vpop.f32.mrf.mxu2  ;;  %v2202_v0 = vpop.f32.mrf.mxu0  ;;  %v1178_v3 = vcvt.s32.f32 %v666_v40 }
 0x141   : > { %v2707_v52 = vpop.f32.mrf.mxu3  ;;  %v2539_v63 = vadd.f32 %v2538_v51, %v2370_v46  ;;  %v2371_v1 = vpop.f32.mrf.mxu1  ;;  %v659_v46 = vunpack.c.2.s8 %v4849_v42  ;;  %v660_v51 = vunpack.c.2.s8 %v4852_v48  ;;  %v1170_v42 = vcvt.s32.f32 %v658_v37 }
 0x142   : > { %v2372_v57 = vadd.f32 %v2371_v1, %v2202_v0 }
 0x143   : > { %v4865_v6 = vadd.f32 %v2707_v52, %v2539_v63  ;;  %v669_v63 = vunpack.c.3.s8 %v4855_v49  ;;  %v1171_v56 = vcvt.s32.f32 %v659_v46  ;;  %v1530_v10 = vpack.c.bf16 %v1178_v3, %v1170_v42 }
 0x145   : > { %v1181_v48 = vcvt.s32.f32 %v669_v63  ;;  %v1531_v12 = vpack.c.bf16 %v1179_v4, %v1171_v56 }
 0x148   : > { %v2540_v23 = vpop.f32.mrf.mxu2  ;;  %v2205_v30 = vpop.f32.mrf.mxu0 }
 0x149   : > { %v2709_v26 = vpop.f32.mrf.mxu3  ;;  %v2541_v28 = vadd.f32 %v2540_v23, %v2372_v57  ;;  %v2374_v31 = vpop.f32.mrf.mxu1  ;;  %v1172_v57 = vcvt.s32.f32 %v660_v51 }
 0x14a   : > { %v2375_v19 = vadd.f32 %v2374_v31, %v2205_v30  ;;  %v307_v30 = vld [vmem:[%s4603_s11 + $0x288] sm:$0xff]  ;;  %v308_v31 = vld [vmem:[%s4603_s11 + $0x290] sm:$0xff] }
 0x14b   : > { %v4867_v35 = vadd.f32 %v2709_v26, %v2541_v28  ;;  %2244 = vmatmul.bf16.gmra.mxu0 %v1522_v27  ;;  %v1532_v23 = vpack.c.bf16 %v1180_v7, %v1172_v57  ;;  %v1533_v26 = vpack.c.bf16 %v1181_v48, %v1173_v8  ;;  %v306_v28 = vld [vmem:[%s4603_s11 + $0x280] sm:$0xff]  ;;  %v675_v21 = vunpack.c.0.s8 %v307_v30 }
 0x14c   : > { %2413 = vmatmul.bf16.gmra.mxu1 %v1523_v29  ;;  %v682_v20 = vunpack.c.1.s8 %v306_v28  ;;  %v683_v37 = vunpack.c.1.s8 %v307_v30  ;;  %v684_v50 = vunpack.c.1.s8 %v308_v31 }
 0x14d   : > { %2582 = vmatmul.bf16.gmra.mxu2 %v1524_v18  ;;  %v309_v18 = vld [vmem:[%s4603_s11 + $0x298] sm:$0xff]  ;;  %v1187_v63 = vcvt.s32.f32 %v675_v21 }
 0x14e   : > { %2751 = vmatmul.bf16.gmra.mxu3 %v1525_v33  ;;  %v674_v33 = vunpack.c.0.s8 %v306_v28  ;;  %v677_v51 = vunpack.c.0.s8 %v309_v18  ;;  %v1194_v61 = vcvt.s32.f32 %v682_v20  ;;  %v1196_v42 = vcvt.s32.f32 %v684_v50 }
 0x150   : > { %v2543_v44 = vpop.f32.mrf.mxu2  ;;  %v2207_v59 = vpop.f32.mrf.mxu0  ;;  %v1186_v55 = vcvt.s32.f32 %v674_v33  ;;  %v1189_v3 = vcvt.s32.f32 %v677_v51  ;;  %v691_v33 = vunpack.c.2.s8 %v307_v30 }
 0x151   : > { %v2712_v45 = vpop.f32.mrf.mxu3  ;;  %v2544_v52 = vadd.f32 %v2543_v44, %v2375_v19  ;;  %v2376_v54 = vpop.f32.mrf.mxu1  ;;  %v676_v44 = vunpack.c.0.s8 %v308_v31 }
 0x152   : > { %v2377_v0 = vadd.f32 %v2376_v54, %v2207_v59  ;;  %v1538_v7 = vpack.c.bf16 %v1194_v61, %v1186_v55 }
 0x153   : > { %v4886_v1 = vadd.f32 %v2712_v45, %v2544_v52  ;;  %v685_v52 = vunpack.c.1.s8 %v309_v18  ;;  %v1188_v41 = vcvt.s32.f32 %v676_v44  ;;  %v700_v44 = vunpack.c.3.s8 %v308_v31 }
 0x155   : > { %v1197_v56 = vcvt.s32.f32 %v685_v52 }
 0x158   : > { %v2545_v9 = vpop.f32.mrf.mxu2  ;;  %v2210_v14 = vpop.f32.mrf.mxu0 }
 0x159   : > { %v2714_v49 = vpop.f32.mrf.mxu3  ;;  %v2546_v13 = vadd.f32 %v2545_v9, %v2377_v0  ;;  %v2379_v22 = vpop.f32.mrf.mxu1  ;;  %v1195_v0 = vcvt.s32.f32 %v683_v37 }
 0x15a   : > { %v2380_v27 = vadd.f32 %v2379_v22, %v2210_v14  ;;  %v690_v22 = vunpack.c.2.s8 %v306_v28 }
 0x15b   : > { %v4891_v29 = vadd.f32 %v2714_v49, %v2546_v13  ;;  %2249 = vmatmul.bf16.gmra.mxu0 %v1530_v10  ;;  %v1539_v8 = vpack.c.bf16 %v1195_v0, %v1187_v63  ;;  %v1540_v10 = vpack.c.bf16 %v1196_v42, %v1188_v41  ;;  %v1212_v63 = vcvt.s32.f32 %v700_v44 }
 0x15c   : > { %2418 = vmatmul.bf16.gmra.mxu1 %v1531_v12  ;;  %v1541_v12 = vpack.c.bf16 %v1197_v56, %v1189_v3  ;;  %v1202_v51 = vcvt.s32.f32 %v690_v22 }
 0x15d   : > { %2587 = vmatmul.bf16.gmra.mxu2 %v1532_v23 }
 0x15e   : > { %2756 = vmatmul.bf16.gmra.mxu3 %v1533_v26 }
 0x160   : > { %v2548_v19 = vpop.f32.mrf.mxu2  ;;  %v2212_v40 = vpop.f32.mrf.mxu0 }
 0x161   : > { %v2717_v36 = vpop.f32.mrf.mxu3  ;;  %v2549_v45 = vadd.f32 %v2548_v19, %v2380_v27  ;;  %v2381_v46 = vpop.f32.mrf.mxu1  ;;  %v698_v27 = vunpack.c.3.s8 %v306_v28  ;;  %v699_v19 = vunpack.c.3.s8 %v307_v30 }
 0x162   : > { %v2382_v59 = vadd.f32 %v2381_v46, %v2212_v40  ;;  %v701_v40 = vunpack.c.3.s8 %v309_v18 }
 0x163   : > { %v4897_v54 = vadd.f32 %v2717_v36, %v2549_v45  ;;  %v692_v36 = vunpack.c.2.s8 %v308_v31  ;;  %v693_v45 = vunpack.c.2.s8 %v309_v18  ;;  %v1210_v52 = vcvt.s32.f32 %v698_v27 }
 0x164   : > { %v1211_v55 = vcvt.s32.f32 %v699_v19  ;;  %v1213_v0 = vcvt.s32.f32 %v701_v40 }
 0x165   : > { %v1204_v61 = vcvt.s32.f32 %v692_v36  ;;  %v1205_v28 = vcvt.s32.f32 %v693_v45  ;;  %v1546_v42 = vpack.c.bf16 %v1210_v52, %v1202_v51 }
 0x168   : > { %v2550_v4 = vpop.f32.mrf.mxu2  ;;  %v2215_v9 = vpop.f32.mrf.mxu0 }
 0x169   : > { %v2719_v57 = vpop.f32.mrf.mxu3  ;;  %v2551_v48 = vadd.f32 %v2550_v4, %v2382_v59  ;;  %v2384_v49 = vpop.f32.mrf.mxu1  ;;  %v1203_v59 = vcvt.s32.f32 %v691_v33  ;;  %v1548_v4 = vpack.c.bf16 %v1212_v63, %v1204_v61 }
 0x16a   : > { %v2385_v13 = vadd.f32 %v2384_v49, %v2215_v9  ;;  %v4909_v9 = vld [vmem:[%s4603_s11 + $0x2c8] sm:$0xff]  ;;  %v4912_v49 = vld [vmem:[%s4603_s11 + $0x2d0] sm:$0xff] }
 0x16b   : > { %v4899_v14 = vadd.f32 %v2719_v57, %v2551_v48  ;;  %2254 = vmatmul.bf16.gmra.mxu0 %v1538_v7  ;;  %v1547_v31 = vpack.c.bf16 %v1211_v55, %v1203_v59  ;;  %v1549_v57 = vpack.c.bf16 %v1213_v0, %v1205_v28  ;;  %v4906_v48 = vld [vmem:[%s4603_s11 + $0x2c0] sm:$0xff]  ;;  %v715_v27 = vunpack.c.1.s8 %v4909_v9 }
 0x16c   : > { %2423 = vmatmul.bf16.gmra.mxu1 %v1539_v8  ;;  %v708_v33 = vunpack.c.0.s8 %v4912_v49 }
 0x16d   : > { %2592 = vmatmul.bf16.gmra.mxu2 %v1540_v10  ;;  %v4915_v10 = vld [vmem:[%s4603_s11 + $0x2d8] sm:$0xff]  ;;  %v1227_v59 = vcvt.s32.f32 %v715_v27 }
 0x16e   : > { %2761 = vmatmul.bf16.gmra.mxu3 %v1541_v12  ;;  %v706_v12 = vunpack.c.0.s8 %v4906_v48  ;;  %v717_v44 = vunpack.c.1.s8 %v4915_v10  ;;  %v1220_v55 = vcvt.s32.f32 %v708_v33  ;;  %v730_v33 = vunpack.c.3.s8 %v4906_v48 }
 0x170   : > { %v2553_v23 = vpop.f32.mrf.mxu2  ;;  %v2217_v21 = vpop.f32.mrf.mxu0  ;;  %v1229_v28 = vcvt.s32.f32 %v717_v44 }
 0x171   : > { %v2722_v26 = vpop.f32.mrf.mxu3  ;;  %v2554_v20 = vadd.f32 %v2553_v23, %v2385_v13  ;;  %v2386_v37 = vpop.f32.mrf.mxu1  ;;  %v714_v23 = vunpack.c.1.s8 %v4906_v48 }
 0x172   : > { %v2387_v46 = vadd.f32 %v2386_v37, %v2217_v21  ;;  %v716_v21 = vunpack.c.1.s8 %v4912_v49  ;;  %v709_v37 = vunpack.c.0.s8 %v4915_v10 }
 0x173   : > { %v4901_v50 = vadd.f32 %v2722_v26, %v2554_v20  ;;  %v707_v26 = vunpack.c.0.s8 %v4909_v9  ;;  %v1226_v51 = vcvt.s32.f32 %v714_v23  ;;  %v722_v23 = vunpack.c.2.s8 %v4906_v48  ;;  %v4458_v48 = vld [vmem:[%s5803_s1 + $0x148] sm:$0xff] }
 0x174   : > { %v1228_v61 = vcvt.s32.f32 %v716_v21  ;;  %v1221_v63 = vcvt.s32.f32 %v709_v37  ;;  %2997 = vmatpush.bf16.msrb.mxu1 %v4458_v48 }
 0x175   : > { %v1219_v52 = vcvt.s32.f32 %v707_v26 }
 0x178   : > { %v2555_v30 = vpop.f32.mrf.mxu2  ;;  %v2220_v3 = vpop.f32.mrf.mxu0 }
 0x179   : > { %v2724_v41 = vpop.f32.mrf.mxu3  ;;  %v2556_v18 = vadd.f32 %v2555_v30, %v2387_v46  ;;  %v2389_v56 = vpop.f32.mrf.mxu1  ;;  %v1218_v46 = vcvt.s32.f32 %v706_v12  ;;  %v4466_v12 = vld [vmem:[%s5803_s1 + $0x188] sm:$0xff] }
 0x17a   : > { %v2390_v7 = vadd.f32 %v2389_v56, %v2220_v3  ;;  %v1556_v56 = vpack.c.bf16 %v1228_v61, %v1220_v55  ;;  %3166 = vmatpush.bf16.msrb.mxu2 %v4466_v12  ;;  %v1242_v55 = vcvt.s32.f32 %v730_v33 }
 0x17b   : > { %v4903_v8 = vadd.f32 %v2724_v41, %v2556_v18  ;;  %2259 = vmatmul.bf16.gmra.mxu0 %v1546_v42  ;;  %v1554_v41 = vpack.c.bf16 %v1226_v51, %v1218_v46  ;;  %v1555_v42 = vpack.c.bf16 %v1227_v59, %v1219_v52  ;;  %v725_v46 = vunpack.c.2.s8 %v4915_v10 }
 0x17c   : > { %2428 = vmatmul.bf16.gmra.mxu1 %v1547_v31  ;;  %v733_v51 = vunpack.c.3.s8 %v4915_v10 }
 0x17d   : > { %2597 = vmatmul.bf16.gmra.mxu2 %v1548_v4  ;;  %v1557_v4 = vpack.c.bf16 %v1229_v28, %v1221_v63 }
 0x17e   : > { %2766 = vmatmul.bf16.gmra.mxu3 %v1549_v57 }
 0x180   : > { %v2558_v13 = vpop.f32.mrf.mxu2  ;;  %v2222_v36 = vpop.f32.mrf.mxu0 }
 0x181   : > { %v2727_v22 = vpop.f32.mrf.mxu3  ;;  %v2559_v19 = vadd.f32 %v2558_v13, %v2390_v7  ;;  %v2391_v20 = vpop.f32.mrf.mxu1  ;;  %v4450_v13 = vld [vmem:[%s5803_s1 + $0x108] sm:$0xff] }
 0x182   : > { %v2392_v45 = vadd.f32 %v2391_v20, %v2222_v36  ;;  %2828 = vmatpush.bf16.msrb.mxu0 %v4450_v13  ;;  %v731_v36 = vunpack.c.3.s8 %v4909_v9  ;;  %v724_v20 = vunpack.c.2.s8 %v4912_v49 }
 0x183   : > { %v4925_v40 = vadd.f32 %v2727_v22, %v2559_v19  ;;  %v4474_v22 = vld [vmem:[%s5803_s1 + $0x1c8] sm:$0xff]  ;;  %v723_v19 = vunpack.c.2.s8 %v4909_v9  ;;  %v1234_v9 = vcvt.s32.f32 %v722_v23 }
 0x184   : > { %3335 = vmatpush.bf16.msrb.mxu3 %v4474_v22  ;;  %v1243_v63 = vcvt.s32.f32 %v731_v36  ;;  %v1236_v28 = vcvt.s32.f32 %v724_v20  ;;  %v322_v22 = vld [vmem:[%s4603_s11 + $0x300] sm:$0xff]  ;;  %v323_v23 = vld [vmem:[%s4603_s11 + $0x308] sm:$0xff] }
 0x185   : > { %v1235_v61 = vcvt.s32.f32 %v723_v19  ;;  %v738_v33 = vunpack.c.0.s8 %v322_v22  ;;  %v746_v20 = vunpack.c.1.s8 %v322_v22 }
 0x188   : > { %v2560_v0 = vpop.f32.mrf.mxu2  ;;  %v2225_v18 = vpop.f32.mrf.mxu0 }
 0x189   : > { %v2729_v30 = vpop.f32.mrf.mxu3  ;;  %v2561_v31 = vadd.f32 %v2560_v0, %v2392_v45  ;;  %v2394_v3 = vpop.f32.mrf.mxu1  ;;  %v732_v45 = vunpack.c.3.s8 %v4912_v49  ;;  %v1245_v49 = vcvt.s32.f32 %v733_v51 }
 0x18a   : > { %v2395_v57 = vadd.f32 %v2394_v3, %v2225_v18 }
 0x18b   : > { %v4927_v7 = vadd.f32 %v2729_v30, %v2561_v31  ;;  %2264 = vmatmul.bf16.gmra.mxu0 %v1554_v41  ;;  %v1244_v0 = vcvt.s32.f32 %v732_v45  ;;  %v1237_v30 = vcvt.s32.f32 %v725_v46  ;;  %v1563_v31 = vpack.c.bf16 %v1243_v63, %v1235_v61 }
 0x18c   : > { %2433 = vmatmul.bf16.gmra.mxu1 %v1555_v42  ;;  %v1562_v42 = vpack.c.bf16 %v1242_v55, %v1234_v9  ;;  %v1250_v63 = vcvt.s32.f32 %v738_v33  ;;  %v754_v33 = vunpack.c.2.s8 %v322_v22 }
 0x18d   : > { %2602 = vmatmul.bf16.gmra.mxu2 %v1556_v56 }
 0x18e   : > { %2771 = vmatmul.bf16.gmra.mxu3 %v1557_v4  ;;  %v1564_v4 = vpack.c.bf16 %v1244_v0, %v1236_v28  ;;  %v1258_v28 = vcvt.s32.f32 %v746_v20 }
 0x190   : > { %v2563_v26 = vpop.f32.mrf.mxu2  ;;  %v2227_v37 = vpop.f32.mrf.mxu0 }
 0x191   : > { %v2732_v27 = vpop.f32.mrf.mxu3  ;;  %v2564_v21 = vadd.f32 %v2563_v26, %v2395_v57  ;;  %v2396_v44 = vpop.f32.mrf.mxu1  ;;  %v1565_v57 = vpack.c.bf16 %v1245_v49, %v1237_v30  ;;  %v324_v26 = vld [vmem:[%s4603_s11 + $0x310] sm:$0xff] }
 0x192   : > { %v2397_v52 = vadd.f32 %v2396_v44, %v2227_v37  ;;  %v747_v37 = vunpack.c.1.s8 %v323_v23  ;;  %v740_v44 = vunpack.c.0.s8 %v324_v26 }
 0x193   : > { %v4946_v59 = vadd.f32 %v2732_v27, %v2564_v21  ;;  %v325_v27 = vld [vmem:[%s4603_s11 + $0x318] sm:$0xff]  ;;  %v739_v21 = vunpack.c.0.s8 %v323_v23 }
 0x194   : > { %v741_v48 = vunpack.c.0.s8 %v325_v27  ;;  %v749_v9 = vunpack.c.1.s8 %v325_v27  ;;  %v1259_v30 = vcvt.s32.f32 %v747_v37  ;;  %v1252_v49 = vcvt.s32.f32 %v740_v44 }
 0x195   : > { %v1251_v0 = vcvt.s32.f32 %v739_v21  ;;  %v762_v37 = vunpack.c.3.s8 %v322_v22  ;;  %v755_v44 = vunpack.c.2.s8 %v323_v23 }
 0x198   : > { %v2565_v41 = vpop.f32.mrf.mxu2  ;;  %v2230_v3 = vpop.f32.mrf.mxu0 }
 0x199   : > { %v2734_v10 = vpop.f32.mrf.mxu3  ;;  %v2566_v18 = vadd.f32 %v2565_v41, %v2397_v52  ;;  %v2399_v56 = vpop.f32.mrf.mxu1  ;;  %v748_v52 = vunpack.c.1.s8 %v324_v26 }
 0x19a   : > { %v2400_v12 = vadd.f32 %v2399_v56, %v2230_v3  ;;  %v1570_v3 = vpack.c.bf16 %v1258_v28, %v1250_v63  ;;  %v1571_v56 = vpack.c.bf16 %v1259_v30, %v1251_v0  ;;  %v757_v63 = vunpack.c.2.s8 %v325_v27 }
 0x19b   : > { %v4951_v13 = vadd.f32 %v2734_v10, %v2566_v18  ;;  %2269 = vmatmul.bf16.gmra.mxu0 %v1562_v42  ;;  %v1260_v41 = vcvt.s32.f32 %v748_v52  ;;  %v1253_v10 = vcvt.s32.f32 %v741_v48  ;;  %v1261_v42 = vcvt.s32.f32 %v749_v9 }
 0x19c   : > { %2438 = vmatmul.bf16.gmra.mxu1 %v1563_v31  ;;  %v765_v28 = vunpack.c.3.s8 %v325_v27  ;;  %v1269_v22 = vcvt.s32.f32 %v757_v63 }
 0x19d   : > { %5807 = vst [vmem:[#allocation2_spill] sm:$0xff] %v4951_v13  ;;  %2607 = vmatmul.bf16.gmra.mxu2 %v1564_v4  ;;  %v1573_v13 = vpack.c.bf16 %v1261_v42, %v1253_v10  ;;  %v1267_v10 = vcvt.s32.f32 %v755_v44  ;;  %v4975_v44 = vld [vmem:[%s4603_s11 + $0x358] sm:$0xff] }
 0x19e   : > { %2776 = vmatmul.bf16.gmra.mxu3 %v1565_v57 }
 0x1a0   : > { %v2568_v19 = vpop.f32.mrf.mxu2  ;;  %v2232_v46 = vpop.f32.mrf.mxu0 }
 0x1a1   : > { %v2737_v36 = vpop.f32.mrf.mxu3  ;;  %v2569_v45 = vadd.f32 %v2568_v19, %v2400_v12  ;;  %v2401_v51 = vpop.f32.mrf.mxu1  ;;  %v1572_v19 = vpack.c.bf16 %v1260_v41, %v1252_v49  ;;  %v1266_v49 = vcvt.s32.f32 %v754_v33  ;;  %v1274_v41 = vcvt.s32.f32 %v762_v37  ;;  %v4972_v37 = vld [vmem:[%s4603_s11 + $0x350] sm:$0xff] }
 0x1a2   : > { %v2402_v55 = vadd.f32 %v2401_v51, %v2232_v46  ;;  %v756_v51 = vunpack.c.2.s8 %v324_v26  ;;  %v772_v63 = vunpack.c.0.s8 %v4972_v37 }
 0x1a3   : > { %v4957_v61 = vadd.f32 %v2737_v36, %v2569_v45  ;;  %v763_v45 = vunpack.c.3.s8 %v323_v23 }
 0x1a4   : > { %v1268_v42 = vcvt.s32.f32 %v756_v51 }
 0x1a5   : > { %5808 = vst [vmem:[#allocation3_spill] sm:$0xff] %v4957_v61 }
 0x1a8   : > { %v2570_v31 = vpop.f32.mrf.mxu2  ;;  %v2235_v57 = vpop.f32.mrf.mxu0 }
 0x1a9   : > { %v2739_v18 = vpop.f32.mrf.mxu3  ;;  %v2571_v4 = vadd.f32 %v2570_v31, %v2402_v55  ;;  %v2404_v12 = vpop.f32.mrf.mxu1  ;;  %v764_v55 = vunpack.c.3.s8 %v324_v26 }
 0x1aa   : > { %v2405_v46 = vadd.f32 %v2404_v12, %v2235_v57 }
 0x1ab   : > { %v4959_v36 = vadd.f32 %v2739_v18, %v2571_v4  ;;  %2274 = vmatmul.bf16.gmra.mxu0 %v1570_v3  ;;  %v1276_v31 = vcvt.s32.f32 %v764_v55  ;;  %v1277_v18 = vcvt.s32.f32 %v765_v28 }
 0x1ac   : > { %2443 = vmatmul.bf16.gmra.mxu1 %v1571_v56  ;;  %v1578_v56 = vpack.c.bf16 %v1274_v41, %v1266_v49  ;;  %v780_v41 = vunpack.c.1.s8 %v4972_v37 }
 0x1ad   : > { %5809 = vst [vmem:[#allocation4_spill] sm:$0xff] %v4959_v36  ;;  %2612 = vmatmul.bf16.gmra.mxu2 %v1572_v19  ;;  %v1580_v12 = vpack.c.bf16 %v1276_v31, %v1268_v42  ;;  %v1581_v19 = vpack.c.bf16 %v1277_v18, %v1269_v22 }
 0x1ae   : > { %2781 = vmatmul.bf16.gmra.mxu3 %v1573_v13  ;;  %v1275_v13 = vcvt.s32.f32 %v763_v45 }
 0x1b0   : > { %v2573_v20 = vpop.f32.mrf.mxu2  ;;  %v2237_v48 = vpop.f32.mrf.mxu0  ;;  %v1579_v26 = vpack.c.bf16 %v1275_v13, %v1267_v10  ;;  %v773_v10 = vunpack.c.0.s8 %v4975_v44  ;;  %v781_v13 = vunpack.c.1.s8 %v4975_v44 }
 0x1b1   : > { %v2742_v21 = vpop.f32.mrf.mxu3  ;;  %v2574_v52 = vadd.f32 %v2573_v20, %v2405_v46  ;;  %v2406_v9 = vpop.f32.mrf.mxu1  ;;  %v4966_v20 = vld [vmem:[%s4603_s11 + $0x340] sm:$0xff] }
 0x1b2   : > { %v2407_v0 = vadd.f32 %v2406_v9, %v2237_v48  ;;  %v770_v45 = vunpack.c.0.s8 %v4966_v20  ;;  %v778_v48 = vunpack.c.1.s8 %v4966_v20 }
 0x1b3   : > { %v4961_v30 = vadd.f32 %v2742_v21, %v2574_v52  ;;  %v4969_v21 = vld [vmem:[%s4603_s11 + $0x348] sm:$0xff] }
 0x1b4   : > { %v771_v9 = vunpack.c.0.s8 %v4969_v21  ;;  %v779_v55 = vunpack.c.1.s8 %v4969_v21  ;;  %v1282_v22 = vcvt.s32.f32 %v770_v45  ;;  %v1290_v18 = vcvt.s32.f32 %v778_v48  ;;  %v4465_v45 = vld [vmem:[%s5803_s1 + $0x180] sm:$0xff] }
 0x1b5   : > { %5810 = vst [vmem:[#allocation5_spill] sm:$0xff] %v4961_v30  ;;  %v4449_v48 = vld [vmem:[%s5803_s1 + $0x100] sm:$0xff]  ;;  %3167 = vmatpush.bf16.msrb.mxu2 %v4465_v45 }
 0x1b6   : > { %2829 = vmatpush.bf16.msrb.mxu0 %v4449_v48 }
 0x1b8   : > { %v2575_v23 = vpop.f32.mrf.mxu2  ;;  %v2240_v4 = vpop.f32.mrf.mxu0 }
 0x1b9   : > { %v2744_v3 = vpop.f32.mrf.mxu3  ;;  %v2576_v27 = vadd.f32 %v2575_v23, %v2407_v0  ;;  %v2409_v57 = vpop.f32.mrf.mxu1  ;;  %v1283_v23 = vcvt.s32.f32 %v771_v9  ;;  %v4473_v9 = vld [vmem:[%s5803_s1 + $0x1c0] sm:$0xff] }
 0x1ba   : > { %v2410_v46 = vadd.f32 %v2409_v57, %v2240_v4  ;;  %v1293_v4 = vcvt.s32.f32 %v781_v13  ;;  %3336 = vmatpush.bf16.msrb.mxu3 %v4473_v9  ;;  %v796_v13 = vunpack.c.3.s8 %v4972_v37 }
 0x1bb   : > { %v4963_v33 = vadd.f32 %v2744_v3, %v2576_v27  ;;  %2279 = vmatmul.bf16.gmra.mxu0 %v1578_v56  ;;  %v1291_v3 = vcvt.s32.f32 %v779_v55  ;;  %v1284_v56 = vcvt.s32.f32 %v772_v63  ;;  %v1285_v27 = vcvt.s32.f32 %v773_v10 }
 0x1bc   : > { %2448 = vmatmul.bf16.gmra.mxu1 %v1579_v26  ;;  %v1292_v26 = vcvt.s32.f32 %v780_v41  ;;  %v795_v63 = vunpack.c.3.s8 %v4969_v21 }
 0x1bd   : > { %5811 = vst [vmem:[#allocation6_spill] sm:$0xff] %v4963_v33  ;;  %2617 = vmatmul.bf16.gmra.mxu2 %v1580_v12  ;;  %v1589_v61 = vpack.c.bf16 %v1293_v4, %v1285_v27  ;;  %v1308_v4 = vcvt.s32.f32 %v796_v13 }
 0x1be   : > { %2786 = vmatmul.bf16.gmra.mxu3 %v1581_v19  ;;  %v1586_v19 = vpack.c.bf16 %v1290_v18, %v1282_v22  ;;  %v1588_v36 = vpack.c.bf16 %v1292_v26, %v1284_v56  ;;  %v797_v22 = vunpack.c.3.s8 %v4975_v44  ;;  %v1307_v26 = vcvt.s32.f32 %v795_v63  ;;  %v341_v63 = vld [vmem:[%s4603_s11 + $0x398] sm:$0xff] }
 0x1c0   : > { %v2578_v51 = vpop.f32.mrf.mxu2  ;;  %v2242_v0 = vpop.f32.mrf.mxu0 }
 0x1c1   : > { %v2747_v52 = vpop.f32.mrf.mxu3  ;;  %v2579_v28 = vadd.f32 %v2578_v51, %v2410_v46  ;;  %v2411_v49 = vpop.f32.mrf.mxu1  ;;  %v1587_v46 = vpack.c.bf16 %v1291_v3, %v1283_v23 }
 0x1c2   : > { %v2412_v42 = vadd.f32 %v2411_v49, %v2242_v0 }
 0x1c3   : > { %v4985_v31 = vadd.f32 %v2747_v52, %v2579_v28  ;;  %v788_v28 = vunpack.c.2.s8 %v4972_v37  ;;  %v1309_v37 = vcvt.s32.f32 %v797_v22 }
 0x1c5   : > { %5812 = vst [vmem:[#allocation7_spill] sm:$0xff] %v4985_v31  ;;  %v1300_v27 = vcvt.s32.f32 %v788_v28 }
 0x1c7   : > { %v1596_v48 = vpack.c.bf16 %v1308_v4, %v1300_v27 }
 0x1c8   : > { %v2580_v57 = vpop.f32.mrf.mxu2  ;;  %v2245_v33 = vpop.f32.mrf.mxu0 }
 0x1c9   : > { %v2749_v12 = vpop.f32.mrf.mxu3  ;;  %v2581_v51 = vadd.f32 %v2580_v57, %v2412_v42  ;;  %v2414_v30 = vpop.f32.mrf.mxu1  ;;  %v789_v42 = vunpack.c.2.s8 %v4975_v44 }
 0x1ca   : > { %v2415_v0 = vadd.f32 %v2414_v30, %v2245_v33  ;;  %v786_v30 = vunpack.c.2.s8 %v4966_v20 }
 0x1cb   : > { %v4987_v52 = vadd.f32 %v2749_v12, %v2581_v51  ;;  %2284 = vmatmul.bf16.gmra.mxu0 %v1586_v19  ;;  %v1301_v57 = vcvt.s32.f32 %v789_v42 }
 0x1cc   : > { %2453 = vmatmul.bf16.gmra.mxu1 %v1587_v46 }
 0x1cd   : > { %5813 = vst [vmem:[#allocation8_spill] sm:$0xff] %v4987_v52  ;;  %2622 = vmatmul.bf16.gmra.mxu2 %v1588_v36  ;;  %v787_v36 = vunpack.c.2.s8 %v4969_v21  ;;  %v1298_v21 = vcvt.s32.f32 %v786_v30  ;;  %v1597_v9 = vpack.c.bf16 %v1309_v37, %v1301_v57 }
 0x1ce   : > { %2791 = vmatmul.bf16.gmra.mxu3 %v1589_v61  ;;  %v794_v61 = vunpack.c.3.s8 %v4966_v20  ;;  %v4457_v20 = vld [vmem:[%s5803_s1 + $0x140] sm:$0xff] }
 0x1cf   : > { %v1299_v56 = vcvt.s32.f32 %v787_v36  ;;  %2998 = vmatpush.bf16.msrb.mxu1 %v4457_v20  ;;  %v340_v36 = vld [vmem:[%s4603_s11 + $0x390] sm:$0xff] }
 0x1d0   : > { %v2583_v33 = vpop.f32.mrf.mxu2  ;;  %v2247_v41 = vpop.f32.mrf.mxu0  ;;  %v1306_v3 = vcvt.s32.f32 %v794_v61  ;;  %v339_v61 = vld [vmem:[%s4603_s11 + $0x388] sm:$0xff]  ;;  %v804_v22 = vunpack.c.0.s8 %v340_v36 }
 0x1d1   : > { %v2752_v55 = vpop.f32.mrf.mxu3  ;;  %v2584_v49 = vadd.f32 %v2583_v33, %v2415_v0  ;;  %v2416_v10 = vpop.f32.mrf.mxu1  ;;  %v1595_v46 = vpack.c.bf16 %v1307_v26, %v1299_v56  ;;  %v803_v13 = vunpack.c.0.s8 %v339_v61  ;;  %v811_v42 = vunpack.c.1.s8 %v339_v61 }
 0x1d2   : > { %v2417_v18 = vadd.f32 %v2416_v10, %v2247_v41  ;;  %v1594_v19 = vpack.c.bf16 %v1306_v3, %v1298_v21  ;;  %v812_v3 = vunpack.c.1.s8 %v340_v36  ;;  %v805_v56 = vunpack.c.0.s8 %v341_v63 }
 0x1d3   : > { %v5006_v23 = vadd.f32 %v2752_v55, %v2584_v49  ;;  %v338_v55 = vld [vmem:[%s4603_s11 + $0x380] sm:$0xff]  ;;  %v813_v26 = vunpack.c.1.s8 %v341_v63 }
 0x1d4   : > { %v802_v28 = vunpack.c.0.s8 %v338_v55  ;;  %v810_v10 = vunpack.c.1.s8 %v338_v55 }
 0x1d5   : > { %5814 = vst [vmem:[#allocation9_spill] sm:$0xff] %v5006_v23 }
 0x1d6   : > { %v1314_v57 = vcvt.s32.f32 %v802_v28  ;;  %v1322_v37 = vcvt.s32.f32 %v810_v10  ;;  %v818_v28 = vunpack.c.2.s8 %v338_v55 }
 0x1d8   : > { %v2585_v12 = vpop.f32.mrf.mxu2  ;;  %v2250_v0 = vpop.f32.mrf.mxu0 }
 0x1d9   : > { %v2754_v44 = vpop.f32.mrf.mxu3  ;;  %v2586_v51 = vadd.f32 %v2585_v12, %v2417_v18  ;;  %v2419_v45 = vpop.f32.mrf.mxu1  ;;  %v1315_v12 = vcvt.s32.f32 %v803_v13 }
 0x1da   : > { %v2420_v30 = vadd.f32 %v2419_v45, %v2250_v0  ;;  %v1325_v0 = vcvt.s32.f32 %v813_v26 }
 0x1db   : > { %v5011_v33 = vadd.f32 %v2754_v44, %v2586_v51  ;;  %2289 = vmatmul.bf16.gmra.mxu0 %v1594_v19  ;;  %v1323_v44 = vcvt.s32.f32 %v811_v42  ;;  %v1316_v19 = vcvt.s32.f32 %v804_v22  ;;  %v1317_v51 = vcvt.s32.f32 %v805_v56 }
 0x1dc   : > { %2458 = vmatmul.bf16.gmra.mxu1 %v1595_v46  ;;  %v1324_v46 = vcvt.s32.f32 %v812_v3  ;;  %v826_v42 = vunpack.c.3.s8 %v338_v55  ;;  %v819_v22 = vunpack.c.2.s8 %v339_v61 }
 0x1dd   : > { %5815 = vst [vmem:[#allocation10_spill] sm:$0xff] %v5011_v33  ;;  %2627 = vmatmul.bf16.gmra.mxu2 %v1596_v48  ;;  %v1605_v31 = vpack.c.bf16 %v1325_v0, %v1317_v51 }
 0x1de   : > { %2796 = vmatmul.bf16.gmra.mxu3 %v1597_v9  ;;  %v1602_v9 = vpack.c.bf16 %v1322_v37, %v1314_v57  ;;  %v1604_v52 = vpack.c.bf16 %v1324_v46, %v1316_v19  ;;  %v821_v57 = vunpack.c.2.s8 %v341_v63  ;;  %v829_v37 = vunpack.c.3.s8 %v341_v63 }
 0x1e0   : > { %v2588_v49 = vpop.f32.mrf.mxu2  ;;  %v2252_v20 = vpop.f32.mrf.mxu0  ;;  %v1333_v55 = vcvt.s32.f32 %v821_v57  ;;  %v1341_v51 = vcvt.s32.f32 %v829_v37 }
 0x1e1   : > { %v2757_v41 = vpop.f32.mrf.mxu3  ;;  %v2589_v18 = vadd.f32 %v2588_v49, %v2420_v30  ;;  %v2421_v21 = vpop.f32.mrf.mxu1  ;;  %v1603_v30 = vpack.c.bf16 %v1323_v44, %v1315_v12  ;;  %v1330_v12 = vcvt.s32.f32 %v818_v28  ;;  %v1338_v44 = vcvt.s32.f32 %v826_v42  ;;  %v348_v42 = vld [vmem:[%s4603_s11 + $0x3d0] sm:$0xff] }
 0x1e2   : > { %v2422_v27 = vadd.f32 %v2421_v21, %v2252_v20  ;;  %v820_v21 = vunpack.c.2.s8 %v340_v36  ;;  %v836_v57 = vunpack.c.0.s8 %v348_v42 }
 0x1e3   : > { %v5017_v4 = vadd.f32 %v2757_v41, %v2589_v18  ;;  %v827_v18 = vunpack.c.3.s8 %v339_v61 }
 0x1e4   : > { %v1332_v19 = vcvt.s32.f32 %v820_v21 }
 0x1e5   : > { %5816 = vst [vmem:[#allocation11_spill] sm:$0xff] %v5017_v4 }
 0x1e8   : > { %v2590_v45 = vpop.f32.mrf.mxu2  ;;  %v2255_v33 = vpop.f32.mrf.mxu0 }
 0x1e9   : > { %v2759_v48 = vpop.f32.mrf.mxu3  ;;  %v2591_v49 = vadd.f32 %v2590_v45, %v2422_v27  ;;  %v2424_v23 = vpop.f32.mrf.mxu1  ;;  %v828_v27 = vunpack.c.3.s8 %v340_v36  ;;  %v1610_v45 = vpack.c.bf16 %v1338_v44, %v1330_v12  ;;  %v844_v44 = vunpack.c.1.s8 %v348_v42 }
 0x1ea   : > { %v2425_v20 = vadd.f32 %v2424_v23, %v2255_v33 }
 0x1eb   : > { %v5019_v41 = vadd.f32 %v2759_v48, %v2591_v49  ;;  %2294 = vmatmul.bf16.gmra.mxu0 %v1602_v9  ;;  %v1340_v46 = vcvt.s32.f32 %v828_v27  ;;  %v1613_v49 = vpack.c.bf16 %v1341_v51, %v1333_v55 }
 0x1ec   : > { %2463 = vmatmul.bf16.gmra.mxu1 %v1603_v30 }
 0x1ed   : > { %5817 = vst [vmem:[#allocation12_spill] sm:$0xff] %v5019_v41  ;;  %2632 = vmatmul.bf16.gmra.mxu2 %v1604_v52  ;;  %v1331_v52 = vcvt.s32.f32 %v819_v22  ;;  %v1612_v30 = vpack.c.bf16 %v1340_v46, %v1332_v19  ;;  %v5029_v22 = vld [vmem:[%s4603_s11 + $0x3d8] sm:$0xff] }
 0x1ee   : > { %2801 = vmatmul.bf16.gmra.mxu3 %v1605_v31  ;;  %v1339_v31 = vcvt.s32.f32 %v827_v18 }
 0x1f0   : > { %v2593_v10 = vpop.f32.mrf.mxu2  ;;  %v2257_v56 = vpop.f32.mrf.mxu0  ;;  %v1611_v36 = vpack.c.bf16 %v1339_v31, %v1331_v52  ;;  %v837_v52 = vunpack.c.0.s8 %v5029_v22  ;;  %v845_v31 = vunpack.c.1.s8 %v5029_v22 }
 0x1f1   : > { %v2762_v13 = vpop.f32.mrf.mxu3  ;;  %v2594_v3 = vadd.f32 %v2593_v10, %v2425_v20  ;;  %v2426_v26 = vpop.f32.mrf.mxu1  ;;  %v346_v10 = vld [vmem:[%s4603_s11 + $0x3c0] sm:$0xff] }
 0x1f2   : > { %v2427_v23 = vadd.f32 %v2426_v26, %v2257_v56  ;;  %v834_v18 = vunpack.c.0.s8 %v346_v10  ;;  %v842_v56 = vunpack.c.1.s8 %v346_v10 }
 0x1f3   : > { %v5021_v33 = vadd.f32 %v2762_v13, %v2594_v3  ;;  %v347_v13 = vld [vmem:[%s4603_s11 + $0x3c8] sm:$0xff] }
 0x1f4   : > { %v835_v26 = vunpack.c.0.s8 %v347_v13  ;;  %v843_v27 = vunpack.c.1.s8 %v347_v13  ;;  %v1346_v55 = vcvt.s32.f32 %v834_v18  ;;  %v1354_v51 = vcvt.s32.f32 %v842_v56 }
 0x1f5   : > { %5818 = vst [vmem:[#allocation13_spill] sm:$0xff] %v5021_v33  ;;  %v850_v18 = vunpack.c.2.s8 %v346_v10 }
 0x1f8   : > { %v2595_v61 = vpop.f32.mrf.mxu2  ;;  %v2260_v48 = vpop.f32.mrf.mxu0 }
 0x1f9   : > { %v2764_v0 = vpop.f32.mrf.mxu3  ;;  %v2596_v63 = vadd.f32 %v2595_v61, %v2427_v23  ;;  %v2429_v9 = vpop.f32.mrf.mxu1  ;;  %v1347_v61 = vcvt.s32.f32 %v835_v26 }
 0x1fa   : > { %v2430_v20 = vadd.f32 %v2429_v9, %v2260_v48  ;;  %v1357_v48 = vcvt.s32.f32 %v845_v31 }
 0x1fb   : > { %v5023_v28 = vadd.f32 %v2764_v0, %v2596_v63  ;;  %2299 = vmatmul.bf16.gmra.mxu0 %v1610_v45  ;;  %v1355_v0 = vcvt.s32.f32 %v843_v27  ;;  %v1348_v45 = vcvt.s32.f32 %v836_v57  ;;  %v1349_v63 = vcvt.s32.f32 %v837_v52 }
 0x1fc   : > { %2468 = vmatmul.bf16.gmra.mxu1 %v1611_v36  ;;  %v1356_v36 = vcvt.s32.f32 %v844_v44  ;;  %v858_v27 = vunpack.c.3.s8 %v346_v10  ;;  %v851_v57 = vunpack.c.2.s8 %v347_v13  ;;  %v852_v44 = vunpack.c.2.s8 %v348_v42 }
 0x1fd   : > { %5819 = vst [vmem:[#allocation14_spill] sm:$0xff] %v5023_v28  ;;  %2637 = vmatmul.bf16.gmra.mxu2 %v1612_v30 }
 0x1fe   : > { %2806 = vmatmul.bf16.gmra.mxu3 %v1613_v49  ;;  %v1618_v49 = vpack.c.bf16 %v1354_v51, %v1346_v55  ;;  %v1620_v41 = vpack.c.bf16 %v1356_v36, %v1348_v45  ;;  %v860_v55 = vunpack.c.3.s8 %v348_v42  ;;  %v1363_v10 = vcvt.s32.f32 %v851_v57  ;;  %v5055_v57 = vld [vmem:[%s4603_s11 + $0x30] sm:$0xff] }
 0x200   : > { %v2598_v21 = vpop.f32.mrf.mxu2  ;;  %v2262_v23 = vpop.f32.mrf.mxu0  ;;  %v1372_v36 = vcvt.s32.f32 %v860_v55 }
 0x201   : > { %v2767_v3 = vpop.f32.mrf.mxu3  ;;  %v2599_v37 = vadd.f32 %v2598_v21, %v2430_v20  ;;  %v2431_v12 = vpop.f32.mrf.mxu1  ;;  %v1619_v20 = vpack.c.bf16 %v1355_v0, %v1347_v61  ;;  %v1362_v61 = vcvt.s32.f32 %v850_v18  ;;  %v1370_v0 = vcvt.s32.f32 %v858_v27  ;;  %v5052_v27 = vld [vmem:[%s4603_s11 + $0x28] sm:$0xff] }
 0x202   : > { %v2432_v19 = vadd.f32 %v2431_v12, %v2262_v23  ;;  %v1621_v23 = vpack.c.bf16 %v1357_v48, %v1349_v63  ;;  %v859_v12 = vunpack.c.3.s8 %v347_v13  ;;  %v1364_v13 = vcvt.s32.f32 %v852_v44 }
 0x203   : > { %v5033_v46 = vadd.f32 %v2767_v3, %v2599_v37  ;;  %v359_v55 = vunpack.c.0.s8 %v5052_v27 }
 0x204   : > { %v1371_v45 = vcvt.s32.f32 %v859_v12  ;;  %v5058_v12 = vld [vmem:[%s4603_s11 + $0x38] sm:$0xff] }
 0x205   : > { %5820 = vst [vmem:[#allocation15_spill] sm:$0xff] %v5033_v46 }
 0x208   : > { %v2600_v9 = vpop.f32.mrf.mxu2  ;;  %v2265_v28 = vpop.f32.mrf.mxu0 }
 0x209   : > { %v2769_v30 = vpop.f32.mrf.mxu3  ;;  %v2601_v21 = vadd.f32 %v2600_v9, %v2432_v19  ;;  %v2434_v33 = vpop.f32.mrf.mxu1 }
 0x20a   : > { %v2435_v3 = vadd.f32 %v2434_v33, %v2265_v28  ;;  %v853_v33 = vunpack.c.2.s8 %v5029_v22  ;;  %v861_v28 = vunpack.c.3.s8 %v5029_v22  ;;  %v1626_v22 = vpack.c.bf16 %v1370_v0, %v1362_v61 }
 0x20b   : > { %v5035_v37 = vadd.f32 %v2769_v30, %v2601_v21  ;;  %2304 = vmatmul.bf16.gmra.mxu0 %v1618_v49  ;;  %v1627_v30 = vpack.c.bf16 %v1371_v45, %v1363_v10  ;;  %v368_v10 = vunpack.c.1.s8 %v5055_v57  ;;  %v361_v45 = vunpack.c.0.s8 %v5058_v12 }
 0x20c   : > { %2473 = vmatmul.bf16.gmra.mxu1 %v1619_v20  ;;  %v1365_v63 = vcvt.s32.f32 %v853_v33  ;;  %v1373_v48 = vcvt.s32.f32 %v861_v28  ;;  %v367_v33 = vunpack.c.1.s8 %v5052_v27  ;;  %v360_v28 = vunpack.c.0.s8 %v5055_v57 }
 0x20d   : > { %5821 = vst [vmem:[#allocation16_spill] sm:$0xff] %v5035_v37  ;;  %2642 = vmatmul.bf16.gmra.mxu2 %v1620_v41 }
 0x20e   : > { %2811 = vmatmul.bf16.gmra.mxu3 %v1621_v23  ;;  %v1628_v23 = vpack.c.bf16 %v1372_v36, %v1364_v13  ;;  %v369_v13 = vunpack.c.1.s8 %v5058_v12  ;;  %v4504_v36 = vmov 0  }
 0x20f   : > { %4490 = vset.pattern.permute.xlu0 %v4504_v36  ;;  %4491 = vset.pattern.permute.xlu1 %v4504_v36 }
 0x210   : > { %v2603_v56 = vpop.f32.mrf.mxu2  ;;  %v2267_v31 = vpop.f32.mrf.mxu0  ;;  %4492 = vset.pattern.permute.xlu2 %v4504_v36 }
 0x211   : > { %v2772_v26 = vpop.f32.mrf.mxu3  ;;  %v2604_v52 = vadd.f32 %v2603_v56, %v2435_v3  ;;  %v2436_v19 = vpop.f32.mrf.mxu1  ;;  %v1629_v3 = vpack.c.bf16 %v1373_v48, %v1365_v63  ;;  %v3498_v63 = vld [vmem:[%s5065_s10] sm:$0xff] }
 0x212   : > { %v2437_v51 = vadd.f32 %v2436_v19, %v2267_v31  ;;  %3564 = vperm.xlu0 %4490, %v3498_v63  }
 0x213   : > { %v5041_v41 = vadd.f32 %v2772_v26, %v2604_v52  ;;  %v5049_v26 = vld [vmem:[%s4603_s11 + $0x20] sm:$0xff] }
 0x214   : > { %v358_v44 = vunpack.c.0.s8 %v5049_v26  ;;  %v366_v52 = vunpack.c.1.s8 %v5049_v26 }
 0x215   : > { %5822 = vst [vmem:[#allocation17_spill] sm:$0xff] %v5041_v41 }
 0x218   : > { %v2605_v42 = vpop.f32.mrf.mxu2  ;;  %v2270_v20 = vpop.f32.mrf.mxu0 }
 0x219   : > { %v2774_v9 = vpop.f32.mrf.mxu3  ;;  %v2606_v49 = vadd.f32 %v2605_v42, %v2437_v51  ;;  %v2439_v21 = vpop.f32.mrf.mxu1 }
 0x21a   : > { %v2440_v18 = vadd.f32 %v2439_v21, %v2270_v20  ;;  %v872_v20 = vcvt.s32.f32 %v360_v28  ;;  %v880_v21 = vcvt.s32.f32 %v368_v10  ;;  %v382_v28 = vunpack.c.3.s8 %v5049_v26 }
 0x21b   : > { %v5045_v56 = vadd.f32 %v2774_v9, %v2606_v49  ;;  %2309 = vmatmul.bf16.gmra.mxu0 %v1626_v22  ;;  %v870_v9 = vcvt.s32.f32 %v358_v44  ;;  %v878_v22 = vcvt.s32.f32 %v366_v52  ;;  %v879_v49 = vcvt.s32.f32 %v367_v33 }
 0x21c   : > { %2478 = vmatmul.bf16.gmra.mxu1 %v1627_v30  ;;  %v871_v30 = vcvt.s32.f32 %v359_v55  ;;  %v374_v52 = vunpack.c.2.s8 %v5049_v26  ;;  %v375_v10 = vunpack.c.2.s8 %v5052_v27 }
 0x21d   : > { %5823 = vst [vmem:[#allocation18_spill] sm:$0xff] %v5045_v56  ;;  %2647 = vmatmul.bf16.gmra.mxu2 %v1628_v23  ;;  %v873_v23 = vcvt.s32.f32 %v361_v45  ;;  %v1382_v56 = vpack.c.bf16 %v878_v22, %v870_v9  ;;  %v383_v45 = vunpack.c.3.s8 %v5052_v27  ;;  %v3500_v9 = vld [vmem:[%s5065_s10 + $0x10] sm:$0xff] }
 0x21e   : > { %2816 = vmatmul.bf16.gmra.mxu3 %v1629_v3  ;;  %v881_v3 = vcvt.s32.f32 %v369_v13  ;;  %v1383_v41 = vpack.c.bf16 %v879_v49, %v871_v30  ;;  %3574 = vperm.xlu1 %4491, %v3500_v9   ;;  %v886_v26 = vcvt.s32.f32 %v374_v52  ;;  %v894_v49 = vcvt.s32.f32 %v382_v28 }
 0x21f   : > { %v887_v27 = vcvt.s32.f32 %v375_v10  ;;  %v238_v10 = vld [vmem:[%s4603_s11 + $0x60] sm:$0xff] }
 0x220   : > { %v2608_v31 = vpop.f32.mrf.mxu2  ;;  %v2272_v61 = vpop.f32.mrf.mxu0  ;;  %v1385_v36 = vpack.c.bf16 %v881_v3, %v873_v23 }
 0x221   : > { %v2777_v19 = vpop.f32.mrf.mxu3  ;;  %v2609_v51 = vadd.f32 %v2608_v31, %v2440_v18  ;;  %v2441_v0 = vpop.f32.mrf.mxu1 }
 0x222   : > { %v2442_v48 = vadd.f32 %v2441_v0, %v2272_v61  ;;  %v1384_v0 = vpack.c.bf16 %v880_v21, %v872_v20  ;;  %v895_v20 = vcvt.s32.f32 %v383_v45  ;;  %v239_v45 = vld [vmem:[%s4603_s11 + $0x68] sm:$0xff] }
 0x223   : > { %v5076_v42 = vadd.f32 %v2777_v19, %v2609_v51  ;;  %v3499_v19 = vld [vmem:[%s5065_s10 + $0x8] sm:$0xff]  ;;  %v399_v9 = vunpack.c.1.s8 %v239_v45 }
 0x224   : > { %3569 = vperm.xlu0 %4490, %v3499_v19  }
 0x225   : > { %5824 = vst [vmem:[#allocation19_spill] sm:$0xff] %v5076_v42 }
 0x228   : > { %v2610_v18 = vpop.f32.mrf.mxu2  ;;  %v2275_v46 = vpop.f32.mrf.mxu0 }
 0x229   : > { %v2779_v31 = vpop.f32.mrf.mxu3  ;;  %v2611_v37 = vadd.f32 %v2610_v18, %v2442_v48  ;;  %v2444_v61 = vpop.f32.mrf.mxu1  ;;  %v385_v48 = vunpack.c.3.s8 %v5058_v12 }
 0x22a   : > { %v2445_v51 = vadd.f32 %v2444_v61, %v2275_v46  ;;  %v376_v46 = vunpack.c.2.s8 %v5055_v57  ;;  %v1390_v61 = vpack.c.bf16 %v894_v49, %v886_v26 }
 0x22b   : > { %v5079_v44 = vadd.f32 %v2779_v31, %v2611_v37  ;;  %2830 = vmatmul.bf16.vlgmr.msrb.gmra.mxu0 %v1382_v56  ;;  %v377_v56 = vunpack.c.2.s8 %v5058_v12  ;;  %v897_v18 = vcvt.s32.f32 %v385_v48  ;;  %v1391_v12 = vpack.c.bf16 %v895_v20, %v887_v27 }
 0x22c   : > { %2999 = vmatmul.bf16.vlgmr.msrb.gmra.mxu1 %v1383_v41  ;;  %v384_v41 = vunpack.c.3.s8 %v5055_v57  ;;  %v888_v21 = vcvt.s32.f32 %v376_v46  ;;  %v240_v46 = vld [vmem:[%s4603_s11 + $0x70] sm:$0xff]  ;;  %v391_v48 = vunpack.c.0.s8 %v239_v45 }
 0x22d   : > { %5825 = vst [vmem:[#allocation20_spill] sm:$0xff] %v5079_v44  ;;  %3168 = vmatmul.bf16.vlgmr.msrb.gmra.mxu2 %v1384_v0  ;;  %v889_v3 = vcvt.s32.f32 %v377_v56  ;;  %v398_v56 = vunpack.c.1.s8 %v238_v10  ;;  %v400_v20 = vunpack.c.1.s8 %v240_v46 }
 0x22e   : > { %3337 = vmatmul.bf16.vlgmr.msrb.gmra.mxu3 %v1385_v36  ;;  %v896_v23 = vcvt.s32.f32 %v384_v41 }
 0x22f   : > { %v1393_v52 = vpack.c.bf16 %v897_v18, %v889_v3 }
 0x230   : > { %v2613_v55 = vpop.f32.mrf.mxu2  ;;  %v2277_v37 = vpop.f32.mrf.mxu0 }
 0x231   : > { %v2782_v33 = vpop.f32.mrf.mxu3  ;;  %v2614_v13 = vadd.f32 %v2613_v55, %v2445_v51  ;;  %v2446_v63 = vpop.f32.mrf.mxu1  ;;  %v1392_v51 = vpack.c.bf16 %v896_v23, %v888_v21  ;;  %v3501_v55 = vld [vmem:[%s5065_s10 + $0x18] sm:$0xff] }
 0x232   : > { %v2447_v22 = vadd.f32 %v2446_v63, %v2277_v37  ;;  %3579 = vperm.xlu1 %4491, %v3501_v55   ;;  %v390_v37 = vunpack.c.0.s8 %v238_v10 }
 0x233   : > { %v5090_v30 = vadd.f32 %v2782_v33, %v2614_v13  ;;  %v5099_v13 = vld [vmem:[%s4603_s11 + $0x78] sm:$0xff] }
 0x234   : > { %v393_v21 = vunpack.c.0.s8 %v5099_v13  ;;  %v401_v23 = vunpack.c.1.s8 %v5099_v13 }
 0x235   : > { %5826 = vst [vmem:[#allocation21_spill] sm:$0xff] %v5090_v30 }
 0x238   : > { %v2615_v57 = vpop.f32.mrf.mxu2  ;;  %v2280_v36 = vpop.f32.mrf.mxu0 }
 0x239   : > { %v2784_v31 = vpop.f32.mrf.mxu3  ;;  %v2616_v0 = vadd.f32 %v2615_v57, %v2447_v22  ;;  %v2449_v19 = vpop.f32.mrf.mxu1  ;;  %v392_v22 = vunpack.c.0.s8 %v240_v46  ;;  %v902_v57 = vcvt.s32.f32 %v390_v37  ;;  %v406_v37 = vunpack.c.2.s8 %v238_v10 }
 0x23a   : > { %v2450_v33 = vadd.f32 %v2449_v19, %v2280_v36  ;;  %v912_v36 = vcvt.s32.f32 %v400_v20  ;;  %v905_v19 = vcvt.s32.f32 %v393_v21 }
 0x23b   : > { %v5093_v28 = vadd.f32 %v2784_v31, %v2616_v0  ;;  %2835 = vmatmul.bf16.gmra.mxu0 %v1390_v61  ;;  %v910_v31 = vcvt.s32.f32 %v398_v56  ;;  %v903_v61 = vcvt.s32.f32 %v391_v48  ;;  %v904_v0 = vcvt.s32.f32 %v392_v22 }
 0x23c   : > { %3004 = vmatmul.bf16.gmra.mxu1 %v1391_v12  ;;  %v911_v12 = vcvt.s32.f32 %v399_v9  ;;  %v414_v9 = vunpack.c.3.s8 %v238_v10  ;;  %v407_v22 = vunpack.c.2.s8 %v239_v45 }
 0x23d   : > { %5827 = vst [vmem:[#allocation22_spill] sm:$0xff] %v5093_v28  ;;  %3173 = vmatmul.bf16.gmra.mxu2 %v1392_v51  ;;  %v913_v51 = vcvt.s32.f32 %v401_v23  ;;  %v1400_v42 = vpack.c.bf16 %v912_v36, %v904_v0 }
 0x23e   : > { %3342 = vmatmul.bf16.gmra.mxu3 %v1393_v52  ;;  %v919_v10 = vcvt.s32.f32 %v407_v22  ;;  %v5117_v22 = vld [vmem:[%s4603_s11 + $0xa0] sm:$0xff] }
 0x23f   : > { %v1401_v4 = vpack.c.bf16 %v913_v51, %v905_v19 }
 0x240   : > { %v2618_v63 = vpop.f32.mrf.mxu2  ;;  %v2282_v49 = vpop.f32.mrf.mxu0 }
 0x241   : > { %v2787_v41 = vpop.f32.mrf.mxu3  ;;  %v2619_v26 = vadd.f32 %v2618_v63, %v2450_v33  ;;  %v2451_v27 = vpop.f32.mrf.mxu1  ;;  %v1398_v33 = vpack.c.bf16 %v910_v31, %v902_v57  ;;  %v1399_v63 = vpack.c.bf16 %v911_v12, %v903_v61  ;;  %v926_v31 = vcvt.s32.f32 %v414_v9 }
 0x242   : > { %v2452_v3 = vadd.f32 %v2451_v27, %v2282_v49  ;;  %v408_v27 = vunpack.c.2.s8 %v240_v46 }
 0x243   : > { %v5103_v18 = vadd.f32 %v2787_v41, %v2619_v26  ;;  %v415_v26 = vunpack.c.3.s8 %v239_v45 }
 0x244   : > { %v920_v61 = vcvt.s32.f32 %v408_v27  ;;  %v5123_v27 = vld [vmem:[%s4603_s11 + $0xb0] sm:$0xff] }
 0x245   : > { %v927_v45 = vcvt.s32.f32 %v415_v26  ;;  %v5120_v26 = vld [vmem:[%s4603_s11 + $0xa8] sm:$0xff] }
 0x248   : > { %v2620_v52 = vpop.f32.mrf.mxu2  ;;  %v2285_v30 = vpop.f32.mrf.mxu0 }
 0x249   : > { %v2789_v55 = vpop.f32.mrf.mxu3  ;;  %v2621_v28 = vadd.f32 %v2620_v52, %v2452_v3  ;;  %v2454_v44 = vpop.f32.mrf.mxu1  ;;  %v416_v3 = vunpack.c.3.s8 %v240_v46 }
 0x24a   : > { %v2455_v49 = vadd.f32 %v2454_v44, %v2285_v30  ;;  %v409_v44 = vunpack.c.2.s8 %v5099_v13  ;;  %v417_v30 = vunpack.c.3.s8 %v5099_v13  ;;  %v1407_v13 = vpack.c.bf16 %v927_v45, %v919_v10 }
 0x24b   : > { %v5105_v41 = vadd.f32 %v2789_v55, %v2621_v28  ;;  %2840 = vmatmul.bf16.gmra.mxu0 %v1398_v33  ;;  %v3504_v28 = vld [vmem:[%s5065_s10 + $0x30] sm:$0xff]  ;;  %v928_v12 = vcvt.s32.f32 %v416_v3  ;;  %v432_v45 = vunpack.c.1.s8 %v5123_v27 }
 0x24c   : > { %3009 = vmatmul.bf16.gmra.mxu1 %v1399_v63  ;;  %3594 = vperm.xlu0 %4490, %v3504_v28   ;;  %v921_v0 = vcvt.s32.f32 %v409_v44  ;;  %v929_v36 = vcvt.s32.f32 %v417_v30  ;;  %v430_v44 = vunpack.c.1.s8 %v5117_v22  ;;  %v423_v30 = vunpack.c.0.s8 %v5120_v26 }
 0x24d   : > { %5828 = vst [vmem:[#allocation23_spill] sm:$0xff] %v5105_v41  ;;  %3178 = vmatmul.bf16.gmra.mxu2 %v1400_v42  ;;  %v1408_v63 = vpack.c.bf16 %v928_v12, %v920_v61  ;;  %v431_v28 = vunpack.c.1.s8 %v5120_v26 }
 0x24e   : > { %3347 = vmatmul.bf16.gmra.mxu3 %v1401_v4  ;;  %v918_v4 = vcvt.s32.f32 %v406_v37  ;;  %v3502_v37 = vld [vmem:[%s5065_s10 + $0x20] sm:$0xff] }
 0x24f   : > { %3584 = vperm.xlu2 %4492, %v3502_v37  }
 0x250   : > { %v2623_v56 = vpop.f32.mrf.mxu2  ;;  %v2287_v21 = vpop.f32.mrf.mxu0  ;;  %v1406_v51 = vpack.c.bf16 %v926_v31, %v918_v4 }
 0x251   : > { %v2792_v48 = vpop.f32.mrf.mxu3  ;;  %v2624_v20 = vadd.f32 %v2623_v56, %v2455_v49  ;;  %v2456_v23 = vpop.f32.mrf.mxu1  ;;  %v1409_v49 = vpack.c.bf16 %v929_v36, %v921_v0  ;;  %v3505_v56 = vld [vmem:[%s5065_s10 + $0x38] sm:$0xff]  ;;  %v3503_v0 = vld [vmem:[%s5065_s10 + $0x28] sm:$0xff] }
 0x252   : > { %v2457_v57 = vadd.f32 %v2456_v23, %v2287_v21  ;;  %3599 = vperm.xlu1 %4491, %v3505_v56   ;;  %v422_v21 = vunpack.c.0.s8 %v5117_v22 }
 0x253   : > { %v5110_v42 = vadd.f32 %v2792_v48, %v2624_v20  ;;  %v5126_v20 = vld [vmem:[%s4603_s11 + $0xb8] sm:$0xff] }
 0x254   : > { %v425_v61 = vunpack.c.0.s8 %v5126_v20  ;;  %v433_v12 = vunpack.c.1.s8 %v5126_v20 }
 0x255   : > { %5829 = vst [vmem:[#allocation24_spill] sm:$0xff] %v5110_v42 }
 0x257   : > { %3589 = vperm.xlu2 %4492, %v3503_v0   ;;  %v448_v0 = vunpack.c.3.s8 %v5123_v27 }
 0x258   : > { %v2625_v46 = vpop.f32.mrf.mxu2  ;;  %v2290_v55 = vpop.f32.mrf.mxu0 }
 0x259   : > { %v2794_v19 = vpop.f32.mrf.mxu3  ;;  %v2626_v52 = vadd.f32 %v2625_v46, %v2457_v57  ;;  %v2459_v33 = vpop.f32.mrf.mxu1  ;;  %v424_v57 = vunpack.c.0.s8 %v5123_v27 }
 0x25a   : > { %v2460_v48 = vadd.f32 %v2459_v33, %v2290_v55  ;;  %v944_v33 = vcvt.s32.f32 %v432_v45  ;;  %v439_v45 = vunpack.c.2.s8 %v5120_v26 }
 0x25b   : > { %v5114_v9 = vadd.f32 %v2794_v19, %v2626_v52  ;;  %2845 = vmatmul.bf16.gmra.mxu0 %v1406_v51  ;;  %v934_v19 = vcvt.s32.f32 %v422_v21  ;;  %v942_v51 = vcvt.s32.f32 %v430_v44  ;;  %v943_v52 = vcvt.s32.f32 %v431_v28 }
 0x25c   : > { %3014 = vmatmul.bf16.gmra.mxu1 %v1407_v13  ;;  %v935_v13 = vcvt.s32.f32 %v423_v30  ;;  %v936_v55 = vcvt.s32.f32 %v424_v57  ;;  %v438_v44 = vunpack.c.2.s8 %v5117_v22  ;;  %v446_v57 = vunpack.c.3.s8 %v5117_v22 }
 0x25d   : > { %5830 = vst [vmem:[#allocation25_spill] sm:$0xff] %v5114_v9  ;;  %3183 = vmatmul.bf16.gmra.mxu2 %v1408_v63  ;;  %v937_v63 = vcvt.s32.f32 %v425_v61  ;;  %v447_v61 = vunpack.c.3.s8 %v5120_v26  ;;  %v951_v26 = vcvt.s32.f32 %v439_v45  ;;  %v5157_v45 = vld [vmem:[%s4603_s11 + $0xe0] sm:$0xff] }
 0x25e   : > { %3352 = vmatmul.bf16.gmra.mxu3 %v1409_v49  ;;  %v945_v49 = vcvt.s32.f32 %v433_v12  ;;  %v950_v22 = vcvt.s32.f32 %v438_v44 }
 0x260   : > { %v2628_v23 = vpop.f32.mrf.mxu2  ;;  %v2292_v31 = vpop.f32.mrf.mxu0 }
 0x261   : > { %v2797_v3 = vpop.f32.mrf.mxu3  ;;  %v2629_v4 = vadd.f32 %v2628_v23, %v2460_v48  ;;  %v2461_v10 = vpop.f32.mrf.mxu1  ;;  %v1414_v48 = vpack.c.bf16 %v942_v51, %v934_v19  ;;  %v1415_v23 = vpack.c.bf16 %v943_v52, %v935_v13  ;;  %v449_v19 = vunpack.c.3.s8 %v5126_v20  ;;  %v3508_v51 = vld [vmem:[%s5065_s10 + $0x50] sm:$0xff] }
 0x262   : > { %v2462_v36 = vadd.f32 %v2461_v10, %v2292_v31  ;;  %v1416_v31 = vpack.c.bf16 %v944_v33, %v936_v55  ;;  %v1417_v10 = vpack.c.bf16 %v945_v49, %v937_v63  ;;  %3614 = vperm.xlu1 %4491, %v3508_v51   ;;  %v958_v55 = vcvt.s32.f32 %v446_v57 }
 0x263   : > { %v5137_v46 = vadd.f32 %v2797_v3, %v2629_v4  ;;  %v3507_v3 = vld [vmem:[%s5065_s10 + $0x48] sm:$0xff]  ;;  %v959_v33 = vcvt.s32.f32 %v447_v61  ;;  %v960_v49 = vcvt.s32.f32 %v448_v0 }
 0x264   : > { %3609 = vperm.xlu0 %4490, %v3507_v3   ;;  %v5160_v61 = vld [vmem:[%s4603_s11 + $0xe8] sm:$0xff] }
 0x265   : > { %5831 = vst [vmem:[#allocation26_spill] sm:$0xff] %v5137_v46  ;;  %v463_v51 = vunpack.c.1.s8 %v5160_v61 }
 0x268   : > { %v2630_v37 = vpop.f32.mrf.mxu2  ;;  %v2295_v42 = vpop.f32.mrf.mxu0 }
 0x269   : > { %v2799_v56 = vpop.f32.mrf.mxu3  ;;  %v2631_v9 = vadd.f32 %v2630_v37, %v2462_v36  ;;  %v2464_v41 = vpop.f32.mrf.mxu1  ;;  %v441_v36 = vunpack.c.2.s8 %v5126_v20  ;;  %v1423_v20 = vpack.c.bf16 %v959_v33, %v951_v26 }
 0x26a   : > { %v2465_v4 = vadd.f32 %v2464_v41, %v2295_v42  ;;  %v440_v41 = vunpack.c.2.s8 %v5123_v27 }
 0x26b   : > { %v5140_v21 = vadd.f32 %v2799_v56, %v2631_v9  ;;  %2850 = vmatmul.bf16.gmra.mxu0 %v1414_v48  ;;  %v953_v37 = vcvt.s32.f32 %v441_v36  ;;  %v961_v56 = vcvt.s32.f32 %v449_v19  ;;  %v462_v36 = vunpack.c.1.s8 %v5157_v45 }
 0x26c   : > { %3019 = vmatmul.bf16.gmra.mxu1 %v1415_v23  ;;  %v952_v63 = vcvt.s32.f32 %v440_v41  ;;  %v1422_v23 = vpack.c.bf16 %v958_v55, %v950_v22  ;;  %v5163_v41 = vld [vmem:[%s4603_s11 + $0xf0] sm:$0xff]  ;;  %v455_v19 = vunpack.c.0.s8 %v5160_v61 }
 0x26d   : > { %5832 = vst [vmem:[#allocation27_spill] sm:$0xff] %v5140_v21  ;;  %3188 = vmatmul.bf16.gmra.mxu2 %v1416_v31  ;;  %v1425_v44 = vpack.c.bf16 %v961_v56, %v953_v37  ;;  %v464_v33 = vunpack.c.1.s8 %v5163_v41  ;;  %v3510_v37 = vld [vmem:[%s5065_s10 + $0x60] sm:$0xff] }
 0x26e   : > { %3357 = vmatmul.bf16.gmra.mxu3 %v1417_v10  ;;  %3624 = vperm.xlu0 %4490, %v3510_v37  }
 0x270   : > { %v2633_v30 = vpop.f32.mrf.mxu2  ;;  %v2297_v9 = vpop.f32.mrf.mxu0 }
 0x271   : > { %v2802_v28 = vpop.f32.mrf.mxu3  ;;  %v2634_v42 = vadd.f32 %v2633_v30, %v2465_v4  ;;  %v2466_v12 = vpop.f32.mrf.mxu1  ;;  %v1424_v4 = vpack.c.bf16 %v960_v49, %v952_v63  ;;  %v3506_v30 = vld [vmem:[%s5065_s10 + $0x40] sm:$0xff] }
 0x272   : > { %v2467_v13 = vadd.f32 %v2466_v12, %v2297_v9  ;;  %3604 = vperm.xlu2 %4492, %v3506_v30   ;;  %v454_v9 = vunpack.c.0.s8 %v5157_v45 }
 0x273   : > { %v5151_v52 = vadd.f32 %v2802_v28, %v2634_v42  ;;  %v5166_v42 = vld [vmem:[%s4603_s11 + $0xf8] sm:$0xff] }
 0x274   : > { %v457_v63 = vunpack.c.0.s8 %v5166_v42  ;;  %v465_v49 = vunpack.c.1.s8 %v5166_v42  ;;  %v473_v37 = vunpack.c.2.s8 %v5166_v42 }
 0x275   : > { %5833 = vst [vmem:[#allocation28_spill] sm:$0xff] %v5151_v52 }
 0x278   : > { %v2635_v27 = vpop.f32.mrf.mxu2  ;;  %v2300_v10 = vpop.f32.mrf.mxu0 }
 0x279   : > { %v2804_v48 = vpop.f32.mrf.mxu3  ;;  %v2636_v31 = vadd.f32 %v2635_v27, %v2467_v13  ;;  %v2469_v3 = vpop.f32.mrf.mxu1  ;;  %v456_v13 = vunpack.c.0.s8 %v5163_v41 }
 0x27a   : > { %v2470_v28 = vadd.f32 %v2469_v3, %v2300_v10  ;;  %v976_v3 = vcvt.s32.f32 %v464_v33  ;;  %v471_v33 = vunpack.c.2.s8 %v5160_v61 }
 0x27b   : > { %v5154_v57 = vadd.f32 %v2804_v48, %v2636_v31  ;;  %2855 = vmatmul.bf16.gmra.mxu0 %v1422_v23  ;;  %v966_v48 = vcvt.s32.f32 %v454_v9  ;;  %v974_v23 = vcvt.s32.f32 %v462_v36  ;;  %v975_v31 = vcvt.s32.f32 %v463_v51 }
 0x27c   : > { %3024 = vmatmul.bf16.gmra.mxu1 %v1423_v20  ;;  %v967_v20 = vcvt.s32.f32 %v455_v19  ;;  %v968_v10 = vcvt.s32.f32 %v456_v13  ;;  %v470_v36 = vunpack.c.2.s8 %v5157_v45  ;;  %v478_v13 = vunpack.c.3.s8 %v5157_v45 }
 0x27d   : > { %5834 = vst [vmem:[#allocation29_spill] sm:$0xff] %v5154_v57  ;;  %3193 = vmatmul.bf16.gmra.mxu2 %v1424_v4  ;;  %v969_v4 = vcvt.s32.f32 %v457_v63  ;;  %v479_v63 = vunpack.c.3.s8 %v5160_v61  ;;  %v983_v61 = vcvt.s32.f32 %v471_v33  ;;  %v5197_v33 = vld [vmem:[%s4603_s11 + $0x120] sm:$0xff] }
 0x27e   : > { %3362 = vmatmul.bf16.gmra.mxu3 %v1425_v44  ;;  %v977_v44 = vcvt.s32.f32 %v465_v49  ;;  %v1431_v57 = vpack.c.bf16 %v975_v31, %v967_v20  ;;  %v982_v45 = vcvt.s32.f32 %v470_v36  ;;  %v990_v31 = vcvt.s32.f32 %v478_v13 }
 0x280   : > { %v2638_v12 = vpop.f32.mrf.mxu2  ;;  %v2302_v55 = vpop.f32.mrf.mxu0 }
 0x281   : > { %v2807_v0 = vpop.f32.mrf.mxu3  ;;  %v2639_v22 = vadd.f32 %v2638_v12, %v2470_v28  ;;  %v2471_v26 = vpop.f32.mrf.mxu1  ;;  %v1430_v12 = vpack.c.bf16 %v974_v23, %v966_v48  ;;  %v3509_v48 = vld [vmem:[%s5065_s10 + $0x58] sm:$0xff] }
 0x282   : > { %v2472_v56 = vadd.f32 %v2471_v26, %v2302_v55  ;;  %v1432_v55 = vpack.c.bf16 %v976_v3, %v968_v10  ;;  %v1433_v26 = vpack.c.bf16 %v977_v44, %v969_v4  ;;  %3619 = vperm.xlu2 %4492, %v3509_v48   ;;  %v991_v10 = vcvt.s32.f32 %v479_v63  ;;  %v5200_v63 = vld [vmem:[%s4603_s11 + $0x128] sm:$0xff] }
 0x283   : > { %v5177_v27 = vadd.f32 %v2807_v0, %v2639_v22  ;;  %v3511_v0 = vld [vmem:[%s5065_s10 + $0x68] sm:$0xff]  ;;  %v985_v44 = vcvt.s32.f32 %v473_v37  ;;  %v494_v37 = vunpack.c.1.s8 %v5197_v33  ;;  %v495_v48 = vunpack.c.1.s8 %v5200_v63 }
 0x284   : > { %3629 = vperm.xlu1 %4491, %v3511_v0  }
 0x285   : > { %5835 = vst [vmem:[#allocation30_spill] sm:$0xff] %v5177_v27 }
 0x288   : > { %v2640_v30 = vpop.f32.mrf.mxu2  ;;  %v2305_v21 = vpop.f32.mrf.mxu0 }
 0x289   : > { %v2809_v28 = vpop.f32.mrf.mxu3  ;;  %v2641_v52 = vadd.f32 %v2640_v30, %v2472_v56  ;;  %v2474_v46 = vpop.f32.mrf.mxu1  ;;  %v481_v56 = vunpack.c.3.s8 %v5166_v42  ;;  %v1439_v42 = vpack.c.bf16 %v991_v10, %v983_v61 }
 0x28a   : > { %v2475_v22 = vadd.f32 %v2474_v46, %v2305_v21  ;;  %v472_v46 = vunpack.c.2.s8 %v5163_v41 }
 0x28b   : > { %v5180_v9 = vadd.f32 %v2809_v28, %v2641_v52  ;;  %2860 = vmatmul.bf16.gmra.mxu0 %v1430_v12  ;;  %v993_v30 = vcvt.s32.f32 %v481_v56  ;;  %v1438_v12 = vpack.c.bf16 %v990_v31, %v982_v45  ;;  %v487_v56 = vunpack.c.0.s8 %v5200_v63 }
 0x28c   : > { %3029 = vmatmul.bf16.gmra.mxu1 %v1431_v57  ;;  %v480_v57 = vunpack.c.3.s8 %v5163_v41  ;;  %v984_v3 = vcvt.s32.f32 %v472_v46  ;;  %v5203_v46 = vld [vmem:[%s4603_s11 + $0x130] sm:$0xff] }
 0x28d   : > { %5836 = vst [vmem:[#allocation31_spill] sm:$0xff] %v5180_v9  ;;  %3198 = vmatmul.bf16.gmra.mxu2 %v1432_v55  ;;  %v1441_v36 = vpack.c.bf16 %v993_v30, %v985_v44  ;;  %v496_v10 = vunpack.c.1.s8 %v5203_v46  ;;  %v3514_v44 = vld [vmem:[%s5065_s10 + $0x80] sm:$0xff] }
 0x28e   : > { %3367 = vmatmul.bf16.gmra.mxu3 %v1433_v26  ;;  %v992_v4 = vcvt.s32.f32 %v480_v57  ;;  %3644 = vperm.xlu1 %4491, %v3514_v44   ;;  %v504_v44 = vunpack.c.2.s8 %v5203_v46 }
 0x290   : > { %v2643_v19 = vpop.f32.mrf.mxu2  ;;  %v2307_v52 = vpop.f32.mrf.mxu0 }
 0x291   : > { %v2812_v51 = vpop.f32.mrf.mxu3  ;;  %v2644_v21 = vadd.f32 %v2643_v19, %v2475_v22  ;;  %v2476_v49 = vpop.f32.mrf.mxu1  ;;  %v1440_v22 = vpack.c.bf16 %v992_v4, %v984_v3  ;;  %v3513_v19 = vld [vmem:[%s5065_s10 + $0x78] sm:$0xff] }
 0x292   : > { %v2477_v23 = vadd.f32 %v2476_v49, %v2307_v52  ;;  %3639 = vperm.xlu0 %4490, %v3513_v19   ;;  %v486_v52 = vunpack.c.0.s8 %v5197_v33 }
 0x293   : > { %v5191_v20 = vadd.f32 %v2812_v51, %v2644_v21  ;;  %v5206_v21 = vld [vmem:[%s4603_s11 + $0x138] sm:$0xff] }
 0x294   : > { %v489_v3 = vunpack.c.0.s8 %v5206_v21  ;;  %v497_v4 = vunpack.c.1.s8 %v5206_v21 }
 0x295   : > { %5837 = vst [vmem:[#allocation32_spill] sm:$0xff] %v5191_v20 }
 0x298   : > { %v2645_v41 = vpop.f32.mrf.mxu2  ;;  %v2310_v26 = vpop.f32.mrf.mxu0 }
 0x299   : > { %v2814_v28 = vpop.f32.mrf.mxu3  ;;  %v2646_v55 = vadd.f32 %v2645_v41, %v2477_v23  ;;  %v2479_v0 = vpop.f32.mrf.mxu1  ;;  %v488_v23 = vunpack.c.0.s8 %v5203_v46 }
 0x29a   : > { %v2480_v51 = vadd.f32 %v2479_v0, %v2310_v26  ;;  %v1008_v0 = vcvt.s32.f32 %v496_v10 }
 0x29b   : > { %v5194_v13 = vadd.f32 %v2814_v28, %v2646_v55  ;;  %2865 = vmatmul.bf16.gmra.mxu0 %v1438_v12  ;;  %v998_v28 = vcvt.s32.f32 %v486_v52  ;;  %v1006_v12 = vcvt.s32.f32 %v494_v37  ;;  %v1007_v55 = vcvt.s32.f32 %v495_v48  ;;  %v3565_v48 = vpop.permute.xlu0 %3564 }
 0x29c   : > { %3034 = vmatmul.bf16.gmra.mxu1 %v1439_v42  ;;  %v999_v42 = vcvt.s32.f32 %v487_v56  ;;  %v1000_v26 = vcvt.s32.f32 %v488_v23  ;;  %v502_v23 = vunpack.c.2.s8 %v5197_v33 }
 0x29d   : > { %5838 = vst [vmem:[#allocation33_spill] sm:$0xff] %v5194_v13  ;;  %3203 = vmatmul.bf16.gmra.mxu2 %v1440_v22  ;;  %v1001_v22 = vcvt.s32.f32 %v489_v3  ;;  %v510_v3 = vunpack.c.3.s8 %v5197_v33 }
 0x29e   : > { %3372 = vmatmul.bf16.gmra.mxu3 %v1441_v36  ;;  %v1009_v36 = vcvt.s32.f32 %v497_v4  ;;  %v1447_v13 = vpack.c.bf16 %v1007_v55, %v999_v42  ;;  %v503_v4 = vunpack.c.2.s8 %v5200_v63  ;;  %v1014_v55 = vcvt.s32.f32 %v502_v23 }
 0x2a0   : > { %v2648_v49 = vpop.f32.mrf.mxu2  ;;  %v2312_v31 = vpop.f32.mrf.mxu0 }
 0x2a1   : > { %v2817_v57 = vpop.f32.mrf.mxu3  ;;  %v2649_v45 = vadd.f32 %v2648_v49, %v2480_v51  ;;  %v2481_v61 = vpop.f32.mrf.mxu1  ;;  %v1446_v49 = vpack.c.bf16 %v1006_v12, %v998_v28  ;;  %v513_v28 = vunpack.c.3.s8 %v5206_v21  ;;  %v3516_v12 = vld [vmem:[%s5065_s10 + $0x90] sm:$0xff] }
 0x2a2   : > { %v2482_v30 = vadd.f32 %v2481_v61, %v2312_v31  ;;  %v1448_v31 = vpack.c.bf16 %v1008_v0, %v1000_v26  ;;  %v1449_v61 = vpack.c.bf16 %v1009_v36, %v1001_v22  ;;  %3654 = vperm.xlu0 %4490, %v3516_v12   ;;  %v1022_v26 = vcvt.s32.f32 %v510_v3  ;;  %v3517_v3 = vld [vmem:[%s5065_s10 + $0x98] sm:$0xff] }
 0x2a3   : > { %v5217_v41 = vadd.f32 %v2817_v57, %v2649_v45  ;;  %v3512_v57 = vld [vmem:[%s5065_s10 + $0x70] sm:$0xff]  ;;  %v1015_v0 = vcvt.s32.f32 %v503_v4  ;;  %v3570_v4 = vpop.permute.xlu0 %3569  ;;  %3659 = vperm.xlu1 %4491, %v3517_v3  }
 0x2a4   : > { %3634 = vperm.xlu2 %4492, %v3512_v57   ;;  %v1454_v57 = vpack.c.bf16 %v1022_v26, %v1014_v55 }
 0x2a8   : > { %v2650_v19 = vpop.f32.mrf.mxu2  ;;  %v2831_v9 = vpop.f32.mrf.mxu0 }
 0x2a9   : > { %v2819_v51 = vpop.f32.mrf.mxu3  ;;  %v2651_v20 = vadd.f32 %v2650_v19, %v2482_v30  ;;  %v3000_v27 = vpop.f32.mrf.mxu1  ;;  %v2832_v37 = vadd.f32 %v2831_v9, %v4721_v5  ;;  %v512_v30 = vunpack.c.3.s8 %v5203_v46  ;;  %v1016_v46 = vcvt.s32.f32 %v504_v44 }
 0x2ab   : > { %v5220_v52 = vadd.f32 %v2819_v51, %v2651_v20  ;;  %2870 = vmatmul.bf16.gmra.mxu0 %v1446_v49  ;;  %v3001_v56 = vadd.f32 %v3000_v27, %v2832_v37  ;;  %v511_v20 = vunpack.c.3.s8 %v5200_v63  ;;  %v505_v27 = vunpack.c.2.s8 %v5206_v21  ;;  %v5236_v63 = vld [vmem:[%s5805_s3] ss:$0 sm:$0xff] }
 0x2ac   : > { %3039 = vmatmul.bf16.gmra.mxu1 %v1447_v13  ;;  %v1024_v19 = vcvt.s32.f32 %v512_v30  ;;  %v1025_v21 = vcvt.s32.f32 %v513_v28  ;;  %v5256_v30 = vld [vmem:[%s4603_s11 + $0x170] sm:$0xff] }
 0x2ad   : > { %3208 = vmatmul.bf16.gmra.mxu2 %v1448_v31  ;;  %v1023_v22 = vcvt.s32.f32 %v511_v20  ;;  %v1017_v51 = vcvt.s32.f32 %v505_v27  ;;  %v5259_v27 = vld [vmem:[%s4603_s11 + $0x178] sm:$0xff] }
 0x2ae   : > { %3377 = vmatmul.bf16.gmra.mxu3 %v1449_v61 }
 0x2af   : > { %v1455_v37 = vpack.c.bf16 %v1023_v22, %v1015_v0 }
 0x2b0   : > { %v3169_v45 = vpop.f32.mrf.mxu2  ;;  %v2833_v9 = vpop.f32.mrf.mxu0 }
 0x2b1   : > { %v3338_v10 = vpop.f32.mrf.mxu3  ;;  %v3170_v5 = vadd.f32 %v3169_v45, %v3001_v56  ;;  %v3002_v13 = vpop.f32.mrf.mxu1  ;;  %v2834_v33 = vadd.f32 %v2833_v9, %v4723_v24  ;;  %v1456_v45 = vpack.c.bf16 %v1024_v19, %v1016_v46  ;;  %v520_v46 = vunpack.c.0.s8 %v5256_v30 }
 0x2b3   : > { %v3339_v42 = vadd.f32 %v3338_v10, %v3170_v5  ;;  %v3003_v24 = vadd.f32 %v3002_v13, %v2834_v33  ;;  %v1457_v10 = vpack.c.bf16 %v1025_v21, %v1017_v51  ;;  %v5250_v5 = vld [vmem:[%s4603_s11 + $0x160] sm:$0xff]  ;;  %v5253_v13 = vld [vmem:[%s4603_s11 + $0x168] sm:$0xff]  ;;  %v528_v21 = vunpack.c.1.s8 %v5256_v30 }
 0x2b4   : > { %v526_v26 = vunpack.c.1.s8 %v5250_v5  ;;  %v519_v0 = vunpack.c.0.s8 %v5253_v13  ;;  %v527_v22 = vunpack.c.1.s8 %v5253_v13 }
 0x2b5   : > { %v3882_v36 = vmul.f32 %v3565_v48, %v3339_v42  ;;  %v3575_v42 = vpop.permute.xlu1 %3574  ;;  %v1040_v3 = vcvt.s32.f32 %v528_v21 }
 0x2b7   : > { %v3950_v49 = vadd.f32 %v5236_v63, %v3882_v36 }
 0x2b8   : > { %v3171_v31 = vpop.f32.mrf.mxu2  ;;  %v2836_v48 = vpop.f32.mrf.mxu0 }
 0x2b9   : > { %v3340_v61 = vpop.f32.mrf.mxu3  ;;  %4014 = vst [vmem:[%s5243_s18] sm:$0xff] %v3950_v49  ;;  %v3172_v56 = vadd.f32 %v3171_v31, %v3003_v24  ;;  %v3005_v23 = vpop.f32.mrf.mxu1  ;;  %v2837_v44 = vadd.f32 %v2836_v48, %v4745_v43  ;;  %v518_v43 = vunpack.c.0.s8 %v5250_v5  ;;  %v521_v24 = vunpack.c.0.s8 %v5259_v27  ;;  %v3515_v31 = vld [vmem:[%s5065_s10 + $0x88] sm:$0xff] }
 0x2ba   : > { %v529_v49 = vunpack.c.1.s8 %v5259_v27  ;;  %3649 = vperm.xlu2 %4492, %v3515_v31   ;;  %v1031_v48 = vcvt.s32.f32 %v519_v0  ;;  %v534_v31 = vunpack.c.2.s8 %v5250_v5 }
 0x2bb   : > { %v3341_v20 = vadd.f32 %v3340_v61, %v3172_v56  ;;  %2875 = vmatmul.bf16.gmra.mxu0 %v1454_v57  ;;  %v3006_v28 = vadd.f32 %v3005_v23, %v2837_v44  ;;  %v1038_v56 = vcvt.s32.f32 %v526_v26  ;;  %v1039_v23 = vcvt.s32.f32 %v527_v22  ;;  %v3519_v22 = vld [vmem:[%s5065_s10 + $0xa8] sm:$0xff] }
 0x2bc   : > { %3044 = vmatmul.bf16.gmra.mxu1 %v1455_v37  ;;  %v1030_v37 = vcvt.s32.f32 %v518_v43  ;;  %3669 = vperm.xlu0 %4490, %v3519_v22  }
 0x2bd   : > { %v3883_v9 = vmul.f32 %v3570_v4, %v3341_v20  ;;  %3213 = vmatmul.bf16.gmra.mxu2 %v1456_v45  ;;  %v1032_v45 = vcvt.s32.f32 %v520_v46  ;;  %v1033_v4 = vcvt.s32.f32 %v521_v24  ;;  %v1041_v20 = vcvt.s32.f32 %v529_v49  ;;  %v3580_v46 = vpop.permute.xlu1 %3579  ;;  %v3585_v49 = vpop.permute.xlu2 %3584 }
 0x2be   : > { %3382 = vmatmul.bf16.gmra.mxu3 %v1457_v10 }
 0x2bf   : > { %v3951_v12 = vadd.f32 %v5236_v63, %v3883_v9  ;;  %v1464_v26 = vpack.c.bf16 %v1040_v3, %v1032_v45  ;;  %v1465_v0 = vpack.c.bf16 %v1041_v20, %v1033_v4  ;;  %v544_v3 = vunpack.c.3.s8 %v5256_v30 }
 0x2c0   : > { %v3174_v33 = vpop.f32.mrf.mxu2  ;;  %v2838_v19 = vpop.f32.mrf.mxu0  ;;  %v537_v4 = vunpack.c.2.s8 %v5259_v27  ;;  %v545_v20 = vunpack.c.3.s8 %v5259_v27 }
 0x2c1   : > { %v3343_v55 = vpop.f32.mrf.mxu3  ;;  %4015 = vst [vmem:[%s5243_s18 + $0x8] sm:$0xff] %v3951_v12  ;;  %v3175_v36 = vadd.f32 %v3174_v33, %v3006_v28  ;;  %v3007_v51 = vpop.f32.mrf.mxu1  ;;  %v2839_v57 = vadd.f32 %v2838_v19, %v4747_v62  ;;  %v1462_v33 = vpack.c.bf16 %v1038_v56, %v1030_v37  ;;  %v542_v37 = vunpack.c.3.s8 %v5250_v5 }
 0x2c2   : > { %v535_v56 = vunpack.c.2.s8 %v5253_v13 }
 0x2c3   : > { %v3344_v61 = vadd.f32 %v3343_v55, %v3175_v36  ;;  %v3008_v44 = vadd.f32 %v3007_v51, %v2839_v57  ;;  %v1463_v55 = vpack.c.bf16 %v1039_v23, %v1031_v48  ;;  %v536_v48 = vunpack.c.2.s8 %v5256_v30 }
 0x2c4   : > { %v1057_v30 = vcvt.s32.f32 %v545_v20 }
 0x2c5   : > { %v3884_v10 = vmul.f32 %v3575_v42, %v3344_v61 }
 0x2c7   : > { %v3952_v9 = vadd.f32 %v5236_v63, %v3884_v10 }
 0x2c8   : > { %v3176_v28 = vpop.f32.mrf.mxu2  ;;  %v2841_v36 = vpop.f32.mrf.mxu0 }
 0x2c9   : > { %v3345_v12 = vpop.f32.mrf.mxu3  ;;  %4016 = vst [vmem:[%s5243_s18 + $0x10] sm:$0xff] %v3952_v9  ;;  %v3177_v62 = vadd.f32 %v3176_v28, %v3008_v44  ;;  %v3010_v43 = vpop.f32.mrf.mxu1  ;;  %v2842_v19 = vadd.f32 %v2841_v36, %v4766_v17  ;;  %v543_v17 = vunpack.c.3.s8 %v5253_v13  ;;  %v3520_v44 = vld [vmem:[%s5065_s10 + $0xb0] sm:$0xff]  ;;  %v1046_v28 = vcvt.s32.f32 %v534_v31 }
 0x2ca   : > { %3674 = vperm.xlu1 %4491, %v3520_v44   ;;  %v1054_v13 = vcvt.s32.f32 %v542_v37  ;;  %v1056_v36 = vcvt.s32.f32 %v544_v3  ;;  %v3590_v31 = vpop.permute.xlu2 %3589  ;;  %v5294_v37 = vld [vmem:[%s4603_s11 + $0x1a0] sm:$0xff] }
 0x2cb   : > { %v3346_v42 = vadd.f32 %v3345_v12, %v3177_v62  ;;  %2880 = vmatmul.bf16.gmra.mxu0 %v1462_v33  ;;  %v3011_v21 = vadd.f32 %v3010_v43, %v2842_v19  ;;  %v1047_v12 = vcvt.s32.f32 %v535_v56  ;;  %v1055_v33 = vcvt.s32.f32 %v543_v17  ;;  %v5297_v17 = vld [vmem:[%s4603_s11 + $0x1a8] sm:$0xff] }
 0x2cc   : > { %3049 = vmatmul.bf16.gmra.mxu1 %v1463_v55  ;;  %v1048_v55 = vcvt.s32.f32 %v536_v48  ;;  %v1049_v43 = vcvt.s32.f32 %v537_v4  ;;  %v5300_v48 = vld [vmem:[%s4603_s11 + $0x1b0] sm:$0xff]  ;;  %v558_v20 = vunpack.c.1.s8 %v5294_v37  ;;  %v551_v44 = vunpack.c.0.s8 %v5297_v17 }
 0x2cd   : > { %v3885_v51 = vmul.f32 %v3580_v46, %v3346_v42  ;;  %3218 = vmatmul.bf16.gmra.mxu2 %v1464_v26  ;;  %v1470_v46 = vpack.c.bf16 %v1054_v13, %v1046_v28  ;;  %v1471_v42 = vpack.c.bf16 %v1055_v33, %v1047_v12  ;;  %v560_v33 = vunpack.c.1.s8 %v5300_v48 }
 0x2ce   : > { %3387 = vmatmul.bf16.gmra.mxu3 %v1465_v0 }
 0x2cf   : > { %v3953_v24 = vadd.f32 %v5236_v63, %v3885_v51 }
 0x2d0   : > { %v3179_v61 = vpop.f32.mrf.mxu2  ;;  %v2843_v45 = vpop.f32.mrf.mxu0 }
 0x2d1   : > { %v3348_v57 = vpop.f32.mrf.mxu3  ;;  %4017 = vst [vmem:[%s5243_s18 + $0x18] sm:$0xff] %v3953_v24  ;;  %v3180_v23 = vadd.f32 %v3179_v61, %v3011_v21  ;;  %v3012_v10 = vpop.f32.mrf.mxu1  ;;  %v2844_v5 = vadd.f32 %v2843_v45, %v4771_v38  ;;  %v1472_v21 = vpack.c.bf16 %v1056_v36, %v1048_v55  ;;  %v1473_v24 = vpack.c.bf16 %v1057_v30, %v1049_v43  ;;  %v3522_v36 = vld [vmem:[%s5065_s10 + $0xc0] sm:$0xff] }
 0x2d2   : > { %v3595_v43 = vpop.permute.xlu0 %3594  ;;  %3684 = vperm.xlu0 %4490, %v3522_v36   ;;  %v567_v36 = vunpack.c.2.s8 %v5297_v17 }
 0x2d3   : > { %v3349_v9 = vadd.f32 %v3348_v57, %v3180_v23  ;;  %v3013_v26 = vadd.f32 %v3012_v10, %v2844_v5  ;;  %v5303_v23 = vld [vmem:[%s4603_s11 + $0x1b8] sm:$0xff]  ;;  %v552_v5 = vunpack.c.0.s8 %v5300_v48 }
 0x2d4   : > { %v553_v55 = vunpack.c.0.s8 %v5303_v23 }
 0x2d5   : > { %v3886_v62 = vmul.f32 %v3585_v49, %v3349_v9  ;;  %v3518_v49 = vld [vmem:[%s5065_s10 + $0xa0] sm:$0xff]  ;;  %v559_v9 = vunpack.c.1.s8 %v5297_v17 }
 0x2d6   : > { %3664 = vperm.xlu2 %4492, %v3518_v49  }
 0x2d7   : > { %v3954_v0 = vadd.f32 %v5236_v63, %v3886_v62  ;;  %v561_v62 = vunpack.c.1.s8 %v5303_v23 }
 0x2d8   : > { %v3181_v27 = vpop.f32.mrf.mxu2  ;;  %v2846_v19 = vpop.f32.mrf.mxu0 }
 0x2d9   : > { %v3350_v22 = vpop.f32.mrf.mxu3  ;;  %4018 = vst [vmem:[%s5243_s18 + $0x20] sm:$0xff] %v3954_v0  ;;  %v3182_v38 = vadd.f32 %v3181_v27, %v3013_v26  ;;  %v3015_v51 = vpop.f32.mrf.mxu1  ;;  %v2847_v57 = vadd.f32 %v2846_v19, %v4777_v58  ;;  %v550_v58 = vunpack.c.0.s8 %v5294_v37  ;;  %v1070_v27 = vcvt.s32.f32 %v558_v20 }
 0x2da   : > { %v1072_v19 = vcvt.s32.f32 %v560_v33  ;;  %v3600_v20 = vpop.permute.xlu1 %3599 }
 0x2db   : > { %v3351_v61 = vadd.f32 %v3350_v22, %v3182_v38  ;;  %2885 = vmatmul.bf16.gmra.mxu0 %v1470_v46  ;;  %v3016_v45 = vadd.f32 %v3015_v51, %v2847_v57  ;;  %v1062_v0 = vcvt.s32.f32 %v550_v58  ;;  %v1063_v22 = vcvt.s32.f32 %v551_v44 }
 0x2dc   : > { %3054 = vmatmul.bf16.gmra.mxu1 %v1471_v42  ;;  %v1071_v46 = vcvt.s32.f32 %v559_v9  ;;  %v1064_v42 = vcvt.s32.f32 %v552_v5  ;;  %v1065_v51 = vcvt.s32.f32 %v553_v55 }
 0x2dd   : > { %v3887_v56 = vmul.f32 %v3590_v31, %v3351_v61  ;;  %3223 = vmatmul.bf16.gmra.mxu2 %v1472_v21  ;;  %v1073_v21 = vcvt.s32.f32 %v561_v62  ;;  %v1478_v57 = vpack.c.bf16 %v1070_v27, %v1062_v0  ;;  %v574_v62 = vunpack.c.3.s8 %v5294_v37 }
 0x2de   : > { %3392 = vmatmul.bf16.gmra.mxu3 %v1473_v24  ;;  %v1480_v58 = vpack.c.bf16 %v1072_v19, %v1064_v42  ;;  %v576_v27 = vunpack.c.3.s8 %v5300_v48  ;;  %v3521_v42 = vld [vmem:[%s5065_s10 + $0xb8] sm:$0xff] }
 0x2df   : > { %v3955_v10 = vadd.f32 %v5236_v63, %v3887_v56  ;;  %v1479_v56 = vpack.c.bf16 %v1071_v46, %v1063_v22  ;;  %v569_v22 = vunpack.c.2.s8 %v5303_v23  ;;  %v577_v46 = vunpack.c.3.s8 %v5303_v23  ;;  %3679 = vperm.xlu2 %4492, %v3521_v42  }
 0x2e0   : > { %v3184_v3 = vpop.f32.mrf.mxu2  ;;  %v2848_v13 = vpop.f32.mrf.mxu0 }
 0x2e1   : > { %v3353_v4 = vpop.f32.mrf.mxu3  ;;  %4019 = vst [vmem:[%s5243_s18 + $0x28] sm:$0xff] %v3955_v10  ;;  %v3185_v28 = vadd.f32 %v3184_v3, %v3016_v45  ;;  %v3017_v12 = vpop.f32.mrf.mxu1  ;;  %v2849_v26 = vadd.f32 %v2848_v13, %v4779_v15  ;;  %v1481_v3 = vpack.c.bf16 %v1073_v21, %v1065_v51  ;;  %v1086_v51 = vcvt.s32.f32 %v574_v62  ;;  %v5344_v62 = vld [vmem:[%s4603_s11 + $0x1f0] sm:$0xff] }
 0x2e2   : > { %v1079_v21 = vcvt.s32.f32 %v567_v36  ;;  %v5347_v36 = vld [vmem:[%s4603_s11 + $0x1f8] sm:$0xff] }
 0x2e3   : > { %v3354_v30 = vadd.f32 %v3353_v4, %v3185_v28  ;;  %v3018_v24 = vadd.f32 %v3017_v12, %v2849_v26  ;;  %v3523_v4 = vld [vmem:[%s5065_s10 + $0xc8] sm:$0xff]  ;;  %v566_v12 = vunpack.c.2.s8 %v5294_v37 }
 0x2e4   : > { %3689 = vperm.xlu1 %4491, %v3523_v4  }
 0x2e5   : > { %v3888_v38 = vmul.f32 %v3595_v43, %v3354_v30  ;;  %v575_v43 = vunpack.c.3.s8 %v5297_v17  ;;  %v1078_v17 = vcvt.s32.f32 %v566_v12  ;;  %v5338_v12 = vld [vmem:[%s4603_s11 + $0x1e0] sm:$0xff] }
 0x2e7   : > { %v3956_v49 = vadd.f32 %v5236_v63, %v3888_v38  ;;  %v3605_v38 = vpop.permute.xlu2 %3604 }
 0x2e8   : > { %v3186_v31 = vpop.f32.mrf.mxu2  ;;  %v2851_v45 = vpop.f32.mrf.mxu0 }
 0x2e9   : > { %v3355_v61 = vpop.f32.mrf.mxu3  ;;  %4020 = vst [vmem:[%s5243_s18 + $0x30] sm:$0xff] %v3956_v49  ;;  %v3187_v15 = vadd.f32 %v3186_v31, %v3018_v24  ;;  %v3020_v10 = vpop.f32.mrf.mxu1  ;;  %v2852_v9 = vadd.f32 %v2851_v45, %v4781_v32  ;;  %v568_v32 = vunpack.c.2.s8 %v5300_v48  ;;  %v1087_v24 = vcvt.s32.f32 %v575_v43 }
 0x2ea   : > { %v1081_v48 = vcvt.s32.f32 %v569_v22 }
 0x2eb   : > { %v3356_v44 = vadd.f32 %v3355_v61, %v3187_v15  ;;  %2890 = vmatmul.bf16.gmra.mxu0 %v1478_v57  ;;  %v3021_v28 = vadd.f32 %v3020_v10, %v2852_v9  ;;  %v1080_v49 = vcvt.s32.f32 %v568_v32  ;;  %v1088_v61 = vcvt.s32.f32 %v576_v27  ;;  %v3525_v9 = vld [vmem:[%s5065_s10 + $0xd8] sm:$0xff] }
 0x2ec   : > { %3059 = vmatmul.bf16.gmra.mxu1 %v1479_v56  ;;  %v1089_v57 = vcvt.s32.f32 %v577_v46  ;;  %v1486_v10 = vpack.c.bf16 %v1086_v51, %v1078_v17  ;;  %3699 = vperm.xlu0 %4490, %v3525_v9   ;;  %v584_v46 = vunpack.c.0.s8 %v5344_v62  ;;  %v585_v17 = vunpack.c.0.s8 %v5347_v36 }
 0x2ed   : > { %v3889_v5 = vmul.f32 %v3600_v20, %v3356_v44  ;;  %3228 = vmatmul.bf16.gmra.mxu2 %v1480_v58  ;;  %v1487_v58 = vpack.c.bf16 %v1087_v24, %v1079_v21  ;;  %v1488_v20 = vpack.c.bf16 %v1088_v61, %v1080_v49  ;;  %v593_v51 = vunpack.c.1.s8 %v5347_v36  ;;  %v3526_v21 = vld [vmem:[%s5065_s10 + $0xe0] sm:$0xff]  ;;  %v3615_v24 = vpop.permute.xlu1 %3614 }
 0x2ee   : > { %3397 = vmatmul.bf16.gmra.mxu3 %v1481_v3  ;;  %v1489_v44 = vpack.c.bf16 %v1089_v57, %v1081_v48  ;;  %3704 = vperm.xlu1 %4491, %v3526_v21  }
 0x2ef   : > { %v3957_v13 = vadd.f32 %v5236_v63, %v3889_v5  ;;  %v3610_v5 = vpop.permute.xlu0 %3609 }
 0x2f0   : > { %v3189_v33 = vpop.f32.mrf.mxu2  ;;  %v2853_v26 = vpop.f32.mrf.mxu0 }
 0x2f1   : > { %v3358_v55 = vpop.f32.mrf.mxu3  ;;  %4021 = vst [vmem:[%s5243_s18 + $0x38] sm:$0xff] %v3957_v13  ;;  %v3190_v30 = vadd.f32 %v3189_v33, %v3021_v28  ;;  %v3022_v0 = vpop.f32.mrf.mxu1  ;;  %v2854_v19 = vadd.f32 %v2853_v26, %v4783_v53 }
 0x2f3   : > { %v3359_v37 = vadd.f32 %v3358_v55, %v3190_v30  ;;  %v3023_v56 = vadd.f32 %v3022_v0, %v2854_v19  ;;  %v5341_v55 = vld [vmem:[%s4603_s11 + $0x1e8] sm:$0xff]  ;;  %v590_v0 = vunpack.c.1.s8 %v5338_v12  ;;  %v592_v19 = vunpack.c.1.s8 %v5344_v62 }
 0x2f4   : > { %v583_v27 = vunpack.c.0.s8 %v5341_v55  ;;  %v591_v22 = vunpack.c.1.s8 %v5341_v55 }
 0x2f5   : > { %v3890_v31 = vmul.f32 %v3605_v38, %v3359_v37  ;;  %v1102_v48 = vcvt.s32.f32 %v590_v0 }
 0x2f6   : > { %v1095_v57 = vcvt.s32.f32 %v583_v27 }
 0x2f7   : > { %v3958_v23 = vadd.f32 %v5236_v63, %v3890_v31 }
 0x2f8   : > { %v3191_v15 = vpop.f32.mrf.mxu2  ;;  %v2856_v3 = vpop.f32.mrf.mxu0 }
 0x2f9   : > { %v3360_v45 = vpop.f32.mrf.mxu3  ;;  %4022 = vst [vmem:[%s5243_s18 + $0x40] sm:$0xff] %v3958_v23  ;;  %v3192_v53 = vadd.f32 %v3191_v15, %v3023_v56  ;;  %v3025_v4 = vpop.f32.mrf.mxu1  ;;  %v2857_v13 = vadd.f32 %v2856_v3, %v4805_v11  ;;  %v582_v11 = vunpack.c.0.s8 %v5338_v12  ;;  %v1103_v56 = vcvt.s32.f32 %v591_v22 }
 0x2fa   : > { %v1096_v23 = vcvt.s32.f32 %v584_v46  ;;  %v598_v22 = vunpack.c.2.s8 %v5338_v12 }
 0x2fb   : > { %v3361_v28 = vadd.f32 %v3360_v45, %v3192_v53  ;;  %2895 = vmatmul.bf16.gmra.mxu0 %v1486_v10  ;;  %v3026_v43 = vadd.f32 %v3025_v4, %v2857_v13  ;;  %v1094_v61 = vcvt.s32.f32 %v582_v11  ;;  %v1104_v45 = vcvt.s32.f32 %v592_v19 }
 0x2fc   : > { %3064 = vmatmul.bf16.gmra.mxu1 %v1487_v58  ;;  %v1097_v10 = vcvt.s32.f32 %v585_v17  ;;  %v1105_v58 = vcvt.s32.f32 %v593_v51  ;;  %v1495_v9 = vpack.c.bf16 %v1103_v56, %v1095_v57  ;;  %v607_v19 = vunpack.c.3.s8 %v5341_v55 }
 0x2fd   : > { %v3891_v33 = vmul.f32 %v3610_v5, %v3361_v28  ;;  %3233 = vmatmul.bf16.gmra.mxu2 %v1488_v20  ;;  %v1496_v13 = vpack.c.bf16 %v1104_v45, %v1096_v23 }
 0x2fe   : > { %3402 = vmatmul.bf16.gmra.mxu3 %v1489_v44  ;;  %v1494_v44 = vpack.c.bf16 %v1102_v48, %v1094_v61  ;;  %v3528_v61 = vld [vmem:[%s5065_s10 + $0xf0] sm:$0xff]  ;;  %v3625_v48 = vpop.permute.xlu0 %3624 }
 0x2ff   : > { %v3959_v32 = vadd.f32 %v5236_v63, %v3891_v33  ;;  %v1497_v33 = vpack.c.bf16 %v1105_v58, %v1097_v10  ;;  %3714 = vperm.xlu0 %4490, %v3528_v61  }
 0x300   : > { %v3194_v30 = vpop.f32.mrf.mxu2  ;;  %v2858_v38 = vpop.f32.mrf.mxu0 }
 0x301   : > { %v3363_v26 = vpop.f32.mrf.mxu3  ;;  %4023 = vst [vmem:[%s5243_s18 + $0x48] sm:$0xff] %v3959_v32  ;;  %v3195_v42 = vadd.f32 %v3194_v30, %v3026_v43  ;;  %v3027_v37 = vpop.f32.mrf.mxu1  ;;  %v2859_v31 = vadd.f32 %v2858_v38, %v4807_v34  ;;  %v3524_v43 = vld [vmem:[%s5065_s10 + $0xd0] sm:$0xff]  ;;  %v606_v38 = vunpack.c.3.s8 %v5338_v12 }
 0x302   : > { %v3620_v32 = vpop.permute.xlu2 %3619  ;;  %3694 = vperm.xlu2 %4492, %v3524_v43   ;;  %v3630_v43 = vpop.permute.xlu1 %3629 }
 0x303   : > { %v3364_v49 = vadd.f32 %v3363_v26, %v3195_v42  ;;  %v3028_v53 = vadd.f32 %v3027_v37, %v2859_v31  ;;  %v599_v37 = vunpack.c.2.s8 %v5341_v55  ;;  %v609_v31 = vunpack.c.3.s8 %v5347_v36 }
 0x304   : > { %v1110_v55 = vcvt.s32.f32 %v598_v22  ;;  %v1118_v56 = vcvt.s32.f32 %v606_v38  ;;  %v5391_v22 = vld [vmem:[%s4603_s11 + $0x238] sm:$0xff] }
 0x305   : > { %v3892_v15 = vmul.f32 %v3615_v24, %v3364_v49  ;;  %v608_v24 = vunpack.c.3.s8 %v5344_v62  ;;  %v601_v49 = vunpack.c.2.s8 %v5347_v36  ;;  %v1111_v23 = vcvt.s32.f32 %v599_v37 }
 0x306   : > { %v617_v61 = vunpack.c.0.s8 %v5391_v22 }
 0x307   : > { %v3960_v3 = vadd.f32 %v5236_v63, %v3892_v15  ;;  %v1119_v15 = vcvt.s32.f32 %v607_v19  ;;  %v1120_v58 = vcvt.s32.f32 %v608_v24 }
 0x308   : > { %v3196_v4 = vpop.f32.mrf.mxu2  ;;  %v2861_v5 = vpop.f32.mrf.mxu0 }
 0x309   : > { %v3365_v20 = vpop.f32.mrf.mxu3  ;;  %4024 = vst [vmem:[%s5243_s18 + $0x50] sm:$0xff] %v3960_v3  ;;  %v3197_v34 = vadd.f32 %v3196_v4, %v3028_v53  ;;  %v3030_v28 = vpop.f32.mrf.mxu1  ;;  %v2862_v30 = vadd.f32 %v2861_v5, %v4826_v60  ;;  %v600_v60 = vunpack.c.2.s8 %v5344_v62  ;;  %v1113_v62 = vcvt.s32.f32 %v601_v49 }
 0x30a   : > { %v1121_v53 = vcvt.s32.f32 %v609_v31 }
 0x30b   : > { %v3366_v11 = vadd.f32 %v3365_v20, %v3197_v34  ;;  %2900 = vmatmul.bf16.gmra.mxu0 %v1494_v44  ;;  %v3031_v0 = vadd.f32 %v3030_v28, %v2862_v30  ;;  %v1112_v45 = vcvt.s32.f32 %v600_v60  ;;  %v1502_v44 = vpack.c.bf16 %v1118_v56, %v1110_v55  ;;  %v5382_v30 = vld [vmem:[%s4603_s11 + $0x220] sm:$0xff]  ;;  %v3635_v55 = vpop.permute.xlu2 %3634 }
 0x30c   : > { %3069 = vmatmul.bf16.gmra.mxu1 %v1495_v9  ;;  %v1503_v9 = vpack.c.bf16 %v1119_v15, %v1111_v23  ;;  %v622_v19 = vunpack.c.1.s8 %v5382_v30 }
 0x30d   : > { %v3893_v26 = vmul.f32 %v3620_v32, %v3366_v11  ;;  %3238 = vmatmul.bf16.gmra.mxu2 %v1496_v13  ;;  %v1504_v28 = vpack.c.bf16 %v1120_v58, %v1112_v45  ;;  %v1505_v13 = vpack.c.bf16 %v1121_v53, %v1113_v62 }
 0x30e   : > { %3407 = vmatmul.bf16.gmra.mxu3 %v1497_v33  ;;  %v3529_v33 = vld [vmem:[%s5065_s10 + $0xf8] sm:$0xff]  ;;  %v1134_v45 = vcvt.s32.f32 %v622_v19 }
 0x30f   : > { %v3961_v27 = vadd.f32 %v5236_v63, %v3893_v26  ;;  %3719 = vperm.xlu1 %4491, %v3529_v33  }
 0x310   : > { %v3199_v46 = vpop.f32.mrf.mxu2  ;;  %v2863_v51 = vpop.f32.mrf.mxu0 }
 0x311   : > { %v3368_v42 = vpop.f32.mrf.mxu3  ;;  %4025 = vst [vmem:[%s5243_s18 + $0x58] sm:$0xff] %v3961_v27  ;;  %v3200_v17 = vadd.f32 %v3199_v46, %v3031_v0  ;;  %v3032_v21 = vpop.f32.mrf.mxu1  ;;  %v2864_v57 = vadd.f32 %v2863_v51, %v4831_v16  ;;  %v5385_v0 = vld [vmem:[%s4603_s11 + $0x228] sm:$0xff]  ;;  %v5388_v27 = vld [vmem:[%s4603_s11 + $0x230] sm:$0xff] }
 0x312   : > { %v615_v60 = vunpack.c.0.s8 %v5385_v0  ;;  %v616_v51 = vunpack.c.0.s8 %v5388_v27  ;;  %v624_v31 = vunpack.c.1.s8 %v5388_v27 }
 0x313   : > { %v3369_v12 = vadd.f32 %v3368_v42, %v3200_v17  ;;  %v3033_v3 = vadd.f32 %v3032_v21, %v2864_v57  ;;  %v623_v17 = vunpack.c.1.s8 %v5385_v0  ;;  %v3531_v57 = vld [vmem:[%s5065_s10 + $0x108] sm:$0xff] }
 0x314   : > { %3729 = vperm.xlu0 %4490, %v3531_v57   ;;  %v1128_v62 = vcvt.s32.f32 %v616_v51  ;;  %v631_v51 = vunpack.c.2.s8 %v5385_v0  ;;  %v3532_v57 = vld [vmem:[%s5065_s10 + $0x110] sm:$0xff] }
 0x315   : > { %v3894_v10 = vmul.f32 %v3625_v48, %v3369_v12  ;;  %v625_v48 = vunpack.c.1.s8 %v5391_v22  ;;  %v3527_v12 = vld [vmem:[%s5065_s10 + $0xe8] sm:$0xff]  ;;  %v1135_v58 = vcvt.s32.f32 %v623_v17  ;;  %v638_v17 = vunpack.c.3.s8 %v5382_v30 }
 0x316   : > { %3709 = vperm.xlu2 %4492, %v3527_v12   ;;  %v641_v12 = vunpack.c.3.s8 %v5391_v22 }
 0x317   : > { %v3962_v36 = vadd.f32 %v5236_v63, %v3894_v10  ;;  %v1127_v10 = vcvt.s32.f32 %v615_v60  ;;  %3734 = vperm.xlu1 %4491, %v3532_v57  }
 0x318   : > { %v3201_v4 = vpop.f32.mrf.mxu2  ;;  %v2866_v34 = vpop.f32.mrf.mxu0 }
 0x319   : > { %v3370_v20 = vpop.f32.mrf.mxu3  ;;  %4026 = vst [vmem:[%s5243_s18 + $0x60] sm:$0xff] %v3962_v36  ;;  %v3202_v16 = vadd.f32 %v3201_v4, %v3033_v3  ;;  %v3035_v5 = vpop.f32.mrf.mxu1  ;;  %v2867_v11 = vadd.f32 %v2866_v34, %v4837_v39  ;;  %v614_v39 = vunpack.c.0.s8 %v5382_v30  ;;  %v1136_v3 = vcvt.s32.f32 %v624_v31 }
 0x31a   : > { %v1129_v36 = vcvt.s32.f32 %v617_v61  ;;  %v1137_v4 = vcvt.s32.f32 %v625_v48  ;;  %v640_v61 = vunpack.c.3.s8 %v5388_v27  ;;  %v633_v48 = vunpack.c.2.s8 %v5391_v22 }
 0x31b   : > { %v3371_v32 = vadd.f32 %v3370_v20, %v3202_v16  ;;  %2905 = vmatmul.bf16.gmra.mxu0 %v1502_v44  ;;  %v3036_v46 = vadd.f32 %v3035_v5, %v2867_v11  ;;  %v1126_v15 = vcvt.s32.f32 %v614_v39  ;;  %v1511_v5 = vpack.c.bf16 %v1135_v58, %v1127_v10  ;;  %v3640_v11 = vpop.permute.xlu0 %3639 }
 0x31c   : > { %3074 = vmatmul.bf16.gmra.mxu1 %v1503_v9  ;;  %v1512_v33 = vpack.c.bf16 %v1136_v3, %v1128_v62  ;;  %v1153_v22 = vcvt.s32.f32 %v641_v12 }
 0x31d   : > { %v3895_v26 = vmul.f32 %v3630_v43, %v3371_v32  ;;  %3243 = vmatmul.bf16.gmra.mxu2 %v1504_v28  ;;  %v1510_v34 = vpack.c.bf16 %v1134_v45, %v1126_v15  ;;  %v1513_v43 = vpack.c.bf16 %v1137_v4, %v1129_v36  ;;  %v3534_v32 = vld [vmem:[%s5065_s10 + $0x120] sm:$0xff]  ;;  %v1150_v15 = vcvt.s32.f32 %v638_v17 }
 0x31e   : > { %3412 = vmatmul.bf16.gmra.mxu3 %v1505_v13  ;;  %3744 = vperm.xlu0 %4490, %v3534_v32   ;;  %v1143_v45 = vcvt.s32.f32 %v631_v51 }
 0x31f   : > { %v3963_v42 = vadd.f32 %v5236_v63, %v3895_v26 }
 0x320   : > { %v3204_v38 = vpop.f32.mrf.mxu2  ;;  %v2868_v24 = vpop.f32.mrf.mxu0 }
 0x321   : > { %v3373_v37 = vpop.f32.mrf.mxu3  ;;  %4027 = vst [vmem:[%s5243_s18 + $0x68] sm:$0xff] %v3963_v42  ;;  %v3205_v21 = vadd.f32 %v3204_v38, %v3036_v46  ;;  %v3037_v49 = vpop.f32.mrf.mxu1  ;;  %v2869_v23 = vadd.f32 %v2868_v24, %v4839_v2 }
 0x323   : > { %v3374_v56 = vadd.f32 %v3373_v37, %v3205_v21  ;;  %v3038_v20 = vadd.f32 %v3037_v49, %v2869_v23  ;;  %v630_v37 = vunpack.c.2.s8 %v5382_v30  ;;  %v632_v21 = vunpack.c.2.s8 %v5388_v27 }
 0x324   : > { %v1152_v27 = vcvt.s32.f32 %v640_v61 }
 0x325   : > { %v3896_v53 = vmul.f32 %v3635_v55, %v3374_v56  ;;  %v3537_v55 = vld [vmem:[%s5065_s10 + $0x138] sm:$0xff]  ;;  %v3645_v56 = vpop.permute.xlu1 %3644  ;;  %v1142_v23 = vcvt.s32.f32 %v630_v37  ;;  %v1144_v58 = vcvt.s32.f32 %v632_v21 }
 0x326   : > { %3759 = vperm.xlu0 %4490, %v3537_v55   ;;  %v3538_v55 = vld [vmem:[%s5065_s10 + $0x140] sm:$0xff] }
 0x327   : > { %v3964_v44 = vadd.f32 %v5236_v63, %v3896_v53  ;;  %v1145_v53 = vcvt.s32.f32 %v633_v48 }
 0x328   : > { %v3206_v9 = vpop.f32.mrf.mxu2  ;;  %v2871_v28 = vpop.f32.mrf.mxu0 }
 0x329   : > { %v3375_v16 = vpop.f32.mrf.mxu3  ;;  %4028 = vst [vmem:[%s5243_s18 + $0x70] sm:$0xff] %v3964_v44  ;;  %v3207_v2 = vadd.f32 %v3206_v9, %v3038_v20  ;;  %v3040_v13 = vpop.f32.mrf.mxu1  ;;  %v2872_v46 = vadd.f32 %v2871_v28, %v4841_v25  ;;  %v639_v25 = vunpack.c.3.s8 %v5385_v0  ;;  %v1518_v44 = vpack.c.bf16 %v1150_v15, %v1142_v23  ;;  %v3530_v28 = vld [vmem:[%s5065_s10 + $0x100] sm:$0xff] }
 0x32a   : > { %3724 = vperm.xlu2 %4492, %v3530_v28   ;;  %v3533_v28 = vld [vmem:[%s5065_s10 + $0x118] sm:$0xff] }
 0x32b   : > { %v3376_v26 = vadd.f32 %v3375_v16, %v3207_v2  ;;  %2910 = vmatmul.bf16.gmra.mxu0 %v1510_v34  ;;  %v3041_v39 = vadd.f32 %v3040_v13, %v2872_v46  ;;  %v1151_v10 = vcvt.s32.f32 %v639_v25  ;;  %v1521_v2 = vpack.c.bf16 %v1153_v22, %v1145_v53  ;;  %v3535_v13 = vld [vmem:[%s5065_s10 + $0x128] sm:$0xff] }
 0x32c   : > { %3079 = vmatmul.bf16.gmra.mxu1 %v1511_v5  ;;  %v1520_v5 = vpack.c.bf16 %v1152_v27, %v1144_v58  ;;  %3749 = vperm.xlu1 %4491, %v3535_v13   ;;  %v3541_v13 = vld [vmem:[%s5065_s10 + $0x158] sm:$0xff] }
 0x32d   : > { %v3897_v42 = vmul.f32 %v3640_v11, %v3376_v26  ;;  %3248 = vmatmul.bf16.gmra.mxu2 %v1512_v33  ;;  %v3540_v33 = vld [vmem:[%s5065_s10 + $0x150] sm:$0xff]  ;;  %v5430_v26 = vld [vmem:[%s4603_s11 + $0x260] sm:$0xff] }
 0x32e   : > { %3417 = vmatmul.bf16.gmra.mxu3 %v1513_v43  ;;  %v3650_v43 = vpop.permute.xlu2 %3649  ;;  %3774 = vperm.xlu0 %4490, %v3540_v33   ;;  %v654_v51 = vunpack.c.1.s8 %v5430_v26  ;;  %v3546_v33 = vld [vmem:[%s5065_s10 + $0x180] sm:$0xff] }
 0x32f   : > { %v3965_v38 = vadd.f32 %v5236_v63, %v3897_v42  ;;  %v5433_v42 = vld [vmem:[%s4603_s11 + $0x268] sm:$0xff] }
 0x330   : > { %v3209_v19 = vpop.f32.mrf.mxu2  ;;  %v2873_v49 = vpop.f32.mrf.mxu0  ;;  %v647_v25 = vunpack.c.0.s8 %v5433_v42  ;;  %v655_v21 = vunpack.c.1.s8 %v5433_v42 }
 0x331   : > { %v3378_v60 = vpop.f32.mrf.mxu3  ;;  %4029 = vst [vmem:[%s5243_s18 + $0x78] sm:$0xff] %v3965_v38  ;;  %v3210_v24 = vadd.f32 %v3209_v19, %v3041_v39  ;;  %v3042_v31 = vpop.f32.mrf.mxu1  ;;  %v2874_v0 = vadd.f32 %v2873_v49, %v4843_v47  ;;  %v1519_v47 = vpack.c.bf16 %v1151_v10, %v1143_v45  ;;  %v5436_v39 = vld [vmem:[%s4603_s11 + $0x270] sm:$0xff]  ;;  %v5439_v38 = vld [vmem:[%s4603_s11 + $0x278] sm:$0xff]  ;;  %v1166_v45 = vcvt.s32.f32 %v654_v51 }
 0x332   : > { %v656_v48 = vunpack.c.1.s8 %v5436_v39  ;;  %v649_v12 = vunpack.c.0.s8 %v5439_v38  ;;  %v657_v57 = vunpack.c.1.s8 %v5439_v38  ;;  %v1159_v10 = vcvt.s32.f32 %v647_v25  ;;  %3739 = vperm.xlu2 %4492, %v3533_v28  }
 0x333   : > { %v3379_v30 = vadd.f32 %v3378_v60, %v3210_v24  ;;  %v3043_v3 = vadd.f32 %v3042_v31, %v2874_v0  ;;  %v648_v24 = vunpack.c.0.s8 %v5436_v39  ;;  %v1167_v58 = vcvt.s32.f32 %v655_v21 }
 0x334   : > { %3764 = vperm.xlu1 %4491, %v3538_v55   ;;  %v1168_v53 = vcvt.s32.f32 %v656_v48  ;;  %v1161_v22 = vcvt.s32.f32 %v649_v12  ;;  %v663_v51 = vunpack.c.2.s8 %v5433_v42  ;;  %v671_v25 = vunpack.c.3.s8 %v5433_v42  ;;  %v3544_v55 = vld [vmem:[%s5065_s10 + $0x170] sm:$0xff] }
 0x335   : > { %v3898_v62 = vmul.f32 %v3645_v56, %v3379_v30  ;;  %v3543_v56 = vld [vmem:[%s5065_s10 + $0x168] sm:$0xff]  ;;  %v3655_v30 = vpop.permute.xlu0 %3654  ;;  %v664_v21 = vunpack.c.2.s8 %v5436_v39  ;;  %v665_v48 = vunpack.c.2.s8 %v5439_v38  ;;  %v673_v12 = vunpack.c.3.s8 %v5439_v38 }
 0x336   : > { %3789 = vperm.xlu0 %4490, %v3543_v56   ;;  %v3549_v56 = vld [vmem:[%s5065_s10 + $0x198] sm:$0xff] }
 0x337   : > { %v3966_v36 = vadd.f32 %v5236_v63, %v3898_v62  ;;  %v1160_v62 = vcvt.s32.f32 %v648_v24  ;;  %v1177_v38 = vcvt.s32.f32 %v665_v48  ;;  %v3542_v48 = vld [vmem:[%s5065_s10 + $0x160] sm:$0xff] }
 0x338   : > { %v3211_v4 = vpop.f32.mrf.mxu2  ;;  %v2876_v16 = vpop.f32.mrf.mxu0 }
 0x339   : > { %v3380_v20 = vpop.f32.mrf.mxu3  ;;  %4030 = vst [vmem:[%s5243_s18 + $0x80] sm:$0xff] %v3966_v36  ;;  %v3212_v9 = vadd.f32 %v3211_v4, %v3043_v3  ;;  %v3045_v34 = vpop.f32.mrf.mxu1  ;;  %v2877_v11 = vadd.f32 %v2876_v16, %v4865_v6  ;;  %v646_v6 = vunpack.c.0.s8 %v5430_v26  ;;  %v1169_v3 = vcvt.s32.f32 %v657_v57  ;;  %v3536_v57 = vld [vmem:[%s5065_s10 + $0x130] sm:$0xff] }
 0x33a   : > { %3754 = vperm.xlu2 %4492, %v3536_v57   ;;  %v3555_v57 = vld [vmem:[%s5065_s10 + $0x1c8] sm:$0xff] }
 0x33b   : > { %v3381_v32 = vadd.f32 %v3380_v20, %v3212_v9  ;;  %2915 = vmatmul.bf16.gmra.mxu0 %v1518_v44  ;;  %v3046_v37 = vadd.f32 %v3045_v34, %v2877_v11  ;;  %v1158_v15 = vcvt.s32.f32 %v646_v6  ;;  %v662_v6 = vunpack.c.2.s8 %v5430_v26 }
 0x33c   : > { %3084 = vmatmul.bf16.gmra.mxu1 %v1519_v47  ;;  %v1527_v47 = vpack.c.bf16 %v1167_v58, %v1159_v10  ;;  %3779 = vperm.xlu1 %4491, %v3541_v13   ;;  %v5486_v13 = vld [vmem:[%s4603_s11 + $0x2a0] sm:$0xff] }
 0x33d   : > { %v3899_v46 = vmul.f32 %v3650_v43, %v3381_v32  ;;  %3253 = vmatmul.bf16.gmra.mxu2 %v1520_v5  ;;  %v1528_v5 = vpack.c.bf16 %v1168_v53, %v1160_v62  ;;  %v3660_v43 = vpop.permute.xlu1 %3659  ;;  %v1185_v62 = vcvt.s32.f32 %v673_v12  ;;  %v3550_v12 = vld [vmem:[%s5065_s10 + $0x1a0] sm:$0xff] }
 0x33e   : > { %3422 = vmatmul.bf16.gmra.mxu3 %v1521_v2  ;;  %v1529_v2 = vpack.c.bf16 %v1169_v3, %v1161_v22  ;;  %3804 = vperm.xlu0 %4490, %v3546_v33  }
 0x33f   : > { %v3967_v19 = vadd.f32 %v5236_v63, %v3899_v46 }
 0x340   : > { %v3214_v60 = vpop.f32.mrf.mxu2  ;;  %v2878_v31 = vpop.f32.mrf.mxu0 }
 0x341   : > { %v3383_v17 = vpop.f32.mrf.mxu3  ;;  %4031 = vst [vmem:[%s5243_s18 + $0x88] sm:$0xff] %v3967_v19  ;;  %v3215_v49 = vadd.f32 %v3214_v60, %v3046_v37  ;;  %v3047_v61 = vpop.f32.mrf.mxu1  ;;  %v2879_v23 = vadd.f32 %v2878_v31, %v4867_v35  ;;  %v1526_v35 = vpack.c.bf16 %v1166_v45, %v1158_v15  ;;  %v5463_v37 = vld [vmem:[%s5805_s3] ss:$0 sm:$0xff]  ;;  %v1175_v15 = vcvt.s32.f32 %v663_v51 }
 0x342   : > { %v1183_v45 = vcvt.s32.f32 %v671_v25 }
 0x343   : > { %v3384_v0 = vadd.f32 %v3383_v17, %v3215_v49  ;;  %v3048_v36 = vadd.f32 %v3047_v61, %v2879_v23  ;;  %v670_v17 = vunpack.c.3.s8 %v5430_v26  ;;  %v672_v61 = vunpack.c.3.s8 %v5436_v39  ;;  %v3665_v26 = vpop.permute.xlu2 %3664 }
 0x344   : > { %3794 = vperm.xlu1 %4491, %v3544_v55   ;;  %v1176_v39 = vcvt.s32.f32 %v664_v21 }
 0x345   : > { %v3900_v27 = vmul.f32 %v3655_v30, %v3384_v0  ;;  %v1174_v0 = vcvt.s32.f32 %v662_v6  ;;  %v1182_v23 = vcvt.s32.f32 %v670_v17  ;;  %v1184_v58 = vcvt.s32.f32 %v672_v61  ;;  %v3675_v55 = vpop.permute.xlu1 %3674 }
 0x346   : > { %3819 = vperm.xlu0 %4490, %v3549_v56  }
 0x347   : > { %v3968_v4 = vadd.f32 %v5236_v63, %v3900_v27 }
 0x348   : > { %v3216_v20 = vpop.f32.mrf.mxu2  ;;  %v2881_v16 = vpop.f32.mrf.mxu0 }
 0x349   : > { %v3385_v44 = vpop.f32.mrf.mxu3  ;;  %4032 = vst [vmem:[%s5243_s18 + $0x90] sm:$0xff] %v3968_v4  ;;  %v3217_v9 = vadd.f32 %v3216_v20, %v3048_v36  ;;  %v3050_v34 = vpop.f32.mrf.mxu1  ;;  %v2882_v11 = vadd.f32 %v2881_v16, %v4886_v1  ;;  %v1535_v36 = vpack.c.bf16 %v1183_v45, %v1175_v15  ;;  %v3547_v16 = vld [vmem:[%s5065_s10 + $0x188] sm:$0xff] }
 0x34b   : > { %v3386_v32 = vadd.f32 %v3385_v44, %v3217_v9  ;;  %2920 = vmatmul.bf16.gmra.mxu0 %v1526_v35  ;;  %v3051_v46 = vadd.f32 %v3050_v34, %v2882_v11  ;;  %v1536_v35 = vpack.c.bf16 %v1184_v58, %v1176_v39  ;;  %v3539_v9 = vld [vmem:[%s5065_s10 + $0x148] sm:$0xff]  ;;  %v3552_v34 = vld [vmem:[%s5065_s10 + $0x1b0] sm:$0xff]  ;;  %v5495_v11 = vld [vmem:[%s4603_s11 + $0x2b8] sm:$0xff] }
 0x34c   : > { %3089 = vmatmul.bf16.gmra.mxu1 %v1527_v47  ;;  %v1537_v47 = vpack.c.bf16 %v1185_v62, %v1177_v38  ;;  %3769 = vperm.xlu2 %4492, %v3539_v9   ;;  %v689_v61 = vunpack.c.1.s8 %v5495_v11  ;;  %v3680_v9 = vpop.permute.xlu2 %3679 }
 0x34d   : > { %v3901_v63 = vmul.f32 %v3660_v43, %v3386_v32  ;;  %3258 = vmatmul.bf16.gmra.mxu2 %v1528_v5  ;;  %v3670_v5 = vpop.permute.xlu0 %3669  ;;  %3809 = vperm.xlu1 %4491, %v3547_v16   ;;  %v5489_v43 = vld [vmem:[%s4603_s11 + $0x2a8] sm:$0xff]  ;;  %v5492_v32 = vld [vmem:[%s4603_s11 + $0x2b0] sm:$0xff] }
 0x34e   : > { %3427 = vmatmul.bf16.gmra.mxu3 %v1529_v2  ;;  %3834 = vperm.xlu0 %4490, %v3552_v34   ;;  %v687_v17 = vunpack.c.1.s8 %v5489_v43  ;;  %v680_v51 = vunpack.c.0.s8 %v5492_v32  ;;  %v1201_v58 = vcvt.s32.f32 %v689_v61 }
 0x34f   : > { %v3969_v19 = vadd.f32 %v5463_v37, %v3901_v63 }
 0x350   : > { %v3219_v1 = vpop.f32.mrf.mxu2  ;;  %v2883_v49 = vpop.f32.mrf.mxu0  ;;  %v1192_v15 = vcvt.s32.f32 %v680_v51  ;;  %v704_v51 = vunpack.c.3.s8 %v5492_v32 }
 0x351   : > { %v3388_v60 = vpop.f32.mrf.mxu3  ;;  %4033 = vst [vmem:[%s5243_s18 + $0x98] sm:$0xff] %v3969_v19  ;;  %v3220_v24 = vadd.f32 %v3219_v1, %v3051_v46  ;;  %v3052_v31 = vpop.f32.mrf.mxu1  ;;  %v2884_v42 = vadd.f32 %v2883_v49, %v4891_v29  ;;  %v1534_v29 = vpack.c.bf16 %v1182_v23, %v1174_v0  ;;  %v686_v1 = vunpack.c.1.s8 %v5486_v13 }
 0x352   : > { %v688_v49 = vunpack.c.1.s8 %v5492_v32  ;;  %v1199_v23 = vcvt.s32.f32 %v687_v17 }
 0x353   : > { %v3389_v30 = vadd.f32 %v3388_v60, %v3220_v24  ;;  %v3053_v27 = vadd.f32 %v3052_v31, %v2884_v42  ;;  %v679_v60 = vunpack.c.0.s8 %v5489_v43  ;;  %v681_v31 = vunpack.c.0.s8 %v5495_v11 }
 0x354   : > { %3784 = vperm.xlu2 %4492, %v3542_v48   ;;  %v1198_v42 = vcvt.s32.f32 %v686_v1  ;;  %v1200_v39 = vcvt.s32.f32 %v688_v49  ;;  %v3556_v49 = vld [vmem:[%s5065_s10 + $0x1d0] sm:$0xff] }
 0x355   : > { %v3902_v10 = vmul.f32 %v3665_v26, %v3389_v30  ;;  %3824 = vperm.xlu1 %4491, %v3550_v12   ;;  %v1191_v0 = vcvt.s32.f32 %v679_v60 }
 0x356   : > { %3849 = vperm.xlu0 %4490, %v3555_v57  }
 0x357   : > { %v3970_v53 = vadd.f32 %v5463_v37, %v3902_v10  ;;  %v1193_v10 = vcvt.s32.f32 %v681_v31  ;;  %v3561_v31 = vld [vmem:[%s5065_s10 + $0x1f8] sm:$0xff] }
 0x358   : > { %v3221_v22 = vpop.f32.mrf.mxu2  ;;  %v2886_v20 = vpop.f32.mrf.mxu0 }
 0x359   : > { %v3390_v3 = vpop.f32.mrf.mxu3  ;;  %4034 = vst [vmem:[%s5243_s18 + $0xa0] sm:$0xff] %v3970_v53  ;;  %v3222_v4 = vadd.f32 %v3221_v22, %v3053_v27  ;;  %v3055_v44 = vpop.f32.mrf.mxu1  ;;  %v2887_v28 = vadd.f32 %v2886_v20, %v4897_v54  ;;  %v678_v54 = vunpack.c.0.s8 %v5486_v13  ;;  %v1543_v22 = vpack.c.bf16 %v1199_v23, %v1191_v0 }
 0x35a   : > { %v1545_v20 = vpack.c.bf16 %v1201_v58, %v1193_v10 }
 0x35b   : > { %v3391_v2 = vadd.f32 %v3390_v3, %v3222_v4  ;;  %2925 = vmatmul.bf16.gmra.mxu0 %v1534_v29  ;;  %v3056_v63 = vadd.f32 %v3055_v44, %v2887_v28  ;;  %v1190_v30 = vcvt.s32.f32 %v678_v54  ;;  %v1544_v4 = vpack.c.bf16 %v1200_v39, %v1192_v15  ;;  %v3545_v44 = vld [vmem:[%s5065_s10 + $0x178] sm:$0xff] }
 0x35c   : > { %3094 = vmatmul.bf16.gmra.mxu1 %v1535_v36  ;;  %3799 = vperm.xlu2 %4492, %v3545_v44   ;;  %v702_v54 = vunpack.c.3.s8 %v5486_v13  ;;  %v5546_v44 = vld [vmem:[%s4603_s11 + $0x2f8] sm:$0xff] }
 0x35d   : > { %v3903_v33 = vmul.f32 %v3670_v5, %v3391_v2  ;;  %3263 = vmatmul.bf16.gmra.mxu2 %v1536_v35  ;;  %v3553_v35 = vld [vmem:[%s5065_s10 + $0x1b8] sm:$0xff] }
 0x35e   : > { %3432 = vmatmul.bf16.gmra.mxu3 %v1537_v47  ;;  %v3558_v47 = vld [vmem:[%s5065_s10 + $0x1e0] sm:$0xff]  ;;  %3839 = vperm.xlu1 %4491, %v3553_v35   ;;  %v1214_v12 = vcvt.s32.f32 %v702_v54 }
 0x35f   : > { %v3971_v46 = vadd.f32 %v5463_v37, %v3903_v33  ;;  %3864 = vperm.xlu0 %4490, %v3558_v47   ;;  %v694_v33 = vunpack.c.2.s8 %v5486_v13  ;;  %v3685_v13 = vpop.permute.xlu0 %3684 }
 0x360   : > { %v3224_v19 = vpop.f32.mrf.mxu2  ;;  %v2888_v21 = vpop.f32.mrf.mxu0 }
 0x361   : > { %v3393_v6 = vpop.f32.mrf.mxu3  ;;  %4035 = vst [vmem:[%s5243_s18 + $0xa8] sm:$0xff] %v3971_v46  ;;  %v3225_v25 = vadd.f32 %v3224_v19, %v3056_v63  ;;  %v3057_v24 = vpop.f32.mrf.mxu1  ;;  %v2889_v26 = vadd.f32 %v2888_v21, %v4899_v14  ;;  %v1542_v14 = vpack.c.bf16 %v1198_v42, %v1190_v30  ;;  %v703_v19 = vunpack.c.3.s8 %v5489_v43 }
 0x362   : > { %v705_v21 = vunpack.c.3.s8 %v5495_v11  ;;  %v1206_v48 = vcvt.s32.f32 %v694_v33 }
 0x363   : > { %v3394_v56 = vadd.f32 %v3393_v6, %v3225_v25  ;;  %v3058_v38 = vadd.f32 %v3057_v24, %v2889_v26  ;;  %v696_v6 = vunpack.c.2.s8 %v5492_v32  ;;  %v697_v25 = vunpack.c.2.s8 %v5495_v11  ;;  %v3548_v24 = vld [vmem:[%s5065_s10 + $0x190] sm:$0xff] }
 0x364   : > { %3814 = vperm.xlu2 %4492, %v3548_v24   ;;  %v1216_v26 = vcvt.s32.f32 %v704_v51  ;;  %v1217_v30 = vcvt.s32.f32 %v705_v21 }
 0x365   : > { %v3904_v45 = vmul.f32 %v3675_v55, %v3394_v56  ;;  %v1215_v55 = vcvt.s32.f32 %v703_v19  ;;  %v1208_v32 = vcvt.s32.f32 %v696_v6  ;;  %v1209_v11 = vcvt.s32.f32 %v697_v25  ;;  %v3554_v6 = vld [vmem:[%s5065_s10 + $0x1c0] sm:$0xff] }
 0x366   : > { %3854 = vperm.xlu1 %4491, %v3556_v49   ;;  %v721_v19 = vunpack.c.1.s8 %v5546_v44 }
 0x367   : > { %v3972_v62 = vadd.f32 %v5463_v37, %v3904_v45  ;;  %3879 = vperm.xlu0 %4490, %v3561_v31   ;;  %v1550_v45 = vpack.c.bf16 %v1214_v12, %v1206_v48 }
 0x368   : > { %v3226_v27 = vpop.f32.mrf.mxu2  ;;  %v2891_v29 = vpop.f32.mrf.mxu0 }
 0x369   : > { %v3395_v53 = vpop.f32.mrf.mxu3  ;;  %4036 = vst [vmem:[%s5243_s18 + $0xb0] sm:$0xff] %v3972_v62  ;;  %v3227_v3 = vadd.f32 %v3226_v27, %v3058_v38  ;;  %v3060_v36 = vpop.f32.mrf.mxu1  ;;  %v2892_v34 = vadd.f32 %v2891_v29, %v4901_v50  ;;  %v695_v50 = vunpack.c.2.s8 %v5489_v43  ;;  %v1552_v38 = vpack.c.bf16 %v1216_v26, %v1208_v32  ;;  %v3551_v27 = vld [vmem:[%s5065_s10 + $0x1a8] sm:$0xff]  ;;  %v5537_v29 = vld [vmem:[%s4603_s11 + $0x2e0] sm:$0xff] }
 0x36a   : > { %v1553_v62 = vpack.c.bf16 %v1217_v30, %v1209_v11 }
 0x36b   : > { %v3396_v16 = vadd.f32 %v3395_v53, %v3227_v3  ;;  %2930 = vmatmul.bf16.gmra.mxu0 %v1542_v14  ;;  %v3061_v2 = vadd.f32 %v3060_v36, %v2892_v34  ;;  %v1207_v57 = vcvt.s32.f32 %v695_v50  ;;  %v3559_v53 = vld [vmem:[%s5065_s10 + $0x1e8] sm:$0xff]  ;;  %v3690_v14 = vpop.permute.xlu1 %3689  ;;  %v718_v34 = vunpack.c.1.s8 %v5537_v29 }
 0x36c   : > { %3099 = vmatmul.bf16.gmra.mxu1 %v1543_v22  ;;  %3829 = vperm.xlu2 %4492, %v3551_v27   ;;  %v713_v50 = vunpack.c.0.s8 %v5546_v44  ;;  %v734_v27 = vunpack.c.3.s8 %v5537_v29 }
 0x36d   : > { %v3905_v5 = vmul.f32 %v3680_v9, %v3396_v16  ;;  %3268 = vmatmul.bf16.gmra.mxu2 %v1544_v4  ;;  %v5540_v4 = vld [vmem:[%s4603_s11 + $0x2e8] sm:$0xff]  ;;  %v1230_v25 = vcvt.s32.f32 %v718_v34  ;;  %v5839_v34 = vld [vmem:[#allocation2_spill] sm:$0xff] }
 0x36e   : > { %3437 = vmatmul.bf16.gmra.mxu3 %v1545_v20  ;;  %3869 = vperm.xlu1 %4491, %v3559_v53   ;;  %v5543_v20 = vld [vmem:[%s4603_s11 + $0x2f0] sm:$0xff]  ;;  %v727_v53 = vunpack.c.2.s8 %v5540_v4 }
 0x36f   : > { %v3973_v28 = vadd.f32 %v5463_v37, %v3905_v5  ;;  %v711_v5 = vunpack.c.0.s8 %v5540_v4  ;;  %v720_v54 = vunpack.c.1.s8 %v5543_v20 }
 0x370   : > { %v3229_v63 = vpop.f32.mrf.mxu2  ;;  %v2893_v60 = vpop.f32.mrf.mxu0 }
 0x371   : > { %v3398_v46 = vpop.f32.mrf.mxu3  ;;  %4037 = vst [vmem:[%s5243_s18 + $0xb8] sm:$0xff] %v3973_v28  ;;  %v3230_v1 = vadd.f32 %v3229_v63, %v3061_v2  ;;  %v3062_v17 = vpop.f32.mrf.mxu1  ;;  %v2894_v43 = vadd.f32 %v2893_v60, %v4903_v8  ;;  %v1551_v8 = vpack.c.bf16 %v1215_v55, %v1207_v57  ;;  %v719_v2 = vunpack.c.1.s8 %v5540_v4 }
 0x372   : > { %v712_v28 = vunpack.c.0.s8 %v5543_v20  ;;  %v1223_v21 = vcvt.s32.f32 %v711_v5 }
 0x373   : > { %v3399_v61 = vadd.f32 %v3398_v46, %v3230_v1  ;;  %v3063_v42 = vadd.f32 %v3062_v17, %v2894_v43  ;;  %v3695_v1 = vpop.permute.xlu2 %3694  ;;  %v1231_v24 = vcvt.s32.f32 %v719_v2  ;;  %v1233_v43 = vcvt.s32.f32 %v721_v19 }
 0x374   : > { %3844 = vperm.xlu2 %4492, %v3554_v6   ;;  %v1224_v49 = vcvt.s32.f32 %v712_v28  ;;  %v1246_v2 = vcvt.s32.f32 %v734_v27  ;;  %v1239_v28 = vcvt.s32.f32 %v727_v53  ;;  %v5841_v53 = vld [vmem:[#allocation4_spill] sm:$0xff] }
 0x375   : > { %v3906_v56 = vmul.f32 %v3685_v13, %v3399_v61  ;;  %v1232_v13 = vcvt.s32.f32 %v720_v54  ;;  %v1225_v61 = vcvt.s32.f32 %v713_v50 }
 0x377   : > { %v3974_v0 = vadd.f32 %v5463_v37, %v3906_v56  ;;  %v1559_v56 = vpack.c.bf16 %v1231_v24, %v1223_v21  ;;  %v1560_v30 = vpack.c.bf16 %v1232_v13, %v1224_v49 }
 0x378   : > { %v3231_v23 = vpop.f32.mrf.mxu2  ;;  %v2896_v10 = vpop.f32.mrf.mxu0 }
 0x379   : > { %v3400_v15 = vpop.f32.mrf.mxu3  ;;  %4038 = vst [vmem:[%s5243_s18 + $0xc0] sm:$0xff] %v3974_v0  ;;  %v3232_v39 = vadd.f32 %v3231_v23, %v3063_v42  ;;  %v3065_v58 = vpop.f32.mrf.mxu1  ;;  %v2897_v3 = vadd.f32 %v2896_v10, %v4925_v40  ;;  %v710_v40 = vunpack.c.0.s8 %v5537_v29  ;;  %v1561_v42 = vpack.c.bf16 %v1233_v43, %v1225_v61  ;;  %v3557_v0 = vld [vmem:[%s5065_s10 + $0x1d8] sm:$0xff]  ;;  %v5840_v61 = vld [vmem:[#allocation3_spill] sm:$0xff] }
 0x37a   : > { %v3700_v23 = vpop.permute.xlu0 %3699 }
 0x37b   : > { %v3401_v22 = vadd.f32 %v3400_v15, %v3232_v39  ;;  %2935 = vmatmul.bf16.gmra.mxu0 %v1550_v45  ;;  %v3066_v35 = vadd.f32 %v3065_v58, %v2897_v3  ;;  %v1222_v51 = vcvt.s32.f32 %v710_v40  ;;  %v726_v58 = vunpack.c.2.s8 %v5537_v29 }
 0x37c   : > { %3104 = vmatmul.bf16.gmra.mxu1 %v1551_v8  ;;  %3859 = vperm.xlu2 %4492, %v3557_v0   ;;  %v737_v40 = vunpack.c.3.s8 %v5546_v44 }
 0x37d   : > { %v3907_v36 = vmul.f32 %v3690_v14, %v3401_v22  ;;  %3273 = vmatmul.bf16.gmra.mxu2 %v1552_v38  ;;  %v1558_v32 = vpack.c.bf16 %v1230_v25, %v1222_v51  ;;  %v735_v14 = vunpack.c.3.s8 %v5540_v4  ;;  %v1238_v4 = vcvt.s32.f32 %v726_v58 }
 0x37e   : > { %3442 = vmatmul.bf16.gmra.mxu3 %v1553_v62 }
 0x37f   : > { %v3975_v47 = vadd.f32 %v5463_v37, %v3907_v36 }
 0x380   : > { %v3234_v9 = vpop.f32.mrf.mxu2  ;;  %v2898_v63 = vpop.f32.mrf.mxu0 }
 0x381   : > { %v3403_v16 = vpop.f32.mrf.mxu3  ;;  %4039 = vst [vmem:[%s5243_s18 + $0xc8] sm:$0xff] %v3975_v47  ;;  %v3235_v33 = vadd.f32 %v3234_v9, %v3066_v35  ;;  %v3067_v46 = vpop.f32.mrf.mxu1  ;;  %v2899_v17 = vadd.f32 %v2898_v63, %v4927_v7  ;;  %v736_v35 = vunpack.c.3.s8 %v5543_v20  ;;  %v729_v47 = vunpack.c.2.s8 %v5546_v44  ;;  %v3560_v9 = vld [vmem:[%s5065_s10 + $0x1f0] sm:$0xff] }
 0x383   : > { %v3404_v60 = vadd.f32 %v3403_v16, %v3235_v33  ;;  %v3068_v48 = vadd.f32 %v3067_v46, %v2899_v17  ;;  %v3705_v16 = vpop.permute.xlu1 %3704  ;;  %v1247_v33 = vcvt.s32.f32 %v735_v14  ;;  %v1248_v54 = vcvt.s32.f32 %v736_v35 }
 0x384   : > { %3874 = vperm.xlu2 %4492, %v3560_v9   ;;  %v1241_v50 = vcvt.s32.f32 %v729_v47 }
 0x385   : > { %v3908_v31 = vmul.f32 %v3695_v1, %v3404_v60  ;;  %v1566_v60 = vpack.c.bf16 %v1246_v2, %v1238_v4  ;;  %v1567_v17 = vpack.c.bf16 %v1247_v33, %v1239_v28 }
 0x387   : > { %v3976_v12 = vadd.f32 %v5463_v37, %v3908_v31  ;;  %v3710_v31 = vpop.permute.xlu2 %3709 }
 0x388   : > { %v3236_v57 = vpop.f32.mrf.mxu2  ;;  %v2901_v26 = vpop.f32.mrf.mxu0 }
 0x389   : > { %v3405_v55 = vpop.f32.mrf.mxu3  ;;  %4040 = vst [vmem:[%s5243_s18 + $0xd0] sm:$0xff] %v3976_v12  ;;  %v3237_v7 = vadd.f32 %v3236_v57, %v3068_v48  ;;  %v3070_v11 = vpop.f32.mrf.mxu1  ;;  %v2902_v45 = vadd.f32 %v2901_v26, %v4946_v59  ;;  %v728_v59 = vunpack.c.2.s8 %v5543_v20  ;;  %v1249_v20 = vcvt.s32.f32 %v737_v40  ;;  %v5580_v48 = vld [vmem:[%s4603_s11 + $0x320] sm:$0xff]  ;;  %v5583_v57 = vld [vmem:[%s4603_s11 + $0x328] sm:$0xff] }
 0x38a   : > { %v742_v26 = vunpack.c.0.s8 %v5580_v48  ;;  %v743_v0 = vunpack.c.0.s8 %v5583_v57 }
 0x38b   : > { %v3406_v15 = vadd.f32 %v3405_v55, %v3237_v7  ;;  %2940 = vmatmul.bf16.gmra.mxu0 %v1558_v32  ;;  %v3071_v39 = vadd.f32 %v3070_v11, %v2902_v45  ;;  %v1240_v63 = vcvt.s32.f32 %v728_v59  ;;  %v1569_v49 = vpack.c.bf16 %v1249_v20, %v1241_v50  ;;  %v5586_v55 = vld [vmem:[%s4603_s11 + $0x330] sm:$0xff]  ;;  %v5589_v32 = vld [vmem:[%s4603_s11 + $0x338] sm:$0xff]  ;;  %v3720_v20 = vpop.permute.xlu1 %3719 }
 0x38c   : > { %3109 = vmatmul.bf16.gmra.mxu1 %v1559_v56  ;;  %v745_v58 = vunpack.c.0.s8 %v5589_v32  ;;  %v1254_v59 = vcvt.s32.f32 %v742_v26  ;;  %v769_v26 = vunpack.c.3.s8 %v5589_v32 }
 0x38d   : > { %v3909_v8 = vmul.f32 %v3700_v23, %v3406_v15  ;;  %3278 = vmatmul.bf16.gmra.mxu2 %v1560_v30  ;;  %v1568_v24 = vpack.c.bf16 %v1248_v54, %v1240_v63  ;;  %v751_v23 = vunpack.c.1.s8 %v5583_v57  ;;  %v744_v15 = vunpack.c.0.s8 %v5586_v55 }
 0x38e   : > { %3447 = vmatmul.bf16.gmra.mxu3 %v1561_v42  ;;  %v750_v42 = vunpack.c.1.s8 %v5580_v48  ;;  %v1257_v9 = vcvt.s32.f32 %v745_v58  ;;  %v1281_v58 = vcvt.s32.f32 %v769_v26 }
 0x38f   : > { %v3977_v10 = vadd.f32 %v5463_v37, %v3909_v8  ;;  %v1256_v35 = vcvt.s32.f32 %v744_v15 }
 0x390   : > { %v3239_v38 = vpop.f32.mrf.mxu2  ;;  %v2903_v3 = vpop.f32.mrf.mxu0 }
 0x391   : > { %v3408_v62 = vpop.f32.mrf.mxu3  ;;  %4041 = vst [vmem:[%s5243_s18 + $0xd8] sm:$0xff] %v3977_v10  ;;  %v3240_v22 = vadd.f32 %v3239_v38, %v3071_v39  ;;  %v3072_v36 = vpop.f32.mrf.mxu1  ;;  %v2904_v5 = vadd.f32 %v2903_v3, %v5839_v34  ;;  %v752_v10 = vunpack.c.1.s8 %v5586_v55  ;;  %v753_v38 = vunpack.c.1.s8 %v5589_v32 }
 0x392   : > { %v1255_v3 = vcvt.s32.f32 %v743_v0 }
 0x393   : > { %v3409_v29 = vadd.f32 %v3408_v62, %v3240_v22  ;;  %v3073_v19 = vadd.f32 %v3072_v36, %v2904_v5  ;;  %v3715_v62 = vpop.permute.xlu0 %3714  ;;  %v1262_v22 = vcvt.s32.f32 %v750_v42  ;;  %v1263_v36 = vcvt.s32.f32 %v751_v23  ;;  %v5843_v42 = vld [vmem:[#allocation6_spill] sm:$0xff] }
 0x394   : > { %v1264_v40 = vcvt.s32.f32 %v752_v10 }
 0x395   : > { %v3910_v46 = vmul.f32 %v3705_v16, %v3409_v29  ;;  %v1265_v16 = vcvt.s32.f32 %v753_v38  ;;  %v1574_v2 = vpack.c.bf16 %v1262_v22, %v1254_v59  ;;  %v1575_v28 = vpack.c.bf16 %v1263_v36, %v1255_v3 }
 0x396   : > { %v1576_v54 = vpack.c.bf16 %v1264_v40, %v1256_v35 }
 0x397   : > { %v3978_v6 = vadd.f32 %v5463_v37, %v3910_v46  ;;  %v1577_v50 = vpack.c.bf16 %v1265_v16, %v1257_v9  ;;  %v5620_v16 = vld [vmem:[%s4603_s11 + $0x360] sm:$0xff] }
 0x398   : > { %v3241_v44 = vpop.f32.mrf.mxu2  ;;  %v2906_v25 = vpop.f32.mrf.mxu0 }
 0x399   : > { %v3410_v1 = vpop.f32.mrf.mxu3  ;;  %4042 = vst [vmem:[%s5243_s18 + $0xe0] sm:$0xff] %v3978_v6  ;;  %v3242_v51 = vadd.f32 %v3241_v44, %v3073_v19  ;;  %v3075_v21 = vpop.f32.mrf.mxu1  ;;  %v2907_v43 = vadd.f32 %v2906_v25, %v5840_v61  ;;  %v5842_v6 = vld [vmem:[#allocation5_spill] sm:$0xff] }
 0x39b   : > { %v3411_v13 = vadd.f32 %v3410_v1, %v3242_v51  ;;  %2945 = vmatmul.bf16.gmra.mxu0 %v1566_v60  ;;  %v3076_v56 = vadd.f32 %v3075_v21, %v2907_v43  ;;  %v758_v51 = vunpack.c.2.s8 %v5580_v48  ;;  %v3730_v9 = vpop.permute.xlu0 %3729 }
 0x39c   : > { %3114 = vmatmul.bf16.gmra.mxu1 %v1567_v17 }
 0x39d   : > { %v3911_v12 = vmul.f32 %v3710_v31, %v3411_v13  ;;  %3283 = vmatmul.bf16.gmra.mxu2 %v1568_v24  ;;  %v766_v24 = vunpack.c.3.s8 %v5580_v48  ;;  %v767_v31 = vunpack.c.3.s8 %v5583_v57  ;;  %v760_v13 = vunpack.c.2.s8 %v5586_v55 }
 0x39e   : > { %3452 = vmatmul.bf16.gmra.mxu3 %v1569_v49  ;;  %v759_v49 = vunpack.c.2.s8 %v5583_v57  ;;  %v1270_v0 = vcvt.s32.f32 %v758_v51 }
 0x39f   : > { %v3979_v7 = vadd.f32 %v5463_v37, %v3911_v12  ;;  %v1278_v23 = vcvt.s32.f32 %v766_v24  ;;  %v1279_v15 = vcvt.s32.f32 %v767_v31  ;;  %v5845_v24 = vld [vmem:[#allocation8_spill] sm:$0xff] }
 0x3a0   : > { %v3244_v11 = vpop.f32.mrf.mxu2  ;;  %v2908_v8 = vpop.f32.mrf.mxu0  ;;  %v1271_v57 = vcvt.s32.f32 %v759_v49 }
 0x3a1   : > { %v3413_v30 = vpop.f32.mrf.mxu3  ;;  %4043 = vst [vmem:[%s5243_s18 + $0xe8] sm:$0xff] %v3979_v7  ;;  %v3245_v45 = vadd.f32 %v3244_v11, %v3076_v56  ;;  %v3077_v39 = vpop.f32.mrf.mxu1  ;;  %v2909_v14 = vadd.f32 %v2908_v8, %v5841_v53  ;;  %v768_v56 = vunpack.c.3.s8 %v5586_v55  ;;  %v761_v7 = vunpack.c.2.s8 %v5589_v32 }
 0x3a2   : > { %v3725_v11 = vpop.permute.xlu2 %3724  ;;  %v1583_v53 = vpack.c.bf16 %v1279_v15, %v1271_v57 }
 0x3a3   : > { %v3414_v27 = vadd.f32 %v3413_v30, %v3245_v45  ;;  %v3078_v29 = vadd.f32 %v3077_v39, %v2909_v14  ;;  %v1272_v45 = vcvt.s32.f32 %v760_v13  ;;  %v1280_v39 = vcvt.s32.f32 %v768_v56 }
 0x3a4   : > { %v1273_v10 = vcvt.s32.f32 %v761_v7 }
 0x3a5   : > { %v3912_v47 = vmul.f32 %v3715_v62, %v3414_v27  ;;  %v1582_v27 = vpack.c.bf16 %v1278_v23, %v1270_v0  ;;  %v1584_v3 = vpack.c.bf16 %v1280_v39, %v1272_v45 }
 0x3a6   : > { %v1585_v36 = vpack.c.bf16 %v1281_v58, %v1273_v10 }
 0x3a7   : > { %v3980_v34 = vadd.f32 %v5463_v37, %v3912_v47  ;;  %v5844_v47 = vld [vmem:[#allocation7_spill] sm:$0xff] }
 0x3a8   : > { %v3246_v5 = vpop.f32.mrf.mxu2  ;;  %v2911_v63 = vpop.f32.mrf.mxu0 }
 0x3a9   : > { %v3415_v4 = vpop.f32.mrf.mxu3  ;;  %4044 = vst [vmem:[%s5243_s18 + $0xf0] sm:$0xff] %v3980_v34  ;;  %v3247_v33 = vadd.f32 %v3246_v5, %v3078_v29  ;;  %v3080_v46 = vpop.f32.mrf.mxu1  ;;  %v2912_v44 = vadd.f32 %v2911_v63, %v5842_v6  ;;  %v5623_v34 = vld [vmem:[%s4603_s11 + $0x368] sm:$0xff]  ;;  %v5626_v5 = vld [vmem:[%s4603_s11 + $0x370] sm:$0xff] }
 0x3ab   : > { %v3416_v19 = vadd.f32 %v3415_v4, %v3247_v33  ;;  %2950 = vmatmul.bf16.gmra.mxu0 %v1574_v2  ;;  %v3081_v60 = vadd.f32 %v3080_v46, %v2912_v44  ;;  %v5629_v4 = vld [vmem:[%s4603_s11 + $0x378] sm:$0xff]  ;;  %v774_v33 = vunpack.c.0.s8 %v5620_v16 }
 0x3ac   : > { %3119 = vmatmul.bf16.gmra.mxu1 %v1575_v28  ;;  %v785_v51 = vunpack.c.1.s8 %v5629_v4 }
 0x3ad   : > { %v3913_v1 = vmul.f32 %v3720_v20, %v3416_v19  ;;  %3288 = vmatmul.bf16.gmra.mxu2 %v1576_v54  ;;  %v782_v54 = vunpack.c.1.s8 %v5620_v16  ;;  %v783_v20 = vunpack.c.1.s8 %v5623_v34  ;;  %v776_v19 = vunpack.c.0.s8 %v5626_v5 }
 0x3ae   : > { %3457 = vmatmul.bf16.gmra.mxu3 %v1577_v50  ;;  %v775_v50 = vunpack.c.0.s8 %v5623_v34  ;;  %v1286_v31 = vcvt.s32.f32 %v774_v33  ;;  %v801_v33 = vunpack.c.3.s8 %v5629_v4 }
 0x3af   : > { %v3981_v17 = vadd.f32 %v5463_v37, %v3913_v1  ;;  %v1294_v13 = vcvt.s32.f32 %v782_v54 }
 0x3b0   : > { %v3249_v25 = vpop.f32.mrf.mxu2  ;;  %v2913_v43 = vpop.f32.mrf.mxu0 }
 0x3b1   : > { %v3418_v21 = vpop.f32.mrf.mxu3  ;;  %4045 = vst [vmem:[%s5243_s18 + $0xf8] sm:$0xff] %v3981_v17  ;;  %v3250_v61 = vadd.f32 %v3249_v25, %v3081_v60  ;;  %v3082_v12 = vpop.f32.mrf.mxu1  ;;  %v2914_v48 = vadd.f32 %v2913_v43, %v5843_v42  ;;  %v784_v60 = vunpack.c.1.s8 %v5626_v5  ;;  %v777_v17 = vunpack.c.0.s8 %v5629_v4 }
 0x3b2   : > { %v3735_v25 = vpop.permute.xlu1 %3734  ;;  %v1295_v43 = vcvt.s32.f32 %v783_v20  ;;  %v1590_v23 = vpack.c.bf16 %v1294_v13, %v1286_v31 }
 0x3b3   : > { %v3419_v30 = vadd.f32 %v3418_v21, %v3250_v61  ;;  %v3083_v38 = vadd.f32 %v3082_v12, %v2914_v48  ;;  %v1287_v61 = vcvt.s32.f32 %v775_v50  ;;  %v1288_v12 = vcvt.s32.f32 %v776_v19  ;;  %v3745_v50 = vpop.permute.xlu0 %3744 }
 0x3b4   : > { %v1296_v7 = vcvt.s32.f32 %v784_v60  ;;  %v1289_v26 = vcvt.s32.f32 %v777_v17  ;;  %v1313_v17 = vcvt.s32.f32 %v801_v33 }
 0x3b5   : > { %v3914_v8 = vmul.f32 %v3725_v11, %v3419_v30  ;;  %v1297_v11 = vcvt.s32.f32 %v785_v51  ;;  %v1591_v57 = vpack.c.bf16 %v1295_v43, %v1287_v61 }
 0x3b6   : > { %v1592_v39 = vpack.c.bf16 %v1296_v7, %v1288_v12 }
 0x3b7   : > { %v3982_v55 = vadd.f32 %v5463_v37, %v3914_v8  ;;  %v1593_v10 = vpack.c.bf16 %v1297_v11, %v1289_v26  ;;  %v5660_v11 = vld [vmem:[%s4603_s11 + $0x3a0] sm:$0xff] }
 0x3b8   : > { %v3251_v62 = vpop.f32.mrf.mxu2  ;;  %v2916_v59 = vpop.f32.mrf.mxu0 }
 0x3b9   : > { %v3420_v32 = vpop.f32.mrf.mxu3  ;;  %4046 = vst [vmem:[%s5243_s18 + $0x100] sm:$0xff] %v3982_v55  ;;  %v3252_v14 = vadd.f32 %v3251_v62, %v3083_v38  ;;  %v3085_v22 = vpop.f32.mrf.mxu1  ;;  %v2917_v40 = vadd.f32 %v2916_v59, %v5844_v47  ;;  %v5846_v38 = vld [vmem:[#allocation9_spill] sm:$0xff]  ;;  %v792_v47 = vunpack.c.2.s8 %v5626_v5 }
 0x3ba   : > { %v3740_v62 = vpop.permute.xlu2 %3739  ;;  %v3750_v26 = vpop.permute.xlu1 %3749 }
 0x3bb   : > { %v3421_v35 = vadd.f32 %v3420_v32, %v3252_v14  ;;  %2955 = vmatmul.bf16.gmra.mxu0 %v1582_v27  ;;  %v3086_v28 = vadd.f32 %v3085_v22, %v2917_v40  ;;  %v790_v14 = vunpack.c.2.s8 %v5620_v16 }
 0x3bc   : > { %3124 = vmatmul.bf16.gmra.mxu1 %v1583_v53 }
 0x3bd   : > { %v3915_v29 = vmul.f32 %v3730_v9, %v3421_v35  ;;  %3293 = vmatmul.bf16.gmra.mxu2 %v1584_v3  ;;  %v798_v3 = vunpack.c.3.s8 %v5620_v16  ;;  %v799_v35 = vunpack.c.3.s8 %v5623_v34  ;;  %v1302_v16 = vcvt.s32.f32 %v790_v14 }
 0x3be   : > { %3462 = vmatmul.bf16.gmra.mxu3 %v1585_v36  ;;  %v791_v36 = vunpack.c.2.s8 %v5623_v34 }
 0x3bf   : > { %v3983_v2 = vadd.f32 %v5463_v37, %v3915_v29  ;;  %v1310_v20 = vcvt.s32.f32 %v798_v3  ;;  %v1311_v19 = vcvt.s32.f32 %v799_v35 }
 0x3c0   : > { %v3254_v63 = vpop.f32.mrf.mxu2  ;;  %v2918_v44 = vpop.f32.mrf.mxu0  ;;  %v1303_v34 = vcvt.s32.f32 %v791_v36 }
 0x3c1   : > { %v3423_v46 = vpop.f32.mrf.mxu3  ;;  %4047 = vst [vmem:[%s5243_s18 + $0x108] sm:$0xff] %v3983_v2  ;;  %v3255_v6 = vadd.f32 %v3254_v63, %v3086_v28  ;;  %v3087_v1 = vpop.f32.mrf.mxu1  ;;  %v2919_v49 = vadd.f32 %v2918_v44, %v5845_v24  ;;  %v800_v2 = vunpack.c.3.s8 %v5626_v5  ;;  %v793_v28 = vunpack.c.2.s8 %v5629_v4 }
 0x3c2   : > { %v1599_v24 = vpack.c.bf16 %v1311_v19, %v1303_v34  ;;  %v3755_v36 = vpop.permute.xlu2 %3754 }
 0x3c3   : > { %v3424_v21 = vadd.f32 %v3423_v46, %v3255_v6  ;;  %v3088_v30 = vadd.f32 %v3087_v1, %v2919_v49  ;;  %v5847_v46 = vld [vmem:[#allocation10_spill] sm:$0xff]  ;;  %v1304_v6 = vcvt.s32.f32 %v792_v47  ;;  %v1312_v1 = vcvt.s32.f32 %v800_v2 }
 0x3c4   : > { %v1305_v60 = vcvt.s32.f32 %v793_v28 }
 0x3c5   : > { %v3916_v56 = vmul.f32 %v3735_v25, %v3424_v21  ;;  %v1598_v21 = vpack.c.bf16 %v1310_v20, %v1302_v16  ;;  %v1600_v61 = vpack.c.bf16 %v1312_v1, %v1304_v6 }
 0x3c6   : > { %v1601_v43 = vpack.c.bf16 %v1313_v17, %v1305_v60 }
 0x3c7   : > { %v3984_v42 = vadd.f32 %v5463_v37, %v3916_v56  ;;  %v5848_v56 = vld [vmem:[#allocation11_spill] sm:$0xff] }
 0x3c8   : > { %v3256_v48 = vpop.f32.mrf.mxu2  ;;  %v2921_v45 = vpop.f32.mrf.mxu0 }
 0x3c9   : > { %v3425_v0 = vpop.f32.mrf.mxu3  ;;  %4048 = vst [vmem:[%s5243_s18 + $0x110] sm:$0xff] %v3984_v42  ;;  %v3257_v15 = vadd.f32 %v3256_v48, %v3088_v30  ;;  %v3090_v8 = vpop.f32.mrf.mxu1  ;;  %v2922_v55 = vadd.f32 %v2921_v45, %v5846_v38  ;;  %v5663_v42 = vld [vmem:[%s4603_s11 + $0x3a8] sm:$0xff]  ;;  %v5666_v48 = vld [vmem:[%s4603_s11 + $0x3b0] sm:$0xff] }
 0x3ca   : > { %v808_v38 = vunpack.c.0.s8 %v5666_v48 }
 0x3cb   : > { %v3426_v58 = vadd.f32 %v3425_v0, %v3257_v15  ;;  %2960 = vmatmul.bf16.gmra.mxu0 %v1590_v23  ;;  %v3091_v53 = vadd.f32 %v3090_v8, %v2922_v55  ;;  %v5669_v0 = vld [vmem:[%s4603_s11 + $0x3b8] sm:$0xff]  ;;  %v806_v15 = vunpack.c.0.s8 %v5660_v11 }
 0x3cc   : > { %3129 = vmatmul.bf16.gmra.mxu1 %v1591_v57 }
 0x3cd   : > { %v3917_v32 = vmul.f32 %v3740_v62, %v3426_v58  ;;  %3298 = vmatmul.bf16.gmra.mxu2 %v1592_v39  ;;  %v814_v39 = vunpack.c.1.s8 %v5660_v11  ;;  %v815_v58 = vunpack.c.1.s8 %v5663_v42  ;;  %v1318_v3 = vcvt.s32.f32 %v806_v15 }
 0x3ce   : > { %3467 = vmatmul.bf16.gmra.mxu3 %v1593_v10  ;;  %v807_v10 = vunpack.c.0.s8 %v5663_v42  ;;  %v833_v15 = vunpack.c.3.s8 %v5669_v0 }
 0x3cf   : > { %v3985_v27 = vadd.f32 %v5463_v37, %v3917_v32  ;;  %v1326_v35 = vcvt.s32.f32 %v814_v39 }
 0x3d0   : > { %v3259_v59 = vpop.f32.mrf.mxu2  ;;  %v2923_v9 = vpop.f32.mrf.mxu0  ;;  %v1319_v47 = vcvt.s32.f32 %v807_v10 }
 0x3d1   : > { %v3428_v22 = vpop.f32.mrf.mxu3  ;;  %4049 = vst [vmem:[%s5243_s18 + $0x118] sm:$0xff] %v3985_v27  ;;  %v3260_v40 = vadd.f32 %v3259_v59, %v3091_v53  ;;  %v3092_v29 = vpop.f32.mrf.mxu1  ;;  %v2924_v54 = vadd.f32 %v2923_v9, %v5847_v46  ;;  %v816_v27 = vunpack.c.1.s8 %v5666_v48  ;;  %v817_v53 = vunpack.c.1.s8 %v5669_v0  ;;  %v5849_v59 = vld [vmem:[#allocation12_spill] sm:$0xff] }
 0x3d2   : > { %v1320_v9 = vcvt.s32.f32 %v808_v38  ;;  %v1606_v20 = vpack.c.bf16 %v1326_v35, %v1318_v3  ;;  %v3765_v10 = vpop.permute.xlu1 %3764 }
 0x3d3   : > { %v3429_v63 = vadd.f32 %v3428_v22, %v3260_v40  ;;  %v3093_v51 = vadd.f32 %v3092_v29, %v2924_v54  ;;  %v1327_v40 = vcvt.s32.f32 %v815_v58  ;;  %v1328_v2 = vcvt.s32.f32 %v816_v27 }
 0x3d4   : > { %v1329_v33 = vcvt.s32.f32 %v817_v53 }
 0x3d5   : > { %v3918_v44 = vmul.f32 %v3745_v50, %v3429_v63  ;;  %v5685_v63 = vld [vmem:[%s5805_s3] ss:$0 sm:$0xff]  ;;  %v1607_v34 = vpack.c.bf16 %v1327_v40, %v1319_v47  ;;  %v1608_v1 = vpack.c.bf16 %v1328_v2, %v1320_v9 }
 0x3d7   : > { %v3986_v5 = vadd.f32 %v5463_v37, %v3918_v44 }
 0x3d8   : > { %v3261_v25 = vpop.f32.mrf.mxu2  ;;  %v2926_v31 = vpop.f32.mrf.mxu0 }
 0x3d9   : > { %v3430_v4 = vpop.f32.mrf.mxu3  ;;  %4050 = vst [vmem:[%s5243_s18 + $0x120] sm:$0xff] %v3986_v5  ;;  %v3262_v49 = vadd.f32 %v3261_v25, %v3093_v51  ;;  %v3095_v13 = vpop.f32.mrf.mxu1  ;;  %v2927_v7 = vadd.f32 %v2926_v31, %v5848_v56  ;;  %v5850_v5 = vld [vmem:[#allocation13_spill] sm:$0xff]  ;;  %v824_v56 = vunpack.c.2.s8 %v5666_v48 }
 0x3da   : > { %v3760_v25 = vpop.permute.xlu0 %3759 }
 0x3db   : > { %v3431_v12 = vadd.f32 %v3430_v4, %v3262_v49  ;;  %2965 = vmatmul.bf16.gmra.mxu0 %v1598_v21  ;;  %v3096_v57 = vadd.f32 %v3095_v13, %v2927_v7  ;;  %v822_v49 = vunpack.c.2.s8 %v5660_v11 }
 0x3dc   : > { %3134 = vmatmul.bf16.gmra.mxu1 %v1599_v24 }
 0x3dd   : > { %v3919_v30 = vmul.f32 %v3750_v26, %v3431_v12  ;;  %3303 = vmatmul.bf16.gmra.mxu2 %v1600_v61  ;;  %v830_v61 = vunpack.c.3.s8 %v5660_v11  ;;  %v831_v12 = vunpack.c.3.s8 %v5663_v42  ;;  %v1334_v11 = vcvt.s32.f32 %v822_v49 }
 0x3de   : > { %3472 = vmatmul.bf16.gmra.mxu3 %v1601_v43  ;;  %v823_v43 = vunpack.c.2.s8 %v5663_v42 }
 0x3df   : > { %v3987_v23 = vadd.f32 %v5463_v37, %v3919_v30  ;;  %v809_v37 = vunpack.c.0.s8 %v5669_v0  ;;  %v1342_v58 = vcvt.s32.f32 %v830_v61  ;;  %v1343_v38 = vcvt.s32.f32 %v831_v12 }
 0x3e0   : > { %v3264_v45 = vpop.f32.mrf.mxu2  ;;  %v2928_v62 = vpop.f32.mrf.mxu0  ;;  %v1335_v42 = vcvt.s32.f32 %v823_v43 }
 0x3e1   : > { %v3433_v8 = vpop.f32.mrf.mxu3  ;;  %4051 = vst [vmem:[%s5243_s18 + $0x128] sm:$0xff] %v3987_v23  ;;  %v3265_v55 = vadd.f32 %v3264_v45, %v3096_v57  ;;  %v3097_v32 = vpop.f32.mrf.mxu1  ;;  %v2929_v22 = vadd.f32 %v2928_v62, %v5849_v59  ;;  %v1321_v28 = vcvt.s32.f32 %v809_v37  ;;  %v832_v23 = vunpack.c.3.s8 %v5666_v48 }
 0x3e2   : > { %v825_v57 = vunpack.c.2.s8 %v5669_v0  ;;  %v1345_v37 = vcvt.s32.f32 %v833_v15  ;;  %v1614_v59 = vpack.c.bf16 %v1342_v58, %v1334_v11  ;;  %v3775_v12 = vpop.permute.xlu0 %3774 }
 0x3e3   : > { %v3434_v14 = vadd.f32 %v3433_v8, %v3265_v55  ;;  %v3098_v54 = vadd.f32 %v3097_v32, %v2929_v22  ;;  %v1609_v60 = vpack.c.bf16 %v1329_v33, %v1321_v28  ;;  %v5851_v8 = vld [vmem:[#allocation14_spill] sm:$0xff]  ;;  %v1336_v55 = vcvt.s32.f32 %v824_v56  ;;  %v3770_v28 = vpop.permute.xlu2 %3769 }
 0x3e4   : > { %v1344_v32 = vcvt.s32.f32 %v832_v23  ;;  %v1337_v27 = vcvt.s32.f32 %v825_v57  ;;  %v1615_v22 = vpack.c.bf16 %v1343_v38, %v1335_v42  ;;  %v5705_v33 = vld [vmem:[%s4603_s11 + $0x3e0] sm:$0xff] }
 0x3e5   : > { %v3920_v29 = vmul.f32 %v3755_v36, %v3434_v14 }
 0x3e6   : > { %v1616_v47 = vpack.c.bf16 %v1344_v32, %v1336_v55  ;;  %v1617_v40 = vpack.c.bf16 %v1345_v37, %v1337_v27 }
 0x3e7   : > { %v3988_v46 = vadd.f32 %v5685_v63, %v3920_v29  ;;  %v5852_v29 = vld [vmem:[#allocation15_spill] sm:$0xff] }
 0x3e8   : > { %v3266_v16 = vpop.f32.mrf.mxu2  ;;  %v2931_v6 = vpop.f32.mrf.mxu0 }
 0x3e9   : > { %v3435_v50 = vpop.f32.mrf.mxu3  ;;  %4052 = vst [vmem:[%s5243_s18 + $0x130] sm:$0xff] %v3988_v46  ;;  %v3267_v19 = vadd.f32 %v3266_v16, %v3098_v54  ;;  %v3100_v44 = vpop.f32.mrf.mxu1  ;;  %v2932_v51 = vadd.f32 %v2931_v6, %v5850_v5  ;;  %v5708_v54 = vld [vmem:[%s4603_s11 + $0x3e8] sm:$0xff]  ;;  %v5711_v16 = vld [vmem:[%s4603_s11 + $0x3f0] sm:$0xff] }
 0x3ea   : > { %v840_v5 = vunpack.c.0.s8 %v5711_v16 }
 0x3eb   : > { %v3436_v17 = vadd.f32 %v3435_v50, %v3267_v19  ;;  %2970 = vmatmul.bf16.gmra.mxu0 %v1606_v20  ;;  %v3101_v24 = vadd.f32 %v3100_v44, %v2932_v51  ;;  %v5714_v50 = vld [vmem:[%s4603_s11 + $0x3f8] sm:$0xff]  ;;  %v838_v19 = vunpack.c.0.s8 %v5705_v33 }
 0x3ec   : > { %3139 = vmatmul.bf16.gmra.mxu1 %v1607_v34  ;;  %v849_v49 = vunpack.c.1.s8 %v5714_v50 }
 0x3ed   : > { %v3921_v4 = vmul.f32 %v3760_v25, %v3436_v17  ;;  %3308 = vmatmul.bf16.gmra.mxu2 %v1608_v1  ;;  %v846_v1 = vunpack.c.1.s8 %v5705_v33  ;;  %v847_v17 = vunpack.c.1.s8 %v5708_v54  ;;  %v1350_v43 = vcvt.s32.f32 %v838_v19 }
 0x3ee   : > { %3477 = vmatmul.bf16.gmra.mxu3 %v1609_v60  ;;  %v839_v60 = vunpack.c.0.s8 %v5708_v54  ;;  %v865_v19 = vunpack.c.3.s8 %v5714_v50 }
 0x3ef   : > { %v3989_v21 = vadd.f32 %v5685_v63, %v3921_v4  ;;  %v1358_v56 = vcvt.s32.f32 %v846_v1 }
 0x3f0   : > { %v3269_v31 = vpop.f32.mrf.mxu2  ;;  %v2933_v26 = vpop.f32.mrf.mxu0 }
 0x3f1   : > { %v3438_v13 = vpop.f32.mrf.mxu3  ;;  %4053 = vst [vmem:[%s5243_s18 + $0x138] sm:$0xff] %v3989_v21  ;;  %v3270_v7 = vadd.f32 %v3269_v31, %v3101_v24  ;;  %v3102_v30 = vpop.f32.mrf.mxu1  ;;  %v2934_v39 = vadd.f32 %v2933_v26, %v5851_v8  ;;  %v848_v21 = vunpack.c.1.s8 %v5711_v16  ;;  %v841_v24 = vunpack.c.0.s8 %v5714_v50 }
 0x3f2   : > { %v1359_v26 = vcvt.s32.f32 %v847_v17  ;;  %v1622_v58 = vpack.c.bf16 %v1358_v56, %v1350_v43 }
 0x3f3   : > { %v3439_v45 = vadd.f32 %v3438_v13, %v3270_v7  ;;  %v3103_v53 = vadd.f32 %v3102_v30, %v2934_v39  ;;  %v5853_v13 = vld [vmem:[#allocation16_spill] sm:$0xff]  ;;  %v1351_v7 = vcvt.s32.f32 %v839_v60  ;;  %v1352_v30 = vcvt.s32.f32 %v840_v5  ;;  %v3785_v60 = vpop.permute.xlu2 %3784 }
 0x3f4   : > { %v1360_v57 = vcvt.s32.f32 %v848_v21  ;;  %v1353_v15 = vcvt.s32.f32 %v841_v24  ;;  %v1377_v24 = vcvt.s32.f32 %v865_v19 }
 0x3f5   : > { %v3922_v62 = vmul.f32 %v3765_v10, %v3439_v45  ;;  %v1361_v45 = vcvt.s32.f32 %v849_v49  ;;  %v1623_v42 = vpack.c.bf16 %v1359_v26, %v1351_v7 }
 0x3f6   : > { %v1624_v32 = vpack.c.bf16 %v1360_v57, %v1352_v30 }
 0x3f7   : > { %v3990_v48 = vadd.f32 %v5685_v63, %v3922_v62  ;;  %v1625_v27 = vpack.c.bf16 %v1361_v45, %v1353_v15  ;;  %v3790_v15 = vpop.permute.xlu0 %3789 }
 0x3f8   : > { %v3271_v14 = vpop.f32.mrf.mxu2  ;;  %v2936_v36 = vpop.f32.mrf.mxu0 }
 0x3f9   : > { %v3440_v0 = vpop.f32.mrf.mxu3  ;;  %4054 = vst [vmem:[%s5243_s18 + $0x140] sm:$0xff] %v3990_v48  ;;  %v3272_v3 = vadd.f32 %v3271_v14, %v3103_v53  ;;  %v3105_v35 = vpop.f32.mrf.mxu1  ;;  %v2937_v2 = vadd.f32 %v2936_v36, %v5852_v29  ;;  %v5854_v48 = vld [vmem:[#allocation17_spill] sm:$0xff]  ;;  %v856_v29 = vunpack.c.2.s8 %v5711_v16 }
 0x3fa   : > { %v3780_v14 = vpop.permute.xlu1 %3779 }
 0x3fb   : > { %v3441_v9 = vadd.f32 %v3440_v0, %v3272_v3  ;;  %2975 = vmatmul.bf16.gmra.mxu0 %v1614_v59  ;;  %v3106_v34 = vadd.f32 %v3105_v35, %v2937_v2  ;;  %v854_v3 = vunpack.c.2.s8 %v5705_v33 }
 0x3fc   : > { %3144 = vmatmul.bf16.gmra.mxu1 %v1615_v22 }
 0x3fd   : > { %v3923_v46 = vmul.f32 %v3770_v28, %v3441_v9  ;;  %3313 = vmatmul.bf16.gmra.mxu2 %v1616_v47  ;;  %v862_v47 = vunpack.c.3.s8 %v5705_v33  ;;  %v863_v9 = vunpack.c.3.s8 %v5708_v54  ;;  %v1366_v33 = vcvt.s32.f32 %v854_v3 }
 0x3fe   : > { %3482 = vmatmul.bf16.gmra.mxu3 %v1617_v40  ;;  %v855_v40 = vunpack.c.2.s8 %v5708_v54 }
 0x3ff   : > { %v3991_v20 = vadd.f32 %v5685_v63, %v3923_v46  ;;  %v1374_v17 = vcvt.s32.f32 %v862_v47  ;;  %v1375_v5 = vcvt.s32.f32 %v863_v9 }
 0x400   : > { %v3274_v6 = vpop.f32.mrf.mxu2  ;;  %v2938_v25 = vpop.f32.mrf.mxu0  ;;  %v1367_v54 = vcvt.s32.f32 %v855_v40 }
 0x401   : > { %v3443_v44 = vpop.f32.mrf.mxu3  ;;  %4055 = vst [vmem:[%s5243_s18 + $0x148] sm:$0xff] %v3991_v20  ;;  %v3275_v51 = vadd.f32 %v3274_v6, %v3106_v34  ;;  %v3107_v4 = vpop.f32.mrf.mxu1  ;;  %v2939_v61 = vadd.f32 %v2938_v25, %v5853_v13  ;;  %v864_v20 = vunpack.c.3.s8 %v5711_v16  ;;  %v857_v34 = vunpack.c.2.s8 %v5714_v50 }
 0x402   : > { %v1630_v50 = vpack.c.bf16 %v1374_v17, %v1366_v33  ;;  %v3800_v40 = vpop.permute.xlu2 %3799  ;;  %v3805_v33 = vpop.permute.xlu0 %3804 }
 0x403   : > { %v3444_v31 = vadd.f32 %v3443_v44, %v3275_v51  ;;  %v3108_v39 = vadd.f32 %v3107_v4, %v2939_v61  ;;  %v5855_v44 = vld [vmem:[#allocation18_spill] sm:$0xff]  ;;  %v1368_v51 = vcvt.s32.f32 %v856_v29  ;;  %v1376_v4 = vcvt.s32.f32 %v864_v20 }
 0x404   : > { %v1369_v21 = vcvt.s32.f32 %v857_v34  ;;  %v1631_v61 = vpack.c.bf16 %v1375_v5, %v1367_v54 }
 0x405   : > { %v3924_v23 = vmul.f32 %v3775_v12, %v3444_v31  ;;  %v1632_v7 = vpack.c.bf16 %v1376_v4, %v1368_v51 }
 0x406   : > { %v1633_v26 = vpack.c.bf16 %v1377_v24, %v1369_v21 }
 0x407   : > { %v3992_v8 = vadd.f32 %v5685_v63, %v3924_v23  ;;  %v5856_v23 = vld [vmem:[#allocation19_spill] sm:$0xff] }
 0x408   : > { %v3276_v11 = vpop.f32.mrf.mxu2  ;;  %v2941_v55 = vpop.f32.mrf.mxu0 }
 0x409   : > { %v3445_v10 = vpop.f32.mrf.mxu3  ;;  %4056 = vst [vmem:[%s5243_s18 + $0x150] sm:$0xff] %v3992_v8  ;;  %v3277_v38 = vadd.f32 %v3276_v11, %v3108_v39  ;;  %v3110_v62 = vpop.f32.mrf.mxu1  ;;  %v2942_v53 = vadd.f32 %v2941_v55, %v5854_v48 }
 0x40b   : > { %v3446_v37 = vadd.f32 %v3445_v10, %v3277_v38  ;;  %2980 = vmatmul.bf16.gmra.mxu0 %v1622_v58  ;;  %v3111_v22 = vadd.f32 %v3110_v62, %v2942_v53  ;;  %v5857_v62 = vld [vmem:[#allocation20_spill] sm:$0xff] }
 0x40c   : > { %3149 = vmatmul.bf16.gmra.mxu1 %v1623_v42 }
 0x40d   : > { %v3925_v0 = vmul.f32 %v3780_v14, %v3446_v37  ;;  %3318 = vmatmul.bf16.gmra.mxu2 %v1624_v32 }
 0x40e   : > { %3487 = vmatmul.bf16.gmra.mxu3 %v1625_v27  ;;  %v3795_v27 = vpop.permute.xlu1 %3794 }
 0x40f   : > { %v3993_v59 = vadd.f32 %v5685_v63, %v3925_v0 }
 0x410   : > { %v3279_v36 = vpop.f32.mrf.mxu2  ;;  %v2943_v28 = vpop.f32.mrf.mxu0 }
 0x411   : > { %v3448_v35 = vpop.f32.mrf.mxu3  ;;  %4057 = vst [vmem:[%s5243_s18 + $0x158] sm:$0xff] %v3993_v59  ;;  %v3280_v2 = vadd.f32 %v3279_v36, %v3111_v22  ;;  %v3112_v46 = vpop.f32.mrf.mxu1  ;;  %v2944_v1 = vadd.f32 %v2943_v28, %v5855_v44  ;;  %v5859_v44 = vld [vmem:[#allocation22_spill] sm:$0xff] }
 0x413   : > { %v3449_v6 = vadd.f32 %v3448_v35, %v3280_v2  ;;  %v3113_v49 = vadd.f32 %v3112_v46, %v2944_v1  ;;  %v5858_v35 = vld [vmem:[#allocation21_spill] sm:$0xff] }
 0x415   : > { %v3926_v25 = vmul.f32 %v3785_v60, %v3449_v6 }
 0x417   : > { %v3994_v16 = vadd.f32 %v5685_v63, %v3926_v25 }
 0x418   : > { %v3281_v31 = vpop.f32.mrf.mxu2  ;;  %v2946_v12 = vpop.f32.mrf.mxu0 }
 0x419   : > { %v3450_v13 = vpop.f32.mrf.mxu3  ;;  %4058 = vst [vmem:[%s5243_s18 + $0x160] sm:$0xff] %v3994_v16  ;;  %v3282_v43 = vadd.f32 %v3281_v31, %v3113_v49  ;;  %v3115_v56 = vpop.f32.mrf.mxu1  ;;  %v2947_v57 = vadd.f32 %v2946_v12, %v5856_v23 }
 0x41a   : > { %v3810_v49 = vpop.permute.xlu1 %3809 }
 0x41b   : > { %v3451_v30 = vadd.f32 %v3450_v13, %v3282_v43  ;;  %2985 = vmatmul.bf16.gmra.mxu0 %v1630_v50  ;;  %v3116_v39 = vadd.f32 %v3115_v56, %v2947_v57  ;;  %v3815_v57 = vpop.permute.xlu2 %3814 }
 0x41c   : > { %3154 = vmatmul.bf16.gmra.mxu1 %v1631_v61 }
 0x41d   : > { %v3927_v45 = vmul.f32 %v3790_v15, %v3451_v30  ;;  %3323 = vmatmul.bf16.gmra.mxu2 %v1632_v7  ;;  %v5860_v30 = vld [vmem:[#allocation23_spill] sm:$0xff] }
 0x41e   : > { %3492 = vmatmul.bf16.gmra.mxu3 %v1633_v26 }
 0x41f   : > { %v3995_v8 = vadd.f32 %v5685_v63, %v3927_v45 }
 0x420   : > { %v3284_v11 = vpop.f32.mrf.mxu2  ;;  %v2948_v42 = vpop.f32.mrf.mxu0 }
 0x421   : > { %v3453_v10 = vpop.f32.mrf.mxu3  ;;  %4059 = vst [vmem:[%s5243_s18 + $0x168] sm:$0xff] %v3995_v8  ;;  %v3285_v58 = vadd.f32 %v3284_v11, %v3116_v39  ;;  %v3117_v38 = vpop.f32.mrf.mxu1  ;;  %v2949_v32 = vadd.f32 %v2948_v42, %v5857_v62 }
 0x422   : > { %v3820_v62 = vpop.permute.xlu0 %3819 }
 0x423   : > { %v3454_v55 = vadd.f32 %v3453_v10, %v3285_v58  ;;  %v3118_v53 = vadd.f32 %v3117_v38, %v2949_v32  ;;  %v5861_v38 = vld [vmem:[#allocation24_spill] sm:$0xff] }
 0x425   : > { %v3928_v37 = vmul.f32 %v3795_v27, %v3454_v55 }
 0x427   : > { %v3996_v48 = vadd.f32 %v5685_v63, %v3928_v37 }
 0x428   : > { %v3286_v14 = vpop.f32.mrf.mxu2  ;;  %v2951_v22 = vpop.f32.mrf.mxu0 }
 0x429   : > { %v3455_v0 = vpop.f32.mrf.mxu3  ;;  %4060 = vst [vmem:[%s5243_s18 + $0x170] sm:$0xff] %v3996_v48  ;;  %v3287_v59 = vadd.f32 %v3286_v14, %v3118_v53  ;;  %v3120_v3 = vpop.f32.mrf.mxu1  ;;  %v2952_v47 = vadd.f32 %v2951_v22, %v5858_v35 }
 0x42a   : > { %v3825_v35 = vpop.permute.xlu1 %3824 }
 0x42b   : > { %v3456_v36 = vadd.f32 %v3455_v0, %v3287_v59  ;;  %v3121_v2 = vadd.f32 %v3120_v3, %v2952_v47  ;;  %v5862_v3 = vld [vmem:[#allocation25_spill] sm:$0xff] }
 0x42d   : > { %v3929_v9 = vmul.f32 %v3800_v40, %v3456_v36 }
 0x42f   : > { %v3997_v29 = vadd.f32 %v5685_v63, %v3929_v9 }
 0x430   : > { %v3289_v28 = vpop.f32.mrf.mxu2  ;;  %v2953_v34 = vpop.f32.mrf.mxu0 }
 0x431   : > { %v3458_v46 = vpop.f32.mrf.mxu3  ;;  %4061 = vst [vmem:[%s5243_s18 + $0x178] sm:$0xff] %v3997_v29  ;;  %v3290_v20 = vadd.f32 %v3289_v28, %v3121_v2  ;;  %v3122_v19 = vpop.f32.mrf.mxu1  ;;  %v2954_v1 = vadd.f32 %v2953_v34, %v5859_v44 }
 0x432   : > { %v3830_v44 = vpop.permute.xlu2 %3829 }
 0x433   : > { %v3459_v6 = vadd.f32 %v3458_v46, %v3290_v20  ;;  %v3123_v54 = vadd.f32 %v3122_v19, %v2954_v1  ;;  %v5863_v19 = vld [vmem:[#allocation26_spill] sm:$0xff] }
 0x435   : > { %v3930_v60 = vmul.f32 %v3805_v33, %v3459_v6 }
 0x437   : > { %v3998_v17 = vadd.f32 %v5685_v63, %v3930_v60 }
 0x438   : > { %v3291_v5 = vpop.f32.mrf.mxu2  ;;  %v2956_v4 = vpop.f32.mrf.mxu0 }
 0x439   : > { %v3460_v51 = vpop.f32.mrf.mxu3  ;;  %4062 = vst [vmem:[%s5243_s18 + $0x180] sm:$0xff] %v3998_v17  ;;  %v3292_v25 = vadd.f32 %v3291_v5, %v3123_v54  ;;  %v3125_v21 = vpop.f32.mrf.mxu1  ;;  %v2957_v16 = vadd.f32 %v2956_v4, %v5103_v18 }
 0x43b   : > { %v3461_v24 = vadd.f32 %v3460_v51, %v3292_v25  ;;  %v3126_v50 = vadd.f32 %v3125_v21, %v2957_v16  ;;  %v5864_v21 = vld [vmem:[#allocation27_spill] sm:$0xff]  ;;  %v3835_v16 = vpop.permute.xlu0 %3834 }
 0x43d   : > { %v3931_v31 = vmul.f32 %v3810_v49, %v3461_v24 }
 0x43f   : > { %v3999_v13 = vadd.f32 %v5685_v63, %v3931_v31 }
 0x440   : > { %v3294_v61 = vpop.f32.mrf.mxu2  ;;  %v2958_v56 = vpop.f32.mrf.mxu0 }
 0x441   : > { %v3463_v43 = vpop.f32.mrf.mxu3  ;;  %4063 = vst [vmem:[%s5243_s18 + $0x188] sm:$0xff] %v3999_v13  ;;  %v3295_v12 = vadd.f32 %v3294_v61, %v3126_v50  ;;  %v3127_v7 = vpop.f32.mrf.mxu1  ;;  %v2959_v23 = vadd.f32 %v2958_v56, %v5860_v30 }
 0x443   : > { %v3464_v26 = vadd.f32 %v3463_v43, %v3295_v12  ;;  %v3128_v18 = vadd.f32 %v3127_v7, %v2959_v23  ;;  %v3840_v23 = vpop.permute.xlu1 %3839 }
 0x445   : > { %v3932_v15 = vmul.f32 %v3815_v57, %v3464_v26  ;;  %v5865_v26 = vld [vmem:[#allocation28_spill] sm:$0xff] }
 0x447   : > { %v4000_v45 = vadd.f32 %v5685_v63, %v3932_v15 }
 0x448   : > { %v3296_v8 = vpop.f32.mrf.mxu2  ;;  %v2961_v10 = vpop.f32.mrf.mxu0 }
 0x449   : > { %v3465_v39 = vpop.f32.mrf.mxu3  ;;  %4064 = vst [vmem:[%s5243_s18 + $0x190] sm:$0xff] %v4000_v45  ;;  %v3297_v11 = vadd.f32 %v3296_v8, %v3128_v18  ;;  %v3130_v58 = vpop.f32.mrf.mxu1  ;;  %v2962_v55 = vadd.f32 %v2961_v10, %v5861_v38 }
 0x44b   : > { %v3466_v42 = vadd.f32 %v3465_v39, %v3297_v11  ;;  %v3131_v37 = vadd.f32 %v3130_v58, %v2962_v55  ;;  %v3845_v55 = vpop.permute.xlu2 %3844 }
 0x44d   : > { %v3933_v32 = vmul.f32 %v3820_v62, %v3466_v42  ;;  %v5866_v42 = vld [vmem:[#allocation29_spill] sm:$0xff] }
 0x44f   : > { %v4001_v27 = vadd.f32 %v5685_v63, %v3933_v32 }
 0x450   : > { %v3299_v48 = vpop.f32.mrf.mxu2  ;;  %v2963_v0 = vpop.f32.mrf.mxu0 }
 0x451   : > { %v3468_v53 = vpop.f32.mrf.mxu3  ;;  %4065 = vst [vmem:[%s5243_s18 + $0x198] sm:$0xff] %v4001_v27  ;;  %v3300_v14 = vadd.f32 %v3299_v48, %v3131_v37  ;;  %v3132_v59 = vpop.f32.mrf.mxu1  ;;  %v2964_v36 = vadd.f32 %v2963_v0, %v5862_v3 }
 0x453   : > { %v3469_v22 = vadd.f32 %v3468_v53, %v3300_v14  ;;  %v3133_v9 = vadd.f32 %v3132_v59, %v2964_v36  ;;  %v3850_v36 = vpop.permute.xlu0 %3849 }
 0x455   : > { %v3934_v47 = vmul.f32 %v3825_v35, %v3469_v22  ;;  %v5867_v22 = vld [vmem:[#allocation30_spill] sm:$0xff] }
 0x457   : > { %v4002_v40 = vadd.f32 %v5685_v63, %v3934_v47 }
 0x458   : > { %v3301_v29 = vpop.f32.mrf.mxu2  ;;  %v2966_v46 = vpop.f32.mrf.mxu0 }
 0x459   : > { %v3470_v2 = vpop.f32.mrf.mxu3  ;;  %4066 = vst [vmem:[%s5243_s18 + $0x1a0] sm:$0xff] %v4002_v40  ;;  %v3302_v28 = vadd.f32 %v3301_v29, %v3133_v9  ;;  %v3135_v20 = vpop.f32.mrf.mxu1  ;;  %v2967_v6 = vadd.f32 %v2966_v46, %v5863_v19 }
 0x45b   : > { %v3471_v34 = vadd.f32 %v3470_v2, %v3302_v28  ;;  %v3136_v60 = vadd.f32 %v3135_v20, %v2967_v6  ;;  %v3855_v6 = vpop.permute.xlu1 %3854 }
 0x45d   : > { %v3935_v1 = vmul.f32 %v3830_v44, %v3471_v34  ;;  %v5868_v34 = vld [vmem:[#allocation31_spill] sm:$0xff] }
 0x45f   : > { %v4003_v33 = vadd.f32 %v5685_v63, %v3935_v1 }
 0x460   : > { %v3304_v17 = vpop.f32.mrf.mxu2  ;;  %v2968_v51 = vpop.f32.mrf.mxu0 }
 0x461   : > { %v3473_v54 = vpop.f32.mrf.mxu3  ;;  %4067 = vst [vmem:[%s5243_s18 + $0x1a8] sm:$0xff] %v4003_v33  ;;  %v3305_v5 = vadd.f32 %v3304_v17, %v3136_v60  ;;  %v3137_v25 = vpop.f32.mrf.mxu1  ;;  %v2969_v24 = vadd.f32 %v2968_v51, %v5864_v21 }
 0x463   : > { %v3474_v4 = vadd.f32 %v3473_v54, %v3305_v5  ;;  %v3138_v13 = vadd.f32 %v3137_v25, %v2969_v24  ;;  %v3860_v24 = vpop.permute.xlu2 %3859 }
 0x465   : > { %v3936_v49 = vmul.f32 %v3835_v16, %v3474_v4  ;;  %v5869_v4 = vld [vmem:[#allocation32_spill] sm:$0xff] }
 0x467   : > { %v4004_v31 = vadd.f32 %v5685_v63, %v3936_v49 }
 0x468   : > { %v3306_v50 = vpop.f32.mrf.mxu2  ;;  %v2971_v12 = vpop.f32.mrf.mxu0 }
 0x469   : > { %v3475_v61 = vpop.f32.mrf.mxu3  ;;  %4068 = vst [vmem:[%s5243_s18 + $0x1b0] sm:$0xff] %v4004_v31  ;;  %v3307_v43 = vadd.f32 %v3306_v50, %v3138_v13  ;;  %v3140_v56 = vpop.f32.mrf.mxu1  ;;  %v2972_v30 = vadd.f32 %v2971_v12, %v5865_v26 }
 0x46b   : > { %v3476_v7 = vadd.f32 %v3475_v61, %v3307_v43  ;;  %v3141_v45 = vadd.f32 %v3140_v56, %v2972_v30  ;;  %v3865_v30 = vpop.permute.xlu0 %3864 }
 0x46d   : > { %v3937_v57 = vmul.f32 %v3840_v23, %v3476_v7  ;;  %v5870_v7 = vld [vmem:[#allocation33_spill] sm:$0xff] }
 0x46f   : > { %v4005_v15 = vadd.f32 %v5685_v63, %v3937_v57 }
 0x470   : > { %v3309_v18 = vpop.f32.mrf.mxu2  ;;  %v2973_v11 = vpop.f32.mrf.mxu0 }
 0x471   : > { %v3478_v8 = vpop.f32.mrf.mxu3  ;;  %4069 = vst [vmem:[%s5243_s18 + $0x1b8] sm:$0xff] %v4005_v15  ;;  %v3310_v39 = vadd.f32 %v3309_v18, %v3141_v45  ;;  %v3142_v10 = vpop.f32.mrf.mxu1  ;;  %v2974_v38 = vadd.f32 %v2973_v11, %v5866_v42 }
 0x473   : > { %v3479_v58 = vadd.f32 %v3478_v8, %v3310_v39  ;;  %v3143_v27 = vadd.f32 %v3142_v10, %v2974_v38 }
 0x475   : > { %v3938_v62 = vmul.f32 %v3845_v55, %v3479_v58  ;;  %v3870_v58 = vpop.permute.xlu1 %3869 }
 0x477   : > { %v4006_v32 = vadd.f32 %v5685_v63, %v3938_v62 }
 0x478   : > { %v3311_v37 = vpop.f32.mrf.mxu2  ;;  %v2976_v14 = vpop.f32.mrf.mxu0 }
 0x479   : > { %v3480_v48 = vpop.f32.mrf.mxu3  ;;  %4070 = vst [vmem:[%s5243_s18 + $0x1c0] sm:$0xff] %v4006_v32  ;;  %v3312_v53 = vadd.f32 %v3311_v37, %v3143_v27  ;;  %v3145_v0 = vpop.f32.mrf.mxu1  ;;  %v2977_v3 = vadd.f32 %v2976_v14, %v5867_v22 }
 0x47b   : > { %v3481_v59 = vadd.f32 %v3480_v48, %v3312_v53  ;;  %v3146_v40 = vadd.f32 %v3145_v0, %v2977_v3  ;;  %v3875_v0 = vpop.permute.xlu2 %3874 }
 0x47d   : > { %v3939_v35 = vmul.f32 %v3850_v36, %v3481_v59 }
 0x47f   : > { %v4007_v47 = vadd.f32 %v5685_v63, %v3939_v35 }
 0x480   : > { %v3314_v9 = vpop.f32.mrf.mxu2  ;;  %v2978_v28 = vpop.f32.mrf.mxu0 }
 0x481   : > { %v3483_v29 = vpop.f32.mrf.mxu3  ;;  %4071 = vst [vmem:[%s5243_s18 + $0x1c8] sm:$0xff] %v4007_v47  ;;  %v3315_v2 = vadd.f32 %v3314_v9, %v3146_v40  ;;  %v3147_v46 = vpop.f32.mrf.mxu1  ;;  %v2979_v19 = vadd.f32 %v2978_v28, %v5868_v34 }
 0x482   : > { %v3880_v9 = vpop.permute.xlu0 %3879 }
 0x483   : > { %v3484_v20 = vadd.f32 %v3483_v29, %v3315_v2  ;;  %v3148_v33 = vadd.f32 %v3147_v46, %v2979_v19 }
 0x485   : > { %v3940_v44 = vmul.f32 %v3855_v6, %v3484_v20 }
 0x487   : > { %v4008_v1 = vadd.f32 %v5685_v63, %v3940_v44 }
 0x488   : > { %v3316_v60 = vpop.f32.mrf.mxu2  ;;  %v2981_v5 = vpop.f32.mrf.mxu0 }
 0x489   : > { %v3485_v17 = vpop.f32.mrf.mxu3  ;;  %4072 = vst [vmem:[%s5243_s18 + $0x1d0] sm:$0xff] %v4008_v1  ;;  %v3317_v54 = vadd.f32 %v3316_v60, %v3148_v33  ;;  %v3150_v51 = vpop.f32.mrf.mxu1  ;;  %v2982_v21 = vadd.f32 %v2981_v5, %v5869_v4 }
 0x48b   : > { %v3486_v25 = vadd.f32 %v3485_v17, %v3317_v54  ;;  %v3151_v31 = vadd.f32 %v3150_v51, %v2982_v21 }
 0x48d   : > { %v3941_v16 = vmul.f32 %v3860_v24, %v3486_v25 }
 0x48f   : > { %v4009_v49 = vadd.f32 %v5685_v63, %v3941_v16 }
 0x490   : > { %v3319_v13 = vpop.f32.mrf.mxu2  ;;  %v2983_v43 = vpop.f32.mrf.mxu0 }
 0x491   : > { %v3488_v50 = vpop.f32.mrf.mxu3  ;;  %4073 = vst [vmem:[%s5243_s18 + $0x1d8] sm:$0xff] %v4009_v49  ;;  %v3320_v61 = vadd.f32 %v3319_v13, %v3151_v31  ;;  %v3152_v12 = vpop.f32.mrf.mxu1  ;;  %v2984_v26 = vadd.f32 %v2983_v43, %v5870_v7 }
 0x493   : > { %v3489_v56 = vadd.f32 %v3488_v50, %v3320_v61  ;;  %v3153_v15 = vadd.f32 %v3152_v12, %v2984_v26 }
 0x495   : > { %v3942_v23 = vmul.f32 %v3865_v30, %v3489_v56 }
 0x497   : > { %v4010_v57 = vadd.f32 %v5685_v63, %v3942_v23 }
 0x498   : > { %v3321_v45 = vpop.f32.mrf.mxu2  ;;  %v2986_v39 = vpop.f32.mrf.mxu0 }
 0x499   : > { %v3490_v18 = vpop.f32.mrf.mxu3  ;;  %4074 = vst [vmem:[%s5243_s18 + $0x1e0] sm:$0xff] %v4010_v57  ;;  %v3322_v8 = vadd.f32 %v3321_v45, %v3153_v15  ;;  %v2987_v10 = vadd.f32 %v2986_v39, %v5217_v41  ;;  %v3155_v42 = vpop.f32.mrf.mxu1 }
 0x49b   : > { %v3491_v11 = vadd.f32 %v3490_v18, %v3322_v8  ;;  %v3156_v62 = vadd.f32 %v3155_v42, %v2987_v10 }
 0x49d   : > { %v3943_v38 = vmul.f32 %v3870_v58, %v3491_v11 }
 0x49f   : > { %v4011_v55 = vadd.f32 %v5685_v63, %v3943_v38 }
 0x4a0   : > { %v3324_v32 = vpop.f32.mrf.mxu2  ;;  %v2988_v48 = vpop.f32.mrf.mxu0 }
 0x4a1   : > { %v3493_v27 = vpop.f32.mrf.mxu3  ;;  %4075 = vst [vmem:[%s5243_s18 + $0x1e8] sm:$0xff] %v4011_v55  ;;  %v3325_v37 = vadd.f32 %v3324_v32, %v3156_v62  ;;  %v2989_v14 = vadd.f32 %v2988_v48, %v5220_v52  ;;  %v3157_v22 = vpop.f32.mrf.mxu1 }
 0x4a3   : > { %v3494_v53 = vadd.f32 %v3493_v27, %v3325_v37  ;;  %v3158_v3 = vadd.f32 %v3157_v22, %v2989_v14 }
 0x4a5   : > { %v3944_v59 = vmul.f32 %v3875_v0, %v3494_v53 }
 0x4a7   : > { %v4012_v41 = vadd.f32 %v5685_v63, %v3944_v59 }
 0x4a8   : > { %v3326_v36 = vpop.f32.mrf.mxu2 }
 0x4a9   : > { %4076 = vst [vmem:[%s5243_s18 + $0x1f0] sm:$0xff] %v4012_v41  ;;  %v3327_v35 = vadd.f32 %v3326_v36, %v3158_v3  ;;  %v3495_v47 = vpop.f32.mrf.mxu3 }
 0x4ab   : > { %v3496_v40 = vadd.f32 %v3495_v47, %v3327_v35 }
 0x4ad   : > { %v3945_v29 = vmul.f32 %v3880_v9, %v3496_v40 }
 0x4af   : > { %v4013_v2 = vadd.f32 %v5685_v63, %v3945_v29 }
 0x4b1   : > { %4077 = vst [vmem:[%s5243_s18 + $0x1f8] sm:$0xff] %v4013_v2 }
 0x4b2 PF: > { %s14_s15 = sadd.s32 1, %s4502_s15  }
 0x4b3   : > { %p11_p5 = scmp.ge.s32.totalorder %s14_s15, 4  }
 0x4b5   :  { %13 = sbr.rel (!%p11_p5) target bundleno = 1 (0x1), region = 69 }

// kernel: gcn_with_dhla_forward.3
= control target key start
LH: loop header
LB: loop body
LE: loop exit
PB: predicated region body
PF: predicated region fallthrough
CT: control target
= control target key end

     0   :  { %s5627_s24 = smov 0   ;;  %s7331_s0 = inlined_call_operand.vmem [shape: s8[1024,1024], index: 0, kind: input, shape index: {}]   ;;  %s7332_s1 = inlined_call_operand.vmem [shape: bf16[1024,128], index: 1, kind: input, shape index: {}]   ;;  %s7333_s2 = inlined_call_operand.vmem [shape: bf16[128,128], index: 2, kind: input, shape index: {}]   ;;  %s7334_s3 = inlined_call_operand.vmem [shape: f32[1,128], index: 3, kind: input, shape index: {}]   ;;  %s7335_s4 = inlined_call_operand.vmem [shape: f32[1024,1], index: 4, kind: input, shape index: {}]   ;;  %s7336_s5 = inlined_call_operand.vmem [shape: f32[1024,1], index: 5, kind: input, shape index: {}]   ;;  %s7337_s6 = inlined_call_operand.vmem [shape: f32[1024,128], index: 6, kind: output, shape index: {0}]   ;;  %s7338_s7 = inlined_call_operand.vmem [shape: f32[16,128], index: 7, kind: output, shape index: {1}]  }
   0x1 LB: > { %s5633_s25 = sadd.s32 4294967295, %s5584_s24   ;;  %p5165_p0 = scmp.ge.s32.totalorder %s5584_s24, 1  ;;  %s5584_s24 = sphi %s5627_s24, %s18_s24  }
   0x2   : > { %p264_p1 = scmp.lt.s32.totalorder %s5584_s24, 3 }
   0x4   : > { %p265_p2 = pnand %p5165_p0, %p264_p1 }
   0x6   : > { %268 = sbr.rel (%p265_p2) target bundleno = 1485 (0x5cd), region = 44 }
   0xb   : > { %v5474_v0 = vld [vmem:[%s7332_s1 + $0x38] sm:$0xff]  ;;  %s5166_s28 = sshll.u32 %s5633_s25, 4  ;;  %v5473_v1 = vld [vmem:[%s7332_s1 + $0x30] sm:$0xff]  ;;  %v5472_v2 = vld [vmem:[%s7332_s1 + $0x28] sm:$0xff]  ;;  %s5169_s30 = sshll.u32 %s5633_s25, 6 }
   0xc   : > { %5539 = vmatpush.bf16.msra.mxu1 %v5474_v0  ;;  %5540 = vmatpush.bf16.msra.mxu2 %v5474_v0  ;;  %p312_p3 = scmp.lt.s32.totalorder %s5166_s28, 31  ;;  %v5471_v3 = vld [vmem:[%s7332_s1 + $0x20] sm:$0xff]  ;;  %v5470_v4 = vld [vmem:[%s7332_s1 + $0x18] sm:$0xff]  ;;  %v5469_v5 = vld [vmem:[%s7332_s1 + $0x10] sm:$0xff]  ;;  %p319_p4 = scmp.lt.s32.totalorder %s5169_s30, 127 }
   0xd   : > { %5541 = vmatpush.bf16.msra.mxu3 %v5474_v0  ;;  %2260 = vmatpush.bf16.msra.mxu0 %v5474_v0  ;;  %v5468_v14 = vld [vmem:[%s7332_s1 + $0x8] sm:$0xff]  ;;  %v5467_v23 = vld [vmem:[%s7332_s1] sm:$0xff]  ;;  %v5490_v26 = vld [vmem:[%s7332_s1 + $0xb8] sm:$0xff]  ;;  %p336_p5 = scmp.lt.s32.totalorder %s5633_s25, 1 }
   0xe   : > { %s7544_s28 = smov (!%p312_p3, %s5166_s28), 31  ;;  %v5498_v27 = vld [vmem:[%s7332_s1 + $0xf8] sm:$0xff]  ;;  %v5489_v34 = vld [vmem:[%s7332_s1 + $0xb0] sm:$0xff]  ;;  %v5488_v38 = vld [vmem:[%s7332_s1 + $0xa8] sm:$0xff]  ;;  %s7546_s30 = smov (!%p319_p4, %s5169_s30), 127 }
   0xf   : > { %s5466_s12 = sshll.u32 %s7544_s28, 6  ;;  %v5482_v28 = vld [vmem:[%s7332_s1 + $0x78] sm:$0xff]  ;;  %v5497_v35 = vld [vmem:[%s7332_s1 + $0xf0] sm:$0xff]  ;;  %v5496_v41 = vld [vmem:[%s7332_s1 + $0xe8] sm:$0xff]  ;;  %s6012_s8 = sshll.u32 %s7546_s30, 3 }
  0x10   : > { %5542 = vmatpush.bf16.msra.mxu1 %v5473_v1  ;;  %5543 = vmatpush.bf16.msra.mxu2 %v5473_v1  ;;  %s5656_s17 = scalar_lea.vmem %s7331_s0, %s5466_s12  ;;  %v5481_v36 = vld [vmem:[%s7332_s1 + $0x70] sm:$0xff]  ;;  %v5480_v42 = vld [vmem:[%s7332_s1 + $0x68] sm:$0xff]  ;;  %v5487_v63 = vld [vmem:[%s7332_s1 + $0xa0] sm:$0xff]  ;;  %s6027_s15 = scalar_lea.vmem %s7335_s4, %s6012_s8 }
  0x11   : > { %5544 = vmatpush.bf16.msra.mxu3 %v5473_v1  ;;  %2261 = vmatpush.bf16.msra.mxu0 %v5473_v1  ;;  %v5662_v6 = vld [vmem:[%s5656_s17 + $0x100] sm:$0xff]  ;;  %s6342_s21 = scalar_lea.vmem %s7336_s5, %s6012_s8  ;;  %s6940_s29 = scalar_lea.vmem %s7337_s6, %s6012_s8 }
  0x12   : > { %v5665_v7 = vld [vmem:[%s5656_s17 + $0x200] sm:$0xff]  ;;  %v596_v9 = vunpack.c.0.s8 %v5662_v6  ;;  %v604_v10 = vunpack.c.1.s8 %v5662_v6  ;;  %v612_v39 = vunpack.c.2.s8 %v5662_v6  ;;  %v620_v40 = vunpack.c.3.s8 %v5662_v6  ;;  %s7548_s25 = smov (!%p336_p5, %s5633_s25), 1 }
  0x13   : > { %v5668_v8 = vld [vmem:[%s5656_s17 + $0x300] sm:$0xff]  ;;  %v724_v11 = vunpack.c.0.s8 %v5665_v7  ;;  %v732_v12 = vunpack.c.1.s8 %v5665_v7  ;;  %v740_v43 = vunpack.c.2.s8 %v5665_v7  ;;  %v748_v44 = vunpack.c.3.s8 %v5665_v7 }
  0x14   : > { %5545 = vmatpush.bf16.msra.mxu1 %v5472_v2  ;;  %5546 = vmatpush.bf16.msra.mxu2 %v5472_v2  ;;  %v5675_v13 = vld [vmem:[%s5656_s17] sm:$0xff]  ;;  %v852_v15 = vunpack.c.0.s8 %v5668_v8  ;;  %v860_v16 = vunpack.c.1.s8 %v5668_v8  ;;  %v1108_v19 = vcvt.s32.f32 %v596_v9  ;;  %v1116_v20 = vcvt.s32.f32 %v604_v10 }
  0x15   : > { %5547 = vmatpush.bf16.msra.mxu3 %v5472_v2  ;;  %2262 = vmatpush.bf16.msra.mxu0 %v5472_v2  ;;  %v468_v17 = vunpack.c.0.s8 %v5675_v13  ;;  %v476_v18 = vunpack.c.1.s8 %v5675_v13  ;;  %v1236_v21 = vcvt.s32.f32 %v724_v11  ;;  %v1244_v22 = vcvt.s32.f32 %v732_v12  ;;  %v380_v61 = vld [vmem:[%s5656_s17 + $0x140] sm:$0xff] }
  0x16   : > { %v1364_v24 = vcvt.s32.f32 %v852_v15  ;;  %v1372_v25 = vcvt.s32.f32 %v860_v16  ;;  %v1556_v29 = vpack.c.bf16 %v1116_v20, %v1108_v19  ;;  %v868_v45 = vunpack.c.2.s8 %v5668_v8  ;;  %v412_v62 = vld [vmem:[%s5656_s17 + $0x240] sm:$0xff] }
  0x17   : > { %v1620_v30 = vpack.c.bf16 %v1244_v22, %v1236_v21  ;;  %v980_v31 = vcvt.s32.f32 %v468_v17  ;;  %v988_v32 = vcvt.s32.f32 %v476_v18  ;;  %v876_v46 = vunpack.c.3.s8 %v5668_v8  ;;  %v5495_v0 = vld [vmem:[%s7332_s1 + $0xe0] sm:$0xff] }
  0x18   : > { %5548 = vmatpush.bf16.msra.mxu1 %v5471_v3  ;;  %5549 = vmatpush.bf16.msra.mxu2 %v5471_v3  ;;  %v1684_v33 = vpack.c.bf16 %v1372_v25, %v1364_v24  ;;  %v1124_v47 = vcvt.s32.f32 %v612_v39  ;;  %v1132_v48 = vcvt.s32.f32 %v620_v40  ;;  %v1252_v49 = vcvt.s32.f32 %v740_v43  ;;  %v5479_v1 = vld [vmem:[%s7332_s1 + $0x60] sm:$0xff]  ;;  %v5486_v24 = vld [vmem:[%s7332_s1 + $0x98] sm:$0xff] }
  0x19   : > { %5550 = vmatpush.bf16.msra.mxu3 %v5471_v3  ;;  %2263 = vmatpush.bf16.msra.mxu0 %v5471_v3  ;;  %v1492_v37 = vpack.c.bf16 %v988_v32, %v980_v31  ;;  %v1260_v50 = vcvt.s32.f32 %v748_v44  ;;  %v484_v51 = vunpack.c.2.s8 %v5675_v13  ;;  %v492_v52 = vunpack.c.3.s8 %v5675_v13  ;;  %v444_v2 = vld [vmem:[%s5656_s17 + $0x340] sm:$0xff]  ;;  %v5494_v25 = vld [vmem:[%s7332_s1 + $0xd8] sm:$0xff] }
  0x1a   : > { %v1380_v53 = vcvt.s32.f32 %v868_v45  ;;  %v1388_v54 = vcvt.s32.f32 %v876_v46  ;;  %v1564_v55 = vpack.c.bf16 %v1132_v48, %v1124_v47  ;;  %v628_v3 = vunpack.c.0.s8 %v380_v61  ;;  %v348_v9 = vld [vmem:[%s5656_s17 + $0x40] sm:$0xff] }
  0x1b   : > { %v1628_v56 = vpack.c.bf16 %v1260_v50, %v1252_v49  ;;  %v996_v57 = vcvt.s32.f32 %v484_v51  ;;  %v1004_v58 = vcvt.s32.f32 %v492_v52  ;;  %v764_v6 = vunpack.c.1.s8 %v412_v62  ;;  %v388_v47 = vld [vmem:[%s5656_s17 + $0x180] sm:$0xff]  ;;  %v5485_v49 = vld [vmem:[%s7332_s1 + $0x90] sm:$0xff] }
  0x1c   : > { %5551 = vmatpush.bf16.msra.mxu1 %v5470_v4  ;;  %5552 = vmatpush.bf16.msra.mxu2 %v5470_v4  ;;  %v1692_v59 = vpack.c.bf16 %v1388_v54, %v1380_v53  ;;  %v884_v7 = vunpack.c.0.s8 %v444_v2  ;;  %v892_v8 = vunpack.c.1.s8 %v444_v2  ;;  %v1140_v10 = vcvt.s32.f32 %v628_v3  ;;  %v420_v48 = vld [vmem:[%s5656_s17 + $0x280] sm:$0xff]  ;;  %v5493_v50 = vld [vmem:[%s7332_s1 + $0xd0] sm:$0xff] }
  0x1d   : > { %5553 = vmatpush.bf16.msra.mxu3 %v5470_v4  ;;  %2264 = vmatpush.bf16.msra.mxu0 %v5470_v4  ;;  %v1500_v60 = vpack.c.bf16 %v1004_v58, %v996_v57  ;;  %v636_v4 = vunpack.c.1.s8 %v380_v61  ;;  %v1276_v13 = vcvt.s32.f32 %v764_v6  ;;  %v508_v15 = vunpack.c.1.s8 %v348_v9  ;;  %v5477_v51 = vld [vmem:[%s7332_s1 + $0x50] sm:$0xff]  ;;  %v452_v52 = vld [vmem:[%s5656_s17 + $0x380] sm:$0xff] }
  0x1e   : > { %v1396_v16 = vcvt.s32.f32 %v884_v7  ;;  %v1404_v17 = vcvt.s32.f32 %v892_v8  ;;  %v900_v31 = vunpack.c.2.s8 %v444_v2  ;;  %v908_v32 = vunpack.c.3.s8 %v444_v2 }
  0x1f   : > { %v1148_v11 = vcvt.s32.f32 %v636_v4  ;;  %v1020_v21 = vcvt.s32.f32 %v508_v15  ;;  %v660_v53 = vunpack.c.0.s8 %v388_v47  ;;  %v668_v54 = vunpack.c.1.s8 %v388_v47 }
  0x20   : > { %5554 = vmatpush.bf16.msra.mxu1 %v5469_v5  ;;  %5555 = vmatpush.bf16.msra.mxu2 %v5469_v5  ;;  %v1700_v22 = vpack.c.bf16 %v1404_v17, %v1396_v16  ;;  %v1412_v39 = vcvt.s32.f32 %v900_v31  ;;  %v1420_v40 = vcvt.s32.f32 %v908_v32  ;;  %v916_v57 = vunpack.c.0.s8 %v452_v52  ;;  %v5506_v17 = vld [vmem:[%s7332_s1 + $0x138] sm:$0xff] }
  0x21   : > { %5556 = vmatpush.bf16.msra.mxu3 %v5469_v5  ;;  %2265 = vmatpush.bf16.msra.mxu0 %v5469_v5  ;;  %v756_v5 = vunpack.c.0.s8 %v412_v62  ;;  %v1572_v18 = vpack.c.bf16 %v1148_v11, %v1140_v10  ;;  %v924_v58 = vunpack.c.1.s8 %v452_v52  ;;  %v5484_v10 = vld [vmem:[%s7332_s1 + $0x88] sm:$0xff]  ;;  %v804_v15 = vunpack.c.2.s8 %v420_v48 }
  0x22   : > { %v1708_v45 = vpack.c.bf16 %v1420_v40, %v1412_v39  ;;  %v1428_v2 = vcvt.s32.f32 %v916_v57  ;;  %v5492_v11 = vld [vmem:[%s7332_s1 + $0xc8] sm:$0xff]  ;;  %v812_v16 = vunpack.c.3.s8 %v420_v48  ;;  %v460_v40 = vld [vmem:[%s5656_s17 + $0x3c0] sm:$0xff] }
  0x23   : > { %v1268_v12 = vcvt.s32.f32 %v756_v5  ;;  %v1436_v3 = vcvt.s32.f32 %v924_v58  ;;  %v5504_v39 = vld [vmem:[%s7332_s1 + $0x128] sm:$0xff]  ;;  %v5502_v58 = vld [vmem:[%s7332_s1 + $0x118] sm:$0xff] }
  0x24   : > { %5557 = vmatpush.bf16.msra.mxu1 %v5468_v14  ;;  %5558 = vmatpush.bf16.msra.mxu2 %v5468_v14 }
  0x25   : > { %5559 = vmatpush.bf16.msra.mxu3 %v5468_v14  ;;  %2266 = vmatpush.bf16.msra.mxu0 %v5468_v14  ;;  %v500_v14 = vunpack.c.0.s8 %v348_v9  ;;  %v1636_v19 = vpack.c.bf16 %v1276_v13, %v1268_v12  ;;  %v1716_v8 = vpack.c.bf16 %v1436_v3, %v1428_v2  ;;  %v5476_v12 = vld [vmem:[%s7332_s1 + $0x48] sm:$0xff]  ;;  %v676_v13 = vunpack.c.2.s8 %v388_v47  ;;  %v5522_v2 = vld [vmem:[%s7332_s1 + $0x1b8] sm:$0xff] }
  0x26   : > { %v5530_v3 = vld [vmem:[%s7332_s1 + $0x1f8] sm:$0xff] }
  0x27   : > { %v1012_v20 = vcvt.s32.f32 %v500_v14  ;;  %v684_v14 = vunpack.c.3.s8 %v388_v47  ;;  %v956_v47 = vunpack.c.1.s8 %v460_v40 }
  0x28   : > { %5560 = vmatpush.bf16.msra.mxu1 %v5467_v23  ;;  %5561 = vmatpush.bf16.msra.mxu2 %v5467_v23 }
  0x29   : > { %5562 = vmatpush.bf16.msra.mxu3 %v5467_v23  ;;  %2267 = vmatpush.bf16.msra.mxu0 %v5467_v23  ;;  %v1508_v23 = vpack.c.bf16 %v1020_v21, %v1012_v20  ;;  %v5505_v20 = vld [vmem:[%s7332_s1 + $0x130] sm:$0xff]  ;;  %v1188_v21 = vcvt.s32.f32 %v676_v13  ;;  %v1468_v57 = vcvt.s32.f32 %v956_v47 }
  0x2b   : > { %2308 = vmatmul.bf16.vlgmr.msra.gmra.mxu1 %v1556_v29  ;;  %2348 = vmatmul.bf16.vlgmr.msra.gmra.mxu2 %v1620_v30  ;;  %v772_v29 = vunpack.c.2.s8 %v412_v62  ;;  %v780_v30 = vunpack.c.3.s8 %v412_v62 }
  0x2c   : > { %2598 = vmatpush.bf16.msrb.mxu2 %v5490_v26  ;;  %2429 = vmatpush.bf16.msrb.mxu1 %v5482_v28  ;;  %v5478_v26 = vld [vmem:[%s7332_s1 + $0x58] sm:$0xff]  ;;  %v652_v28 = vunpack.c.3.s8 %v380_v61 }
  0x2d   : > { %2767 = vmatpush.bf16.msrb.mxu3 %v5498_v27  ;;  %2268 = vmatmul.bf16.vlgmr.msra.gmra.mxu0 %v1492_v37  ;;  %v644_v27 = vunpack.c.2.s8 %v380_v61  ;;  %v516_v37 = vunpack.c.2.s8 %v348_v9  ;;  %v1180_v61 = vcvt.s32.f32 %v668_v54 }
  0x2e   : > { %2388 = vmatmul.bf16.vlgmr.msra.gmra.mxu3 %v1684_v33  ;;  %2936 = vmatpush.bf16.msrb.mxu0 %v5506_v17 }
  0x2f   : > { %v1156_v33 = vcvt.s32.f32 %v644_v27  ;;  %v1028_v43 = vcvt.s32.f32 %v516_v37  ;;  %v5483_v37 = vld [vmem:[%s7332_s1 + $0x80] sm:$0xff] }
  0x30   : > { %2599 = vmatpush.bf16.msrb.mxu2 %v5489_v34  ;;  %2430 = vmatpush.bf16.msrb.mxu1 %v5481_v36  ;;  %v1164_v34 = vcvt.s32.f32 %v652_v28  ;;  %v1292_v36 = vcvt.s32.f32 %v780_v30 }
  0x31   : > { %2768 = vmatpush.bf16.msrb.mxu3 %v5497_v35  ;;  %v1284_v35 = vcvt.s32.f32 %v772_v29 }
  0x32   : > { %2937 = vmatpush.bf16.msrb.mxu0 %v5505_v20 }
  0x34   : > { %2600 = vmatpush.bf16.msrb.mxu2 %v5488_v38  ;;  %2431 = vmatpush.bf16.msrb.mxu1 %v5480_v42  ;;  %v524_v38 = vunpack.c.3.s8 %v348_v9  ;;  %v1644_v42 = vpack.c.bf16 %v1292_v36, %v1284_v35  ;;  %v396_v35 = vld [vmem:[%s5656_s17 + $0x1c0] sm:$0xff] }
  0x35   : > { %2769 = vmatpush.bf16.msrb.mxu3 %v5496_v41  ;;  %v1580_v41 = vpack.c.bf16 %v1164_v34, %v1156_v33  ;;  %v428_v36 = vld [vmem:[%s5656_s17 + $0x2c0] sm:$0xff] }
  0x36   : > { %v1036_v44 = vcvt.s32.f32 %v524_v38  ;;  %v5491_v38 = vld [vmem:[%s7332_s1 + $0xc0] sm:$0xff]  ;;  %2938 = vmatpush.bf16.msrb.mxu0 %v5504_v39 }
  0x38   : > { %2601 = vmatpush.bf16.msrb.mxu2 %v5487_v63  ;;  %2432 = vmatpush.bf16.msrb.mxu1 %v5479_v1  ;;  %v1516_v46 = vpack.c.bf16 %v1036_v44, %v1028_v43  ;;  %v700_v43 = vunpack.c.1.s8 %v396_v35  ;;  %v820_v44 = vunpack.c.0.s8 %v428_v36 }
  0x39   : > { %2770 = vmatpush.bf16.msrb.mxu3 %v5495_v0 }
  0x3b   : > { %2313 = vmatmul.bf16.gmra.mxu1 %v1564_v55  ;;  %2353 = vmatmul.bf16.gmra.mxu2 %v1628_v56  ;;  %v788_v55 = vunpack.c.0.s8 %v420_v48  ;;  %v796_v56 = vunpack.c.1.s8 %v420_v48  ;;  %v364_v48 = vld [vmem:[%s5656_s17 + $0xc0] sm:$0xff] }
  0x3c   : > { %2602 = vmatpush.bf16.msrb.mxu2 %v5486_v24  ;;  %2433 = vmatpush.bf16.msrb.mxu1 %v5478_v26  ;;  %v1324_v24 = vcvt.s32.f32 %v812_v16  ;;  %v564_v54 = vunpack.c.0.s8 %v364_v48  ;;  %v580_v17 = vunpack.c.2.s8 %v364_v48 }
  0x3d   : > { %2273 = vmatmul.bf16.gmra.mxu0 %v1500_v60  ;;  %2771 = vmatpush.bf16.msrb.mxu3 %v5494_v25  ;;  %v1172_v60 = vcvt.s32.f32 %v660_v53  ;;  %v1300_v62 = vcvt.s32.f32 %v788_v55  ;;  %v1308_v63 = vcvt.s32.f32 %v796_v56  ;;  %v572_v55 = vunpack.c.1.s8 %v364_v48 }
  0x3e   : > { %2393 = vmatmul.bf16.gmra.mxu3 %v1692_v59  ;;  %v356_v59 = vld [vmem:[%s5656_s17 + $0x80] sm:$0xff] }
  0x3f   : > { %v532_v0 = vunpack.c.0.s8 %v356_v59  ;;  %v540_v1 = vunpack.c.1.s8 %v356_v59  ;;  %v1588_v4 = vpack.c.bf16 %v1180_v61, %v1172_v60  ;;  %v1652_v5 = vpack.c.bf16 %v1308_v63, %v1300_v62 }
  0x40   : > { %2603 = vmatpush.bf16.msrb.mxu2 %v5485_v49  ;;  %2434 = vmatpush.bf16.msrb.mxu1 %v5477_v51  ;;  %v548_v25 = vunpack.c.2.s8 %v356_v59  ;;  %v556_v26 = vunpack.c.3.s8 %v356_v59  ;;  %v5503_v49 = vld [vmem:[%s7332_s1 + $0x120] sm:$0xff]  ;;  %v1212_v51 = vcvt.s32.f32 %v700_v43  ;;  %v1076_v61 = vcvt.s32.f32 %v564_v54 }
  0x41   : > { %2772 = vmatpush.bf16.msrb.mxu3 %v5493_v50  ;;  %v1044_v6 = vcvt.s32.f32 %v532_v0  ;;  %v1052_v7 = vcvt.s32.f32 %v540_v1  ;;  %2939 = vmatpush.bf16.msrb.mxu0 %v5503_v49  ;;  %v1084_v62 = vcvt.s32.f32 %v572_v55  ;;  %v5501_v0 = vld [vmem:[%s7332_s1 + $0x110] sm:$0xff] }
  0x42   : > { %v1060_v31 = vcvt.s32.f32 %v548_v25  ;;  %v1068_v32 = vcvt.s32.f32 %v556_v26 }
  0x43   : > { %v1524_v9 = vpack.c.bf16 %v1052_v7, %v1044_v6  ;;  %v1540_v1 = vpack.c.bf16 %v1084_v62, %v1076_v61  ;;  %v716_v6 = vunpack.c.3.s8 %v396_v35  ;;  %v836_v7 = vunpack.c.2.s8 %v428_v36 }
  0x44   : > { %2604 = vmatpush.bf16.msrb.mxu2 %v5484_v10  ;;  %2435 = vmatpush.bf16.msrb.mxu1 %v5476_v12  ;;  %v1532_v34 = vpack.c.bf16 %v1068_v32, %v1060_v31  ;;  %v964_v10 = vunpack.c.2.s8 %v460_v40  ;;  %v5499_v12 = vld [vmem:[%s7332_s1 + $0x100] sm:$0xff] }
  0x45   : > { %2773 = vmatpush.bf16.msrb.mxu3 %v5492_v11  ;;  %2940 = vmatpush.bf16.msrb.mxu0 %v5502_v58  ;;  %v972_v11 = vunpack.c.3.s8 %v460_v40 }
  0x47   : > { %v1484_v20 = vcvt.s32.f32 %v972_v11 }
  0x48   : > { %2605 = vmatpush.bf16.msrb.mxu2 %v5483_v37 }
  0x49   : > { %2774 = vmatpush.bf16.msrb.mxu3 %v5491_v38  ;;  %2941 = vmatpush.bf16.msrb.mxu0 %v5501_v0 }
  0x4b   : > { %2318 = vmatmul.bf16.gmra.mxu1 %v1572_v18  ;;  %2358 = vmatmul.bf16.gmra.mxu2 %v1636_v19  ;;  %v932_v18 = vunpack.c.2.s8 %v452_v52  ;;  %v940_v19 = vunpack.c.3.s8 %v452_v52  ;;  %v1332_v52 = vcvt.s32.f32 %v820_v44 }
  0x4c   : > { %3274 = vmatpush.bf16.msra.mxu2 %v5522_v2 }
  0x4d   : > { %2278 = vmatmul.bf16.gmra.mxu0 %v1508_v23  ;;  %v1316_v23 = vcvt.s32.f32 %v804_v15  ;;  %v1444_v27 = vcvt.s32.f32 %v932_v18  ;;  %v1452_v28 = vcvt.s32.f32 %v940_v19  ;;  %3443 = vmatpush.bf16.msra.mxu3 %v5530_v3  ;;  %v1348_v15 = vcvt.s32.f32 %v836_v7 }
  0x4e   : > { %2398 = vmatmul.bf16.gmra.mxu3 %v1700_v22  ;;  %v1196_v22 = vcvt.s32.f32 %v684_v14  ;;  %v1228_v14 = vcvt.s32.f32 %v716_v6  ;;  %v588_v18 = vunpack.c.3.s8 %v364_v48  ;;  %v1476_v19 = vcvt.s32.f32 %v964_v10 }
  0x4f   : > { %v1660_v30 = vpack.c.bf16 %v1324_v24, %v1316_v23  ;;  %v1724_v33 = vpack.c.bf16 %v1452_v28, %v1444_v27  ;;  %v1092_v23 = vcvt.s32.f32 %v580_v17  ;;  %v341_v27 = vld [vmem:[%s5656_s17 + $0x8] sm:$0xff]  ;;  %v342_v28 = vld [vmem:[%s5656_s17 + $0x10] sm:$0xff] }
  0x50   : > { %v1596_v29 = vpack.c.bf16 %v1196_v22, %v1188_v21  ;;  %v1100_v24 = vcvt.s32.f32 %v588_v18  ;;  %v1740_v25 = vpack.c.bf16 %v1484_v20, %v1476_v19  ;;  %v477_v31 = vunpack.c.1.s8 %v341_v27  ;;  %v350_v18 = vld [vmem:[%s5656_s17 + $0x50] sm:$0xff]  ;;  %v351_v19 = vld [vmem:[%s5656_s17 + $0x58] sm:$0xff] }
  0x51   : > { %v470_v32 = vunpack.c.0.s8 %v342_v28  ;;  %v485_v54 = vunpack.c.2.s8 %v341_v27  ;;  %v493_v55 = vunpack.c.3.s8 %v341_v27  ;;  %v494_v58 = vunpack.c.3.s8 %v342_v28 }
  0x52   : > { %v1548_v26 = vpack.c.bf16 %v1100_v24, %v1092_v23  ;;  %v989_v38 = vcvt.s32.f32 %v477_v31  ;;  %v502_v24 = vunpack.c.0.s8 %v350_v18 }
  0x53   : > { %v982_v39 = vcvt.s32.f32 %v470_v32  ;;  %v997_v62 = vcvt.s32.f32 %v485_v54 }
  0x54   : > { %v1014_v32 = vcvt.s32.f32 %v502_v24 }
  0x5b   : > { %2323 = vmatmul.bf16.gmra.mxu1 %v1580_v41  ;;  %2363 = vmatmul.bf16.gmra.mxu2 %v1644_v42  ;;  %v5475_v41 = vld [vmem:[%s7332_s1 + $0x40] sm:$0xff]  ;;  %v692_v42 = vunpack.c.0.s8 %v396_v35 }
  0x5c   : > { %2436 = vmatpush.bf16.msrb.mxu1 %v5475_v41 }
  0x5d   : > { %2283 = vmatmul.bf16.gmra.mxu0 %v1516_v46  ;;  %v948_v46 = vunpack.c.0.s8 %v460_v40  ;;  %v1204_v50 = vcvt.s32.f32 %v692_v42 }
  0x5e   : > { %2403 = vmatmul.bf16.gmra.mxu3 %v1708_v45  ;;  %v828_v45 = vunpack.c.1.s8 %v428_v36 }
  0x5f   : > { %v1460_v56 = vcvt.s32.f32 %v948_v46  ;;  %v1604_v59 = vpack.c.bf16 %v1212_v51, %v1204_v50 }
  0x60   : > { %v1340_v53 = vcvt.s32.f32 %v828_v45 }
  0x61   : > { %v1732_v63 = vpack.c.bf16 %v1468_v57, %v1460_v56  ;;  %v486_v57 = vunpack.c.2.s8 %v342_v28 }
  0x62   : > { %v1668_v60 = vpack.c.bf16 %v1340_v53, %v1332_v52 }
  0x63   : > { %v998_v0 = vcvt.s32.f32 %v486_v57 }
  0x6b   : > { %2328 = vmatmul.bf16.gmra.mxu1 %v1588_v4  ;;  %2368 = vmatmul.bf16.gmra.mxu2 %v1652_v5  ;;  %v5500_v4 = vld [vmem:[%s7332_s1 + $0x108] sm:$0xff]  ;;  %v708_v5 = vunpack.c.2.s8 %v396_v35 }
  0x6c   : > { %2942 = vmatpush.bf16.msrb.mxu0 %v5500_v4 }
  0x6d   : > { %2288 = vmatmul.bf16.gmra.mxu0 %v1524_v9  ;;  %v5514_v9 = vld [vmem:[%s7332_s1 + $0x178] sm:$0xff]  ;;  %v1220_v13 = vcvt.s32.f32 %v708_v5 }
  0x6e   : > { %2408 = vmatmul.bf16.gmra.mxu3 %v1716_v8  ;;  %v844_v8 = vunpack.c.3.s8 %v428_v36  ;;  %3105 = vmatpush.bf16.msra.mxu1 %v5514_v9  ;;  %v344_v36 = vld [vmem:[%s5656_s17 + $0x20] sm:$0xff] }
  0x6f   : > { %v1612_v21 = vpack.c.bf16 %v1228_v14, %v1220_v13  ;;  %v472_v41 = vunpack.c.0.s8 %v344_v36  ;;  %v480_v42 = vunpack.c.1.s8 %v344_v36  ;;  %v488_v2 = vunpack.c.2.s8 %v344_v36 }
  0x70   : > { %v1356_v16 = vcvt.s32.f32 %v844_v8  ;;  %2943 = vmatpush.bf16.msrb.mxu0 %v5499_v12  ;;  %v496_v3 = vunpack.c.3.s8 %v344_v36 }
  0x71   : > { %v984_v47 = vcvt.s32.f32 %v472_v41  ;;  %v992_v48 = vcvt.s32.f32 %v480_v42  ;;  %v1000_v11 = vcvt.s32.f32 %v488_v2 }
  0x72   : > { %v1676_v22 = vpack.c.bf16 %v1356_v16, %v1348_v15  ;;  %v1008_v12 = vcvt.s32.f32 %v496_v3  ;;  %v349_v16 = vld [vmem:[%s5656_s17 + $0x48] sm:$0xff] }
  0x73   : > { %v1496_v51 = vpack.c.bf16 %v992_v48, %v984_v47  ;;  %v525_v57 = vunpack.c.3.s8 %v349_v16 }
  0x74   : > { %v1504_v15 = vpack.c.bf16 %v1008_v12, %v1000_v11 }
  0x75   : > { %v1037_v3 = vcvt.s32.f32 %v525_v57 }
  0x7b   : > { %2333 = vmatmul.bf16.gmra.mxu1 %v1596_v29  ;;  %2373 = vmatmul.bf16.gmra.mxu2 %v1660_v30  ;;  %v343_v29 = vld [vmem:[%s5656_s17 + $0x18] sm:$0xff]  ;;  %v469_v30 = vunpack.c.0.s8 %v341_v27  ;;  %v503_v27 = vunpack.c.0.s8 %v351_v19 }
  0x7c   : > { %v479_v35 = vunpack.c.1.s8 %v343_v29  ;;  %v495_v61 = vunpack.c.3.s8 %v343_v29 }
  0x7d   : > { %2293 = vmatmul.bf16.gmra.mxu0 %v1532_v34  ;;  %v471_v34 = vunpack.c.0.s8 %v343_v29  ;;  %v981_v37 = vcvt.s32.f32 %v469_v30 }
  0x7e   : > { %2413 = vmatmul.bf16.gmra.mxu3 %v1724_v33  ;;  %v478_v33 = vunpack.c.1.s8 %v342_v28  ;;  %v991_v44 = vcvt.s32.f32 %v479_v35  ;;  %v1007_v6 = vcvt.s32.f32 %v495_v61  ;;  %v511_v28 = vunpack.c.1.s8 %v351_v19 }
  0x7f   : > { %v983_v43 = vcvt.s32.f32 %v471_v34  ;;  %v1493_v45 = vpack.c.bf16 %v989_v38, %v981_v37  ;;  %v1015_v37 = vcvt.s32.f32 %v503_v27  ;;  %v526_v61 = vunpack.c.3.s8 %v350_v18 }
  0x80   : > { %v990_v40 = vcvt.s32.f32 %v478_v33  ;;  %v1023_v38 = vcvt.s32.f32 %v511_v28  ;;  %v357_v28 = vld [vmem:[%s5656_s17 + $0x88] sm:$0xff] }
  0x81   : > { %v1495_v50 = vpack.c.bf16 %v991_v44, %v983_v43 }
  0x82   : > { %v1494_v46 = vpack.c.bf16 %v990_v40, %v982_v39 }
  0x8b   : > { %2338 = vmatmul.bf16.gmra.mxu1 %v1604_v59  ;;  %2378 = vmatmul.bf16.gmra.mxu2 %v1668_v60  ;;  %v487_v60 = vunpack.c.2.s8 %v343_v29  ;;  %v352_v29 = vld [vmem:[%s5656_s17 + $0x60] sm:$0xff] }
  0x8c   : > { %v504_v34 = vunpack.c.0.s8 %v352_v29  ;;  %v512_v35 = vunpack.c.1.s8 %v352_v29 }
  0x8d   : > { %2298 = vmatmul.bf16.gmra.mxu0 %v1540_v1  ;;  %v1006_v1 = vcvt.s32.f32 %v494_v58  ;;  %v999_v5 = vcvt.s32.f32 %v487_v60  ;;  %v518_v60 = vunpack.c.2.s8 %v350_v18 }
  0x8e   : > { %2418 = vmatmul.bf16.gmra.mxu3 %v1732_v63  ;;  %v1005_v63 = vcvt.s32.f32 %v493_v55  ;;  %v1016_v43 = vcvt.s32.f32 %v504_v34  ;;  %v1024_v44 = vcvt.s32.f32 %v512_v35  ;;  %v517_v55 = vunpack.c.2.s8 %v349_v16 }
  0x8f   : > { %v1502_v10 = vpack.c.bf16 %v1006_v1, %v998_v0  ;;  %v1503_v14 = vpack.c.bf16 %v1007_v6, %v999_v5  ;;  %v519_v0 = vunpack.c.2.s8 %v351_v19  ;;  %v527_v1 = vunpack.c.3.s8 %v351_v19 }
  0x90   : > { %v1501_v9 = vpack.c.bf16 %v1005_v63, %v997_v62  ;;  %v1512_v47 = vpack.c.bf16 %v1024_v44, %v1016_v43  ;;  %v5513_v62 = vld [vmem:[%s7332_s1 + $0x170] sm:$0xff]  ;;  %v1029_v2 = vcvt.s32.f32 %v517_v55  ;;  %v1030_v5 = vcvt.s32.f32 %v518_v60  ;;  %v360_v44 = vld [vmem:[%s5656_s17 + $0xa0] sm:$0xff] }
  0x91   : > { %3106 = vmatpush.bf16.msra.mxu1 %v5513_v62  ;;  %v1038_v6 = vcvt.s32.f32 %v526_v61  ;;  %v1031_v12 = vcvt.s32.f32 %v519_v0  ;;  %v541_v34 = vunpack.c.1.s8 %v357_v28  ;;  %v536_v55 = vunpack.c.0.s8 %v360_v44 }
  0x92   : > { %v544_v57 = vunpack.c.1.s8 %v360_v44 }
  0x93   : > { %v1518_v19 = vpack.c.bf16 %v1038_v6, %v1030_v5  ;;  %v1048_v5 = vcvt.s32.f32 %v536_v55 }
  0x94   : > { %v1056_v6 = vcvt.s32.f32 %v544_v57 }
  0x9b   : > { %2343 = vmatmul.bf16.gmra.mxu1 %v1612_v21  ;;  %2383 = vmatmul.bf16.gmra.mxu2 %v1676_v22  ;;  %v501_v21 = vunpack.c.0.s8 %v349_v16  ;;  %v509_v22 = vunpack.c.1.s8 %v349_v16 }
  0x9d   : > { %2303 = vmatmul.bf16.gmra.mxu0 %v1548_v26  ;;  %v1013_v30 = vcvt.s32.f32 %v501_v21  ;;  %v1021_v31 = vcvt.s32.f32 %v509_v22 }
  0x9e   : > { %2423 = vmatmul.bf16.gmra.mxu3 %v1740_v25  ;;  %v510_v25 = vunpack.c.1.s8 %v350_v18  ;;  %v1517_v18 = vpack.c.bf16 %v1037_v3, %v1029_v2 }
  0x9f   : > { %v1509_v41 = vpack.c.bf16 %v1021_v31, %v1013_v30  ;;  %v358_v30 = vld [vmem:[%s5656_s17 + $0x90] sm:$0xff]  ;;  %v359_v31 = vld [vmem:[%s5656_s17 + $0x98] sm:$0xff] }
  0xa0   : > { %v1022_v33 = vcvt.s32.f32 %v510_v25  ;;  %v543_v43 = vunpack.c.1.s8 %v359_v31 }
  0xa2   : > { %v1510_v42 = vpack.c.bf16 %v1022_v33, %v1014_v32  ;;  %v533_v33 = vunpack.c.0.s8 %v357_v28  ;;  %v1055_v62 = vcvt.s32.f32 %v543_v43 }
  0xa8   : > { %v5816_v49 = vpop.f32.mrf.mxu1 }
  0xaa   : > { %v5818_v52 = vpop.f32.mrf.mxu0 }
  0xab   : > { %2437 = vmatmul.bf16.vlgmr.msrb.gmra.mxu1 %v1493_v45  ;;  %2606 = vmatmul.bf16.vlgmr.msrb.gmra.mxu2 %v1494_v46  ;;  %v1511_v46 = vpack.c.bf16 %v1023_v38, %v1015_v37  ;;  %v534_v37 = vunpack.c.0.s8 %v358_v30  ;;  %v542_v38 = vunpack.c.1.s8 %v358_v30 }
  0xad   : > { %2944 = vmatmul.bf16.vlgmr.msrb.gmra.mxu0 %v1496_v51  ;;  %v5529_v51 = vld [vmem:[%s7332_s1 + $0x1f0] sm:$0xff] }
  0xae   : > { %2775 = vmatmul.bf16.vlgmr.msrb.gmra.mxu3 %v1495_v50  ;;  %v5820_v53 = vpop.f32.mrf.mxu2  ;;  %v5521_v50 = vld [vmem:[%s7332_s1 + $0x1b0] sm:$0xff] }
  0xaf   : > { %3275 = vmatpush.bf16.msra.mxu2 %v5521_v50  ;;  %3444 = vmatpush.bf16.msra.mxu3 %v5529_v51  ;;  %v1046_v50 = vcvt.s32.f32 %v534_v37  ;;  %v1054_v51 = vcvt.s32.f32 %v542_v38  ;;  %v559_v37 = vunpack.c.3.s8 %v359_v31 }
  0xb0   : > { %v5824_v59 = vpop.f32.mrf.mxu1 }
  0xb1   : > { %v5822_v56 = vpop.f32.mrf.mxu3  ;;  %v1526_v3 = vpack.c.bf16 %v1054_v51, %v1046_v50  ;;  %v560_v50 = vunpack.c.3.s8 %v360_v44 }
  0xb2   : > { %7339 = vst [vmem:[#allocation2_spill] sm:$0xff] %v5822_v56  ;;  %v5826_v4 = vpop.f32.mrf.mxu0 }
  0xb6   : > { %v5828_v7 = vpop.f32.mrf.mxu2 }
  0xb8   : > { %v5832_v13 = vpop.f32.mrf.mxu1 }
  0xb9   : > { %v5830_v8 = vpop.f32.mrf.mxu3 }
  0xba   : > { %7340 = vst [vmem:[#allocation3_spill] sm:$0xff] %v5830_v8  ;;  %v5835_v17 = vpop.f32.mrf.mxu0 }
  0xbb   : > { %2442 = vmatmul.bf16.gmra.mxu1 %v1501_v9  ;;  %2611 = vmatmul.bf16.gmra.mxu2 %v1502_v10  ;;  %v520_v9 = vunpack.c.2.s8 %v352_v29  ;;  %v528_v10 = vunpack.c.3.s8 %v352_v29 }
  0xbd   : > { %2949 = vmatmul.bf16.gmra.mxu0 %v1504_v15  ;;  %v1032_v21 = vcvt.s32.f32 %v520_v9  ;;  %v1040_v22 = vcvt.s32.f32 %v528_v10 }
  0xbe   : > { %2780 = vmatmul.bf16.gmra.mxu3 %v1503_v14  ;;  %v5839_v20 = vpop.f32.mrf.mxu2  ;;  %v1039_v14 = vcvt.s32.f32 %v527_v1 }
  0xbf   : > { %v1520_v27 = vpack.c.bf16 %v1040_v22, %v1032_v21  ;;  %v557_v21 = vunpack.c.3.s8 %v357_v28 }
  0xc0   : > { %v5843_v26 = vpop.f32.mrf.mxu1  ;;  %v1519_v25 = vpack.c.bf16 %v1039_v14, %v1031_v12  ;;  %v1528_v12 = vpack.c.bf16 %v1056_v6, %v1048_v5  ;;  %v365_v6 = vld [vmem:[%s5656_s17 + $0xc8] sm:$0xff] }
  0xc1   : > { %v5841_v23 = vpop.f32.mrf.mxu3 }
  0xc2   : > { %7341 = vst [vmem:[#allocation4_spill] sm:$0xff] %v5841_v23  ;;  %v5846_v36 = vpop.f32.mrf.mxu0  ;;  %v375_v23 = vld [vmem:[%s5656_s17 + $0x118] sm:$0xff] }
  0xc6   : > { %v5848_v39 = vpop.f32.mrf.mxu2 }
  0xc8   : > { %v5852_v45 = vpop.f32.mrf.mxu1 }
  0xc9   : > { %v5850_v40 = vpop.f32.mrf.mxu3 }
  0xca   : > { %7342 = vst [vmem:[#allocation5_spill] sm:$0xff] %v5850_v40  ;;  %v5854_v48 = vpop.f32.mrf.mxu0 }
  0xcb   : > { %2447 = vmatmul.bf16.gmra.mxu1 %v1509_v41  ;;  %2616 = vmatmul.bf16.gmra.mxu2 %v1510_v42  ;;  %v535_v42 = vunpack.c.0.s8 %v359_v31 }
  0xcd   : > { %2954 = vmatmul.bf16.gmra.mxu0 %v1512_v47  ;;  %v1053_v47 = vcvt.s32.f32 %v541_v34  ;;  %v1047_v61 = vcvt.s32.f32 %v535_v42  ;;  %v551_v34 = vunpack.c.2.s8 %v359_v31  ;;  %v1069_v42 = vcvt.s32.f32 %v557_v21 }
  0xce   : > { %2785 = vmatmul.bf16.gmra.mxu3 %v1511_v46  ;;  %v5862_v54 = vpop.f32.mrf.mxu2  ;;  %v1045_v46 = vcvt.s32.f32 %v533_v33 }
  0xcf   : > { %7343 = vst [vmem:[#allocation6_spill] sm:$0xff] %v5862_v54  ;;  %v1527_v10 = vpack.c.bf16 %v1055_v62, %v1047_v61  ;;  %v1063_v55 = vcvt.s32.f32 %v551_v34 }
  0xd0   : > { %v5869_v63 = vpop.f32.mrf.mxu1  ;;  %v1525_v2 = vpack.c.bf16 %v1053_v47, %v1045_v46  ;;  %v552_v47 = vunpack.c.2.s8 %v360_v44 }
  0xd1   : > { %v5864_v58 = vpop.f32.mrf.mxu3 }
  0xd2   : > { %7344 = vst [vmem:[#allocation7_spill] sm:$0xff] %v5864_v58  ;;  %v5871_v11 = vpop.f32.mrf.mxu0  ;;  %v1064_v31 = vcvt.s32.f32 %v552_v47  ;;  %v368_v47 = vld [vmem:[%s5656_s17 + $0xe0] sm:$0xff] }
  0xd6   : > { %v5873_v15 = vpop.f32.mrf.mxu2 }
  0xd7   : > { %7345 = vst [vmem:[#allocation8_spill] sm:$0xff] %v5873_v15 }
  0xd8   : > { %v5877_v24 = vpop.f32.mrf.mxu1 }
  0xd9   : > { %v5875_v16 = vpop.f32.mrf.mxu3 }
  0xda   : > { %7346 = vst [vmem:[#allocation9_spill] sm:$0xff] %v5875_v16  ;;  %v5880_v29 = vpop.f32.mrf.mxu0 }
  0xdb   : > { %2452 = vmatmul.bf16.gmra.mxu1 %v1517_v18  ;;  %2621 = vmatmul.bf16.gmra.mxu2 %v1518_v19  ;;  %v549_v19 = vunpack.c.2.s8 %v357_v28  ;;  %v1071_v28 = vcvt.s32.f32 %v559_v37 }
  0xdd   : > { %2959 = vmatmul.bf16.gmra.mxu0 %v1520_v27  ;;  %v558_v27 = vunpack.c.3.s8 %v358_v30  ;;  %v1061_v38 = vcvt.s32.f32 %v549_v19  ;;  %v1535_v5 = vpack.c.bf16 %v1071_v28, %v1063_v55  ;;  %v367_v19 = vld [vmem:[%s5656_s17 + $0xd8] sm:$0xff] }
  0xde   : > { %2790 = vmatmul.bf16.gmra.mxu3 %v1519_v25  ;;  %v5884_v32 = vpop.f32.mrf.mxu2  ;;  %v550_v25 = vunpack.c.2.s8 %v358_v30 }
  0xdf   : > { %7347 = vst [vmem:[#allocation10_spill] sm:$0xff] %v5884_v32  ;;  %v1070_v46 = vcvt.s32.f32 %v558_v27  ;;  %v1533_v61 = vpack.c.bf16 %v1069_v42, %v1061_v38  ;;  %v573_v27 = vunpack.c.1.s8 %v365_v6 }
  0xe0   : > { %v5888_v41 = vpop.f32.mrf.mxu1  ;;  %v1062_v43 = vcvt.s32.f32 %v550_v25  ;;  %v565_v25 = vunpack.c.0.s8 %v365_v6 }
  0xe1   : > { %v5886_v35 = vpop.f32.mrf.mxu3  ;;  %v1085_v55 = vcvt.s32.f32 %v573_v27 }
  0xe2   : > { %7348 = vst [vmem:[#allocation11_spill] sm:$0xff] %v5886_v35  ;;  %v5891_v60 = vpop.f32.mrf.mxu0  ;;  %v1534_v62 = vpack.c.bf16 %v1070_v46, %v1062_v43  ;;  %v567_v43 = vunpack.c.0.s8 %v367_v19  ;;  %v575_v46 = vunpack.c.1.s8 %v367_v19 }
  0xe6   : > { %v5893_v0 = vpop.f32.mrf.mxu2 }
  0xe7   : > { %7349 = vst [vmem:[#allocation12_spill] sm:$0xff] %v5893_v0 }
  0xe8   : > { %v5897_v9 = vpop.f32.mrf.mxu1 }
  0xe9   : > { %v5895_v1 = vpop.f32.mrf.mxu3 }
  0xea   : > { %7350 = vst [vmem:[#allocation13_spill] sm:$0xff] %v5895_v1  ;;  %v5899_v14 = vpop.f32.mrf.mxu0 }
  0xeb   : > { %2457 = vmatmul.bf16.gmra.mxu1 %v1525_v2  ;;  %2626 = vmatmul.bf16.gmra.mxu2 %v1526_v3  ;;  %v1072_v2 = vcvt.s32.f32 %v560_v50  ;;  %v1077_v50 = vcvt.s32.f32 %v565_v25 }
  0xed   : > { %2964 = vmatmul.bf16.gmra.mxu0 %v1528_v12  ;;  %v1536_v44 = vpack.c.bf16 %v1072_v2, %v1064_v31  ;;  %v366_v12 = vld [vmem:[%s5656_s17 + $0xd0] sm:$0xff]  ;;  %v576_v31 = vunpack.c.1.s8 %v368_v47 }
  0xee   : > { %2795 = vmatmul.bf16.gmra.mxu3 %v1527_v10  ;;  %v5901_v18 = vpop.f32.mrf.mxu2  ;;  %v566_v37 = vunpack.c.0.s8 %v366_v12  ;;  %v574_v38 = vunpack.c.1.s8 %v366_v12 }
  0xef   : > { %7351 = vst [vmem:[#allocation14_spill] sm:$0xff] %v5901_v18  ;;  %v1088_v16 = vcvt.s32.f32 %v576_v31 }
  0xf0   : > { %v5905_v33 = vpop.f32.mrf.mxu1  ;;  %v1078_v28 = vcvt.s32.f32 %v566_v37 }
  0xf1   : > { %v5903_v22 = vpop.f32.mrf.mxu3 }
  0xf2   : > { %7352 = vst [vmem:[#allocation15_spill] sm:$0xff] %v5903_v22  ;;  %v5907_v51 = vpop.f32.mrf.mxu0 }
  0xf6   : > { %v5909_v57 = vpop.f32.mrf.mxu2 }
  0xf7   : > { %7353 = vst [vmem:[#allocation16_spill] sm:$0xff] %v5909_v57 }
  0xf8   : > { %v5913_v3 = vpop.f32.mrf.mxu1 }
  0xf9   : > { %v5911_v30 = vpop.f32.mrf.mxu3 }
  0xfa   : > { %7354 = vst [vmem:[#allocation17_spill] sm:$0xff] %v5911_v30  ;;  %v5916_v10 = vpop.f32.mrf.mxu0  ;;  %v1087_v30 = vcvt.s32.f32 %v575_v46 }
  0xfb   : > { %2462 = vmatmul.bf16.gmra.mxu1 %v1533_v61  ;;  %2631 = vmatmul.bf16.gmra.mxu2 %v1534_v62  ;;  %v1086_v61 = vcvt.s32.f32 %v574_v38  ;;  %v568_v62 = vunpack.c.0.s8 %v368_v47  ;;  %v5520_v38 = vld [vmem:[%s7332_s1 + $0x1a8] sm:$0xff] }
  0xfc   : > { %3276 = vmatpush.bf16.msra.mxu2 %v5520_v38  ;;  %v592_v38 = vunpack.c.3.s8 %v368_v47 }
  0xfd   : > { %2969 = vmatmul.bf16.gmra.mxu0 %v1536_v44  ;;  %v1542_v1 = vpack.c.bf16 %v1086_v61, %v1078_v28  ;;  %v1080_v35 = vcvt.s32.f32 %v568_v62  ;;  %v591_v28 = vunpack.c.3.s8 %v367_v19  ;;  %v5512_v61 = vld [vmem:[%s7332_s1 + $0x168] sm:$0xff] }
  0xfe   : > { %2800 = vmatmul.bf16.gmra.mxu3 %v1535_v5  ;;  %v5920_v21 = vpop.f32.mrf.mxu2  ;;  %v1079_v5 = vcvt.s32.f32 %v567_v43  ;;  %v5528_v43 = vld [vmem:[%s7332_s1 + $0x1e8] sm:$0xff]  ;;  %3107 = vmatpush.bf16.msra.mxu1 %v5512_v61 }
  0xff   : > { %7355 = vst [vmem:[#allocation18_spill] sm:$0xff] %v5920_v21  ;;  %v1544_v27 = vpack.c.bf16 %v1088_v16, %v1080_v35  ;;  %3445 = vmatpush.bf16.msra.mxu3 %v5528_v43  ;;  %v582_v16 = vunpack.c.2.s8 %v366_v12  ;;  %v590_v35 = vunpack.c.3.s8 %v366_v12  ;;  %v1103_v12 = vcvt.s32.f32 %v591_v28  ;;  %v373_v61 = vld [vmem:[%s5656_s17 + $0x108] sm:$0xff]  ;;  %v374_v28 = vld [vmem:[%s5656_s17 + $0x110] sm:$0xff] }
 0x100   : > { %v5924_v42 = vpop.f32.mrf.mxu1  ;;  %v1543_v25 = vpack.c.bf16 %v1087_v30, %v1079_v5  ;;  %v614_v15 = vunpack.c.2.s8 %v374_v28 }
 0x101   : > { %v5922_v34 = vpop.f32.mrf.mxu3  ;;  %v1094_v5 = vcvt.s32.f32 %v582_v16 }
 0x102   : > { %7356 = vst [vmem:[#allocation19_spill] sm:$0xff] %v5922_v34  ;;  %v5927_v2 = vpop.f32.mrf.mxu0  ;;  %v1541_v34 = vpack.c.bf16 %v1085_v55, %v1077_v50  ;;  %v581_v50 = vunpack.c.2.s8 %v365_v6  ;;  %v589_v55 = vunpack.c.3.s8 %v365_v6  ;;  %v584_v6 = vunpack.c.2.s8 %v368_v47 }
 0x104   : > { %v1093_v62 = vcvt.s32.f32 %v581_v50  ;;  %v1101_v31 = vcvt.s32.f32 %v589_v55  ;;  %v1096_v50 = vcvt.s32.f32 %v584_v6  ;;  %v1104_v55 = vcvt.s32.f32 %v592_v38  ;;  %v376_v38 = vld [vmem:[%s5656_s17 + $0x120] sm:$0xff] }
 0x105   : > { %v600_v56 = vunpack.c.0.s8 %v376_v38 }
 0x106   : > { %v5929_v22 = vpop.f32.mrf.mxu2  ;;  %v1552_v47 = vpack.c.bf16 %v1104_v55, %v1096_v50 }
 0x107   : > { %7357 = vst [vmem:[#allocation20_spill] sm:$0xff] %v5929_v22  ;;  %v1112_v18 = vcvt.s32.f32 %v600_v56  ;;  %v615_v56 = vunpack.c.2.s8 %v375_v23 }
 0x108   : > { %v5933_v58 = vpop.f32.mrf.mxu1 }
 0x109   : > { %v5931_v44 = vpop.f32.mrf.mxu3 }
 0x10a   : > { %7358 = vst [vmem:[#allocation21_spill] sm:$0xff] %v5931_v44  ;;  %v5935_v37 = vpop.f32.mrf.mxu0  ;;  %v1549_v44 = vpack.c.bf16 %v1101_v31, %v1093_v62  ;;  %v605_v62 = vunpack.c.1.s8 %v373_v61 }
 0x10b   : > { %2467 = vmatmul.bf16.gmra.mxu1 %v1541_v34  ;;  %2636 = vmatmul.bf16.gmra.mxu2 %v1542_v1  ;;  %v583_v34 = vunpack.c.2.s8 %v367_v19 }
 0x10c   : > { %v1117_v50 = vcvt.s32.f32 %v605_v62 }
 0x10d   : > { %2974 = vmatmul.bf16.gmra.mxu0 %v1544_v27  ;;  %v1095_v27 = vcvt.s32.f32 %v583_v34 }
 0x10e   : > { %2805 = vmatmul.bf16.gmra.mxu3 %v1543_v25  ;;  %v5943_v46 = vpop.f32.mrf.mxu2  ;;  %v1102_v25 = vcvt.s32.f32 %v590_v35 }
 0x10f   : > { %7359 = vst [vmem:[#allocation22_spill] sm:$0xff] %v5943_v46  ;;  %v1551_v35 = vpack.c.bf16 %v1103_v12, %v1095_v27  ;;  %v5538_v27 = vld [vmem:[%s7333_s2 + $0x38] sm:$0xff] }
 0x110   : > { %v5947_v1 = vpop.f32.mrf.mxu1  ;;  %v1550_v40 = vpack.c.bf16 %v1102_v25, %v1094_v5  ;;  %v598_v5 = vunpack.c.0.s8 %v374_v28  ;;  %v606_v25 = vunpack.c.1.s8 %v374_v28  ;;  %4160 = vmatpush.bf16.msra.mxu0 %v5538_v27 }
 0x111   : > { %v5945_v30 = vpop.f32.mrf.mxu3 }
 0x112   : > { %7360 = vst [vmem:[#allocation23_spill] sm:$0xff] %v5945_v30  ;;  %v5952_v43 = vpop.f32.mrf.mxu0  ;;  %v1110_v55 = vcvt.s32.f32 %v598_v5 }
 0x116   : > { %v5954_v30 = vpop.f32.mrf.mxu2 }
 0x117   : > { %7361 = vst [vmem:[#allocation24_spill] sm:$0xff] %v5954_v30 }
 0x118   : > { %v5958_v16 = vpop.f32.mrf.mxu1 }
 0x119   : > { %v5956_v19 = vpop.f32.mrf.mxu3 }
 0x11a   : > { %7362 = vst [vmem:[#allocation25_spill] sm:$0xff] %v5956_v19  ;;  %v5961_v34 = vpop.f32.mrf.mxu0  ;;  %v597_v19 = vunpack.c.0.s8 %v373_v61 }
 0x11b   : > { %2472 = vmatmul.bf16.gmra.mxu1 %v1549_v44  ;;  %2641 = vmatmul.bf16.gmra.mxu2 %v1550_v40  ;;  %v599_v40 = vunpack.c.0.s8 %v375_v23  ;;  %v607_v44 = vunpack.c.1.s8 %v375_v23 }
 0x11c   : > { %v1109_v12 = vcvt.s32.f32 %v597_v19 }
 0x11d   : > { %2979 = vmatmul.bf16.gmra.mxu0 %v1552_v47  ;;  %v1111_v47 = vcvt.s32.f32 %v599_v40  ;;  %v1119_v30 = vcvt.s32.f32 %v607_v44  ;;  %v613_v40 = vunpack.c.2.s8 %v373_v61  ;;  %v621_v44 = vunpack.c.3.s8 %v373_v61 }
 0x11e   : > { %2810 = vmatmul.bf16.gmra.mxu3 %v1551_v35  ;;  %v5965_v8 = vpop.f32.mrf.mxu2  ;;  %v1118_v35 = vcvt.s32.f32 %v606_v25  ;;  %v1557_v21 = vpack.c.bf16 %v1117_v50, %v1109_v12  ;;  %v622_v12 = vunpack.c.3.s8 %v374_v28 }
 0x11f   : > { %7363 = vst [vmem:[#allocation26_spill] sm:$0xff] %v5965_v8  ;;  %v608_v8 = vunpack.c.1.s8 %v376_v38  ;;  %v1559_v19 = vpack.c.bf16 %v1119_v30, %v1111_v47  ;;  %v1125_v30 = vcvt.s32.f32 %v613_v40  ;;  %v1127_v47 = vcvt.s32.f32 %v615_v56 }
 0x120   : > { %v5969_v6 = vpop.f32.mrf.mxu1  ;;  %v1558_v57 = vpack.c.bf16 %v1118_v35, %v1110_v55  ;;  %v1133_v35 = vcvt.s32.f32 %v621_v44 }
 0x121   : > { %v5967_v31 = vpop.f32.mrf.mxu3  ;;  %v1120_v0 = vcvt.s32.f32 %v608_v8  ;;  %v623_v8 = vunpack.c.3.s8 %v375_v23 }
 0x122   : > { %7364 = vst [vmem:[#allocation27_spill] sm:$0xff] %v5967_v31  ;;  %v5975_v31 = vpop.f32.mrf.mxu0  ;;  %v1565_v28 = vpack.c.bf16 %v1133_v35, %v1125_v30 }
 0x123   : > { %v1560_v5 = vpack.c.bf16 %v1120_v0, %v1112_v18  ;;  %v1134_v0 = vcvt.s32.f32 %v622_v12  ;;  %v616_v18 = vunpack.c.2.s8 %v376_v38  ;;  %v1135_v61 = vcvt.s32.f32 %v623_v8  ;;  %v5989_v12 = vld [vmem:[%s5656_s17 + $0x148] sm:$0xff]  ;;  %v5995_v8 = vld [vmem:[%s5656_s17 + $0x158] sm:$0xff] }
 0x124   : > { %v629_v30 = vunpack.c.0.s8 %v5989_v12 }
 0x126   : > { %v5977_v46 = vpop.f32.mrf.mxu2 }
 0x127   : > { %7365 = vst [vmem:[#allocation28_spill] sm:$0xff] %v5977_v46 }
 0x128   : > { %v2438_v32 = vpop.f32.mrf.mxu1 }
 0x129   : > { %v5979_v22 = vpop.f32.mrf.mxu3  ;;  %v2439_v62 = vadd.f32 %v2438_v32, %v5818_v52  ;;  %v1126_v52 = vcvt.s32.f32 %v614_v15 }
 0x12a   : > { %v2945_v25 = vpop.f32.mrf.mxu0 }
 0x12b   : > { %2477 = vmatmul.bf16.gmra.mxu1 %v1557_v21  ;;  %2646 = vmatmul.bf16.gmra.mxu2 %v1558_v57  ;;  %v624_v57 = vunpack.c.3.s8 %v376_v38 }
 0x12d   : > { %2984 = vmatmul.bf16.gmra.mxu0 %v1560_v5  ;;  %v1136_v15 = vcvt.s32.f32 %v624_v57 }
 0x12e   : > { %2815 = vmatmul.bf16.gmra.mxu3 %v1559_v19  ;;  %v2607_v27 = vpop.f32.mrf.mxu2 }
 0x12f   : > { %v2608_v46 = vadd.f32 %v2607_v27, %v2439_v62  ;;  %v1567_v27 = vpack.c.bf16 %v1135_v61, %v1127_v47  ;;  %v639_v47 = vunpack.c.1.s8 %v5995_v8  ;;  %v6005_v61 = vld [vmem:[%s5656_s17 + $0x160] sm:$0xff] }
 0x130   : > { %v2440_v50 = vpop.f32.mrf.mxu1 }
 0x131   : > { %v2776_v54 = vpop.f32.mrf.mxu3  ;;  %v2441_v19 = vadd.f32 %v2440_v50, %v5826_v4  ;;  %v5992_v50 = vld [vmem:[%s5656_s17 + $0x150] sm:$0xff] }
 0x132   : > { %v2777_v55 = vadd.f32 %v2776_v54, %v2608_v46  ;;  %v2947_v21 = vpop.f32.mrf.mxu0  ;;  %v1566_v54 = vpack.c.bf16 %v1134_v0, %v1126_v52  ;;  %v1128_v46 = vcvt.s32.f32 %v616_v18  ;;  %v630_v35 = vunpack.c.0.s8 %v5992_v50 }
 0x133   : > { %v638_v18 = vunpack.c.1.s8 %v5992_v50 }
 0x134   : > { %v5982_v32 = vadd.f32 %v2945_v25, %v2777_v55  ;;  %v1568_v4 = vpack.c.bf16 %v1136_v15, %v1128_v46  ;;  %v632_v46 = vunpack.c.0.s8 %v6005_v61  ;;  %v640_v15 = vunpack.c.1.s8 %v6005_v61 }
 0x136   : > { %v2609_v62 = vpop.f32.mrf.mxu2 }
 0x137   : > { %v2610_v5 = vadd.f32 %v2609_v62, %v2441_v19  ;;  %v1141_v62 = vcvt.s32.f32 %v629_v30 }
 0x138   : > { %v2443_v25 = vpop.f32.mrf.mxu1 }
 0x139   : > { %v2778_v23 = vpop.f32.mrf.mxu3  ;;  %v2444_v38 = vadd.f32 %v2443_v25, %v5835_v17  ;;  %v637_v17 = vunpack.c.1.s8 %v5989_v12 }
 0x13a   : > { %v2779_v40 = vadd.f32 %v2778_v23, %v2610_v5  ;;  %v2950_v56 = vpop.f32.mrf.mxu0  ;;  %v1142_v5 = vcvt.s32.f32 %v630_v35  ;;  %v1144_v35 = vcvt.s32.f32 %v632_v46 }
 0x13b   : > { %2482 = vmatmul.bf16.gmra.mxu1 %v1565_v28  ;;  %2651 = vmatmul.bf16.gmra.mxu2 %v1566_v54  ;;  %v1149_v28 = vcvt.s32.f32 %v637_v17  ;;  %v1150_v54 = vcvt.s32.f32 %v638_v18 }
 0x13c   : > { %v5986_v44 = vadd.f32 %v2947_v21, %v2779_v40  ;;  %v631_v21 = vunpack.c.0.s8 %v5995_v8  ;;  %v1151_v40 = vcvt.s32.f32 %v639_v47  ;;  %v5519_v47 = vld [vmem:[%s7332_s1 + $0x1a0] sm:$0xff] }
 0x13d   : > { %2989 = vmatmul.bf16.gmra.mxu0 %v1568_v4  ;;  %v1574_v17 = vpack.c.bf16 %v1150_v54, %v1142_v5  ;;  %v653_v5 = vunpack.c.3.s8 %v5989_v12  ;;  %v646_v54 = vunpack.c.2.s8 %v5992_v50  ;;  %3277 = vmatpush.bf16.msra.mxu2 %v5519_v47 }
 0x13e   : > { %2820 = vmatmul.bf16.gmra.mxu3 %v1567_v27  ;;  %v2612_v55 = vpop.f32.mrf.mxu2  ;;  %v1143_v27 = vcvt.s32.f32 %v631_v21 }
 0x13f   : > { %v2613_v52 = vadd.f32 %v2612_v55, %v2444_v38  ;;  %v1573_v55 = vpack.c.bf16 %v1149_v28, %v1141_v62  ;;  %v5527_v62 = vld [vmem:[%s7332_s1 + $0x1e0] sm:$0xff]  ;;  %v645_v28 = vunpack.c.2.s8 %v5989_v12 }
 0x140   : > { %v2445_v57 = vpop.f32.mrf.mxu1  ;;  %3446 = vmatpush.bf16.msra.mxu3 %v5527_v62  ;;  %v5511_v12 = vld [vmem:[%s7332_s1 + $0x160] sm:$0xff] }
 0x141   : > { %v2781_v0 = vpop.f32.mrf.mxu3  ;;  %v2446_v38 = vadd.f32 %v2445_v57, %v5846_v36  ;;  %3108 = vmatpush.bf16.msra.mxu1 %v5511_v12 }
 0x142   : > { %v2782_v19 = vadd.f32 %v2781_v0, %v2613_v52  ;;  %v2952_v25 = vpop.f32.mrf.mxu0  ;;  %v1152_v0 = vcvt.s32.f32 %v640_v15 }
 0x144   : > { %v6007_v23 = vadd.f32 %v2950_v56, %v2782_v19  ;;  %v1575_v19 = vpack.c.bf16 %v1151_v40, %v1143_v27  ;;  %v1576_v36 = vpack.c.bf16 %v1152_v0, %v1144_v35  ;;  %v647_v40 = vunpack.c.2.s8 %v5995_v8 }
 0x145   : > { %v648_v0 = vunpack.c.2.s8 %v6005_v61 }
 0x146   : > { %7366 = vst [vmem:[#allocation29_spill] sm:$0xff] %v6007_v23  ;;  %v2614_v4 = vpop.f32.mrf.mxu2 }
 0x147   : > { %v2615_v52 = vadd.f32 %v2614_v4, %v2446_v38  ;;  %v655_v38 = vunpack.c.3.s8 %v5995_v8  ;;  %v5586_v4 = vmov 0   ;;  %v656_v8 = vunpack.c.3.s8 %v6005_v61 }
 0x148   : > { %v2448_v56 = vpop.f32.mrf.mxu1  ;;  %5572 = vset.pattern.permute.xlu0 %v5586_v4  ;;  %5573 = vset.pattern.permute.xlu1 %v5586_v4 }
 0x149   : > { %v2783_v30 = vpop.f32.mrf.mxu3  ;;  %v2449_v23 = vadd.f32 %v2448_v56, %v5854_v48  ;;  %5574 = vset.pattern.permute.xlu2 %v5586_v4  ;;  %v6052_v4 = vld [vmem:[%s5656_s17 + $0x190] sm:$0xff] }
 0x14a   : > { %v2784_v18 = vadd.f32 %v2783_v30, %v2615_v52  ;;  %v2955_v57 = vpop.f32.mrf.mxu0  ;;  %v1165_v30 = vcvt.s32.f32 %v653_v5  ;;  %v1160_v5 = vcvt.s32.f32 %v648_v0  ;;  %v670_v0 = vunpack.c.1.s8 %v6052_v4 }
 0x14b   : > { %2487 = vmatmul.bf16.gmra.mxu1 %v1573_v55  ;;  %2656 = vmatmul.bf16.gmra.mxu2 %v1574_v17  ;;  %v3612_v55 = vld [vmem:[%s6027_s15] sm:$0xff]  ;;  %v1158_v17 = vcvt.s32.f32 %v646_v54  ;;  %v1168_v54 = vcvt.s32.f32 %v656_v8 }
 0x14c   : > { %v6015_v21 = vadd.f32 %v2952_v25, %v2784_v18  ;;  %v654_v25 = vunpack.c.3.s8 %v5992_v50  ;;  %3678 = vperm.xlu0 %5572, %v3612_v55   ;;  %v1167_v18 = vcvt.s32.f32 %v655_v38 }
 0x14d   : > { %2994 = vmatmul.bf16.gmra.mxu0 %v1576_v36 }
 0x14e   : > { %2825 = vmatmul.bf16.gmra.mxu3 %v1575_v19  ;;  %v2617_v48 = vpop.f32.mrf.mxu2  ;;  %v1166_v35 = vcvt.s32.f32 %v654_v25  ;;  %v1159_v19 = vcvt.s32.f32 %v647_v40  ;;  %v3613_v25 = vld [vmem:[%s6027_s15 + $0x8] sm:$0xff] }
 0x14f   : > { %v2618_v46 = vadd.f32 %v2617_v48, %v2449_v23  ;;  %v1157_v23 = vcvt.s32.f32 %v645_v28 }
 0x150   : > { %v2450_v27 = vpop.f32.mrf.mxu1 }
 0x151   : > { %v2786_v15 = vpop.f32.mrf.mxu3  ;;  %v2451_v36 = vadd.f32 %v2450_v27, %v5871_v11  ;;  %v1581_v62 = vpack.c.bf16 %v1165_v30, %v1157_v23  ;;  %v1584_v11 = vpack.c.bf16 %v1168_v54, %v1160_v5  ;;  %v6049_v27 = vld [vmem:[%s5656_s17 + $0x188] sm:$0xff]  ;;  %v662_v30 = vunpack.c.0.s8 %v6052_v4 }
 0x152   : > { %v2787_v52 = vadd.f32 %v2786_v15, %v2618_v46  ;;  %v2957_v56 = vpop.f32.mrf.mxu0  ;;  %v1583_v15 = vpack.c.bf16 %v1167_v18, %v1159_v19  ;;  %v661_v23 = vunpack.c.0.s8 %v6049_v27  ;;  %v6064_v18 = vld [vmem:[%s5656_s17 + $0x1a0] sm:$0xff] }
 0x153   : > { %v1174_v5 = vcvt.s32.f32 %v662_v30 }
 0x154   : > { %v6039_v50 = vadd.f32 %v2955_v57, %v2787_v52  ;;  %v1582_v57 = vpack.c.bf16 %v1166_v35, %v1158_v17  ;;  %3683 = vperm.xlu0 %5572, %v3613_v25   ;;  %v6055_v52 = vld [vmem:[%s5656_s17 + $0x198] sm:$0xff]  ;;  %v672_v25 = vunpack.c.1.s8 %v6064_v18 }
 0x155   : > { %v671_v19 = vunpack.c.1.s8 %v6055_v52 }
 0x156   : > { %v2619_v47 = vpop.f32.mrf.mxu2 }
 0x157   : > { %v2620_v48 = vadd.f32 %v2619_v47, %v2451_v36  ;;  %v3614_v36 = vld [vmem:[%s6027_s15 + $0x10] sm:$0xff] }
 0x158   : > { %v2453_v46 = vpop.f32.mrf.mxu1  ;;  %v3618_v47 = vld [vmem:[%s6027_s15 + $0x30] sm:$0xff]  ;;  %3688 = vperm.xlu1 %5573, %v3614_v36   ;;  %v1184_v36 = vcvt.s32.f32 %v672_v25  ;;  %v687_v25 = vunpack.c.3.s8 %v6055_v52 }
 0x159   : > { %v2788_v28 = vpop.f32.mrf.mxu3  ;;  %v2454_v40 = vadd.f32 %v2453_v46, %v5880_v29  ;;  %v669_v29 = vunpack.c.1.s8 %v6049_v27  ;;  %v1182_v46 = vcvt.s32.f32 %v670_v0 }
 0x15a   : > { %v2789_v61 = vadd.f32 %v2788_v28, %v2620_v48  ;;  %v2960_v55 = vpop.f32.mrf.mxu0  ;;  %v5537_v48 = vld [vmem:[%s7333_s2 + $0x30] sm:$0xff]  ;;  %v1173_v28 = vcvt.s32.f32 %v661_v23 }
 0x15b   : > { %2492 = vmatmul.bf16.gmra.mxu1 %v1581_v62  ;;  %2661 = vmatmul.bf16.gmra.mxu2 %v1582_v57  ;;  %v1181_v57 = vcvt.s32.f32 %v669_v29  ;;  %v1590_v30 = vpack.c.bf16 %v1182_v46, %v1174_v5  ;;  %v678_v5 = vunpack.c.2.s8 %v6052_v4 }
 0x15c   : > { %v6046_v38 = vadd.f32 %v2957_v56, %v2789_v61  ;;  %v663_v56 = vunpack.c.0.s8 %v6055_v52  ;;  %3708 = vperm.xlu0 %5572, %v3618_v47   ;;  %4161 = vmatpush.bf16.msra.mxu0 %v5537_v48 }
 0x15d   : > { %2999 = vmatmul.bf16.gmra.mxu0 %v1584_v11  ;;  %v1183_v11 = vcvt.s32.f32 %v671_v19 }
 0x15e   : > { %7367 = vst [vmem:[#allocation30_spill] sm:$0xff] %v6046_v38  ;;  %2830 = vmatmul.bf16.gmra.mxu3 %v1583_v15  ;;  %v2622_v12 = vpop.f32.mrf.mxu2  ;;  %v664_v15 = vunpack.c.0.s8 %v6064_v18 }
 0x15f   : > { %v2623_v17 = vadd.f32 %v2622_v12, %v2454_v40  ;;  %v1175_v40 = vcvt.s32.f32 %v663_v56 }
 0x160   : > { %v2455_v8 = vpop.f32.mrf.mxu1 }
 0x161   : > { %v2791_v35 = vpop.f32.mrf.mxu3  ;;  %v2456_v12 = vadd.f32 %v2455_v8, %v5891_v60  ;;  %v1591_v47 = vpack.c.bf16 %v1183_v11, %v1175_v40  ;;  %v3624_v40 = vld [vmem:[%s6027_s15 + $0x60] sm:$0xff] }
 0x162   : > { %v2792_v62 = vadd.f32 %v2791_v35, %v2623_v17  ;;  %v2962_v61 = vpop.f32.mrf.mxu0  ;;  %v1589_v35 = vpack.c.bf16 %v1181_v57, %v1173_v28  ;;  %v677_v28 = vunpack.c.2.s8 %v6049_v27  ;;  %v685_v57 = vunpack.c.3.s8 %v6049_v27 }
 0x163   : > { %v1190_v27 = vcvt.s32.f32 %v678_v5  ;;  %v3622_v5 = vld [vmem:[%s6027_s15 + $0x50] sm:$0xff] }
 0x164   : > { %v6071_v54 = vadd.f32 %v2960_v55, %v2792_v62  ;;  %v1176_v55 = vcvt.s32.f32 %v664_v15  ;;  %v3615_v62 = vld [vmem:[%s6027_s15 + $0x18] sm:$0xff]  ;;  %v679_v15 = vunpack.c.2.s8 %v6055_v52  ;;  %v1199_v52 = vcvt.s32.f32 %v687_v25 }
 0x165   : > { %3693 = vperm.xlu1 %5573, %v3615_v62  }
 0x166   : > { %7368 = vst [vmem:[#allocation31_spill] sm:$0xff] %v6071_v54  ;;  %v2624_v17 = vpop.f32.mrf.mxu2  ;;  %v3621_v54 = vld [vmem:[%s6027_s15 + $0x48] sm:$0xff]  ;;  %v1592_v60 = vpack.c.bf16 %v1184_v36, %v1176_v55  ;;  %v1191_v55 = vcvt.s32.f32 %v679_v15  ;;  %v6103_v15 = vld [vmem:[%s5656_s17 + $0x1d0] sm:$0xff] }
 0x167   : > { %v2625_v23 = vadd.f32 %v2624_v17, %v2456_v12  ;;  %3723 = vperm.xlu0 %5572, %v3621_v54   ;;  %v1189_v12 = vcvt.s32.f32 %v677_v28  ;;  %v1197_v17 = vcvt.s32.f32 %v685_v57 }
 0x168   : > { %v2458_v0 = vpop.f32.mrf.mxu1  ;;  %v1599_v57 = vpack.c.bf16 %v1199_v52, %v1191_v55  ;;  %v6115_v55 = vld [vmem:[%s5656_s17 + $0x1e0] sm:$0xff]  ;;  %v3625_v52 = vld [vmem:[%s6027_s15 + $0x68] sm:$0xff] }
 0x169   : > { %v2793_v29 = vpop.f32.mrf.mxu3  ;;  %v2459_v48 = vadd.f32 %v2458_v0, %v5899_v14  ;;  %v686_v14 = vunpack.c.3.s8 %v6052_v4  ;;  %v688_v4 = vunpack.c.3.s8 %v6064_v18 }
 0x16a   : > { %v2794_v38 = vadd.f32 %v2793_v29, %v2625_v23  ;;  %v2965_v8 = vpop.f32.mrf.mxu0  ;;  %v680_v29 = vunpack.c.2.s8 %v6064_v18 }
 0x16b   : > { %2497 = vmatmul.bf16.gmra.mxu1 %v1589_v35  ;;  %2666 = vmatmul.bf16.gmra.mxu2 %v1590_v30  ;;  %v1198_v23 = vcvt.s32.f32 %v686_v14 }
 0x16c   : > { %v6079_v56 = vadd.f32 %v2962_v61, %v2794_v38  ;;  %v3619_v61 = vld [vmem:[%s6027_s15 + $0x38] sm:$0xff] }
 0x16d   : > { %3004 = vmatmul.bf16.gmra.mxu0 %v1592_v60  ;;  %3713 = vperm.xlu1 %5573, %v3619_v61   ;;  %v1598_v60 = vpack.c.bf16 %v1198_v23, %v1190_v27  ;;  %v6106_v61 = vld [vmem:[%s5656_s17 + $0x1d8] sm:$0xff]  ;;  %v702_v23 = vunpack.c.1.s8 %v6103_v15 }
 0x16e   : > { %2835 = vmatmul.bf16.gmra.mxu3 %v1591_v47  ;;  %v2627_v19 = vpop.f32.mrf.mxu2  ;;  %v1597_v47 = vpack.c.bf16 %v1197_v17, %v1189_v12  ;;  %v694_v12 = vunpack.c.0.s8 %v6103_v15 }
 0x16f   : > { %v2628_v46 = vadd.f32 %v2627_v19, %v2459_v48  ;;  %3738 = vperm.xlu0 %5572, %v3624_v40   ;;  %v1200_v19 = vcvt.s32.f32 %v688_v4  ;;  %v695_v4 = vunpack.c.0.s8 %v6106_v61 }
 0x170   : > { %v2460_v38 = vpop.f32.mrf.mxu1 }
 0x171   : > { %v2796_v54 = vpop.f32.mrf.mxu3  ;;  %v2461_v36 = vadd.f32 %v2460_v38, %v5907_v51  ;;  %v6100_v38 = vld [vmem:[%s5656_s17 + $0x1c8] sm:$0xff] }
 0x172   : > { %v2797_v11 = vadd.f32 %v2796_v54, %v2628_v46  ;;  %v2967_v30 = vpop.f32.mrf.mxu0  ;;  %v3627_v46 = vld [vmem:[%s6027_s15 + $0x78] sm:$0xff] }
 0x174   : > { %v6089_v35 = vadd.f32 %v2965_v8, %v2797_v11  ;;  %v1192_v8 = vcvt.s32.f32 %v680_v29  ;;  %v693_v11 = vunpack.c.0.s8 %v6100_v38 }
 0x175   : > { %3728 = vperm.xlu1 %5573, %v3622_v5   ;;  %v1207_v5 = vcvt.s32.f32 %v695_v4 }
 0x176   : > { %v2629_v0 = vpop.f32.mrf.mxu2  ;;  %v1600_v14 = vpack.c.bf16 %v1200_v19, %v1192_v8  ;;  %v1214_v8 = vcvt.s32.f32 %v702_v23  ;;  %v696_v19 = vunpack.c.0.s8 %v6115_v55  ;;  %v3628_v23 = vld [vmem:[%s6027_s15 + $0x80] sm:$0xff] }
 0x177   : > { %v2630_v62 = vadd.f32 %v2629_v0, %v2461_v36  ;;  %3753 = vperm.xlu0 %5572, %v3627_v46   ;;  %v3630_v36 = vld [vmem:[%s6027_s15 + $0x90] sm:$0xff] }
 0x178   : > { %v2463_v28 = vpop.f32.mrf.mxu1 }
 0x179   : > { %v2798_v48 = vpop.f32.mrf.mxu3  ;;  %v2464_v54 = vadd.f32 %v2463_v28, %v5916_v10  ;;  %v701_v10 = vunpack.c.1.s8 %v6100_v38  ;;  %v704_v28 = vunpack.c.1.s8 %v6115_v55 }
 0x17a   : > { %v2799_v18 = vadd.f32 %v2798_v48, %v2630_v62  ;;  %v2970_v25 = vpop.f32.mrf.mxu0  ;;  %v1206_v48 = vcvt.s32.f32 %v694_v12  ;;  %v1208_v12 = vcvt.s32.f32 %v696_v19 }
 0x17b   : > { %2502 = vmatmul.bf16.gmra.mxu1 %v1597_v47  ;;  %2671 = vmatmul.bf16.gmra.mxu2 %v1598_v60  ;;  %v1205_v47 = vcvt.s32.f32 %v693_v11  ;;  %v1213_v62 = vcvt.s32.f32 %v701_v10 }
 0x17c   : > { %v6097_v51 = vadd.f32 %v2967_v30, %v2799_v18  ;;  %v703_v30 = vunpack.c.1.s8 %v6106_v61  ;;  %v1606_v10 = vpack.c.bf16 %v1214_v8, %v1206_v48  ;;  %v717_v48 = vunpack.c.3.s8 %v6100_v38 }
 0x17d   : > { %3009 = vmatmul.bf16.gmra.mxu0 %v1600_v14  ;;  %3743 = vperm.xlu1 %5573, %v3625_v52   ;;  %v1605_v14 = vpack.c.bf16 %v1213_v62, %v1205_v47  ;;  %v3633_v52 = vld [vmem:[%s6027_s15 + $0xa8] sm:$0xff]  ;;  %v5526_v47 = vld [vmem:[%s7332_s1 + $0x1d8] sm:$0xff]  ;;  %v710_v8 = vunpack.c.2.s8 %v6103_v15 }
 0x17e   : > { %2840 = vmatmul.bf16.gmra.mxu3 %v1599_v57  ;;  %v2632_v40 = vpop.f32.mrf.mxu2  ;;  %v1215_v46 = vcvt.s32.f32 %v703_v30  ;;  %v5518_v30 = vld [vmem:[%s7332_s1 + $0x198] sm:$0xff] }
 0x17f   : > { %v2633_v17 = vadd.f32 %v2632_v40, %v2464_v54  ;;  %3768 = vperm.xlu0 %5572, %v3630_v36   ;;  %3278 = vmatpush.bf16.msra.mxu2 %v5518_v30 }
 0x180   : > { %v2465_v29 = vpop.f32.mrf.mxu1  ;;  %3447 = vmatpush.bf16.msra.mxu3 %v5526_v47 }
 0x181   : > { %v2801_v27 = vpop.f32.mrf.mxu3  ;;  %v2466_v18 = vadd.f32 %v2465_v29, %v5927_v2 }
 0x182   : > { %v2802_v0 = vadd.f32 %v2801_v27, %v2633_v17  ;;  %v2972_v57 = vpop.f32.mrf.mxu0  ;;  %v1607_v27 = vpack.c.bf16 %v1215_v46, %v1207_v5  ;;  %v711_v46 = vunpack.c.2.s8 %v6106_v61 }
 0x184   : > { %v6119_v60 = vadd.f32 %v2970_v25, %v2802_v0  ;;  %v1216_v25 = vcvt.s32.f32 %v704_v28 }
 0x185   : > { %3758 = vperm.xlu1 %5573, %v3628_v23  }
 0x186   : > { %v2634_v54 = vpop.f32.mrf.mxu2  ;;  %v1608_v2 = vpack.c.bf16 %v1216_v25, %v1208_v12  ;;  %v1229_v12 = vcvt.s32.f32 %v717_v48  ;;  %v1222_v25 = vcvt.s32.f32 %v710_v8 }
 0x187   : > { %v2635_v40 = vadd.f32 %v2634_v54, %v2466_v18  ;;  %3783 = vperm.xlu0 %5572, %v3633_v52   ;;  %v719_v18 = vunpack.c.3.s8 %v6106_v61  ;;  %v3616_v54 = vld [vmem:[%s6027_s15 + $0x20] sm:$0xff]  ;;  %v720_v61 = vunpack.c.3.s8 %v6115_v55  ;;  %v1223_v52 = vcvt.s32.f32 %v711_v46 }
 0x188   : > { %v2468_v17 = vpop.f32.mrf.mxu1  ;;  %3698 = vperm.xlu2 %5574, %v3616_v54  }
 0x189   : > { %v2803_v11 = vpop.f32.mrf.mxu3  ;;  %v2469_v0 = vadd.f32 %v2468_v17, %v5935_v37  ;;  %v709_v37 = vunpack.c.2.s8 %v6100_v38  ;;  %v5510_v38 = vld [vmem:[%s7332_s1 + $0x158] sm:$0xff]  ;;  %v1232_v48 = vcvt.s32.f32 %v720_v61  ;;  %v6172_v61 = vld [vmem:[%s5656_s17 + $0x220] sm:$0xff] }
 0x18a   : > { %v2804_v36 = vadd.f32 %v2803_v11, %v2635_v40  ;;  %v2975_v29 = vpop.f32.mrf.mxu0  ;;  %v3636_v40 = vld [vmem:[%s6027_s15 + $0xc0] sm:$0xff]  ;;  %3109 = vmatpush.bf16.msra.mxu1 %v5510_v38 }
 0x18b   : > { %2507 = vmatmul.bf16.gmra.mxu1 %v1605_v14  ;;  %2676 = vmatmul.bf16.gmra.mxu2 %v1606_v10  ;;  %v3631_v14 = vld [vmem:[%s6027_s15 + $0x98] sm:$0xff]  ;;  %v1221_v10 = vcvt.s32.f32 %v709_v37 }
 0x18c   : > { %v6127_v4 = vadd.f32 %v2972_v57, %v2804_v36  ;;  %v718_v57 = vunpack.c.3.s8 %v6103_v15  ;;  %v1231_v36 = vcvt.s32.f32 %v719_v18  ;;  %v6159_v18 = vld [vmem:[%s5656_s17 + $0x208] sm:$0xff] }
 0x18d   : > { %3014 = vmatmul.bf16.gmra.mxu0 %v1608_v2  ;;  %3773 = vperm.xlu1 %5573, %v3631_v14   ;;  %v1613_v30 = vpack.c.bf16 %v1229_v12, %v1221_v10  ;;  %v6162_v14 = vld [vmem:[%s5656_s17 + $0x210] sm:$0xff]  ;;  %v733_v10 = vunpack.c.1.s8 %v6159_v18 }
 0x18e   : > { %2845 = vmatmul.bf16.gmra.mxu3 %v1607_v27  ;;  %v2637_v62 = vpop.f32.mrf.mxu2  ;;  %v1230_v17 = vcvt.s32.f32 %v718_v57  ;;  %v712_v27 = vunpack.c.2.s8 %v6115_v55  ;;  %v3617_v55 = vld [vmem:[%s6027_s15 + $0x28] sm:$0xff]  ;;  %v3639_v57 = vld [vmem:[%s6027_s15 + $0xd8] sm:$0xff]  ;;  %v726_v12 = vunpack.c.0.s8 %v6162_v14 }
 0x18f   : > { %v2638_v19 = vadd.f32 %v2637_v62, %v2469_v0  ;;  %3798 = vperm.xlu0 %5572, %v3636_v40  }
 0x190   : > { %v2470_v5 = vpop.f32.mrf.mxu1  ;;  %v1224_v37 = vcvt.s32.f32 %v712_v27  ;;  %3703 = vperm.xlu2 %5574, %v3617_v55   ;;  %v734_v27 = vunpack.c.1.s8 %v6162_v14  ;;  %v728_v55 = vunpack.c.0.s8 %v6172_v61 }
 0x191   : > { %v2806_v28 = vpop.f32.mrf.mxu3  ;;  %v2471_v0 = vadd.f32 %v2470_v5, %v5952_v43 }
 0x192   : > { %v2807_v11 = vadd.f32 %v2806_v28, %v2638_v19  ;;  %v2977_v23 = vpop.f32.mrf.mxu0  ;;  %v1615_v19 = vpack.c.bf16 %v1231_v36, %v1223_v52  ;;  %v3634_v28 = vld [vmem:[%s6027_s15 + $0xb0] sm:$0xff]  ;;  %v1616_v46 = vpack.c.bf16 %v1232_v48, %v1224_v37  ;;  %v1245_v37 = vcvt.s32.f32 %v733_v10 }
 0x193   : > { %v1238_v48 = vcvt.s32.f32 %v726_v12 }
 0x194   : > { %v6147_v15 = vadd.f32 %v2975_v29, %v2807_v11  ;;  %v1614_v29 = vpack.c.bf16 %v1230_v17, %v1222_v25  ;;  %v6165_v11 = vld [vmem:[%s5656_s17 + $0x218] sm:$0xff] }
 0x195   : > { %3788 = vperm.xlu1 %5573, %v3634_v28   ;;  %v727_v52 = vunpack.c.0.s8 %v6165_v11  ;;  %v735_v36 = vunpack.c.1.s8 %v6165_v11  ;;  %v736_v28 = vunpack.c.1.s8 %v6172_v61 }
 0x196   : > { %v2639_v2 = vpop.f32.mrf.mxu2 }
 0x197   : > { %v2640_v47 = vadd.f32 %v2639_v2, %v2471_v0  ;;  %3813 = vperm.xlu0 %5572, %v3639_v57   ;;  %v3620_v0 = vld [vmem:[%s6027_s15 + $0x40] sm:$0xff]  ;;  %v3637_v2 = vld [vmem:[%s6027_s15 + $0xc8] sm:$0xff] }
 0x198   : > { %v2473_v8 = vpop.f32.mrf.mxu1  ;;  %3718 = vperm.xlu2 %5574, %v3620_v0  }
 0x199   : > { %v2808_v62 = vpop.f32.mrf.mxu3  ;;  %v2474_v43 = vadd.f32 %v2473_v8, %v5961_v34  ;;  %v725_v34 = vunpack.c.0.s8 %v6159_v18 }
 0x19a   : > { %v2809_v54 = vadd.f32 %v2808_v62, %v2640_v47  ;;  %v2980_v40 = vpop.f32.mrf.mxu0  ;;  %v5536_v62 = vld [vmem:[%s7333_s2 + $0x28] sm:$0xff] }
 0x19b   : > { %2512 = vmatmul.bf16.gmra.mxu1 %v1613_v30  ;;  %2681 = vmatmul.bf16.gmra.mxu2 %v1614_v29  ;;  %v3642_v30 = vld [vmem:[%s6027_s15 + $0xf0] sm:$0xff]  ;;  %v1237_v29 = vcvt.s32.f32 %v725_v34 }
 0x19c   : > { %v6156_v5 = vadd.f32 %v2977_v23, %v2809_v54  ;;  %4162 = vmatpush.bf16.msra.mxu0 %v5536_v62  ;;  %v1239_v54 = vcvt.s32.f32 %v727_v52 }
 0x19d   : > { %3019 = vmatmul.bf16.gmra.mxu0 %v1616_v46  ;;  %3803 = vperm.xlu1 %5573, %v3637_v2   ;;  %v1621_v34 = vpack.c.bf16 %v1245_v37, %v1237_v29  ;;  %v3623_v2 = vld [vmem:[%s6027_s15 + $0x58] sm:$0xff]  ;;  %v741_v29 = vunpack.c.2.s8 %v6159_v18  ;;  %v749_v37 = vunpack.c.3.s8 %v6159_v18 }
 0x19e   : > { %2850 = vmatmul.bf16.gmra.mxu3 %v1615_v19  ;;  %v2642_v38 = vpop.f32.mrf.mxu2  ;;  %v1246_v19 = vcvt.s32.f32 %v734_v27 }
 0x19f   : > { %v2643_v25 = vadd.f32 %v2642_v38, %v2474_v43  ;;  %3828 = vperm.xlu0 %5572, %v3642_v30   ;;  %v1247_v43 = vcvt.s32.f32 %v735_v36  ;;  %v3640_v30 = vld [vmem:[%s6027_s15 + $0xe0] sm:$0xff]  ;;  %v1261_v18 = vcvt.s32.f32 %v749_v37 }
 0x1a0   : > { %v2475_v23 = vpop.f32.mrf.mxu1  ;;  %3733 = vperm.xlu2 %5574, %v3623_v2  }
 0x1a1   : > { %v2811_v17 = vpop.f32.mrf.mxu3  ;;  %v2476_v46 = vadd.f32 %v2475_v23, %v5975_v31  ;;  %v1623_v0 = vpack.c.bf16 %v1247_v43, %v1239_v54  ;;  %v751_v54 = vunpack.c.3.s8 %v6165_v11  ;;  %v3626_v43 = vld [vmem:[%s6027_s15 + $0x70] sm:$0xff] }
 0x1a2   : > { %v2812_v47 = vadd.f32 %v2811_v17, %v2643_v25  ;;  %v2982_v57 = vpop.f32.mrf.mxu0  ;;  %v1240_v25 = vcvt.s32.f32 %v728_v55  ;;  %v1248_v17 = vcvt.s32.f32 %v736_v28  ;;  %v750_v55 = vunpack.c.3.s8 %v6162_v14 }
 0x1a4   : > { %v6182_v8 = vadd.f32 %v2980_v40, %v2812_v47  ;;  %v1622_v40 = vpack.c.bf16 %v1246_v19, %v1238_v48  ;;  %v3645_v47 = vld [vmem:[%s6027_s15 + $0x108] sm:$0xff]  ;;  %v1624_v31 = vpack.c.bf16 %v1248_v17, %v1240_v25  ;;  %v742_v48 = vunpack.c.2.s8 %v6162_v14 }
 0x1a5   : > { %3818 = vperm.xlu1 %5573, %v3640_v30   ;;  %v744_v14 = vunpack.c.2.s8 %v6172_v61  ;;  %v752_v25 = vunpack.c.3.s8 %v6172_v61  ;;  %v3646_v61 = vld [vmem:[%s6027_s15 + $0x110] sm:$0xff] }
 0x1a6   : > { %7369 = vst [vmem:[#allocation32_spill] sm:$0xff] %v6182_v8  ;;  %v2644_v38 = vpop.f32.mrf.mxu2 }
 0x1a7   : > { %v2645_v10 = vadd.f32 %v2644_v38, %v2476_v46  ;;  %3843 = vperm.xlu0 %5572, %v3645_v47   ;;  %v3643_v46 = vld [vmem:[%s6027_s15 + $0xf8] sm:$0xff] }
 0x1a8   : > { %v2478_v27 = vpop.f32.mrf.mxu1  ;;  %3748 = vperm.xlu2 %5574, %v3626_v43  }
 0x1a9   : > { %v2813_v12 = vpop.f32.mrf.mxu3  ;;  %v2479_v36 = vadd.f32 %v2478_v27, %v5816_v49  ;;  %v3648_v49 = vld [vmem:[%s6027_s15 + $0x120] sm:$0xff]  ;;  %v1263_v27 = vcvt.s32.f32 %v751_v54 }
 0x1aa   : > { %v2814_v8 = vadd.f32 %v2813_v12, %v2645_v10  ;;  %v2985_v23 = vpop.f32.mrf.mxu0  ;;  %v1254_v10 = vcvt.s32.f32 %v742_v48  ;;  %v3629_v48 = vld [vmem:[%s6027_s15 + $0x88] sm:$0xff] }
 0x1ab   : > { %2517 = vmatmul.bf16.gmra.mxu1 %v1621_v34  ;;  %2686 = vmatmul.bf16.gmra.mxu2 %v1622_v40  ;;  %v1253_v34 = vcvt.s32.f32 %v741_v29  ;;  %v1262_v40 = vcvt.s32.f32 %v750_v55 }
 0x1ac   : > { %v6190_v52 = vadd.f32 %v2982_v57, %v2814_v8  ;;  %v743_v57 = vunpack.c.2.s8 %v6165_v11 }
 0x1ad   : > { %3024 = vmatmul.bf16.gmra.mxu0 %v1624_v31  ;;  %3833 = vperm.xlu1 %5573, %v3643_v46   ;;  %v1629_v30 = vpack.c.bf16 %v1261_v18, %v1253_v34  ;;  %v6220_v46 = vld [vmem:[%s5656_s17 + $0x258] sm:$0xff] }
 0x1ae   : > { %2855 = vmatmul.bf16.gmra.mxu3 %v1623_v0  ;;  %v2647_v62 = vpop.f32.mrf.mxu2  ;;  %v1255_v17 = vcvt.s32.f32 %v743_v57  ;;  %v6216_v57 = vld [vmem:[%s5656_s17 + $0x250] sm:$0xff] }
 0x1af   : > { %v2648_v19 = vadd.f32 %v2647_v62, %v2479_v36  ;;  %3858 = vperm.xlu0 %5572, %v3648_v49   ;;  %v1630_v36 = vpack.c.bf16 %v1262_v40, %v1254_v10  ;;  %v1264_v62 = vcvt.s32.f32 %v752_v25  ;;  %v758_v18 = vunpack.c.0.s8 %v6216_v57  ;;  %v6227_v25 = vld [vmem:[%s5656_s17 + $0x260] sm:$0xff] }
 0x1b0   : > { %v2480_v28 = vpop.f32.mrf.mxu1  ;;  %v1631_v37 = vpack.c.bf16 %v1263_v27, %v1255_v17  ;;  %3763 = vperm.xlu2 %5574, %v3629_v48   ;;  %v767_v17 = vunpack.c.1.s8 %v6220_v46  ;;  %v3632_v27 = vld [vmem:[%s6027_s15 + $0xa0] sm:$0xff] }
 0x1b1   : > { %v2816_v8 = vpop.f32.mrf.mxu3  ;;  %v2481_v0 = vadd.f32 %v2480_v28, %v5824_v59  ;;  %v6213_v28 = vld [vmem:[%s5656_s17 + $0x248] sm:$0xff] }
 0x1b2   : > { %v2817_v38 = vadd.f32 %v2816_v8, %v2648_v19  ;;  %v2987_v11 = vpop.f32.mrf.mxu0  ;;  %v3651_v19 = vld [vmem:[%s6027_s15 + $0x138] sm:$0xff]  ;;  %v765_v34 = vunpack.c.1.s8 %v6213_v28 }
 0x1b4   : > { %v6202_v12 = vadd.f32 %v2985_v23, %v2817_v38  ;;  %v1256_v23 = vcvt.s32.f32 %v744_v14  ;;  %v757_v38 = vunpack.c.0.s8 %v6213_v28  ;;  %v766_v14 = vunpack.c.1.s8 %v6216_v57 }
 0x1b5   : > { %3848 = vperm.xlu1 %5573, %v3646_v61  }
 0x1b6   : > { %v2649_v2 = vpop.f32.mrf.mxu2  ;;  %v1632_v55 = vpack.c.bf16 %v1264_v62, %v1256_v23  ;;  %v1278_v62 = vcvt.s32.f32 %v766_v14  ;;  %v3635_v14 = vld [vmem:[%s6027_s15 + $0xb8] sm:$0xff] }
 0x1b7   : > { %v2650_v47 = vadd.f32 %v2649_v2, %v2481_v0  ;;  %3873 = vperm.xlu0 %5572, %v3651_v19   ;;  %v3649_v0 = vld [vmem:[%s6027_s15 + $0x128] sm:$0xff]  ;;  %v3654_v2 = vld [vmem:[%s6027_s15 + $0x150] sm:$0xff]  ;;  %v1279_v19 = vcvt.s32.f32 %v767_v17 }
 0x1b8   : > { %v2483_v29 = vpop.f32.mrf.mxu1  ;;  %3778 = vperm.xlu2 %5574, %v3632_v27   ;;  %v3652_v27 = vld [vmem:[%s6027_s15 + $0x140] sm:$0xff]  ;;  %v5517_v17 = vld [vmem:[%s7332_s1 + $0x190] sm:$0xff] }
 0x1b9   : > { %v2818_v31 = vpop.f32.mrf.mxu3  ;;  %v2484_v43 = vadd.f32 %v2483_v29, %v5832_v13  ;;  %v759_v13 = vunpack.c.0.s8 %v6220_v46  ;;  %v760_v29 = vunpack.c.0.s8 %v6227_v25  ;;  %3279 = vmatpush.bf16.msra.mxu2 %v5517_v17 }
 0x1ba   : > { %v2819_v8 = vadd.f32 %v2818_v31, %v2650_v47  ;;  %v2990_v54 = vpop.f32.mrf.mxu0  ;;  %v1269_v47 = vcvt.s32.f32 %v757_v38  ;;  %v1277_v31 = vcvt.s32.f32 %v765_v34 }
 0x1bb   : > { %2522 = vmatmul.bf16.gmra.mxu1 %v1629_v30  ;;  %2691 = vmatmul.bf16.gmra.mxu2 %v1630_v36  ;;  %v1270_v36 = vcvt.s32.f32 %v758_v18  ;;  %v1271_v61 = vcvt.s32.f32 %v759_v13 }
 0x1bc   : > { %v6210_v59 = vadd.f32 %v2987_v11, %v2819_v8 }
 0x1bd   : > { %3029 = vmatmul.bf16.gmra.mxu0 %v1632_v55  ;;  %3863 = vperm.xlu1 %5573, %v3649_v0   ;;  %v1638_v34 = vpack.c.bf16 %v1278_v62, %v1270_v36  ;;  %v3657_v0 = vld [vmem:[%s6027_s15 + $0x168] sm:$0xff]  ;;  %v773_v36 = vunpack.c.2.s8 %v6213_v28  ;;  %v781_v62 = vunpack.c.3.s8 %v6213_v28  ;;  %v5509_v28 = vld [vmem:[%s7332_s1 + $0x150] sm:$0xff] }
 0x1be   : > { %2860 = vmatmul.bf16.gmra.mxu3 %v1631_v37  ;;  %v2652_v49 = vpop.f32.mrf.mxu2  ;;  %v768_v37 = vunpack.c.1.s8 %v6227_v25  ;;  %3110 = vmatpush.bf16.msra.mxu1 %v5509_v28 }
 0x1bf   : > { %v2653_v10 = vadd.f32 %v2652_v49, %v2484_v43  ;;  %3888 = vperm.xlu0 %5572, %v3654_v2   ;;  %v1637_v43 = vpack.c.bf16 %v1277_v31, %v1269_v47 }
 0x1c0   : > { %v2485_v11 = vpop.f32.mrf.mxu1  ;;  %v1280_v18 = vcvt.s32.f32 %v768_v37  ;;  %3793 = vperm.xlu2 %5574, %v3635_v14  }
 0x1c1   : > { %v2821_v40 = vpop.f32.mrf.mxu3  ;;  %v2486_v8 = vadd.f32 %v2485_v11, %v5843_v26 }
 0x1c2   : > { %v2822_v30 = vadd.f32 %v2821_v40, %v2653_v10  ;;  %v2992_v48 = vpop.f32.mrf.mxu0  ;;  %v1639_v40 = vpack.c.bf16 %v1279_v19, %v1271_v61  ;;  %v782_v61 = vunpack.c.3.s8 %v6216_v57 }
 0x1c4   : > { %v6234_v23 = vadd.f32 %v2990_v54, %v2822_v30  ;;  %v1272_v54 = vcvt.s32.f32 %v760_v29  ;;  %v5525_v30 = vld [vmem:[%s7332_s1 + $0x1d0] sm:$0xff]  ;;  %v774_v29 = vunpack.c.2.s8 %v6216_v57 }
 0x1c5   : > { %3878 = vperm.xlu1 %5573, %v3652_v27   ;;  %3448 = vmatpush.bf16.msra.mxu3 %v5525_v30 }
 0x1c6   : > { %v2654_v55 = vpop.f32.mrf.mxu2  ;;  %v1640_v26 = vpack.c.bf16 %v1280_v18, %v1272_v54  ;;  %v1293_v54 = vcvt.s32.f32 %v781_v62  ;;  %v1286_v18 = vcvt.s32.f32 %v774_v29 }
 0x1c7   : > { %v2655_v49 = vadd.f32 %v2654_v55, %v2486_v8  ;;  %3903 = vperm.xlu0 %5572, %v3657_v0   ;;  %v775_v8 = vunpack.c.2.s8 %v6220_v46  ;;  %v3638_v55 = vld [vmem:[%s6027_s15 + $0xd0] sm:$0xff] }
 0x1c8   : > { %v2488_v10 = vpop.f32.mrf.mxu1  ;;  %3808 = vperm.xlu2 %5574, %v3638_v55  }
 0x1c9   : > { %v2823_v38 = vpop.f32.mrf.mxu3  ;;  %v2489_v47 = vadd.f32 %v2488_v10, %v5852_v45  ;;  %v783_v45 = vunpack.c.3.s8 %v6220_v46  ;;  %v1294_v10 = vcvt.s32.f32 %v782_v61  ;;  %v784_v46 = vunpack.c.3.s8 %v6227_v25 }
 0x1ca   : > { %v2824_v2 = vadd.f32 %v2823_v38, %v2655_v49  ;;  %v2995_v11 = vpop.f32.mrf.mxu0  ;;  %v3660_v49 = vld [vmem:[%s6027_s15 + $0x180] sm:$0xff]  ;;  %v1287_v27 = vcvt.s32.f32 %v775_v8  ;;  %v6274_v8 = vld [vmem:[%s5656_s17 + $0x288] sm:$0xff] }
 0x1cb   : > { %2527 = vmatmul.bf16.gmra.mxu1 %v1637_v43  ;;  %2696 = vmatmul.bf16.gmra.mxu2 %v1638_v34  ;;  %v3655_v43 = vld [vmem:[%s6027_s15 + $0x158] sm:$0xff]  ;;  %v1285_v34 = vcvt.s32.f32 %v773_v36  ;;  %v1295_v0 = vcvt.s32.f32 %v783_v45  ;;  %v1296_v36 = vcvt.s32.f32 %v784_v46  ;;  %v6277_v45 = vld [vmem:[%s5656_s17 + $0x290] sm:$0xff]  ;;  %v789_v28 = vunpack.c.0.s8 %v6274_v8  ;;  %v6288_v46 = vld [vmem:[%s5656_s17 + $0x2a0] sm:$0xff] }
 0x1cc   : > { %v6242_v13 = vadd.f32 %v2992_v48, %v2824_v2 }
 0x1cd   : > { %3034 = vmatmul.bf16.gmra.mxu0 %v1640_v26  ;;  %3893 = vperm.xlu1 %5573, %v3655_v43   ;;  %v1645_v17 = vpack.c.bf16 %v1293_v54, %v1285_v34  ;;  %v1647_v29 = vpack.c.bf16 %v1295_v0, %v1287_v27  ;;  %v797_v34 = vunpack.c.1.s8 %v6274_v8  ;;  %v790_v54 = vunpack.c.0.s8 %v6277_v45  ;;  %v3644_v0 = vld [vmem:[%s6027_s15 + $0x100] sm:$0xff] }
 0x1ce   : > { %2865 = vmatmul.bf16.gmra.mxu3 %v1639_v40  ;;  %v2657_v31 = vpop.f32.mrf.mxu2  ;;  %v776_v40 = vunpack.c.2.s8 %v6227_v25  ;;  %v3641_v25 = vld [vmem:[%s6027_s15 + $0xe8] sm:$0xff] }
 0x1cf   : > { %v2658_v37 = vadd.f32 %v2657_v31, %v2489_v47  ;;  %3918 = vperm.xlu0 %5572, %v3660_v49   ;;  %v6281_v49 = vld [vmem:[%s5656_s17 + $0x298] sm:$0xff] }
 0x1d0   : > { %v2490_v19 = vpop.f32.mrf.mxu1  ;;  %v1288_v31 = vcvt.s32.f32 %v776_v40  ;;  %3823 = vperm.xlu2 %5574, %v3641_v25   ;;  %v798_v40 = vunpack.c.1.s8 %v6277_v45  ;;  %v799_v27 = vunpack.c.1.s8 %v6281_v49  ;;  %v800_v25 = vunpack.c.1.s8 %v6288_v46 }
 0x1d1   : > { %v2826_v48 = vpop.f32.mrf.mxu3  ;;  %v2491_v2 = vadd.f32 %v2490_v19, %v5869_v63 }
 0x1d2   : > { %v2827_v38 = vadd.f32 %v2826_v48, %v2658_v37  ;;  %v2997_v14 = vpop.f32.mrf.mxu0  ;;  %v3658_v37 = vld [vmem:[%s6027_s15 + $0x170] sm:$0xff]  ;;  %v3663_v48 = vld [vmem:[%s6027_s15 + $0x198] sm:$0xff]  ;;  %v1648_v19 = vpack.c.bf16 %v1296_v36, %v1288_v31  ;;  %v1302_v31 = vcvt.s32.f32 %v790_v54 }
 0x1d4   : > { %v6263_v57 = vadd.f32 %v2995_v11, %v2827_v38  ;;  %v1646_v11 = vpack.c.bf16 %v1294_v10, %v1286_v18 }
 0x1d5   : > { %3908 = vperm.xlu1 %5573, %v3658_v37  }
 0x1d6   : > { %v2659_v26 = vpop.f32.mrf.mxu2 }
 0x1d7   : > { %v2660_v30 = vadd.f32 %v2659_v26, %v2491_v2  ;;  %3933 = vperm.xlu0 %5572, %v3663_v48   ;;  %v3661_v2 = vld [vmem:[%s6027_s15 + $0x188] sm:$0xff]  ;;  %v3666_v26 = vld [vmem:[%s6027_s15 + $0x1b0] sm:$0xff] }
 0x1d8   : > { %v2493_v62 = vpop.f32.mrf.mxu1  ;;  %3838 = vperm.xlu2 %5574, %v3644_v0   ;;  %v3647_v0 = vld [vmem:[%s6027_s15 + $0x118] sm:$0xff] }
 0x1d9   : > { %v2828_v47 = vpop.f32.mrf.mxu3  ;;  %v2494_v43 = vadd.f32 %v2493_v62, %v5877_v24  ;;  %v791_v24 = vunpack.c.0.s8 %v6281_v49  ;;  %v1310_v62 = vcvt.s32.f32 %v798_v40 }
 0x1da   : > { %v2829_v61 = vadd.f32 %v2828_v47, %v2660_v30  ;;  %v3000_v55 = vpop.f32.mrf.mxu0  ;;  %v5535_v30 = vld [vmem:[%s7333_s2 + $0x20] sm:$0xff]  ;;  %v1301_v47 = vcvt.s32.f32 %v789_v28 }
 0x1db   : > { %2532 = vmatmul.bf16.gmra.mxu1 %v1645_v17  ;;  %2701 = vmatmul.bf16.gmra.mxu2 %v1646_v11  ;;  %v1309_v11 = vcvt.s32.f32 %v797_v34  ;;  %v1303_v48 = vcvt.s32.f32 %v791_v24 }
 0x1dc   : > { %v6271_v63 = vadd.f32 %v2997_v14, %v2829_v61  ;;  %4163 = vmatpush.bf16.msra.mxu0 %v5535_v30  ;;  %v1311_v61 = vcvt.s32.f32 %v799_v27 }
 0x1dd   : > { %3039 = vmatmul.bf16.gmra.mxu0 %v1648_v19  ;;  %3923 = vperm.xlu1 %5573, %v3661_v2   ;;  %v3664_v2 = vld [vmem:[%s6027_s15 + $0x1a0] sm:$0xff] }
 0x1de   : > { %2870 = vmatmul.bf16.gmra.mxu3 %v1647_v29  ;;  %v2662_v38 = vpop.f32.mrf.mxu2  ;;  %v792_v29 = vunpack.c.0.s8 %v6288_v46  ;;  %v1655_v40 = vpack.c.bf16 %v1311_v61, %v1303_v48  ;;  %v807_v48 = vunpack.c.2.s8 %v6281_v49  ;;  %v815_v61 = vunpack.c.3.s8 %v6281_v49 }
 0x1df   : > { %v2663_v18 = vadd.f32 %v2662_v38, %v2494_v43  ;;  %3948 = vperm.xlu0 %5572, %v3666_v26   ;;  %v1653_v38 = vpack.c.bf16 %v1309_v11, %v1301_v47  ;;  %v3669_v26 = vld [vmem:[%s6027_s15 + $0x1c8] sm:$0xff]  ;;  %v805_v47 = vunpack.c.2.s8 %v6274_v8  ;;  %v813_v11 = vunpack.c.3.s8 %v6274_v8 }
 0x1e0   : > { %v2495_v14 = vpop.f32.mrf.mxu1  ;;  %v1304_v54 = vcvt.s32.f32 %v792_v29  ;;  %3853 = vperm.xlu2 %5574, %v3647_v0  }
 0x1e1   : > { %v2831_v10 = vpop.f32.mrf.mxu3  ;;  %v2496_v19 = vadd.f32 %v2495_v14, %v5888_v41  ;;  %v1325_v8 = vcvt.s32.f32 %v813_v11 }
 0x1e2   : > { %v2832_v17 = vadd.f32 %v2831_v10, %v2663_v18  ;;  %v3002_v37 = vpop.f32.mrf.mxu0  ;;  %v1312_v18 = vcvt.s32.f32 %v800_v25  ;;  %v814_v25 = vunpack.c.3.s8 %v6277_v45 }
 0x1e4   : > { %v6298_v36 = vadd.f32 %v3000_v55, %v2832_v17  ;;  %v1654_v55 = vpack.c.bf16 %v1310_v62, %v1302_v31  ;;  %v1656_v41 = vpack.c.bf16 %v1312_v18, %v1304_v54  ;;  %v806_v31 = vunpack.c.2.s8 %v6277_v45 }
 0x1e5   : > { %3938 = vperm.xlu1 %5573, %v3664_v2   ;;  %v1326_v54 = vcvt.s32.f32 %v814_v25  ;;  %v808_v45 = vunpack.c.2.s8 %v6288_v46  ;;  %v816_v18 = vunpack.c.3.s8 %v6288_v46  ;;  %v3670_v46 = vld [vmem:[%s6027_s15 + $0x1d0] sm:$0xff] }
 0x1e6   : > { %7370 = vst [vmem:[#allocation33_spill] sm:$0xff] %v6298_v36  ;;  %v2664_v43 = vpop.f32.mrf.mxu2 }
 0x1e7   : > { %v2665_v28 = vadd.f32 %v2664_v43, %v2496_v19  ;;  %3963 = vperm.xlu0 %5572, %v3669_v26   ;;  %v3650_v19 = vld [vmem:[%s6027_s15 + $0x130] sm:$0xff]  ;;  %v3667_v43 = vld [vmem:[%s6027_s15 + $0x1b8] sm:$0xff] }
 0x1e8   : > { %v2498_v10 = vpop.f32.mrf.mxu1  ;;  %3868 = vperm.xlu2 %5574, %v3650_v19  }
 0x1e9   : > { %v2833_v34 = vpop.f32.mrf.mxu3  ;;  %v2499_v27 = vadd.f32 %v2498_v10, %v5897_v9  ;;  %v3672_v9 = vld [vmem:[%s6027_s15 + $0x1e0] sm:$0xff]  ;;  %v1319_v10 = vcvt.s32.f32 %v807_v48  ;;  %v6332_v48 = vld [vmem:[%s5656_s17 + $0x2d0] sm:$0xff] }
 0x1ea   : > { %v2834_v17 = vadd.f32 %v2833_v34, %v2665_v28  ;;  %v3005_v14 = vpop.f32.mrf.mxu0  ;;  %v1317_v28 = vcvt.s32.f32 %v805_v47  ;;  %v1318_v34 = vcvt.s32.f32 %v806_v31  ;;  %v3653_v31 = vld [vmem:[%s6027_s15 + $0x148] sm:$0xff] }
 0x1eb   : > { %2537 = vmatmul.bf16.gmra.mxu1 %v1653_v38  ;;  %2706 = vmatmul.bf16.gmra.mxu2 %v1654_v55 }
 0x1ec   : > { %v6306_v24 = vadd.f32 %v3002_v37, %v2834_v17  ;;  %v1661_v26 = vpack.c.bf16 %v1325_v8, %v1317_v28  ;;  %v822_v8 = vunpack.c.0.s8 %v6332_v48 }
 0x1ed   : > { %3044 = vmatmul.bf16.gmra.mxu0 %v1656_v41  ;;  %3953 = vperm.xlu1 %5573, %v3667_v43   ;;  %v6336_v43 = vld [vmem:[%s5656_s17 + $0x2d8] sm:$0xff] }
 0x1ee   : > { %7371 = vst [vmem:[#allocation34_spill] sm:$0xff] %v6306_v24  ;;  %2875 = vmatmul.bf16.gmra.mxu3 %v1655_v40  ;;  %v2667_v30 = vpop.f32.mrf.mxu2  ;;  %v1327_v40 = vcvt.s32.f32 %v815_v61 }
 0x1ef   : > { %v2668_v62 = vadd.f32 %v2667_v30, %v2499_v27  ;;  %3978 = vperm.xlu0 %5572, %v3672_v9   ;;  %v1662_v27 = vpack.c.bf16 %v1326_v54, %v1318_v34  ;;  %v1328_v30 = vcvt.s32.f32 %v816_v18 }
 0x1f0   : > { %v2500_v37 = vpop.f32.mrf.mxu1  ;;  %v1663_v11 = vpack.c.bf16 %v1327_v40, %v1319_v10  ;;  %3883 = vperm.xlu2 %5574, %v3653_v31   ;;  %v831_v10 = vunpack.c.1.s8 %v6336_v43  ;;  %v3656_v40 = vld [vmem:[%s6027_s15 + $0x160] sm:$0xff] }
 0x1f1   : > { %v2836_v29 = vpop.f32.mrf.mxu3  ;;  %v2501_v0 = vadd.f32 %v2500_v37, %v5905_v33  ;;  %v6329_v37 = vld [vmem:[%s5656_s17 + $0x2c8] sm:$0xff] }
 0x1f2   : > { %v2837_v38 = vadd.f32 %v2836_v29, %v2668_v62  ;;  %v3007_v49 = vpop.f32.mrf.mxu0  ;;  %v3675_v62 = vld [vmem:[%s6027_s15 + $0x1f8] sm:$0xff]  ;;  %v829_v28 = vunpack.c.1.s8 %v6329_v37 }
 0x1f4   : > { %v6318_v55 = vadd.f32 %v3005_v14, %v2837_v38  ;;  %v1320_v14 = vcvt.s32.f32 %v808_v45  ;;  %v821_v38 = vunpack.c.0.s8 %v6329_v37  ;;  %v6349_v45 = vld [vmem:[%s5656_s17 + $0x2e0] sm:$0xff] }
 0x1f5   : > { %3968 = vperm.xlu1 %5573, %v3670_v46  }
 0x1f6   : > { %7372 = vst [vmem:[#allocation35_spill] sm:$0xff] %v6318_v55  ;;  %v2669_v2 = vpop.f32.mrf.mxu2  ;;  %v1664_v25 = vpack.c.bf16 %v1328_v30, %v1320_v14 }
 0x1f7   : > { %v2670_v17 = vadd.f32 %v2669_v2, %v2501_v0  ;;  %3993 = vperm.xlu0 %5572, %v3675_v62   ;;  %v3673_v0 = vld [vmem:[%s6027_s15 + $0x1e8] sm:$0xff]  ;;  %v4331_v2 = vld [vmem:[%s6342_s21 + $0x10] sm:$0xff]  ;;  %v1343_v62 = vcvt.s32.f32 %v831_v10 }
 0x1f8   : > { %v2503_v47 = vpop.f32.mrf.mxu1  ;;  %3898 = vperm.xlu2 %5574, %v3656_v40   ;;  %v4329_v40 = vld [vmem:[%s6342_s21] sm:$0xff]  ;;  %v5516_v10 = vld [vmem:[%s7332_s1 + $0x188] sm:$0xff] }
 0x1f9   : > { %v2838_v41 = vpop.f32.mrf.mxu3  ;;  %v2504_v19 = vadd.f32 %v2503_v47, %v5913_v3  ;;  %v830_v3 = vunpack.c.1.s8 %v6332_v48  ;;  %v824_v47 = vunpack.c.0.s8 %v6349_v45  ;;  %3280 = vmatpush.bf16.msra.mxu2 %v5516_v10 }
 0x1fa   : > { %v2839_v29 = vadd.f32 %v2838_v41, %v2670_v17  ;;  %v3010_v61 = vpop.f32.mrf.mxu0  ;;  %v1333_v17 = vcvt.s32.f32 %v821_v38  ;;  %v1341_v41 = vcvt.s32.f32 %v829_v28 }
 0x1fb   : > { %2542 = vmatmul.bf16.gmra.mxu1 %v1661_v26  ;;  %2711 = vmatmul.bf16.gmra.mxu2 %v1662_v27  ;;  %v1334_v27 = vcvt.s32.f32 %v822_v8  ;;  %v1342_v30 = vcvt.s32.f32 %v830_v3  ;;  %v3659_v3 = vld [vmem:[%s6027_s15 + $0x178] sm:$0xff] }
 0x1fc   : > { %v6326_v33 = vadd.f32 %v3007_v49, %v2839_v29  ;;  %v823_v49 = vunpack.c.0.s8 %v6336_v43 }
 0x1fd   : > { %3049 = vmatmul.bf16.gmra.mxu0 %v1664_v25  ;;  %3983 = vperm.xlu1 %5573, %v3673_v0   ;;  %v1670_v28 = vpack.c.bf16 %v1342_v30, %v1334_v27  ;;  %v4334_v0 = vld [vmem:[%s6342_s21 + $0x28] sm:$0xff]  ;;  %v837_v27 = vunpack.c.2.s8 %v6329_v37  ;;  %v845_v30 = vunpack.c.3.s8 %v6329_v37 }
 0x1fe   : > { %7373 = vst [vmem:[#allocation36_spill] sm:$0xff] %v6326_v33  ;;  %2880 = vmatmul.bf16.gmra.mxu3 %v1663_v11  ;;  %v2672_v9 = vpop.f32.mrf.mxu2  ;;  %v832_v11 = vunpack.c.1.s8 %v6349_v45  ;;  %v1335_v46 = vcvt.s32.f32 %v823_v49  ;;  %v5508_v37 = vld [vmem:[%s7332_s1 + $0x148] sm:$0xff] }
 0x1ff   : > { %v2673_v34 = vadd.f32 %v2672_v9, %v2504_v19  ;;  %4405 = vperm.xlu0 %5572, %v4331_v2   ;;  %v1669_v19 = vpack.c.bf16 %v1341_v41, %v1333_v17  ;;  %3111 = vmatpush.bf16.msra.mxu1 %v5508_v37 }
 0x200   : > { %v2505_v18 = vpop.f32.mrf.mxu1  ;;  %v1344_v8 = vcvt.s32.f32 %v832_v11  ;;  %3913 = vperm.xlu2 %5574, %v3659_v3  }
 0x201   : > { %v2841_v54 = vpop.f32.mrf.mxu3  ;;  %v2506_v29 = vadd.f32 %v2505_v18, %v5924_v42 }
 0x202   : > { %v2842_v26 = vadd.f32 %v2841_v54, %v2673_v34  ;;  %v3012_v31 = vpop.f32.mrf.mxu0  ;;  %v1671_v54 = vpack.c.bf16 %v1343_v62, %v1335_v46  ;;  %v846_v46 = vunpack.c.3.s8 %v6332_v48 }
 0x204   : > { %v6356_v14 = vadd.f32 %v3010_v61, %v2842_v26  ;;  %v1336_v61 = vcvt.s32.f32 %v824_v47  ;;  %v5524_v26 = vld [vmem:[%s7332_s1 + $0x1c8] sm:$0xff]  ;;  %v838_v47 = vunpack.c.2.s8 %v6332_v48 }
 0x205   : > { %4395 = vperm.xlu1 %5573, %v4329_v40   ;;  %3449 = vmatpush.bf16.msra.mxu3 %v5524_v26 }
 0x206   : > { %7374 = vst [vmem:[#allocation37_spill] sm:$0xff] %v6356_v14  ;;  %v2674_v25 = vpop.f32.mrf.mxu2  ;;  %v1672_v42 = vpack.c.bf16 %v1344_v8, %v1336_v61  ;;  %v1357_v61 = vcvt.s32.f32 %v845_v30  ;;  %v1350_v8 = vcvt.s32.f32 %v838_v47 }
 0x207   : > { %v2675_v9 = vadd.f32 %v2674_v25, %v2506_v29  ;;  %4420 = vperm.xlu0 %5572, %v4334_v0   ;;  %v839_v29 = vunpack.c.2.s8 %v6336_v43  ;;  %v3662_v25 = vld [vmem:[%s6027_s15 + $0x190] sm:$0xff] }
 0x208   : > { %v2508_v34 = vpop.f32.mrf.mxu1  ;;  %3928 = vperm.xlu2 %5574, %v3662_v25  }
 0x209   : > { %v2843_v38 = vpop.f32.mrf.mxu3  ;;  %v2509_v17 = vadd.f32 %v2508_v34, %v5933_v58  ;;  %v847_v58 = vunpack.c.3.s8 %v6336_v43  ;;  %v1358_v34 = vcvt.s32.f32 %v846_v46  ;;  %v848_v43 = vunpack.c.3.s8 %v6349_v45 }
 0x20a   : > { %v2844_v2 = vadd.f32 %v2843_v38, %v2675_v9  ;;  %v3015_v18 = vpop.f32.mrf.mxu0  ;;  %v4337_v9 = vld [vmem:[%s6342_s21 + $0x40] sm:$0xff]  ;;  %v1351_v40 = vcvt.s32.f32 %v839_v29  ;;  %v6396_v29 = vld [vmem:[%s5656_s17 + $0x308] sm:$0xff] }
 0x20b   : > { %2547 = vmatmul.bf16.gmra.mxu1 %v1669_v19  ;;  %2716 = vmatmul.bf16.gmra.mxu2 %v1670_v28  ;;  %v4332_v19 = vld [vmem:[%s6342_s21 + $0x18] sm:$0xff]  ;;  %v1349_v28 = vcvt.s32.f32 %v837_v27  ;;  %v1359_v0 = vcvt.s32.f32 %v847_v58  ;;  %v1360_v27 = vcvt.s32.f32 %v848_v43  ;;  %v6399_v58 = vld [vmem:[%s5656_s17 + $0x310] sm:$0xff]  ;;  %v853_v37 = vunpack.c.0.s8 %v6396_v29  ;;  %v6410_v43 = vld [vmem:[%s5656_s17 + $0x320] sm:$0xff] }
 0x20c   : > { %v6364_v49 = vadd.f32 %v3012_v31, %v2844_v2 }
 0x20d   : > { %3054 = vmatmul.bf16.gmra.mxu0 %v1672_v42  ;;  %4410 = vperm.xlu1 %5573, %v4332_v19   ;;  %v1677_v10 = vpack.c.bf16 %v1357_v61, %v1349_v28  ;;  %v1679_v47 = vpack.c.bf16 %v1359_v0, %v1351_v40  ;;  %v861_v28 = vunpack.c.1.s8 %v6396_v29  ;;  %v854_v61 = vunpack.c.0.s8 %v6399_v58  ;;  %v3668_v0 = vld [vmem:[%s6027_s15 + $0x1c0] sm:$0xff] }
 0x20e   : > { %7375 = vst [vmem:[#allocation38_spill] sm:$0xff] %v6364_v49  ;;  %2885 = vmatmul.bf16.gmra.mxu3 %v1671_v54  ;;  %v2677_v41 = vpop.f32.mrf.mxu2  ;;  %v840_v54 = vunpack.c.2.s8 %v6349_v45  ;;  %v3665_v45 = vld [vmem:[%s6027_s15 + $0x1a8] sm:$0xff] }
 0x20f   : > { %v2678_v11 = vadd.f32 %v2677_v41, %v2509_v17  ;;  %4435 = vperm.xlu0 %5572, %v4337_v9   ;;  %v6403_v9 = vld [vmem:[%s5656_s17 + $0x318] sm:$0xff] }
 0x210   : > { %v2510_v62 = vpop.f32.mrf.mxu1  ;;  %v1352_v41 = vcvt.s32.f32 %v840_v54  ;;  %3943 = vperm.xlu2 %5574, %v3665_v45   ;;  %v862_v54 = vunpack.c.1.s8 %v6399_v58  ;;  %v863_v40 = vunpack.c.1.s8 %v6403_v9  ;;  %v864_v45 = vunpack.c.1.s8 %v6410_v43 }
 0x211   : > { %v2846_v31 = vpop.f32.mrf.mxu3  ;;  %v2511_v2 = vadd.f32 %v2510_v62, %v5947_v1 }
 0x212   : > { %v2847_v38 = vadd.f32 %v2846_v31, %v2678_v11  ;;  %v3017_v3 = vpop.f32.mrf.mxu0  ;;  %v4335_v11 = vld [vmem:[%s6342_s21 + $0x30] sm:$0xff]  ;;  %v4340_v31 = vld [vmem:[%s6342_s21 + $0x58] sm:$0xff]  ;;  %v1680_v62 = vpack.c.bf16 %v1360_v27, %v1352_v41  ;;  %v1366_v41 = vcvt.s32.f32 %v854_v61 }
 0x214   : > { %v6385_v48 = vadd.f32 %v3015_v18, %v2847_v38  ;;  %v1678_v18 = vpack.c.bf16 %v1358_v34, %v1350_v8 }
 0x215   : > { %4425 = vperm.xlu1 %5573, %v4335_v11  }
 0x216   : > { %7376 = vst [vmem:[#allocation39_spill] sm:$0xff] %v6385_v48  ;;  %v2679_v42 = vpop.f32.mrf.mxu2 }
 0x217   : > { %v2680_v26 = vadd.f32 %v2679_v42, %v2511_v2  ;;  %4450 = vperm.xlu0 %5572, %v4340_v31   ;;  %v4338_v2 = vld [vmem:[%s6342_s21 + $0x48] sm:$0xff]  ;;  %v4343_v42 = vld [vmem:[%s6342_s21 + $0x70] sm:$0xff] }
 0x218   : > { %v2513_v30 = vpop.f32.mrf.mxu1  ;;  %3958 = vperm.xlu2 %5574, %v3668_v0   ;;  %v3671_v0 = vld [vmem:[%s6027_s15 + $0x1d8] sm:$0xff] }
 0x219   : > { %v2848_v17 = vpop.f32.mrf.mxu3  ;;  %v2514_v19 = vadd.f32 %v2513_v30, %v5958_v16  ;;  %v855_v16 = vunpack.c.0.s8 %v6403_v9  ;;  %v1374_v30 = vcvt.s32.f32 %v862_v54 }
 0x21a   : > { %v2849_v46 = vadd.f32 %v2848_v17, %v2680_v26  ;;  %v3020_v25 = vpop.f32.mrf.mxu0  ;;  %v5534_v26 = vld [vmem:[%s7333_s2 + $0x18] sm:$0xff]  ;;  %v1365_v17 = vcvt.s32.f32 %v853_v37 }
 0x21b   : > { %2552 = vmatmul.bf16.gmra.mxu1 %v1677_v10  ;;  %2721 = vmatmul.bf16.gmra.mxu2 %v1678_v18  ;;  %v1373_v18 = vcvt.s32.f32 %v861_v28  ;;  %v1367_v31 = vcvt.s32.f32 %v855_v16 }
 0x21c   : > { %v6393_v1 = vadd.f32 %v3017_v3, %v2849_v46  ;;  %4164 = vmatpush.bf16.msra.mxu0 %v5534_v26  ;;  %v1375_v46 = vcvt.s32.f32 %v863_v40 }
 0x21d   : > { %3059 = vmatmul.bf16.gmra.mxu0 %v1680_v62  ;;  %4440 = vperm.xlu1 %5573, %v4338_v2   ;;  %v4341_v2 = vld [vmem:[%s6342_s21 + $0x60] sm:$0xff] }
 0x21e   : > { %7377 = vst [vmem:[#allocation40_spill] sm:$0xff] %v6393_v1  ;;  %2890 = vmatmul.bf16.gmra.mxu3 %v1679_v47  ;;  %v2682_v38 = vpop.f32.mrf.mxu2  ;;  %v856_v47 = vunpack.c.0.s8 %v6410_v43  ;;  %v1687_v54 = vpack.c.bf16 %v1375_v46, %v1367_v31  ;;  %v871_v31 = vunpack.c.2.s8 %v6403_v9  ;;  %v879_v46 = vunpack.c.3.s8 %v6403_v9 }
 0x21f   : > { %v2683_v8 = vadd.f32 %v2682_v38, %v2514_v19  ;;  %4465 = vperm.xlu0 %5572, %v4343_v42   ;;  %v1685_v38 = vpack.c.bf16 %v1373_v18, %v1365_v17  ;;  %v4346_v42 = vld [vmem:[%s6342_s21 + $0x88] sm:$0xff]  ;;  %v869_v17 = vunpack.c.2.s8 %v6396_v29  ;;  %v877_v18 = vunpack.c.3.s8 %v6396_v29 }
 0x220   : > { %v2515_v3 = vpop.f32.mrf.mxu1  ;;  %v1368_v61 = vcvt.s32.f32 %v856_v47  ;;  %3973 = vperm.xlu2 %5574, %v3671_v0  }
 0x221   : > { %v2851_v34 = vpop.f32.mrf.mxu3  ;;  %v2516_v62 = vadd.f32 %v2515_v3, %v5969_v6  ;;  %v1389_v29 = vcvt.s32.f32 %v877_v18 }
 0x222   : > { %v2852_v10 = vadd.f32 %v2851_v34, %v2683_v8  ;;  %v3022_v11 = vpop.f32.mrf.mxu0  ;;  %v1376_v8 = vcvt.s32.f32 %v864_v45  ;;  %v878_v45 = vunpack.c.3.s8 %v6399_v58 }
 0x224   : > { %v6420_v27 = vadd.f32 %v3020_v25, %v2852_v10  ;;  %v1686_v25 = vpack.c.bf16 %v1374_v30, %v1366_v41  ;;  %v1688_v6 = vpack.c.bf16 %v1376_v8, %v1368_v61  ;;  %v870_v41 = vunpack.c.2.s8 %v6399_v58 }
 0x225   : > { %4455 = vperm.xlu1 %5573, %v4341_v2   ;;  %v1390_v61 = vcvt.s32.f32 %v878_v45  ;;  %v872_v58 = vunpack.c.2.s8 %v6410_v43  ;;  %v880_v8 = vunpack.c.3.s8 %v6410_v43  ;;  %v4347_v43 = vld [vmem:[%s6342_s21 + $0x90] sm:$0xff] }
 0x226   : > { %7378 = vst [vmem:[#allocation41_spill] sm:$0xff] %v6420_v27  ;;  %v2684_v19 = vpop.f32.mrf.mxu2 }
 0x227   : > { %v2685_v37 = vadd.f32 %v2684_v19, %v2516_v62  ;;  %4480 = vperm.xlu0 %5572, %v4346_v42   ;;  %v3674_v62 = vld [vmem:[%s6027_s15 + $0x1f0] sm:$0xff]  ;;  %v4344_v19 = vld [vmem:[%s6342_s21 + $0x78] sm:$0xff]  ;;  %s5175_s15 = sshll.u32 %s7548_s25, 3 }
 0x228   : > { %v2518_v34 = vpop.f32.mrf.mxu1  ;;  %3988 = vperm.xlu2 %5574, %v3674_v62   ;;  %s339_s12 = scalar_lea.vmem %s7338_s7, %s5175_s15 }
 0x229   : > { %v2853_v28 = vpop.f32.mrf.mxu3  ;;  %v2519_v40 = vadd.f32 %v2518_v34, %v5820_v53  ;;  %v4349_v53 = vld [vmem:[%s6342_s21 + $0xa0] sm:$0xff]  ;;  %v1383_v34 = vcvt.s32.f32 %v871_v31  ;;  %v6454_v31 = vld [vmem:[%s5656_s17 + $0x350] sm:$0xff] }
 0x22a   : > { %v2854_v10 = vadd.f32 %v2853_v28, %v2685_v37  ;;  %v3025_v3 = vpop.f32.mrf.mxu0  ;;  %v1381_v37 = vcvt.s32.f32 %v869_v17  ;;  %v1382_v28 = vcvt.s32.f32 %v870_v41  ;;  %v4330_v41 = vld [vmem:[%s6342_s21 + $0x8] sm:$0xff] }
 0x22b   : > { %2557 = vmatmul.bf16.gmra.mxu1 %v1685_v38  ;;  %2726 = vmatmul.bf16.gmra.mxu2 %v1686_v25 }
 0x22c   : > { %v6428_v16 = vadd.f32 %v3022_v11, %v2854_v10  ;;  %v1693_v42 = vpack.c.bf16 %v1389_v29, %v1381_v37  ;;  %v886_v29 = vunpack.c.0.s8 %v6454_v31 }
 0x22d   : > { %3064 = vmatmul.bf16.gmra.mxu0 %v1688_v6  ;;  %4470 = vperm.xlu1 %5573, %v4344_v19   ;;  %v6458_v19 = vld [vmem:[%s5656_s17 + $0x358] sm:$0xff] }
 0x22e   : > { %7379 = vst [vmem:[#allocation42_spill] sm:$0xff] %v6428_v16  ;;  %2895 = vmatmul.bf16.gmra.mxu3 %v1687_v54  ;;  %v2687_v26 = vpop.f32.mrf.mxu2  ;;  %v1391_v54 = vcvt.s32.f32 %v879_v46 }
 0x22f   : > { %v2688_v30 = vadd.f32 %v2687_v26, %v2519_v40  ;;  %4495 = vperm.xlu0 %5572, %v4349_v53   ;;  %v1694_v40 = vpack.c.bf16 %v1390_v61, %v1382_v28  ;;  %v1392_v26 = vcvt.s32.f32 %v880_v8  ;;  %v6465_v8 = vld [vmem:[%s5656_s17 + $0x360] sm:$0xff] }
 0x230   : > { %v2520_v11 = vpop.f32.mrf.mxu1  ;;  %v1695_v18 = vpack.c.bf16 %v1391_v54, %v1383_v34  ;;  %4400 = vperm.xlu2 %5574, %v4330_v41   ;;  %v895_v34 = vunpack.c.1.s8 %v6458_v19  ;;  %v4333_v54 = vld [vmem:[%s6342_s21 + $0x20] sm:$0xff] }
 0x231   : > { %v2856_v47 = vpop.f32.mrf.mxu3  ;;  %v2521_v0 = vadd.f32 %v2520_v11, %v5828_v7  ;;  %v6451_v11 = vld [vmem:[%s5656_s17 + $0x348] sm:$0xff] }
 0x232   : > { %v2857_v38 = vadd.f32 %v2856_v47, %v2688_v30  ;;  %v3027_v9 = vpop.f32.mrf.mxu0  ;;  %v4352_v30 = vld [vmem:[%s6342_s21 + $0xb8] sm:$0xff]  ;;  %v893_v37 = vunpack.c.1.s8 %v6451_v11 }
 0x234   : > { %v6440_v25 = vadd.f32 %v3025_v3, %v2857_v38  ;;  %v1384_v3 = vcvt.s32.f32 %v872_v58  ;;  %v885_v38 = vunpack.c.0.s8 %v6451_v11  ;;  %v894_v58 = vunpack.c.1.s8 %v6454_v31 }
 0x235   : > { %4485 = vperm.xlu1 %5573, %v4347_v43  }
 0x236   : > { %7380 = vst [vmem:[#allocation43_spill] sm:$0xff] %v6440_v25  ;;  %v2689_v2 = vpop.f32.mrf.mxu2  ;;  %v1696_v45 = vpack.c.bf16 %v1392_v26, %v1384_v3  ;;  %v1406_v26 = vcvt.s32.f32 %v894_v58  ;;  %v4336_v58 = vld [vmem:[%s6342_s21 + $0x38] sm:$0xff] }
 0x237   : > { %v2690_v10 = vadd.f32 %v2689_v2, %v2521_v0  ;;  %4510 = vperm.xlu0 %5572, %v4352_v30   ;;  %v4350_v0 = vld [vmem:[%s6342_s21 + $0xa8] sm:$0xff]  ;;  %v4355_v2 = vld [vmem:[%s6342_s21 + $0xd0] sm:$0xff]  ;;  %v1407_v30 = vcvt.s32.f32 %v895_v34  ;;  %v5515_v34 = vld [vmem:[%s7332_s1 + $0x180] sm:$0xff] }
 0x238   : > { %v2523_v17 = vpop.f32.mrf.mxu1  ;;  %4415 = vperm.xlu2 %5574, %v4333_v54   ;;  %v4353_v54 = vld [vmem:[%s6342_s21 + $0xc0] sm:$0xff]  ;;  %3281 = vmatpush.bf16.msra.mxu2 %v5515_v34  ;;  %v7386_v34 = vld [vmem:[#allocation8_spill] sm:$0xff] }
 0x239   : > { %v2858_v6 = vpop.f32.mrf.mxu3  ;;  %v2524_v62 = vadd.f32 %v2523_v17, %v5839_v20  ;;  %v887_v20 = vunpack.c.0.s8 %v6458_v19  ;;  %v888_v17 = vunpack.c.0.s8 %v6465_v8 }
 0x23a   : > { %v2859_v47 = vadd.f32 %v2858_v6, %v2690_v10  ;;  %v3030_v46 = vpop.f32.mrf.mxu0  ;;  %v1397_v10 = vcvt.s32.f32 %v885_v38  ;;  %v1405_v6 = vcvt.s32.f32 %v893_v37 }
 0x23b   : > { %2562 = vmatmul.bf16.gmra.mxu1 %v1693_v42  ;;  %2731 = vmatmul.bf16.gmra.mxu2 %v1694_v40  ;;  %v1398_v40 = vcvt.s32.f32 %v886_v29  ;;  %v1399_v43 = vcvt.s32.f32 %v887_v20 }
 0x23c   : > { %v6448_v7 = vadd.f32 %v3027_v9, %v2859_v47 }
 0x23d   : > { %3069 = vmatmul.bf16.gmra.mxu0 %v1696_v45  ;;  %4500 = vperm.xlu1 %5573, %v4350_v0   ;;  %v1702_v37 = vpack.c.bf16 %v1406_v26, %v1398_v40  ;;  %v4358_v0 = vld [vmem:[%s6342_s21 + $0xe8] sm:$0xff]  ;;  %v901_v26 = vunpack.c.2.s8 %v6451_v11 }
 0x23e   : > { %7381 = vst [vmem:[#allocation44_spill] sm:$0xff] %v6448_v7  ;;  %2900 = vmatmul.bf16.gmra.mxu3 %v1695_v18  ;;  %v2692_v53 = vpop.f32.mrf.mxu2  ;;  %v896_v18 = vunpack.c.1.s8 %v6465_v8 }
 0x23f   : > { %v2693_v28 = vadd.f32 %v2692_v53, %v2524_v62  ;;  %4525 = vperm.xlu0 %5572, %v4355_v2   ;;  %v1701_v62 = vpack.c.bf16 %v1405_v6, %v1397_v10  ;;  %v7384_v10 = vld [vmem:[#allocation6_spill] sm:$0xff] }
 0x240   : > { %v2525_v9 = vpop.f32.mrf.mxu1  ;;  %v1408_v29 = vcvt.s32.f32 %v896_v18  ;;  %4430 = vperm.xlu2 %5574, %v4336_v58   ;;  %v902_v18 = vunpack.c.2.s8 %v6454_v31 }
 0x241   : > { %v2861_v61 = vpop.f32.mrf.mxu3  ;;  %v2526_v47 = vadd.f32 %v2525_v9, %v5848_v39 }
 0x242   : > { %v2862_v42 = vadd.f32 %v2861_v61, %v2693_v28  ;;  %v3032_v41 = vpop.f32.mrf.mxu0  ;;  %v1703_v61 = vpack.c.bf16 %v1407_v30, %v1399_v43  ;;  %v910_v30 = vunpack.c.3.s8 %v6454_v31 }
 0x244   : > { %v6472_v3 = vadd.f32 %v3030_v46, %v2862_v42  ;;  %v1400_v46 = vcvt.s32.f32 %v888_v17  ;;  %v5523_v42 = vld [vmem:[%s7332_s1 + $0x1c0] sm:$0xff]  ;;  %v909_v17 = vunpack.c.3.s8 %v6451_v11  ;;  %v1422_v58 = vcvt.s32.f32 %v910_v30  ;;  %v4359_v30 = vld [vmem:[%s6342_s21 + $0xf0] sm:$0xff] }
 0x245   : > { %4515 = vperm.xlu1 %5573, %v4353_v54   ;;  %3450 = vmatpush.bf16.msra.mxu3 %v5523_v42  ;;  %v5507_v11 = vld [vmem:[%s7332_s1 + $0x140] sm:$0xff]  ;;  %v904_v54 = vunpack.c.2.s8 %v6465_v8 }
 0x246   : > { %7382 = vst [vmem:[#allocation45_spill] sm:$0xff] %v6472_v3  ;;  %v2694_v45 = vpop.f32.mrf.mxu2  ;;  %v1704_v39 = vpack.c.bf16 %v1408_v29, %v1400_v46  ;;  %v1413_v29 = vcvt.s32.f32 %v901_v26  ;;  %3112 = vmatpush.bf16.msra.mxu1 %v5507_v11  ;;  %v7388_v11 = vld [vmem:[#allocation10_spill] sm:$0xff] }
 0x247   : > { %v2695_v53 = vadd.f32 %v2694_v45, %v2526_v47  ;;  %4540 = vperm.xlu0 %5572, %v4358_v0   ;;  %v903_v45 = vunpack.c.2.s8 %v6458_v19 }
 0x248   : > { %v2528_v28 = vpop.f32.mrf.mxu1 }
 0x249   : > { %v2863_v38 = vpop.f32.mrf.mxu3  ;;  %v2529_v6 = vadd.f32 %v2528_v28, %v7384_v10  ;;  %v1421_v28 = vcvt.s32.f32 %v909_v17  ;;  %v1416_v17 = vcvt.s32.f32 %v904_v54 }
 0x24a   : > { %v2864_v2 = vadd.f32 %v2863_v38, %v2695_v53  ;;  %v3035_v9 = vpop.f32.mrf.mxu0  ;;  %v4339_v53 = vld [vmem:[%s6342_s21 + $0x50] sm:$0xff]  ;;  %v4356_v38 = vld [vmem:[%s6342_s21 + $0xd8] sm:$0xff] }
 0x24b   : > { %2567 = vmatmul.bf16.gmra.mxu1 %v1701_v62  ;;  %2736 = vmatmul.bf16.gmra.mxu2 %v1702_v37  ;;  %v911_v62 = vunpack.c.3.s8 %v6458_v19  ;;  %v4361_v37 = vld [vmem:[%s6342_s21 + $0x100] sm:$0xff]  ;;  %v912_v19 = vunpack.c.3.s8 %v6465_v8  ;;  %v4342_v8 = vld [vmem:[%s6342_s21 + $0x68] sm:$0xff] }
 0x24c   : > { %v6480_v20 = vadd.f32 %v3032_v41, %v2864_v2  ;;  %4445 = vperm.xlu2 %5574, %v4339_v53   ;;  %v1415_v2 = vcvt.s32.f32 %v903_v45  ;;  %v4364_v53 = vld [vmem:[%s6342_s21 + $0x118] sm:$0xff] }
 0x24d   : > { %3074 = vmatmul.bf16.gmra.mxu0 %v1704_v39  ;;  %4530 = vperm.xlu1 %5573, %v4356_v38   ;;  %v1423_v39 = vcvt.s32.f32 %v911_v62  ;;  %v6512_v62 = vld [vmem:[%s5656_s17 + $0x388] sm:$0xff] }
 0x24e   : > { %7383 = vst [vmem:[#allocation46_spill] sm:$0xff] %v6480_v20  ;;  %2905 = vmatmul.bf16.gmra.mxu3 %v1703_v61  ;;  %v2697_v40 = vpop.f32.mrf.mxu2  ;;  %v1414_v61 = vcvt.s32.f32 %v902_v18  ;;  %v1424_v18 = vcvt.s32.f32 %v912_v19  ;;  %v925_v54 = vunpack.c.1.s8 %v6512_v62 }
 0x24f   : > { %v2698_v41 = vadd.f32 %v2697_v40, %v2529_v6  ;;  %4555 = vperm.xlu0 %5572, %v4361_v37   ;;  %v1709_v6 = vpack.c.bf16 %v1421_v28, %v1413_v29  ;;  %v6515_v37 = vld [vmem:[%s5656_s17 + $0x390] sm:$0xff]  ;;  %v6519_v28 = vld [vmem:[%s5656_s17 + $0x398] sm:$0xff] }
 0x250   : > { %v2530_v47 = vpop.f32.mrf.mxu1  ;;  %v1712_v45 = vpack.c.bf16 %v1424_v18, %v1416_v17  ;;  %v918_v19 = vunpack.c.0.s8 %v6515_v37  ;;  %v5533_v18 = vld [vmem:[%s7333_s2 + $0x10] sm:$0xff] }
 0x251   : > { %v2866_v43 = vpop.f32.mrf.mxu3  ;;  %v2531_v42 = vadd.f32 %v2530_v47, %v7386_v34  ;;  %v6526_v34 = vld [vmem:[%s5656_s17 + $0x3a0] sm:$0xff]  ;;  %4165 = vmatpush.bf16.msra.mxu0 %v5533_v18 }
 0x252   : > { %v2867_v46 = vadd.f32 %v2866_v43, %v2698_v41  ;;  %v3037_v0 = vpop.f32.mrf.mxu0  ;;  %v1711_v43 = vpack.c.bf16 %v1423_v39, %v1415_v2  ;;  %v926_v39 = vunpack.c.1.s8 %v6515_v37  ;;  %v7392_v18 = vld [vmem:[#allocation14_spill] sm:$0xff] }
 0x254   : > { %v6501_v31 = vadd.f32 %v3035_v9, %v2867_v46  ;;  %v1710_v9 = vpack.c.bf16 %v1422_v58, %v1414_v61  ;;  %4460 = vperm.xlu2 %5574, %v4342_v8   ;;  %v917_v58 = vunpack.c.0.s8 %v6512_v62  ;;  %v1430_v8 = vcvt.s32.f32 %v918_v19 }
 0x255   : > { %4545 = vperm.xlu1 %5573, %v4359_v30  }
 0x256   : > { %7385 = vst [vmem:[#allocation6_spill] sm:$0xff] %v6501_v31  ;;  %v2699_v10 = vpop.f32.mrf.mxu2  ;;  %v4370_v31 = vld [vmem:[%s6342_s21 + $0x148] sm:$0xff] }
 0x257   : > { %v2700_v40 = vadd.f32 %v2699_v10, %v2531_v42  ;;  %4570 = vperm.xlu0 %5572, %v4364_v53   ;;  %v919_v10 = vunpack.c.0.s8 %v6519_v28  ;;  %v1438_v53 = vcvt.s32.f32 %v926_v39 }
 0x258   : > { %v2533_v41 = vpop.f32.mrf.mxu1 }
 0x259   : > { %v2868_v26 = vpop.f32.mrf.mxu3  ;;  %v2534_v29 = vadd.f32 %v2533_v41, %v7388_v11  ;;  %v1429_v41 = vcvt.s32.f32 %v917_v58 }
 0x25a   : > { %v2869_v38 = vadd.f32 %v2868_v26, %v2700_v40  ;;  %v3040_v46 = vpop.f32.mrf.mxu0  ;;  %v4345_v40 = vld [vmem:[%s6342_s21 + $0x80] sm:$0xff]  ;;  %v4362_v26 = vld [vmem:[%s6342_s21 + $0x108] sm:$0xff] }
 0x25b   : > { %2572 = vmatmul.bf16.gmra.mxu1 %v1709_v6  ;;  %2741 = vmatmul.bf16.gmra.mxu2 %v1710_v9  ;;  %v927_v6 = vunpack.c.1.s8 %v6519_v28  ;;  %v4367_v9 = vld [vmem:[%s6342_s21 + $0x130] sm:$0xff] }
 0x25c   : > { %v6509_v47 = vadd.f32 %v3037_v0, %v2869_v38  ;;  %4475 = vperm.xlu2 %5574, %v4345_v40   ;;  %v920_v38 = vunpack.c.0.s8 %v6526_v34 }
 0x25d   : > { %3079 = vmatmul.bf16.gmra.mxu0 %v1712_v45  ;;  %4560 = vperm.xlu1 %5573, %v4362_v26   ;;  %v928_v45 = vunpack.c.1.s8 %v6526_v34 }
 0x25e   : > { %7387 = vst [vmem:[#allocation8_spill] sm:$0xff] %v6509_v47  ;;  %2910 = vmatmul.bf16.gmra.mxu3 %v1711_v43  ;;  %v2702_v61 = vpop.f32.mrf.mxu2  ;;  %v1437_v43 = vcvt.s32.f32 %v925_v54  ;;  %v1432_v26 = vcvt.s32.f32 %v920_v38  ;;  %v4365_v47 = vld [vmem:[%s6342_s21 + $0x120] sm:$0xff] }
 0x25f   : > { %v2703_v0 = vadd.f32 %v2702_v61, %v2534_v29  ;;  %4585 = vperm.xlu0 %5572, %v4367_v9   ;;  %v1431_v29 = vcvt.s32.f32 %v919_v10  ;;  %v1439_v61 = vcvt.s32.f32 %v927_v6  ;;  %v1440_v39 = vcvt.s32.f32 %v928_v45 }
 0x260   : > { %v2535_v42 = vpop.f32.mrf.mxu1  ;;  %v1717_v54 = vpack.c.bf16 %v1437_v43, %v1429_v41  ;;  %v935_v45 = vunpack.c.2.s8 %v6519_v28 }
 0x261   : > { %v2871_v2 = vpop.f32.mrf.mxu3 }
 0x262   : > { %v2872_v17 = vadd.f32 %v2871_v2, %v2703_v0  ;;  %v3042_v11 = vpop.f32.mrf.mxu0  ;;  %v7390_v0 = vld [vmem:[#allocation12_spill] sm:$0xff] }
 0x263   : > { %v2536_v2 = vadd.f32 %v2535_v42, %v7390_v0  ;;  %v1720_v42 = vpack.c.bf16 %v1440_v39, %v1432_v26  ;;  %v4373_v0 = vld [vmem:[%s6342_s21 + $0x160] sm:$0xff]  ;;  %v1447_v26 = vcvt.s32.f32 %v935_v45  ;;  %v6569_v45 = vld [vmem:[%s5656_s17 + $0x3c8] sm:$0xff] }
 0x264   : > { %v6536_v30 = vadd.f32 %v3040_v46, %v2872_v17  ;;  %v1718_v46 = vpack.c.bf16 %v1438_v53, %v1430_v8  ;;  %v1719_v17 = vpack.c.bf16 %v1439_v61, %v1431_v29  ;;  %v933_v8 = vunpack.c.2.s8 %v6512_v62  ;;  %v4351_v29 = vld [vmem:[%s6342_s21 + $0xb0] sm:$0xff]  ;;  %v4368_v61 = vld [vmem:[%s6342_s21 + $0x138] sm:$0xff] }
 0x265   : > { %4575 = vperm.xlu1 %5573, %v4365_v47   ;;  %v941_v53 = vunpack.c.3.s8 %v6512_v62  ;;  %v934_v47 = vunpack.c.2.s8 %v6515_v37 }
 0x266   : > { %7389 = vst [vmem:[#allocation10_spill] sm:$0xff] %v6536_v30  ;;  %v2704_v58 = vpop.f32.mrf.mxu2  ;;  %v4348_v30 = vld [vmem:[%s6342_s21 + $0x98] sm:$0xff] }
 0x267   : > { %v2705_v19 = vadd.f32 %v2704_v58, %v2536_v2  ;;  %4490 = vperm.xlu2 %5574, %v4348_v30   ;;  %4600 = vperm.xlu0 %5572, %v4370_v31   ;;  %v942_v30 = vunpack.c.3.s8 %v6515_v37  ;;  %v1445_v58 = vcvt.s32.f32 %v933_v8  ;;  %v1453_v62 = vcvt.s32.f32 %v941_v53 }
 0x268   : > { %v2538_v9 = vpop.f32.mrf.mxu1  ;;  %v936_v37 = vunpack.c.2.s8 %v6526_v34 }
 0x269   : > { %v2873_v40 = vpop.f32.mrf.mxu3  ;;  %v2539_v41 = vadd.f32 %v2538_v9, %v7392_v18  ;;  %v7395_v9 = vld [vmem:[#allocation16_spill] sm:$0xff]  ;;  %v1725_v18 = vpack.c.bf16 %v1453_v62, %v1445_v58  ;;  %v6576_v58 = vld [vmem:[%s5656_s17 + $0x3d8] sm:$0xff] }
 0x26a   : > { %v2874_v20 = vadd.f32 %v2873_v40, %v2705_v19  ;;  %v3045_v6 = vpop.f32.mrf.mxu0  ;;  %v1454_v40 = vcvt.s32.f32 %v942_v30  ;;  %v1448_v8 = vcvt.s32.f32 %v936_v37  ;;  %v4376_v30 = vld [vmem:[%s6342_s21 + $0x178] sm:$0xff] }
 0x26b   : > { %2577 = vmatmul.bf16.gmra.mxu1 %v1717_v54  ;;  %2746 = vmatmul.bf16.gmra.mxu2 %v1718_v46  ;;  %v1446_v54 = vcvt.s32.f32 %v934_v47  ;;  %v944_v46 = vunpack.c.3.s8 %v6526_v34  ;;  %v4354_v34 = vld [vmem:[%s6342_s21 + $0xc8] sm:$0xff] }
 0x26c   : > { %v6544_v10 = vadd.f32 %v3042_v11, %v2874_v20  ;;  %v943_v11 = vunpack.c.3.s8 %v6519_v28 }
 0x26d   : > { %3084 = vmatmul.bf16.gmra.mxu0 %v1720_v42  ;;  %4590 = vperm.xlu1 %5573, %v4368_v61   ;;  %v1456_v53 = vcvt.s32.f32 %v944_v46 }
 0x26e   : > { %7391 = vst [vmem:[#allocation12_spill] sm:$0xff] %v6544_v10  ;;  %2915 = vmatmul.bf16.gmra.mxu3 %v1719_v17  ;;  %v2707_v43 = vpop.f32.mrf.mxu2  ;;  %v1455_v39 = vcvt.s32.f32 %v943_v11  ;;  %v6572_v11 = vld [vmem:[%s5656_s17 + $0x3d0] sm:$0xff] }
 0x26f   : > { %v2708_v31 = vadd.f32 %v2707_v43, %v2539_v41  ;;  %4505 = vperm.xlu2 %5574, %v4351_v29   ;;  %4615 = vperm.xlu0 %5572, %v4373_v0   ;;  %v7397_v0 = vld [vmem:[#allocation18_spill] sm:$0xff]  ;;  %v950_v37 = vunpack.c.0.s8 %v6572_v11 }
 0x270   : > { %v2540_v38 = vpop.f32.mrf.mxu1 }
 0x271   : > { %v2876_v20 = vpop.f32.mrf.mxu3  ;;  %v2541_v17 = vadd.f32 %v2540_v38, %v7395_v9  ;;  %v1728_v38 = vpack.c.bf16 %v1456_v53, %v1448_v8  ;;  %v6583_v9 = vld [vmem:[%s5656_s17 + $0x3e0] sm:$0xff] }
 0x272   : > { %v2877_v2 = vadd.f32 %v2876_v20, %v2708_v31  ;;  %v6560_v28 = vpop.f32.mrf.mxu0  ;;  %v1727_v31 = vpack.c.bf16 %v1455_v39, %v1447_v26  ;;  %v4371_v20 = vld [vmem:[%s6342_s21 + $0x150] sm:$0xff]  ;;  %v958_v39 = vunpack.c.1.s8 %v6572_v11 }
 0x273   : > { %7394 = vst [vmem:[#allocation47_spill] sm:$0xff] %v6560_v28  ;;  %v4377_v28 = vld [vmem:[%s6342_s21 + $0x180] sm:$0xff] }
 0x274   : > { %v6556_v19 = vadd.f32 %v3045_v6, %v2877_v2  ;;  %v1726_v6 = vpack.c.bf16 %v1454_v40, %v1446_v54  ;;  %v949_v54 = vunpack.c.0.s8 %v6569_v45  ;;  %v957_v40 = vunpack.c.1.s8 %v6569_v45 }
 0x275   : > { %4605 = vperm.xlu1 %5573, %v4371_v20   ;;  %v1470_v20 = vcvt.s32.f32 %v958_v39 }
 0x276   : > { %7393 = vst [vmem:[#allocation14_spill] sm:$0xff] %v6556_v19  ;;  %v2709_v42 = vpop.f32.mrf.mxu2  ;;  %v1461_v53 = vcvt.s32.f32 %v949_v54 }
 0x277   : > { %v2710_v41 = vadd.f32 %v2709_v42, %v2541_v17  ;;  %4520 = vperm.xlu2 %5574, %v4354_v34   ;;  %4630 = vperm.xlu0 %5572, %v4376_v30   ;;  %v951_v42 = vunpack.c.0.s8 %v6576_v58  ;;  %v952_v30 = vunpack.c.0.s8 %v6583_v9 }
 0x278   : > { %v2543_v47 = vpop.f32.mrf.mxu1 }
 0x279   : > { %v2878_v43 = vpop.f32.mrf.mxu3  ;;  %v2544_v2 = vadd.f32 %v2543_v47, %v7397_v0  ;;  %v1469_v47 = vcvt.s32.f32 %v957_v40 }
 0x27a   : > { %v6566_v29 = vadd.f32 %v2878_v43, %v2710_v41  ;;  %v3050_v61 = vpop.f32.mrf.mxu0  ;;  %v4357_v41 = vld [vmem:[%s6342_s21 + $0xe0] sm:$0xff]  ;;  %v4374_v43 = vld [vmem:[%s6342_s21 + $0x168] sm:$0xff] }
 0x27b   : > { %2582 = vmatmul.bf16.gmra.mxu1 %v1725_v18  ;;  %2751 = vmatmul.bf16.gmra.mxu2 %v1726_v6  ;;  %v959_v18 = vunpack.c.1.s8 %v6576_v58  ;;  %v4379_v6 = vld [vmem:[%s6342_s21 + $0x190] sm:$0xff]  ;;  %v1733_v40 = vpack.c.bf16 %v1469_v47, %v1461_v53 }
 0x27c   : > { %7396 = vst [vmem:[#allocation16_spill] sm:$0xff] %v6566_v29  ;;  %v4382_v29 = vld [vmem:[%s6342_s21 + $0x1a8] sm:$0xff] }
 0x27d   : > { %3089 = vmatmul.bf16.gmra.mxu0 %v1728_v38  ;;  %4620 = vperm.xlu1 %5573, %v4374_v43   ;;  %v960_v38 = vunpack.c.1.s8 %v6583_v9  ;;  %v1464_v43 = vcvt.s32.f32 %v952_v30  ;;  %v966_v30 = vunpack.c.2.s8 %v6572_v11 }
 0x27e   : > { %2920 = vmatmul.bf16.gmra.mxu3 %v1727_v31  ;;  %v2712_v62 = vpop.f32.mrf.mxu2  ;;  %v1462_v31 = vcvt.s32.f32 %v950_v37 }
 0x27f   : > { %v2713_v46 = vadd.f32 %v2712_v62, %v2544_v2  ;;  %4535 = vperm.xlu2 %5574, %v4357_v41   ;;  %4645 = vperm.xlu0 %5572, %v4379_v6   ;;  %v1463_v2 = vcvt.s32.f32 %v951_v42  ;;  %v1471_v62 = vcvt.s32.f32 %v959_v18  ;;  %v1472_v39 = vcvt.s32.f32 %v960_v38  ;;  %v7402_v18 = vld [vmem:[#allocation22_spill] sm:$0xff] }
 0x280   : > { %v2545_v17 = vpop.f32.mrf.mxu1 }
 0x281   : > { %v2881_v26 = vpop.f32.mrf.mxu3 }
 0x282   : > { %v2882_v8 = vadd.f32 %v2881_v26, %v2713_v46  ;;  %v6594_v0 = vpop.f32.mrf.mxu0  ;;  %v7400_v46 = vld [vmem:[#allocation20_spill] sm:$0xff] }
 0x283   : > { %7399 = vst [vmem:[#allocation48_spill] sm:$0xff] %v6594_v0  ;;  %v2546_v26 = vadd.f32 %v2545_v17, %v7400_v46  ;;  %v1736_v17 = vpack.c.bf16 %v1472_v39, %v1464_v43  ;;  %v4363_v46 = vld [vmem:[%s6342_s21 + $0x110] sm:$0xff]  ;;  %v976_v39 = vunpack.c.3.s8 %v6583_v9 }
 0x284   : > { %v6590_v34 = vadd.f32 %v3050_v61, %v2882_v8  ;;  %v1734_v61 = vpack.c.bf16 %v1470_v20, %v1462_v31  ;;  %v1735_v8 = vpack.c.bf16 %v1471_v62, %v1463_v2  ;;  %v965_v31 = vunpack.c.2.s8 %v6569_v45 }
 0x285   : > { %4635 = vperm.xlu1 %5573, %v4377_v28   ;;  %v973_v20 = vunpack.c.3.s8 %v6569_v45  ;;  %v967_v2 = vunpack.c.2.s8 %v6576_v58  ;;  %v975_v62 = vunpack.c.3.s8 %v6576_v58 }
 0x286   : > { %7398 = vst [vmem:[#allocation18_spill] sm:$0xff] %v6590_v34  ;;  %v2714_v54 = vpop.f32.mrf.mxu2  ;;  %v4360_v34 = vld [vmem:[%s6342_s21 + $0xf8] sm:$0xff] }
 0x287   : > { %v2715_v37 = vadd.f32 %v2714_v54, %v2546_v26  ;;  %4550 = vperm.xlu2 %5574, %v4360_v34   ;;  %4660 = vperm.xlu0 %5572, %v4382_v29   ;;  %v974_v29 = vunpack.c.3.s8 %v6572_v11  ;;  %v4380_v26 = vld [vmem:[%s6342_s21 + $0x198] sm:$0xff]  ;;  %v4385_v54 = vld [vmem:[%s6342_s21 + $0x1c0] sm:$0xff]  ;;  %v1485_v45 = vcvt.s32.f32 %v973_v20  ;;  %v968_v11 = vunpack.c.2.s8 %v6583_v9  ;;  %v4366_v9 = vld [vmem:[%s6342_s21 + $0x128] sm:$0xff] }
 0x288   : > { %v2548_v6 = vpop.f32.mrf.mxu1 }
 0x289   : > { %v2883_v41 = vpop.f32.mrf.mxu3  ;;  %v2549_v53 = vadd.f32 %v2548_v6, %v7402_v18  ;;  %v1486_v43 = vcvt.s32.f32 %v974_v29  ;;  %v1479_v6 = vcvt.s32.f32 %v967_v2  ;;  %v6625_v2 = vld [vmem:[%s5656_s17 + $0x28] sm:$0xff] }
 0x28a   : > { %v6600_v19 = vadd.f32 %v2883_v41, %v2715_v37  ;;  %v3055_v42 = vpop.f32.mrf.mxu0  ;;  %v1477_v37 = vcvt.s32.f32 %v965_v31  ;;  %v1478_v41 = vcvt.s32.f32 %v966_v30  ;;  %v1480_v30 = vcvt.s32.f32 %v968_v11 }
 0x28b   : > { %2587 = vmatmul.bf16.gmra.mxu1 %v1733_v40  ;;  %2756 = vmatmul.bf16.gmra.mxu2 %v1734_v61  ;;  %v473_v11 = vunpack.c.0.s8 %v6625_v2 }
 0x28c   : > { %7401 = vst [vmem:[#allocation20_spill] sm:$0xff] %v6600_v19 }
 0x28d   : > { %3094 = vmatmul.bf16.gmra.mxu0 %v1736_v17  ;;  %4650 = vperm.xlu1 %5573, %v4380_v26   ;;  %v7405_v17 = vld [vmem:[#allocation24_spill] sm:$0xff]  ;;  %v4388_v26 = vld [vmem:[%s6342_s21 + $0x1d8] sm:$0xff] }
 0x28e   : > { %2925 = vmatmul.bf16.gmra.mxu3 %v1735_v8  ;;  %v2717_v47 = vpop.f32.mrf.mxu2  ;;  %v1487_v8 = vcvt.s32.f32 %v975_v62 }
 0x28f   : > { %v2718_v34 = vadd.f32 %v2717_v47, %v2549_v53  ;;  %4565 = vperm.xlu2 %5574, %v4363_v46   ;;  %4675 = vperm.xlu0 %5572, %v4385_v54   ;;  %v1741_v47 = vpack.c.bf16 %v1485_v45, %v1477_v37  ;;  %v4383_v46 = vld [vmem:[%s6342_s21 + $0x1b0] sm:$0xff]  ;;  %v7407_v37 = vld [vmem:[#allocation26_spill] sm:$0xff] }
 0x290   : > { %v2550_v38 = vpop.f32.mrf.mxu1  ;;  %v1743_v29 = vpack.c.bf16 %v1487_v8, %v1479_v6  ;;  %v481_v8 = vunpack.c.1.s8 %v6625_v2 }
 0x291   : > { %v2886_v28 = vpop.f32.mrf.mxu3  ;;  %v2551_v18 = vadd.f32 %v2550_v38, %v7405_v17 }
 0x292   : > { %v2887_v40 = vadd.f32 %v2886_v28, %v2718_v34  ;;  %v6616_v58 = vpop.f32.mrf.mxu0  ;;  %v1488_v34 = vcvt.s32.f32 %v976_v39 }
 0x293   : > { %7404 = vst [vmem:[#allocation49_spill] sm:$0xff] %v6616_v58 }
 0x294   : > { %v6612_v61 = vadd.f32 %v3055_v42, %v2887_v40  ;;  %v1742_v42 = vpack.c.bf16 %v1486_v43, %v1478_v41  ;;  %v1744_v38 = vpack.c.bf16 %v1488_v34, %v1480_v30  ;;  %v6628_v40 = vld [vmem:[%s5656_s17 + $0x30] sm:$0xff]  ;;  %v6632_v41 = vld [vmem:[%s5656_s17 + $0x38] sm:$0xff] }
 0x295   : > { %4665 = vperm.xlu1 %5573, %v4383_v46   ;;  %v474_v17 = vunpack.c.0.s8 %v6628_v40  ;;  %v4391_v30 = vld [vmem:[%s6342_s21 + $0x1f0] sm:$0xff]  ;;  %v993_v46 = vcvt.s32.f32 %v481_v8 }
 0x296   : > { %7403 = vst [vmem:[#allocation22_spill] sm:$0xff] %v6612_v61  ;;  %v2719_v53 = vpop.f32.mrf.mxu2 }
 0x297   : > { %v2720_v31 = vadd.f32 %v2719_v53, %v2551_v18  ;;  %4580 = vperm.xlu2 %5574, %v4366_v9   ;;  %4690 = vperm.xlu0 %5572, %v4388_v26   ;;  %v482_v18 = vunpack.c.1.s8 %v6628_v40  ;;  %v986_v26 = vcvt.s32.f32 %v474_v17 }
 0x298   : > { %v2553_v28 = vpop.f32.mrf.mxu1 }
 0x299   : > { %v2888_v20 = vpop.f32.mrf.mxu3  ;;  %v2554_v45 = vadd.f32 %v2553_v28, %v7407_v37  ;;  %v5532_v28 = vld [vmem:[%s7333_s2 + $0x8] sm:$0xff] }
 0x29a   : > { %v6622_v54 = vadd.f32 %v2888_v20, %v2720_v31  ;;  %v3060_v62 = vpop.f32.mrf.mxu0  ;;  %v483_v31 = vunpack.c.1.s8 %v6632_v41  ;;  %v4369_v20 = vld [vmem:[%s6342_s21 + $0x140] sm:$0xff]  ;;  %4166 = vmatpush.bf16.msra.mxu0 %v5532_v28 }
 0x29b   : > { %2592 = vmatmul.bf16.gmra.mxu1 %v1741_v47  ;;  %2761 = vmatmul.bf16.gmra.mxu2 %v1742_v42  ;;  %v475_v47 = vunpack.c.0.s8 %v6632_v41  ;;  %v4386_v42 = vld [vmem:[%s6342_s21 + $0x1c8] sm:$0xff] }
 0x29c   : > { %7406 = vst [vmem:[#allocation24_spill] sm:$0xff] %v6622_v54 }
 0x29d   : > { %3099 = vmatmul.bf16.gmra.mxu0 %v1744_v38  ;;  %4680 = vperm.xlu1 %5573, %v4386_v42   ;;  %v994_v38 = vcvt.s32.f32 %v482_v18  ;;  %v7412_v18 = vld [vmem:[#allocation2_spill] sm:$0xff] }
 0x29e   : > { %2930 = vmatmul.bf16.gmra.mxu3 %v1743_v29  ;;  %v2722_v43 = vpop.f32.mrf.mxu2  ;;  %v985_v29 = vcvt.s32.f32 %v473_v11 }
 0x29f   : > { %v2723_v39 = vadd.f32 %v2722_v43, %v2554_v45  ;;  %4595 = vperm.xlu2 %5574, %v4369_v20   ;;  %4705 = vperm.xlu0 %5572, %v4391_v30   ;;  %v987_v45 = vcvt.s32.f32 %v475_v47  ;;  %v995_v43 = vcvt.s32.f32 %v483_v31  ;;  %v1498_v11 = vpack.c.bf16 %v994_v38, %v986_v26 }
 0x2a0   : > { %v2555_v53 = vpop.f32.mrf.mxu1  ;;  %v1497_v42 = vpack.c.bf16 %v993_v46, %v985_v29  ;;  %v489_v47 = vunpack.c.2.s8 %v6625_v2  ;;  %v497_v29 = vunpack.c.3.s8 %v6625_v2  ;;  %v498_v46 = vunpack.c.3.s8 %v6628_v40 }
 0x2a1   : > { %v2891_v6 = vpop.f32.mrf.mxu3  ;;  %v491_v26 = vunpack.c.2.s8 %v6632_v41  ;;  %v499_v38 = vunpack.c.3.s8 %v6632_v41 }
 0x2a2   : > { %v2892_v34 = vadd.f32 %v2891_v6, %v2723_v39  ;;  %v6648_v37 = vpop.f32.mrf.mxu0  ;;  %v7410_v39 = vld [vmem:[#allocation28_spill] sm:$0xff] }
 0x2a3   : > { %7409 = vst [vmem:[#allocation50_spill] sm:$0xff] %v6648_v37  ;;  %v2556_v6 = vadd.f32 %v2555_v53, %v7410_v39 }
 0x2a4   : > { %v6646_v9 = vadd.f32 %v3060_v62, %v2892_v34  ;;  %v1499_v62 = vpack.c.bf16 %v995_v43, %v987_v45  ;;  %v4372_v34 = vld [vmem:[%s6342_s21 + $0x158] sm:$0xff]  ;;  %v4375_v45 = vld [vmem:[%s6342_s21 + $0x170] sm:$0xff] }
 0x2a5   : > { %v4392_v43 = vld [vmem:[%s6342_s21 + $0x1f8] sm:$0xff] }
 0x2a6   : > { %7408 = vst [vmem:[#allocation26_spill] sm:$0xff] %v6646_v9  ;;  %v2724_v58 = vpop.f32.mrf.mxu2  ;;  %v4389_v9 = vld [vmem:[%s6342_s21 + $0x1e0] sm:$0xff] }
 0x2a7   : > { %v2725_v54 = vadd.f32 %v2724_v58, %v2556_v6  ;;  %4610 = vperm.xlu2 %5574, %v4372_v34   ;;  %4695 = vperm.xlu1 %5573, %v4389_v9   ;;  %v1001_v6 = vcvt.s32.f32 %v489_v47  ;;  %v7415_v34 = vld [vmem:[#allocation3_spill] sm:$0xff] }
 0x2a8   : > { %v2558_v30 = vpop.f32.mrf.mxu1 }
 0x2a9   : > { %v2893_v20 = vpop.f32.mrf.mxu3  ;;  %v2559_v53 = vadd.f32 %v2558_v30, %v7412_v18 }
 0x2aa   : > { %v6653_v8 = vadd.f32 %v2893_v20, %v2725_v54  ;;  %v3065_v17 = vpop.f32.mrf.mxu0  ;;  %v490_v54 = vunpack.c.2.s8 %v6628_v40  ;;  %v1003_v40 = vcvt.s32.f32 %v491_v26  ;;  %v7417_v26 = vld [vmem:[#allocation4_spill] sm:$0xff] }
 0x2ab   : > { %3113 = vmatmul.bf16.vlgmr.msra.gmra.mxu1 %v1497_v42  ;;  %3282 = vmatmul.bf16.vlgmr.msra.gmra.mxu2 %v1498_v11  ;;  %v1009_v42 = vcvt.s32.f32 %v497_v29  ;;  %v1010_v11 = vcvt.s32.f32 %v498_v46 }
 0x2ac   : > { %7411 = vst [vmem:[#allocation28_spill] sm:$0xff] %v6653_v8  ;;  %v1002_v2 = vcvt.s32.f32 %v490_v54  ;;  %v353_v54 = vld [vmem:[%s5656_s17 + $0x68] sm:$0xff] }
 0x2ae   : > { %3451 = vmatmul.bf16.vlgmr.msra.gmra.mxu3 %v1499_v62  ;;  %v2727_v58 = vpop.f32.mrf.mxu2  ;;  %v1011_v62 = vcvt.s32.f32 %v499_v38  ;;  %v1506_v47 = vpack.c.bf16 %v1010_v11, %v1002_v2  ;;  %v513_v2 = vunpack.c.1.s8 %v353_v54 }
 0x2af   : > { %v2728_v31 = vadd.f32 %v2727_v58, %v2559_v53  ;;  %4625 = vperm.xlu2 %5574, %v4375_v45   ;;  %4710 = vperm.xlu1 %5573, %v4392_v43   ;;  %v4378_v45 = vld [vmem:[%s6342_s21 + $0x188] sm:$0xff]  ;;  %v355_v43 = vld [vmem:[%s5656_s17 + $0x78] sm:$0xff] }
 0x2b0   : > { %v2560_v9 = vpop.f32.mrf.mxu1 }
 0x2b1   : > { %v2896_v28 = vpop.f32.mrf.mxu3  ;;  %v2561_v18 = vadd.f32 %v2560_v9, %v7415_v34  ;;  %v354_v9 = vld [vmem:[%s5656_s17 + $0x70] sm:$0xff]  ;;  %v505_v34 = vunpack.c.0.s8 %v353_v54 }
 0x2b2   : > { %v2897_v39 = vadd.f32 %v2896_v28, %v2728_v31  ;;  %v6666_v30 = vpop.f32.mrf.mxu0  ;;  %v1505_v31 = vpack.c.bf16 %v1009_v42, %v1001_v6  ;;  %v506_v11 = vunpack.c.0.s8 %v354_v9 }
 0x2b3   : > { %7414 = vst [vmem:[#allocation51_spill] sm:$0xff] %v6666_v30  ;;  %v7420_v30 = vld [vmem:[#allocation5_spill] sm:$0xff] }
 0x2b4   : > { %v6664_v20 = vadd.f32 %v3065_v17, %v2897_v39  ;;  %v1507_v17 = vpack.c.bf16 %v1011_v62, %v1003_v40  ;;  %v514_v40 = vunpack.c.1.s8 %v354_v9 }
 0x2b6   : > { %7413 = vst [vmem:[#allocation2_spill] sm:$0xff] %v6664_v20  ;;  %v2729_v41 = vpop.f32.mrf.mxu2 }
 0x2b7   : > { %v2730_v53 = vadd.f32 %v2729_v41, %v2561_v18  ;;  %4640 = vperm.xlu2 %5574, %v4378_v45   ;;  %v507_v18 = vunpack.c.0.s8 %v355_v43  ;;  %v515_v41 = vunpack.c.1.s8 %v355_v43  ;;  %v1026_v45 = vcvt.s32.f32 %v514_v40 }
 0x2b8   : > { %v2563_v28 = vpop.f32.mrf.mxu1 }
 0x2b9   : > { %v2898_v58 = vpop.f32.mrf.mxu3  ;;  %v2564_v38 = vadd.f32 %v2563_v28, %v7417_v26  ;;  %v1018_v28 = vcvt.s32.f32 %v506_v11 }
 0x2ba   : > { %v6670_v29 = vadd.f32 %v2898_v58, %v2730_v53  ;;  %v3070_v46 = vpop.f32.mrf.mxu0  ;;  %v4381_v53 = vld [vmem:[%s6342_s21 + $0x1a0] sm:$0xff] }
 0x2bb   : > { %3118 = vmatmul.bf16.gmra.mxu1 %v1505_v31  ;;  %3287 = vmatmul.bf16.gmra.mxu2 %v1506_v47  ;;  %v1017_v31 = vcvt.s32.f32 %v505_v34  ;;  %v1514_v0 = vpack.c.bf16 %v1026_v45, %v1018_v28  ;;  %v4384_v34 = vld [vmem:[%s6342_s21 + $0x1b8] sm:$0xff] }
 0x2bc   : > { %7416 = vst [vmem:[#allocation3_spill] sm:$0xff] %v6670_v29 }
 0x2be   : > { %3456 = vmatmul.bf16.gmra.mxu3 %v1507_v17  ;;  %v2732_v39 = vpop.f32.mrf.mxu2  ;;  %v1025_v17 = vcvt.s32.f32 %v513_v2  ;;  %v7422_v2 = vld [vmem:[#allocation7_spill] sm:$0xff] }
 0x2bf   : > { %v2733_v6 = vadd.f32 %v2732_v39, %v2564_v38  ;;  %4655 = vperm.xlu2 %5574, %v4381_v53   ;;  %v1019_v38 = vcvt.s32.f32 %v507_v18  ;;  %v1027_v39 = vcvt.s32.f32 %v515_v41  ;;  %v522_v18 = vunpack.c.2.s8 %v354_v9 }
 0x2c0   : > { %v2565_v62 = vpop.f32.mrf.mxu1  ;;  %v1513_v61 = vpack.c.bf16 %v1025_v17, %v1017_v31  ;;  %v530_v41 = vunpack.c.3.s8 %v354_v9  ;;  %v523_v31 = vunpack.c.2.s8 %v355_v43  ;;  %v531_v17 = vunpack.c.3.s8 %v355_v43 }
 0x2c1   : > { %v2901_v42 = vpop.f32.mrf.mxu3  ;;  %v2566_v29 = vadd.f32 %v2565_v62, %v7420_v30  ;;  %v521_v30 = vunpack.c.2.s8 %v353_v54  ;;  %v1034_v45 = vcvt.s32.f32 %v522_v18 }
 0x2c2   : > { %v2902_v58 = vadd.f32 %v2901_v42, %v2733_v6  ;;  %v6679_v26 = vpop.f32.mrf.mxu0  ;;  %v1515_v42 = vpack.c.bf16 %v1027_v39, %v1019_v38  ;;  %v1042_v38 = vcvt.s32.f32 %v530_v41  ;;  %v362_v41 = vld [vmem:[%s5656_s17 + $0xb0] sm:$0xff] }
 0x2c3   : > { %7419 = vst [vmem:[#allocation52_spill] sm:$0xff] %v6679_v26  ;;  %v1033_v28 = vcvt.s32.f32 %v521_v30 }
 0x2c4   : > { %v6677_v47 = vadd.f32 %v3070_v46, %v2902_v58 }
 0x2c6   : > { %7418 = vst [vmem:[#allocation4_spill] sm:$0xff] %v6677_v47  ;;  %v2734_v20 = vpop.f32.mrf.mxu2 }
 0x2c7   : > { %v2735_v37 = vadd.f32 %v2734_v20, %v2566_v29  ;;  %4670 = vperm.xlu2 %5574, %v4384_v34   ;;  %v529_v29 = vunpack.c.3.s8 %v353_v54  ;;  %v1043_v54 = vcvt.s32.f32 %v531_v17  ;;  %v363_v17 = vld [vmem:[%s5656_s17 + $0xb8] sm:$0xff] }
 0x2c8   : > { %v2568_v6 = vpop.f32.mrf.mxu1 }
 0x2c9   : > { %v2903_v8 = vpop.f32.mrf.mxu3  ;;  %v2569_v11 = vadd.f32 %v2568_v6, %v7422_v2  ;;  %v1035_v6 = vcvt.s32.f32 %v523_v31 }
 0x2ca   : > { %v6683_v53 = vadd.f32 %v2903_v8, %v2735_v37  ;;  %v3075_v46 = vpop.f32.mrf.mxu0  ;;  %v4387_v37 = vld [vmem:[%s6342_s21 + $0x1d0] sm:$0xff] }
 0x2cb   : > { %3123 = vmatmul.bf16.gmra.mxu1 %v1513_v61  ;;  %3292 = vmatmul.bf16.gmra.mxu2 %v1514_v0  ;;  %v1041_v61 = vcvt.s32.f32 %v529_v29  ;;  %v361_v29 = vld [vmem:[%s5656_s17 + $0xa8] sm:$0xff] }
 0x2cc   : > { %7421 = vst [vmem:[#allocation5_spill] sm:$0xff] %v6683_v53 }
 0x2ce   : > { %3461 = vmatmul.bf16.gmra.mxu3 %v1515_v42  ;;  %v2737_v40 = vpop.f32.mrf.mxu2  ;;  %v7425_v42 = vld [vmem:[#allocation9_spill] sm:$0xff] }
 0x2cf   : > { %v2738_v62 = vadd.f32 %v2737_v40, %v2569_v11  ;;  %4685 = vperm.xlu2 %5574, %v4387_v37   ;;  %v1521_v11 = vpack.c.bf16 %v1041_v61, %v1033_v28  ;;  %v1522_v40 = vpack.c.bf16 %v1042_v38, %v1034_v45  ;;  %v545_v61 = vunpack.c.1.s8 %v361_v29 }
 0x2d0   : > { %v2570_v58 = vpop.f32.mrf.mxu1  ;;  %v538_v45 = vunpack.c.0.s8 %v362_v41  ;;  %v546_v38 = vunpack.c.1.s8 %v362_v41 }
 0x2d1   : > { %v2906_v20 = vpop.f32.mrf.mxu3  ;;  %v2571_v9 = vadd.f32 %v2570_v58, %v7425_v42  ;;  %v7427_v58 = vld [vmem:[#allocation11_spill] sm:$0xff] }
 0x2d2   : > { %v2907_v8 = vadd.f32 %v2906_v20, %v2738_v62  ;;  %v6689_v39 = vpop.f32.mrf.mxu0  ;;  %v4390_v62 = vld [vmem:[%s6342_s21 + $0x1e8] sm:$0xff] }
 0x2d3   : > { %7424 = vst [vmem:[#allocation53_spill] sm:$0xff] %v6689_v39 }
 0x2d4   : > { %v6687_v0 = vadd.f32 %v3075_v46, %v2907_v8  ;;  %v1523_v46 = vpack.c.bf16 %v1043_v54, %v1035_v6  ;;  %v537_v8 = vunpack.c.0.s8 %v361_v29  ;;  %v539_v54 = vunpack.c.0.s8 %v363_v17 }
 0x2d6   : > { %7423 = vst [vmem:[#allocation7_spill] sm:$0xff] %v6687_v0  ;;  %v2739_v34 = vpop.f32.mrf.mxu2 }
 0x2d7   : > { %v2740_v43 = vadd.f32 %v2739_v34, %v2571_v9  ;;  %4700 = vperm.xlu2 %5574, %v4390_v62   ;;  %v547_v9 = vunpack.c.1.s8 %v363_v17 }
 0x2d8   : > { %v2573_v30 = vpop.f32.mrf.mxu1 }
 0x2d9   : > { %v2908_v2 = vpop.f32.mrf.mxu3  ;;  %v2574_v31 = vadd.f32 %v2573_v30, %v7427_v58  ;;  %v1050_v30 = vcvt.s32.f32 %v538_v45  ;;  %v1051_v58 = vcvt.s32.f32 %v539_v54  ;;  %v7432_v45 = vld [vmem:[#allocation15_spill] sm:$0xff] }
 0x2da   : > { %v6693_v20 = vadd.f32 %v2908_v2, %v2740_v43  ;;  %v3080_v18 = vpop.f32.mrf.mxu0  ;;  %v5531_v43 = vld [vmem:[%s7333_s2] sm:$0xff]  ;;  %v1049_v2 = vcvt.s32.f32 %v537_v8 }
 0x2db   : > { %3128 = vmatmul.bf16.gmra.mxu1 %v1521_v11  ;;  %3297 = vmatmul.bf16.gmra.mxu2 %v1522_v40  ;;  %v1057_v40 = vcvt.s32.f32 %v545_v61 }
 0x2dc   : > { %7426 = vst [vmem:[#allocation9_spill] sm:$0xff] %v6693_v20  ;;  %4167 = vmatpush.bf16.msra.mxu0 %v5531_v43  ;;  %v562_v43 = vunpack.c.3.s8 %v362_v41 }
 0x2de   : > { %3466 = vmatmul.bf16.gmra.mxu3 %v1523_v46  ;;  %v2742_v37 = vpop.f32.mrf.mxu2  ;;  %v1058_v46 = vcvt.s32.f32 %v546_v38 }
 0x2df   : > { %v2743_v42 = vadd.f32 %v2742_v37, %v2574_v31  ;;  %v1059_v31 = vcvt.s32.f32 %v547_v9  ;;  %v7430_v37 = vld [vmem:[#allocation13_spill] sm:$0xff]  ;;  %v553_v9 = vunpack.c.2.s8 %v361_v29 }
 0x2e0   : > { %v2575_v6 = vpop.f32.mrf.mxu1  ;;  %v1530_v26 = vpack.c.bf16 %v1058_v46, %v1050_v30  ;;  %v563_v30 = vunpack.c.3.s8 %v363_v17  ;;  %v6712_v46 = vpop.permute.xlu0 %3678 }
 0x2e1   : > { %v2911_v28 = vpop.f32.mrf.mxu3  ;;  %v2576_v39 = vadd.f32 %v2575_v6, %v7430_v37  ;;  %v1531_v47 = vpack.c.bf16 %v1059_v31, %v1051_v58  ;;  %v1074_v37 = vcvt.s32.f32 %v562_v43  ;;  %v369_v43 = vld [vmem:[%s5656_s17 + $0xe8] sm:$0xff] }
 0x2e2   : > { %v2912_v34 = vadd.f32 %v2911_v28, %v2743_v42  ;;  %v6704_v62 = vpop.f32.mrf.mxu0  ;;  %v1529_v28 = vpack.c.bf16 %v1057_v40, %v1049_v2  ;;  %v555_v40 = vunpack.c.2.s8 %v363_v17 }
 0x2e3   : > { %7429 = vst [vmem:[#allocation54_spill] sm:$0xff] %v6704_v62 }
 0x2e4   : > { %v6702_v11 = vadd.f32 %v3080_v18, %v2912_v34  ;;  %v6709_v18 = vpop.permute.xlu1 %3688 }
 0x2e6   : > { %7428 = vst [vmem:[#allocation11_spill] sm:$0xff] %v6702_v11  ;;  %v2744_v20 = vpop.f32.mrf.mxu2 }
 0x2e7   : > { %v2745_v0 = vadd.f32 %v2744_v20, %v2576_v39  ;;  %v561_v39 = vunpack.c.3.s8 %v361_v29  ;;  %v554_v20 = vunpack.c.2.s8 %v362_v41  ;;  %v1067_v29 = vcvt.s32.f32 %v555_v40  ;;  %v7435_v41 = vld [vmem:[#allocation17_spill] sm:$0xff] }
 0x2e8   : > { %v2578_v53 = vpop.f32.mrf.mxu1  ;;  %v6726_v40 = vpop.permute.xlu0 %3683 }
 0x2e9   : > { %v2913_v42 = vpop.f32.mrf.mxu3  ;;  %v2579_v38 = vadd.f32 %v2578_v53, %v7432_v45  ;;  %v1066_v31 = vcvt.s32.f32 %v554_v20  ;;  %v6716_v53 = vpop.permute.xlu2 %3698 }
 0x2ea   : > { %v6707_v8 = vadd.f32 %v2913_v42, %v2745_v0  ;;  %v3085_v61 = vpop.f32.mrf.mxu0 }
 0x2eb   : > { %3133 = vmatmul.bf16.gmra.mxu1 %v1529_v28  ;;  %3302 = vmatmul.bf16.gmra.mxu2 %v1530_v26  ;;  %v1065_v26 = vcvt.s32.f32 %v553_v9  ;;  %v1075_v28 = vcvt.s32.f32 %v563_v30  ;;  %v370_v30 = vld [vmem:[%s5656_s17 + $0xf0] sm:$0xff] }
 0x2ec   : > { %7431 = vst [vmem:[#allocation13_spill] sm:$0xff] %v6707_v8  ;;  %v6721_v17 = vpop.permute.xlu1 %3693 }
 0x2ee   : > { %3471 = vmatmul.bf16.gmra.mxu3 %v1531_v47  ;;  %v2747_v54 = vpop.f32.mrf.mxu2  ;;  %v1073_v47 = vcvt.s32.f32 %v561_v39  ;;  %v1539_v39 = vpack.c.bf16 %v1075_v28, %v1067_v29  ;;  %v570_v29 = vunpack.c.0.s8 %v370_v30  ;;  %v578_v28 = vunpack.c.1.s8 %v370_v30 }
 0x2ef   : > { %v2748_v6 = vadd.f32 %v2747_v54, %v2579_v38 }
 0x2f0   : > { %v2580_v2 = vpop.f32.mrf.mxu1  ;;  %v1537_v9 = vpack.c.bf16 %v1073_v47, %v1065_v26  ;;  %v569_v26 = vunpack.c.0.s8 %v369_v43  ;;  %v1090_v62 = vcvt.s32.f32 %v578_v28  ;;  %v6740_v10 = vpop.permute.xlu0 %3708  ;;  %v7442_v28 = vld [vmem:[#allocation23_spill] sm:$0xff] }
 0x2f1   : > { %v2916_v34 = vpop.f32.mrf.mxu3  ;;  %v2581_v45 = vadd.f32 %v2580_v2, %v7435_v41 }
 0x2f2   : > { %v2917_v0 = vadd.f32 %v2916_v34, %v2748_v6  ;;  %v6718_v42 = vpop.f32.mrf.mxu0  ;;  %v1538_v6 = vpack.c.bf16 %v1074_v37, %v1066_v31  ;;  %v577_v37 = vunpack.c.1.s8 %v369_v43 }
 0x2f3   : > { %7434 = vst [vmem:[#allocation55_spill] sm:$0xff] %v6718_v42  ;;  %v371_v42 = vld [vmem:[%s5656_s17 + $0xf8] sm:$0xff] }
 0x2f4   : > { %v6714_v58 = vadd.f32 %v3085_v61, %v2917_v0  ;;  %v7437_v0 = vld [vmem:[#allocation19_spill] sm:$0xff] }
 0x2f6   : > { %7433 = vst [vmem:[#allocation15_spill] sm:$0xff] %v6714_v58  ;;  %v2749_v38 = vpop.f32.mrf.mxu2  ;;  %v6731_v58 = vpop.permute.xlu2 %3703 }
 0x2f7   : > { %v2750_v54 = vadd.f32 %v2749_v38, %v2581_v45  ;;  %v6733_v38 = vpop.permute.xlu1 %3713 }
 0x2f8   : > { %v2583_v34 = vpop.f32.mrf.mxu1 }
 0x2f9   : > { %v2918_v61 = vpop.f32.mrf.mxu3  ;;  %v2584_v41 = vadd.f32 %v2583_v34, %v7437_v0  ;;  %v1089_v34 = vcvt.s32.f32 %v577_v37  ;;  %v1082_v0 = vcvt.s32.f32 %v570_v29 }
 0x2fa   : > { %v6723_v20 = vadd.f32 %v2918_v61, %v2750_v54  ;;  %v3090_v2 = vpop.f32.mrf.mxu0  ;;  %v571_v61 = vunpack.c.0.s8 %v371_v42 }
 0x2fb   : > { %3138 = vmatmul.bf16.gmra.mxu1 %v1537_v9  ;;  %3307 = vmatmul.bf16.gmra.mxu2 %v1538_v6  ;;  %v579_v9 = vunpack.c.1.s8 %v371_v42  ;;  %v1546_v27 = vpack.c.bf16 %v1090_v62, %v1082_v0  ;;  %v586_v62 = vunpack.c.2.s8 %v370_v30 }
 0x2fc   : > { %7436 = vst [vmem:[#allocation17_spill] sm:$0xff] %v6723_v20  ;;  %v1083_v11 = vcvt.s32.f32 %v571_v61 }
 0x2fe   : > { %3476 = vmatmul.bf16.gmra.mxu3 %v1539_v39  ;;  %v2752_v45 = vpop.f32.mrf.mxu2  ;;  %v1081_v39 = vcvt.s32.f32 %v569_v26 }
 0x2ff   : > { %v2753_v47 = vadd.f32 %v2752_v45, %v2584_v41  ;;  %v1091_v41 = vcvt.s32.f32 %v579_v9  ;;  %v7440_v45 = vld [vmem:[#allocation21_spill] sm:$0xff]  ;;  %v6746_v37 = vpop.permute.xlu1 %3728  ;;  %v585_v9 = vunpack.c.2.s8 %v369_v43 }
 0x300   : > { %v2585_v54 = vpop.f32.mrf.mxu1  ;;  %v1545_v16 = vpack.c.bf16 %v1089_v34, %v1081_v39  ;;  %v594_v39 = vunpack.c.3.s8 %v370_v30  ;;  %v6749_v34 = vpop.permute.xlu0 %3723  ;;  %v7444_v30 = vld [vmem:[#allocation25_spill] sm:$0xff] }
 0x301   : > { %v2921_v31 = vpop.f32.mrf.mxu3  ;;  %v2586_v19 = vadd.f32 %v2585_v54, %v7440_v45  ;;  %v1547_v26 = vpack.c.bf16 %v1091_v41, %v1083_v11 }
 0x302   : > { %v2922_v6 = vadd.f32 %v2921_v31, %v2753_v47  ;;  %v6737_v8 = vpop.f32.mrf.mxu0  ;;  %v6742_v47 = vpop.permute.xlu2 %3718 }
 0x303   : > { %7439 = vst [vmem:[#allocation56_spill] sm:$0xff] %v6737_v8 }
 0x304   : > { %v6735_v20 = vadd.f32 %v3090_v2, %v2922_v6  ;;  %v593_v6 = vunpack.c.3.s8 %v369_v43 }
 0x306   : > { %7438 = vst [vmem:[#allocation19_spill] sm:$0xff] %v6735_v20  ;;  %v2754_v3 = vpop.f32.mrf.mxu2  ;;  %v1105_v45 = vcvt.s32.f32 %v593_v6 }
 0x307   : > { %v2755_v7 = vadd.f32 %v2754_v3, %v2586_v19 }
 0x308   : > { %v2588_v2 = vpop.f32.mrf.mxu1 }
 0x309   : > { %v2923_v25 = vpop.f32.mrf.mxu3  ;;  %v2589_v54 = vadd.f32 %v2588_v2, %v7442_v28  ;;  %v1098_v2 = vcvt.s32.f32 %v586_v62  ;;  %v6755_v28 = vpop.permute.xlu1 %3743 }
 0x30a   : > { %v6744_v31 = vadd.f32 %v2923_v25, %v2755_v7  ;;  %v3095_v29 = vpop.f32.mrf.mxu0  ;;  %v587_v25 = vunpack.c.2.s8 %v371_v42  ;;  %v595_v7 = vunpack.c.3.s8 %v371_v42  ;;  %v6751_v41 = vpop.permute.xlu2 %3733 }
 0x30b   : > { %3143 = vmatmul.bf16.gmra.mxu1 %v1545_v16  ;;  %3312 = vmatmul.bf16.gmra.mxu2 %v1546_v27  ;;  %v1097_v27 = vcvt.s32.f32 %v585_v9 }
 0x30c   : > { %7441 = vst [vmem:[#allocation21_spill] sm:$0xff] %v6744_v31  ;;  %v1099_v43 = vcvt.s32.f32 %v587_v25  ;;  %v377_v25 = vld [vmem:[%s5656_s17 + $0x128] sm:$0xff] }
 0x30d   : > { %v1553_v9 = vpack.c.bf16 %v1105_v45, %v1097_v27  ;;  %v601_v45 = vunpack.c.0.s8 %v377_v25 }
 0x30e   : > { %3481 = vmatmul.bf16.gmra.mxu3 %v1547_v26  ;;  %v2757_v61 = vpop.f32.mrf.mxu2  ;;  %v1106_v26 = vcvt.s32.f32 %v594_v39  ;;  %v6762_v39 = vpop.permute.xlu0 %3738 }
 0x30f   : > { %v2758_v3 = vadd.f32 %v2757_v61, %v2589_v54  ;;  %v1107_v54 = vcvt.s32.f32 %v595_v7 }
 0x310   : > { %v2590_v11 = vpop.f32.mrf.mxu1 }
 0x311   : > { %v2926_v19 = vpop.f32.mrf.mxu3  ;;  %v2591_v61 = vadd.f32 %v2590_v11, %v7444_v30  ;;  %v1555_v6 = vpack.c.bf16 %v1107_v54, %v1099_v43  ;;  %v378_v11 = vld [vmem:[%s5656_s17 + $0x130] sm:$0xff]  ;;  %v609_v43 = vunpack.c.1.s8 %v377_v25 }
 0x312   : > { %v2927_v0 = vadd.f32 %v2926_v19, %v2758_v3  ;;  %v6758_v31 = vpop.f32.mrf.mxu0  ;;  %v6765_v7 = vpop.permute.xlu2 %3748  ;;  %v602_v54 = vunpack.c.0.s8 %v378_v11 }
 0x313   : > { %7445 = vst [vmem:[#allocation25_spill] sm:$0xff] %v6758_v31  ;;  %v379_v31 = vld [vmem:[%s5656_s17 + $0x138] sm:$0xff]  ;;  %v1121_v20 = vcvt.s32.f32 %v609_v43 }
 0x314   : > { %v6753_v16 = vadd.f32 %v3095_v29, %v2927_v0  ;;  %v1554_v29 = vpack.c.bf16 %v1106_v26, %v1098_v2  ;;  %v7447_v0 = vld [vmem:[#allocation27_spill] sm:$0xff] }
 0x316   : > { %7443 = vst [vmem:[#allocation23_spill] sm:$0xff] %v6753_v16  ;;  %v2759_v8 = vpop.f32.mrf.mxu2  ;;  %v1113_v16 = vcvt.s32.f32 %v601_v45  ;;  %v6774_v1 = vpop.permute.xlu0 %3753 }
 0x317   : > { %v2760_v42 = vadd.f32 %v2759_v8, %v2591_v61  ;;  %v6770_v8 = vpop.permute.xlu1 %3758  ;;  %v610_v61 = vunpack.c.1.s8 %v378_v11 }
 0x318   : > { %v2593_v19 = vpop.f32.mrf.mxu1  ;;  %v1561_v24 = vpack.c.bf16 %v1121_v20, %v1113_v16  ;;  %v619_v16 = vunpack.c.2.s8 %v379_v31 }
 0x319   : > { %v2928_v3 = vpop.f32.mrf.mxu3  ;;  %v2594_v30 = vadd.f32 %v2593_v19, %v7447_v0  ;;  %v1114_v19 = vcvt.s32.f32 %v602_v54  ;;  %v1122_v0 = vcvt.s32.f32 %v610_v61 }
 0x31a   : > { %v6760_v62 = vadd.f32 %v2928_v3, %v2760_v42  ;;  %v3100_v3 = vpop.f32.mrf.mxu0 }
 0x31b   : > { %3148 = vmatmul.bf16.gmra.mxu1 %v1553_v9  ;;  %3317 = vmatmul.bf16.gmra.mxu2 %v1554_v29  ;;  %v603_v9 = vunpack.c.0.s8 %v379_v31  ;;  %v611_v29 = vunpack.c.1.s8 %v379_v31  ;;  %v1562_v36 = vpack.c.bf16 %v1122_v0, %v1114_v19  ;;  %v1131_v0 = vcvt.s32.f32 %v619_v16  ;;  %v386_v16 = vld [vmem:[%s5656_s17 + $0x170] sm:$0xff] }
 0x31c   : > { %7446 = vst [vmem:[#allocation57_spill] sm:$0xff] %v6760_v62 }
 0x31d   : > { %v1115_v48 = vcvt.s32.f32 %v603_v9  ;;  %v1123_v49 = vcvt.s32.f32 %v611_v29  ;;  %v627_v29 = vunpack.c.3.s8 %v379_v31 }
 0x31e   : > { %3486 = vmatmul.bf16.gmra.mxu3 %v1555_v6  ;;  %v2762_v27 = vpop.f32.mrf.mxu2  ;;  %v6783_v43 = vpop.permute.xlu0 %3768 }
 0x31f   : > { %v2763_v2 = vadd.f32 %v2762_v27, %v2594_v30  ;;  %v6777_v27 = vpop.permute.xlu2 %3763  ;;  %v1563_v45 = vpack.c.bf16 %v1123_v49, %v1115_v48 }
 0x320   : > { %v2595_v42 = vpop.f32.mrf.mxu1 }
 0x321   : > { %v2931_v26 = vpop.f32.mrf.mxu3  ;;  %v2596_v30 = vadd.f32 %v2595_v42, %v5979_v22  ;;  %v617_v22 = vunpack.c.2.s8 %v377_v25  ;;  %v625_v42 = vunpack.c.3.s8 %v377_v25 }
 0x322   : > { %v2932_v62 = vadd.f32 %v2931_v26, %v2763_v2  ;;  %v6779_v2 = vpop.permute.xlu1 %3773 }
 0x324   : > { %v6772_v6 = vadd.f32 %v3100_v3, %v2932_v62  ;;  %v618_v3 = vunpack.c.2.s8 %v378_v11 }
 0x326   : > { %7448 = vst [vmem:[#allocation27_spill] sm:$0xff] %v6772_v6  ;;  %v2764_v14 = vpop.f32.mrf.mxu2  ;;  %v1130_v48 = vcvt.s32.f32 %v618_v3 }
 0x327   : > { %v2765_v33 = vadd.f32 %v2764_v14, %v2596_v30  ;;  %v626_v14 = vunpack.c.3.s8 %v378_v11  ;;  %v6785_v9 = vpop.permute.xlu2 %3778  ;;  %v1139_v30 = vcvt.s32.f32 %v627_v29 }
 0x328   : > { %v3114_v62 = vpop.f32.mrf.mxu1  ;;  %7450 = vst [vmem:[#allocation59_spill] sm:$0xff] %v6785_v9 }
 0x329   : > { %v2933_v55 = vpop.f32.mrf.mxu3  ;;  %v3115_v49 = vadd.f32 %v3114_v62, %v5982_v32  ;;  %v1138_v19 = vcvt.s32.f32 %v626_v14  ;;  %v6791_v62 = vpop.permute.xlu0 %3783 }
 0x32a   : > { %v6781_v26 = vadd.f32 %v2933_v55, %v2765_v33  ;;  %v6788_v55 = vpop.permute.xlu1 %3788  ;;  %v1137_v33 = vcvt.s32.f32 %v625_v42  ;;  %7452 = vst [vmem:[#allocation61_spill] sm:$0xff] %v6791_v62 }
 0x32b   : > { %3153 = vmatmul.bf16.gmra.mxu1 %v1561_v24  ;;  %3322 = vmatmul.bf16.gmra.mxu2 %v1562_v36  ;;  %7451 = vst [vmem:[#allocation60_spill] sm:$0xff] %v6788_v55  ;;  %v1129_v24 = vcvt.s32.f32 %v617_v22  ;;  %v1570_v32 = vpack.c.bf16 %v1138_v19, %v1130_v48  ;;  %v642_v48 = vunpack.c.1.s8 %v386_v16 }
 0x32c   : > { %7449 = vst [vmem:[#allocation58_spill] sm:$0xff] %v6781_v26 }
 0x32d   : > { %v1569_v31 = vpack.c.bf16 %v1137_v33, %v1129_v24 }
 0x32e   : > { %3491 = vmatmul.bf16.gmra.mxu3 %v1563_v45  ;;  %v3283_v54 = vpop.f32.mrf.mxu2 }
 0x32f   : > { %v3284_v36 = vadd.f32 %v3283_v54, %v3115_v49  ;;  %v1571_v54 = vpack.c.bf16 %v1139_v30, %v1131_v0  ;;  %v6793_v3 = vpop.permute.xlu2 %3793  ;;  %v387_v49 = vld [vmem:[%s5656_s17 + $0x178] sm:$0xff] }
 0x330   : > { %v3116_v20 = vpop.f32.mrf.mxu1  ;;  %7453 = vst [vmem:[#allocation62_spill] sm:$0xff] %v6793_v3  ;;  %v643_v0 = vunpack.c.1.s8 %v387_v49 }
 0x331   : > { %v3452_v61 = vpop.f32.mrf.mxu3  ;;  %v3117_v25 = vadd.f32 %v3116_v20, %v5986_v44 }
 0x332   : > { %v3453_v45 = vadd.f32 %v3452_v61, %v3284_v36  ;;  %v385_v61 = vld [vmem:[%s5656_s17 + $0x168] sm:$0xff]  ;;  %v6798_v20 = vpop.permute.xlu1 %3803 }
 0x333   : > { %7454 = vst [vmem:[#allocation63_spill] sm:$0xff] %v6798_v20  ;;  %v633_v36 = vunpack.c.0.s8 %v385_v61 }
 0x334   : > { %v3996_v14 = vmul.f32 %v6712_v46, %v3453_v45  ;;  %v635_v46 = vunpack.c.0.s8 %v387_v49 }
 0x336   : > { %v3285_v11 = vpop.f32.mrf.mxu2 }
 0x337   : > { %v3286_v26 = vadd.f32 %v3285_v11, %v3117_v25  ;;  %v6803_v25 = vpop.permute.xlu0 %3798  ;;  %v1145_v11 = vcvt.s32.f32 %v633_v36 }
 0x338   : > { %v3119_v22 = vpop.f32.mrf.mxu1 }
 0x339   : > { %v3454_v6 = vpop.f32.mrf.mxu3 }
 0x33a   : > { %v3455_v42 = vadd.f32 %v3454_v6, %v3286_v26  ;;  %v641_v6 = vunpack.c.1.s8 %v385_v61  ;;  %v634_v26 = vunpack.c.0.s8 %v386_v16  ;;  %v6808_v20 = vpop.permute.xlu1 %3818 }
 0x33b   : > { %3158 = vmatmul.bf16.gmra.mxu1 %v1569_v31  ;;  %3327 = vmatmul.bf16.gmra.mxu2 %v1570_v32 }
 0x33c   : > { %v3997_v44 = vmul.f32 %v6726_v40, %v3455_v42  ;;  %v7455_v40 = vld [vmem:[#allocation29_spill] sm:$0xff]  ;;  %v1153_v31 = vcvt.s32.f32 %v641_v6  ;;  %v1146_v32 = vcvt.s32.f32 %v634_v26  ;;  %v6805_v42 = vpop.permute.xlu2 %3808 }
 0x33d   : > { %v3120_v30 = vadd.f32 %v3119_v22, %v7455_v40  ;;  %7456 = vst [vmem:[#allocation29_spill] sm:$0xff] %v6803_v25 }
 0x33e   : > { %3496 = vmatmul.bf16.gmra.mxu3 %v1571_v54  ;;  %v4060_v29 = vpack.c.bf16 %v3997_v44, %v3996_v14  ;;  %v3288_v24 = vpop.f32.mrf.mxu2  ;;  %v1154_v54 = vcvt.s32.f32 %v642_v48  ;;  %v1147_v14 = vcvt.s32.f32 %v635_v46  ;;  %v1155_v44 = vcvt.s32.f32 %v643_v0 }
 0x33f   : > { %v3289_v45 = vadd.f32 %v3288_v24, %v3120_v30  ;;  %v1577_v22 = vpack.c.bf16 %v1153_v31, %v1145_v11  ;;  %v6812_v48 = vpop.permute.xlu0 %3813  ;;  %v657_v0 = vunpack.c.3.s8 %v385_v61  ;;  %v650_v30 = vunpack.c.2.s8 %v386_v16 }
 0x340   : > { %4168 = vmatmul.bf16.vlgmr.msra.gmra.mxu0 %v4060_v29  ;;  %v3121_v19 = vpop.f32.mrf.mxu1  ;;  %v1578_v40 = vpack.c.bf16 %v1154_v54, %v1146_v32  ;;  %v1579_v36 = vpack.c.bf16 %v1155_v44, %v1147_v14  ;;  %v658_v11 = vunpack.c.3.s8 %v386_v16 }
 0x341   : > { %v3457_v33 = vpop.f32.mrf.mxu3  ;;  %v3122_v29 = vadd.f32 %v3121_v19, %v6015_v21  ;;  %v1169_v32 = vcvt.s32.f32 %v657_v0  ;;  %v1162_v54 = vcvt.s32.f32 %v650_v30 }
 0x342   : > { %v3458_v55 = vadd.f32 %v3457_v33, %v3289_v45  ;;  %v1170_v14 = vcvt.s32.f32 %v658_v11  ;;  %v394_v11 = vld [vmem:[%s5656_s17 + $0x1b0] sm:$0xff] }
 0x344   : > { %v3998_v6 = vmul.f32 %v6709_v18, %v3458_v55  ;;  %v6814_v19 = vpop.permute.xlu2 %3823  ;;  %v651_v55 = vunpack.c.2.s8 %v387_v49 }
 0x346   : > { %v3290_v3 = vpop.f32.mrf.mxu2  ;;  %v1163_v44 = vcvt.s32.f32 %v651_v55  ;;  %v395_v55 = vld [vmem:[%s5656_s17 + $0x1b8] sm:$0xff] }
 0x347   : > { %v3291_v62 = vadd.f32 %v3290_v3, %v3122_v29  ;;  %v649_v3 = vunpack.c.2.s8 %v385_v61 }
 0x348   : > { %v3124_v25 = vpop.f32.mrf.mxu1 }
 0x349   : > { %v3459_v9 = vpop.f32.mrf.mxu3  ;;  %v1161_v45 = vcvt.s32.f32 %v649_v3 }
 0x34a   : > { %v3460_v24 = vadd.f32 %v3459_v9, %v3291_v62  ;;  %v6816_v9 = vpop.permute.xlu1 %3833  ;;  %v3125_v62 = vadd.f32 %v3124_v25, %v6039_v50  ;;  %v1586_v50 = vpack.c.bf16 %v1170_v14, %v1162_v54  ;;  %v674_v54 = vunpack.c.1.s8 %v394_v11 }
 0x34b   : > { %3163 = vmatmul.bf16.gmra.mxu1 %v1577_v22  ;;  %3332 = vmatmul.bf16.gmra.mxu2 %v1578_v40  ;;  %7457 = vst [vmem:[#allocation64_spill] sm:$0xff] %v6816_v9  ;;  %v7458_v22 = vld [vmem:[#allocation30_spill] sm:$0xff] }
 0x34c   : > { %v3999_v26 = vmul.f32 %v6721_v17, %v3460_v24  ;;  %v659_v17 = vunpack.c.3.s8 %v387_v49  ;;  %v1585_v49 = vpack.c.bf16 %v1169_v32, %v1161_v45  ;;  %v6822_v25 = vpop.permute.xlu2 %3838  ;;  %v666_v32 = vunpack.c.0.s8 %v394_v11 }
 0x34d   : > { %7459 = vst [vmem:[#allocation30_spill] sm:$0xff] %v6822_v25 }
 0x34e   : > { %3501 = vmatmul.bf16.gmra.mxu3 %v1579_v36  ;;  %v4061_v21 = vpack.c.bf16 %v3999_v26, %v3998_v6  ;;  %v3293_v33 = vpop.f32.mrf.mxu2  ;;  %v1171_v29 = vcvt.s32.f32 %v659_v17  ;;  %v6820_v36 = vpop.permute.xlu0 %3828 }
 0x34f   : > { %v3294_v31 = vadd.f32 %v3293_v33, %v3125_v62 }
 0x350   : > { %4173 = vmatmul.bf16.gmra.mxu0 %v4061_v21  ;;  %v3126_v18 = vpop.f32.mrf.mxu1  ;;  %v1587_v21 = vpack.c.bf16 %v1171_v29, %v1163_v44  ;;  %v675_v29 = vunpack.c.1.s8 %v395_v55 }
 0x351   : > { %v3462_v46 = vpop.f32.mrf.mxu3  ;;  %v3127_v40 = vadd.f32 %v3126_v18, %v7458_v22 }
 0x352   : > { %v3463_v16 = vadd.f32 %v3462_v46, %v3294_v31  ;;  %v6824_v3 = vpop.permute.xlu1 %3848  ;;  %v393_v46 = vld [vmem:[%s5656_s17 + $0x1a8] sm:$0xff] }
 0x353   : > { %7460 = vst [vmem:[#allocation65_spill] sm:$0xff] %v6824_v3  ;;  %v665_v62 = vunpack.c.0.s8 %v393_v46  ;;  %v673_v31 = vunpack.c.1.s8 %v393_v46 }
 0x354   : > { %v4000_v0 = vmul.f32 %v6716_v53, %v3463_v16  ;;  %v667_v53 = vunpack.c.0.s8 %v395_v55 }
 0x356   : > { %v3295_v61 = vpop.f32.mrf.mxu2  ;;  %v6831_v14 = vpop.permute.xlu0 %3843 }
 0x357   : > { %v3296_v24 = vadd.f32 %v3295_v61, %v3127_v40  ;;  %7461 = vst [vmem:[#allocation66_spill] sm:$0xff] %v6831_v14  ;;  %v6834_v40 = vpop.permute.xlu2 %3853  ;;  %v1177_v61 = vcvt.s32.f32 %v665_v62 }
 0x358   : > { %v3129_v26 = vpop.f32.mrf.mxu1 }
 0x359   : > { %v3464_v6 = vpop.f32.mrf.mxu3 }
 0x35a   : > { %v3465_v33 = vadd.f32 %v3464_v6, %v3296_v24  ;;  %v1185_v24 = vcvt.s32.f32 %v673_v31  ;;  %v1178_v6 = vcvt.s32.f32 %v666_v32 }
 0x35b   : > { %3168 = vmatmul.bf16.gmra.mxu1 %v1585_v49  ;;  %3337 = vmatmul.bf16.gmra.mxu2 %v1586_v50  ;;  %v1186_v49 = vcvt.s32.f32 %v674_v54  ;;  %v6836_v50 = vpop.permute.xlu1 %3863 }
 0x35c   : > { %v4001_v30 = vmul.f32 %v6731_v58, %v3465_v33  ;;  %v7462_v58 = vld [vmem:[#allocation31_spill] sm:$0xff]  ;;  %v1187_v33 = vcvt.s32.f32 %v675_v29  ;;  %v1593_v25 = vpack.c.bf16 %v1185_v24, %v1177_v61  ;;  %v689_v29 = vunpack.c.3.s8 %v393_v46 }
 0x35d   : > { %v3130_v22 = vadd.f32 %v3129_v26, %v7462_v58  ;;  %7463 = vst [vmem:[#allocation31_spill] sm:$0xff] %v6834_v40  ;;  %v1594_v9 = vpack.c.bf16 %v1186_v49, %v1178_v6  ;;  %v683_v61 = vunpack.c.2.s8 %v395_v55 }
 0x35e   : > { %3506 = vmatmul.bf16.gmra.mxu3 %v1587_v21  ;;  %v4062_v18 = vpack.c.bf16 %v4001_v30, %v4000_v0  ;;  %v3298_v17 = vpop.f32.mrf.mxu2  ;;  %v1179_v21 = vcvt.s32.f32 %v667_v53  ;;  %v6839_v62 = vpop.permute.xlu0 %3858 }
 0x35f   : > { %v3299_v16 = vadd.f32 %v3298_v17, %v3130_v22  ;;  %v6843_v32 = vpop.permute.xlu2 %3868  ;;  %v1195_v49 = vcvt.s32.f32 %v683_v61 }
 0x360   : > { %4178 = vmatmul.bf16.gmra.mxu0 %v4062_v18  ;;  %v3131_v44 = vpop.f32.mrf.mxu1  ;;  %v1595_v58 = vpack.c.bf16 %v1187_v33, %v1179_v21 }
 0x361   : > { %v3467_v45 = vpop.f32.mrf.mxu3  ;;  %v3132_v0 = vadd.f32 %v3131_v44, %v6079_v56  ;;  %v681_v44 = vunpack.c.2.s8 %v393_v46 }
 0x362   : > { %v3468_v18 = vadd.f32 %v3467_v45, %v3299_v16 }
 0x363   : > { %v6845_v45 = vpop.permute.xlu1 %3878 }
 0x364   : > { %v4002_v17 = vmul.f32 %v6740_v10, %v3468_v18  ;;  %v691_v10 = vunpack.c.3.s8 %v395_v55 }
 0x366   : > { %v3300_v30 = vpop.f32.mrf.mxu2  ;;  %v6848_v6 = vpop.permute.xlu0 %3873  ;;  %v1203_v21 = vcvt.s32.f32 %v691_v10 }
 0x367   : > { %v3301_v3 = vadd.f32 %v3300_v30, %v3132_v0  ;;  %v6851_v46 = vpop.permute.xlu2 %3883 }
 0x368   : > { %v3134_v26 = vpop.f32.mrf.mxu1 }
 0x369   : > { %v3469_v14 = vpop.f32.mrf.mxu3 }
 0x36a   : > { %v3470_v40 = vadd.f32 %v3469_v14, %v3301_v3  ;;  %v682_v3 = vunpack.c.2.s8 %v394_v11  ;;  %v690_v14 = vunpack.c.3.s8 %v394_v11 }
 0x36b   : > { %3173 = vmatmul.bf16.gmra.mxu1 %v1593_v25  ;;  %3342 = vmatmul.bf16.gmra.mxu2 %v1594_v9  ;;  %v1193_v25 = vcvt.s32.f32 %v681_v44  ;;  %v402_v44 = vld [vmem:[%s5656_s17 + $0x1f0] sm:$0xff] }
 0x36c   : > { %v4003_v31 = vmul.f32 %v6733_v38, %v3470_v40  ;;  %v3135_v38 = vadd.f32 %v3134_v26, %v6089_v35  ;;  %v1201_v40 = vcvt.s32.f32 %v689_v29  ;;  %v1194_v16 = vcvt.s32.f32 %v682_v3  ;;  %v6853_v26 = vpop.permute.xlu1 %3893  ;;  %v403_v29 = vld [vmem:[%s5656_s17 + $0x1f8] sm:$0xff] }
 0x36d   : > { %v1202_v24 = vcvt.s32.f32 %v690_v14 }
 0x36e   : > { %3511 = vmatmul.bf16.gmra.mxu3 %v1595_v58  ;;  %v4063_v56 = vpack.c.bf16 %v4003_v31, %v4002_v17  ;;  %v3303_v54 = vpop.f32.mrf.mxu2  ;;  %v1601_v30 = vpack.c.bf16 %v1201_v40, %v1193_v25  ;;  %v1603_v17 = vpack.c.bf16 %v1203_v21, %v1195_v49  ;;  %v6860_v3 = vpop.permute.xlu0 %3888  ;;  %v706_v25 = vunpack.c.1.s8 %v402_v44 }
 0x36f   : > { %v3304_v9 = vadd.f32 %v3303_v54, %v3135_v38  ;;  %v1602_v18 = vpack.c.bf16 %v1202_v24, %v1194_v16  ;;  %v401_v54 = vld [vmem:[%s5656_s17 + $0x1e8] sm:$0xff]  ;;  %v698_v38 = vunpack.c.0.s8 %v402_v44  ;;  %v707_v40 = vunpack.c.1.s8 %v403_v29 }
 0x370   : > { %4183 = vmatmul.bf16.gmra.mxu0 %v4063_v56  ;;  %v3136_v22 = vpop.f32.mrf.mxu1  ;;  %v705_v10 = vunpack.c.1.s8 %v401_v54 }
 0x371   : > { %v3472_v53 = vpop.f32.mrf.mxu3  ;;  %v3137_v33 = vadd.f32 %v3136_v22, %v6097_v51  ;;  %v697_v22 = vunpack.c.0.s8 %v401_v54 }
 0x372   : > { %v3473_v0 = vadd.f32 %v3472_v53, %v3304_v9  ;;  %v6862_v9 = vpop.permute.xlu2 %3898 }
 0x373   : > { %7464 = vst [vmem:[#allocation67_spill] sm:$0xff] %v6862_v9  ;;  %v1209_v49 = vcvt.s32.f32 %v697_v22 }
 0x374   : > { %v4004_v56 = vmul.f32 %v6742_v47, %v3473_v0  ;;  %v6865_v24 = vpop.permute.xlu1 %3908  ;;  %v1218_v0 = vcvt.s32.f32 %v706_v25  ;;  %v713_v25 = vunpack.c.2.s8 %v401_v54 }
 0x375   : > { %7465 = vst [vmem:[#allocation68_spill] sm:$0xff] %v6865_v24 }
 0x376   : > { %v3305_v11 = vpop.f32.mrf.mxu2  ;;  %v6868_v9 = vpop.permute.xlu0 %3903 }
 0x377   : > { %v3306_v55 = vadd.f32 %v3305_v11, %v3137_v33  ;;  %v1217_v33 = vcvt.s32.f32 %v705_v10  ;;  %v1210_v11 = vcvt.s32.f32 %v698_v38 }
 0x378   : > { %v3139_v58 = vpop.f32.mrf.mxu1 }
 0x379   : > { %v3474_v35 = vpop.f32.mrf.mxu3  ;;  %v3140_v16 = vadd.f32 %v3139_v58, %v6119_v60 }
 0x37a   : > { %v3475_v31 = vadd.f32 %v3474_v35, %v3306_v55  ;;  %v1219_v35 = vcvt.s32.f32 %v707_v40  ;;  %v6870_v22 = vpop.permute.xlu2 %3913  ;;  %v714_v40 = vunpack.c.2.s8 %v402_v44 }
 0x37b   : > { %3178 = vmatmul.bf16.gmra.mxu1 %v1601_v30  ;;  %3347 = vmatmul.bf16.gmra.mxu2 %v1602_v18 }
 0x37c   : > { %v4005_v51 = vmul.f32 %v6749_v34, %v3475_v31  ;;  %v699_v34 = vunpack.c.0.s8 %v403_v29 }
 0x37e   : > { %3516 = vmatmul.bf16.gmra.mxu3 %v1603_v17  ;;  %v4064_v53 = vpack.c.bf16 %v4005_v51, %v4004_v56  ;;  %v3308_v14 = vpop.f32.mrf.mxu2  ;;  %v1211_v55 = vcvt.s32.f32 %v699_v34  ;;  %v1609_v51 = vpack.c.bf16 %v1217_v33, %v1209_v49  ;;  %v721_v34 = vunpack.c.3.s8 %v401_v54 }
 0x37f   : > { %v3309_v21 = vadd.f32 %v3308_v14, %v3140_v16  ;;  %v722_v16 = vunpack.c.3.s8 %v402_v44  ;;  %v723_v33 = vunpack.c.3.s8 %v403_v29 }
 0x380   : > { %4188 = vmatmul.bf16.gmra.mxu0 %v4064_v53  ;;  %v3141_v47 = vpop.f32.mrf.mxu1  ;;  %v1610_v53 = vpack.c.bf16 %v1218_v0, %v1210_v11  ;;  %v1611_v58 = vpack.c.bf16 %v1219_v35, %v1211_v55  ;;  %v6877_v11 = vpop.permute.xlu0 %3918  ;;  %v1233_v0 = vcvt.s32.f32 %v721_v34  ;;  %v1226_v55 = vcvt.s32.f32 %v714_v40  ;;  %v411_v34 = vld [vmem:[%s5656_s17 + $0x238] sm:$0xff] }
 0x381   : > { %v3477_v61 = vpop.f32.mrf.mxu3  ;;  %v3142_v30 = vadd.f32 %v3141_v47, %v6127_v4  ;;  %v6874_v4 = vpop.permute.xlu1 %3923  ;;  %v1234_v35 = vcvt.s32.f32 %v722_v16 }
 0x382   : > { %v3478_v17 = vadd.f32 %v3477_v61, %v3309_v21  ;;  %v715_v21 = vunpack.c.2.s8 %v403_v29 }
 0x384   : > { %v4006_v14 = vmul.f32 %v6746_v37, %v3478_v17  ;;  %v1235_v17 = vcvt.s32.f32 %v723_v33 }
 0x386   : > { %v3310_v18 = vpop.f32.mrf.mxu2 }
 0x387   : > { %v3311_v31 = vadd.f32 %v3310_v18, %v3142_v30  ;;  %v6879_v30 = vpop.permute.xlu2 %3928  ;;  %v1227_v18 = vcvt.s32.f32 %v715_v21 }
 0x388   : > { %v3144_v60 = vpop.f32.mrf.mxu1 }
 0x389   : > { %v3479_v56 = vpop.f32.mrf.mxu3  ;;  %v3145_v37 = vadd.f32 %v3144_v60, %v6147_v15  ;;  %v6882_v44 = vpop.permute.xlu1 %3938 }
 0x38a   : > { %v3480_v24 = vadd.f32 %v3479_v56, %v3311_v31 }
 0x38b   : > { %3183 = vmatmul.bf16.gmra.mxu1 %v1609_v51  ;;  %3352 = vmatmul.bf16.gmra.mxu2 %v1610_v53  ;;  %v1618_v53 = vpack.c.bf16 %v1234_v35, %v1226_v55  ;;  %v7468_v55 = vld [vmem:[#allocation32_spill] sm:$0xff] }
 0x38c   : > { %v4007_v10 = vmul.f32 %v6751_v41, %v3480_v24  ;;  %v1225_v41 = vcvt.s32.f32 %v713_v25  ;;  %v410_v25 = vld [vmem:[%s5656_s17 + $0x230] sm:$0xff] }
 0x38e   : > { %3521 = vmatmul.bf16.gmra.mxu3 %v1611_v58  ;;  %v4065_v61 = vpack.c.bf16 %v4007_v10, %v4006_v14  ;;  %v3313_v38 = vpop.f32.mrf.mxu2  ;;  %v1617_v51 = vpack.c.bf16 %v1233_v0, %v1225_v41  ;;  %v1619_v58 = vpack.c.bf16 %v1235_v17, %v1227_v18  ;;  %v739_v0 = vunpack.c.1.s8 %v411_v34 }
 0x38f   : > { %v3314_v24 = vadd.f32 %v3313_v38, %v3145_v37  ;;  %v6887_v38 = vpop.permute.xlu0 %3933  ;;  %v6891_v40 = vpop.permute.xlu2 %3943  ;;  %v730_v37 = vunpack.c.0.s8 %v410_v25 }
 0x390   : > { %4193 = vmatmul.bf16.gmra.mxu0 %v4065_v61  ;;  %v3146_v49 = vpop.f32.mrf.mxu1  ;;  %7466 = vst [vmem:[#allocation69_spill] sm:$0xff] %v6891_v40 }
 0x391   : > { %v3482_v47 = vpop.f32.mrf.mxu3  ;;  %v3147_v54 = vadd.f32 %v3146_v49, %v6156_v5  ;;  %v409_v5 = vld [vmem:[%s5656_s17 + $0x228] sm:$0xff]  ;;  %v6893_v41 = vpop.permute.xlu1 %3953 }
 0x392   : > { %v3483_v29 = vadd.f32 %v3482_v47, %v3314_v24  ;;  %v729_v49 = vunpack.c.0.s8 %v409_v5  ;;  %v737_v33 = vunpack.c.1.s8 %v409_v5  ;;  %7467 = vst [vmem:[#allocation70_spill] sm:$0xff] %v6893_v41  ;;  %v731_v24 = vunpack.c.0.s8 %v411_v34 }
 0x394   : > { %v4008_v10 = vmul.f32 %v6762_v39, %v3483_v29  ;;  %v738_v39 = vunpack.c.1.s8 %v410_v25  ;;  %v1241_v18 = vcvt.s32.f32 %v729_v49 }
 0x396   : > { %v3315_v31 = vpop.f32.mrf.mxu2  ;;  %v1250_v29 = vcvt.s32.f32 %v738_v39 }
 0x397   : > { %v3316_v15 = vadd.f32 %v3315_v31, %v3147_v54  ;;  %v1249_v54 = vcvt.s32.f32 %v737_v33  ;;  %v1242_v31 = vcvt.s32.f32 %v730_v37  ;;  %v6899_v40 = vpop.permute.xlu2 %3958 }
 0x398   : > { %v3149_v60 = vpop.f32.mrf.mxu1 }
 0x399   : > { %v3484_v56 = vpop.f32.mrf.mxu3  ;;  %v3150_v35 = vadd.f32 %v3149_v60, %v7468_v55  ;;  %v1626_v41 = vpack.c.bf16 %v1250_v29, %v1242_v31  ;;  %v6901_v33 = vpop.permute.xlu1 %3968  ;;  %v746_v55 = vunpack.c.2.s8 %v410_v25  ;;  %v755_v31 = vunpack.c.3.s8 %v411_v34 }
 0x39a   : > { %v3485_v14 = vadd.f32 %v3484_v56, %v3316_v15  ;;  %v1243_v15 = vcvt.s32.f32 %v731_v24  ;;  %v1251_v56 = vcvt.s32.f32 %v739_v0  ;;  %v753_v0 = vunpack.c.3.s8 %v409_v5 }
 0x39b   : > { %3188 = vmatmul.bf16.gmra.mxu1 %v1617_v51  ;;  %3357 = vmatmul.bf16.gmra.mxu2 %v1618_v53  ;;  %v6897_v53 = vpop.permute.xlu0 %3948 }
 0x39c   : > { %v4009_v61 = vmul.f32 %v6755_v28, %v3485_v14  ;;  %v1627_v49 = vpack.c.bf16 %v1251_v56, %v1243_v15  ;;  %v1265_v15 = vcvt.s32.f32 %v753_v0  ;;  %v1258_v56 = vcvt.s32.f32 %v746_v55 }
 0x39e   : > { %3526 = vmatmul.bf16.gmra.mxu3 %v1619_v58  ;;  %v4066_v47 = vpack.c.bf16 %v4009_v61, %v4008_v10  ;;  %v3318_v16 = vpop.f32.mrf.mxu2 }
 0x39f   : > { %v3319_v17 = vadd.f32 %v3318_v16, %v3150_v35  ;;  %v754_v35 = vunpack.c.3.s8 %v410_v25  ;;  %v6908_v29 = vpop.permute.xlu2 %3973  ;;  %v1267_v25 = vcvt.s32.f32 %v755_v31  ;;  %v6934_v31 = vld [vmem:[%s5656_s17 + $0x278] sm:$0xff] }
 0x3a0   : > { %4198 = vmatmul.bf16.gmra.mxu0 %v4066_v47  ;;  %v3151_v28 = vpop.f32.mrf.mxu1  ;;  %v1625_v47 = vpack.c.bf16 %v1249_v54, %v1241_v18  ;;  %v747_v54 = vunpack.c.2.s8 %v411_v34 }
 0x3a1   : > { %v3487_v21 = vpop.f32.mrf.mxu3  ;;  %v3152_v51 = vadd.f32 %v3151_v28, %v6190_v52  ;;  %v745_v28 = vunpack.c.2.s8 %v409_v5 }
 0x3a2   : > { %v3488_v14 = vadd.f32 %v3487_v21, %v3319_v17  ;;  %v1259_v5 = vcvt.s32.f32 %v747_v54 }
 0x3a3   : > { %v6905_v18 = vpop.permute.xlu0 %3963 }
 0x3a4   : > { %v4010_v37 = vmul.f32 %v6765_v7, %v3488_v14  ;;  %v6912_v14 = vpop.f32.mrf.mxu0 }
 0x3a5   : > { %7469 = vst [vmem:[#allocation32_spill] sm:$0xff] %v6912_v14 }
 0x3a6   : > { %v3320_v58 = vpop.f32.mrf.mxu2 }
 0x3a7   : > { %v3321_v10 = vadd.f32 %v3320_v58, %v3152_v51  ;;  %v1266_v51 = vcvt.s32.f32 %v754_v35  ;;  %v6910_v58 = vpop.permute.xlu1 %3983  ;;  %v6927_v0 = vpop.permute.xlu2 %3988  ;;  %v6930_v35 = vld [vmem:[%s5656_s17 + $0x270] sm:$0xff] }
 0x3a8   : > { %v3154_v60 = vpop.f32.mrf.mxu1  ;;  %7470 = vst [vmem:[#allocation71_spill] sm:$0xff] %v6927_v0 }
 0x3a9   : > { %v3489_v61 = vpop.f32.mrf.mxu3  ;;  %v3155_v7 = vadd.f32 %v3154_v60, %v6202_v12 }
 0x3aa   : > { %v3490_v16 = vadd.f32 %v3489_v61, %v3321_v10 }
 0x3ab   : > { %3193 = vmatmul.bf16.gmra.mxu1 %v1625_v47  ;;  %3362 = vmatmul.bf16.gmra.mxu2 %v1626_v41 }
 0x3ac   : > { %v4011_v39 = vmul.f32 %v6774_v1, %v3490_v16  ;;  %v1257_v1 = vcvt.s32.f32 %v745_v28 }
 0x3ae   : > { %3531 = vmatmul.bf16.gmra.mxu3 %v1627_v49  ;;  %v4067_v52 = vpack.c.bf16 %v4011_v39, %v4010_v37  ;;  %v3323_v21 = vpop.f32.mrf.mxu2  ;;  %v1633_v60 = vpack.c.bf16 %v1265_v15, %v1257_v1  ;;  %v1634_v49 = vpack.c.bf16 %v1266_v51, %v1258_v56  ;;  %v1635_v37 = vpack.c.bf16 %v1267_v25, %v1259_v5 }
 0x3af   : > { %v3324_v41 = vadd.f32 %v3323_v21, %v3155_v7  ;;  %v6920_v21 = vpop.permute.xlu0 %3978  ;;  %v4396_v7 = vpop.permute.xlu1 %4395  ;;  %v762_v56 = vunpack.c.0.s8 %v6930_v35  ;;  %v770_v51 = vunpack.c.1.s8 %v6930_v35  ;;  %v763_v25 = vunpack.c.0.s8 %v6934_v31 }
 0x3b0   : > { %4203 = vmatmul.bf16.gmra.mxu0 %v4067_v52  ;;  %v3156_v17 = vpop.f32.mrf.mxu1  ;;  %v6918_v52 = vld [vmem:[%s7334_s3] ss:$0 sm:$0xff] }
 0x3b1   : > { %v3492_v24 = vpop.f32.mrf.mxu3  ;;  %v3157_v10 = vadd.f32 %v3156_v17, %v6210_v59 }
 0x3b2   : > { %v3493_v34 = vadd.f32 %v3492_v24, %v3324_v41  ;;  %v6925_v24 = vld [vmem:[%s5656_s17 + $0x268] sm:$0xff] }
 0x3b3   : > { %v769_v1 = vunpack.c.1.s8 %v6925_v24 }
 0x3b4   : > { %v4012_v59 = vmul.f32 %v6770_v8, %v3493_v34 }
 0x3b6   : > { %v3325_v61 = vpop.f32.mrf.mxu2 }
 0x3b7   : > { %v3326_v47 = vadd.f32 %v3325_v61, %v3157_v10  ;;  %v771_v10 = vunpack.c.1.s8 %v6934_v31 }
 0x3b8   : > { %v3159_v16 = vpop.f32.mrf.mxu1 }
 0x3b9   : > { %v3494_v12 = vpop.f32.mrf.mxu3  ;;  %v3160_v61 = vadd.f32 %v3159_v16, %v6234_v23 }
 0x3ba   : > { %v3495_v39 = vadd.f32 %v3494_v12, %v3326_v47  ;;  %v1281_v47 = vcvt.s32.f32 %v769_v1 }
 0x3bb   : > { %3198 = vmatmul.bf16.gmra.mxu1 %v1633_v60  ;;  %3367 = vmatmul.bf16.gmra.mxu2 %v1634_v49  ;;  %v1274_v60 = vcvt.s32.f32 %v762_v56  ;;  %v1282_v49 = vcvt.s32.f32 %v770_v51 }
 0x3bc   : > { %v4013_v28 = vmul.f32 %v6777_v27, %v3495_v39  ;;  %v761_v27 = vunpack.c.0.s8 %v6925_v24 }
 0x3bd   : > { %v4169_v55 = vpop.f32.mrf.mxu0 }
 0x3be   : > { %3536 = vmatmul.bf16.gmra.mxu3 %v1635_v37  ;;  %v4170_v17 = vadd.f32 %v6918_v52, %v4169_v55  ;;  %v4068_v54 = vpack.c.bf16 %v4013_v28, %v4012_v59  ;;  %v3328_v8 = vpop.f32.mrf.mxu2  ;;  %v1273_v34 = vcvt.s32.f32 %v761_v27  ;;  %v6950_v37 = vpop.permute.xlu0 %3993  ;;  %v1275_v59 = vcvt.s32.f32 %v763_v25 }
 0x3bf   : > { %v3329_v12 = vadd.f32 %v3328_v8, %v3160_v61  ;;  %7471 = vst [vmem:[#allocation72_spill] sm:$0xff] %v6950_v37  ;;  %v1283_v28 = vcvt.s32.f32 %v771_v10  ;;  %v1642_v8 = vpack.c.bf16 %v1282_v49, %v1274_v60  ;;  %v777_v49 = vunpack.c.2.s8 %v6925_v24 }
 0x3c0   : > { %v4713_v41 = vmul.f32 %v4396_v7, %v4170_v17  ;;  %4208 = vmatmul.bf16.gmra.mxu0 %v4068_v54  ;;  %v3161_v5 = vpop.f32.mrf.mxu1  ;;  %v4401_v54 = vpop.permute.xlu2 %4400  ;;  %v1641_v0 = vpack.c.bf16 %v1281_v47, %v1273_v34 }
 0x3c1   : > { %v3497_v15 = vpop.f32.mrf.mxu3  ;;  %v3162_v55 = vadd.f32 %v3161_v5, %v6242_v13  ;;  %v1643_v51 = vpack.c.bf16 %v1283_v28, %v1275_v59  ;;  %v787_v28 = vunpack.c.3.s8 %v6934_v31 }
 0x3c2   : > { %4777 = vst [vmem:[%s6940_s29] sm:$0xff] %v4713_v41  ;;  %v3498_v23 = vadd.f32 %v3497_v15, %v3329_v12  ;;  %v4910_v61 = vmul.f32 %v4713_v41, %v4713_v41 }
 0x3c4   : > { %v4014_v10 = vmul.f32 %v6783_v43, %v3498_v23  ;;  %v778_v43 = vunpack.c.2.s8 %v6930_v35 }
 0x3c5   : > { %v4171_v39 = vpop.f32.mrf.mxu0 }
 0x3c6   : > { %v4172_v17 = vadd.f32 %v6918_v52, %v4171_v39  ;;  %v3330_v7 = vpop.f32.mrf.mxu2  ;;  %v4406_v12 = vpop.permute.xlu0 %4405 }
 0x3c7   : > { %v3331_v27 = vadd.f32 %v3330_v7, %v3162_v55  ;;  %v1289_v7 = vcvt.s32.f32 %v777_v49 }
 0x3c8   : > { %v4714_v16 = vmul.f32 %v4401_v54, %v4172_v17  ;;  %v3164_v56 = vpop.f32.mrf.mxu1 }
 0x3c9   : > { %v3499_v1 = vpop.f32.mrf.mxu3  ;;  %v3165_v55 = vadd.f32 %v3164_v56, %v6263_v57 }
 0x3ca   : > { %4778 = vst [vmem:[%s6940_s29 + $0x8] sm:$0xff] %v4714_v16  ;;  %v4841_v37 = vadd.f32 %v4714_v16, %v4713_v41  ;;  %v4911_v14 = vmul.f32 %v4714_v16, %v4714_v16  ;;  %v3500_v25 = vadd.f32 %v3499_v1, %v3331_v27  ;;  %v785_v41 = vunpack.c.3.s8 %v6925_v24 }
 0x3cb   : > { %3203 = vmatmul.bf16.gmra.mxu1 %v1641_v0  ;;  %3372 = vmatmul.bf16.gmra.mxu2 %v1642_v8  ;;  %v779_v0 = vunpack.c.2.s8 %v6934_v31  ;;  %v1290_v27 = vcvt.s32.f32 %v778_v43  ;;  %v4411_v31 = vpop.permute.xlu1 %4410  ;;  %v7473_v43 = vld [vmem:[#allocation61_spill] sm:$0xff] }
 0x3cc   : > { %v4974_v13 = vadd.f32 %v4911_v14, %v4910_v61  ;;  %v4015_v5 = vmul.f32 %v6779_v2, %v3500_v25  ;;  %v786_v2 = vunpack.c.3.s8 %v6930_v35  ;;  %v1297_v23 = vcvt.s32.f32 %v785_v41 }
 0x3cd   : > { %v4174_v15 = vpop.f32.mrf.mxu0  ;;  %v1299_v35 = vcvt.s32.f32 %v787_v28 }
 0x3ce   : > { %3541 = vmatmul.bf16.gmra.mxu3 %v1643_v51  ;;  %v4175_v34 = vadd.f32 %v6918_v52, %v4174_v15  ;;  %v4069_v47 = vpack.c.bf16 %v4015_v5, %v4014_v10  ;;  %v3333_v60 = vpop.f32.mrf.mxu2  ;;  %v1298_v1 = vcvt.s32.f32 %v786_v2  ;;  %v1291_v51 = vcvt.s32.f32 %v779_v0  ;;  %v6975_v0 = vld [vmem:[%s5656_s17 + $0x2b0] sm:$0xff] }
 0x3cf   : > { %v3334_v16 = vadd.f32 %v3333_v60, %v3165_v55  ;;  %v1649_v57 = vpack.c.bf16 %v1297_v23, %v1289_v7 }
 0x3d0   : > { %v4715_v39 = vmul.f32 %v4406_v12, %v4175_v34  ;;  %4213 = vmatmul.bf16.gmra.mxu0 %v4069_v47  ;;  %v3166_v14 = vpop.f32.mrf.mxu1  ;;  %v1651_v47 = vpack.c.bf16 %v1299_v35, %v1291_v51 }
 0x3d1   : > { %v3502_v59 = vpop.f32.mrf.mxu3  ;;  %v3167_v61 = vadd.f32 %v3166_v14, %v6271_v63  ;;  %v7472_v63 = vld [vmem:[#allocation59_spill] sm:$0xff] }
 0x3d2   : > { %4779 = vst [vmem:[%s6940_s29 + $0x10] sm:$0xff] %v4715_v39  ;;  %v4842_v17 = vadd.f32 %v4841_v37, %v4715_v39  ;;  %v4912_v54 = vmul.f32 %v4715_v39, %v4715_v39  ;;  %v3503_v56 = vadd.f32 %v3502_v59, %v3334_v16  ;;  %v6972_v59 = vld [vmem:[%s5656_s17 + $0x2a8] sm:$0xff] }
 0x3d3   : > { %v793_v23 = vunpack.c.0.s8 %v6972_v59 }
 0x3d4   : > { %v4975_v24 = vadd.f32 %v4974_v13, %v4912_v54  ;;  %v1650_v13 = vpack.c.bf16 %v1298_v1, %v1290_v27  ;;  %v4016_v41 = vmul.f32 %v7472_v63, %v3503_v56  ;;  %v4416_v54 = vpop.permute.xlu2 %4415  ;;  %v794_v1 = vunpack.c.0.s8 %v6975_v0 }
 0x3d5   : > { %v4176_v8 = vpop.f32.mrf.mxu0  ;;  %v1305_v56 = vcvt.s32.f32 %v793_v23 }
 0x3d6   : > { %v4177_v25 = vadd.f32 %v6918_v52, %v4176_v8  ;;  %v3335_v10 = vpop.f32.mrf.mxu2  ;;  %v802_v8 = vunpack.c.1.s8 %v6975_v0 }
 0x3d7   : > { %v3336_v5 = vadd.f32 %v3335_v10, %v3167_v61 }
 0x3d8   : > { %v4716_v37 = vmul.f32 %v4411_v31, %v4177_v25  ;;  %v3169_v34 = vpop.f32.mrf.mxu1  ;;  %v7474_v25 = vld [vmem:[#allocation33_spill] sm:$0xff] }
 0x3d9   : > { %v3504_v15 = vpop.f32.mrf.mxu3  ;;  %v3170_v31 = vadd.f32 %v3169_v34, %v7474_v25 }
 0x3da   : > { %4780 = vst [vmem:[%s6940_s29 + $0x18] sm:$0xff] %v4716_v37  ;;  %v4843_v12 = vadd.f32 %v4842_v17, %v4716_v37  ;;  %v4913_v60 = vmul.f32 %v4716_v37, %v4716_v37  ;;  %v3505_v49 = vadd.f32 %v3504_v15, %v3336_v5  ;;  %v6979_v17 = vld [vmem:[%s5656_s17 + $0x2b8] sm:$0xff] }
 0x3db   : > { %3208 = vmatmul.bf16.gmra.mxu1 %v1649_v57  ;;  %3377 = vmatmul.bf16.gmra.mxu2 %v1650_v13  ;;  %v795_v35 = vunpack.c.0.s8 %v6979_v17  ;;  %v803_v61 = vunpack.c.1.s8 %v6979_v17  ;;  %v1306_v13 = vcvt.s32.f32 %v794_v1 }
 0x3dc   : > { %v4976_v39 = vadd.f32 %v4975_v24, %v4913_v60  ;;  %v4017_v2 = vmul.f32 %v7473_v43, %v3505_v49  ;;  %v801_v24 = vunpack.c.1.s8 %v6972_v59 }
 0x3dd   : > { %v4179_v14 = vpop.f32.mrf.mxu0  ;;  %v1307_v49 = vcvt.s32.f32 %v795_v35  ;;  %v1315_v63 = vcvt.s32.f32 %v803_v61  ;;  %v7476_v35 = vld [vmem:[#allocation60_spill] sm:$0xff] }
 0x3de   : > { %3546 = vmatmul.bf16.gmra.mxu3 %v1651_v47  ;;  %v4180_v28 = vadd.f32 %v6918_v52, %v4179_v14  ;;  %v4070_v55 = vpack.c.bf16 %v4017_v2, %v4016_v41  ;;  %v3338_v7 = vpop.f32.mrf.mxu2  ;;  %v1313_v37 = vcvt.s32.f32 %v801_v24  ;;  %v1314_v47 = vcvt.s32.f32 %v802_v8  ;;  %v7475_v41 = vld [vmem:[#allocation34_spill] sm:$0xff]  ;;  %v4421_v14 = vpop.permute.xlu0 %4420 }
 0x3df   : > { %v3339_v15 = vadd.f32 %v3338_v7, %v3170_v31  ;;  %v1659_v7 = vpack.c.bf16 %v1315_v63, %v1307_v49  ;;  %v818_v49 = vunpack.c.3.s8 %v6975_v0 }
 0x3e0   : > { %v4717_v16 = vmul.f32 %v4416_v54, %v4180_v28  ;;  %4218 = vmatmul.bf16.gmra.mxu0 %v4070_v55  ;;  %v3171_v51 = vpop.f32.mrf.mxu1  ;;  %v1657_v34 = vpack.c.bf16 %v1313_v37, %v1305_v56  ;;  %v1658_v24 = vpack.c.bf16 %v1314_v47, %v1306_v13  ;;  %v4426_v37 = vpop.permute.xlu1 %4425  ;;  %v809_v13 = vunpack.c.2.s8 %v6972_v59 }
 0x3e1   : > { %v3507_v27 = vpop.f32.mrf.mxu3  ;;  %v3172_v43 = vadd.f32 %v3171_v51, %v7475_v41  ;;  %v7477_v51 = vld [vmem:[#allocation62_spill] sm:$0xff]  ;;  %v811_v41 = vunpack.c.2.s8 %v6979_v17 }
 0x3e2   : > { %4781 = vst [vmem:[%s6940_s29 + $0x20] sm:$0xff] %v4717_v16  ;;  %v4844_v10 = vadd.f32 %v4843_v12, %v4717_v16  ;;  %v4914_v57 = vmul.f32 %v4717_v16, %v4717_v16  ;;  %v3508_v55 = vadd.f32 %v3507_v27, %v3339_v15 }
 0x3e4   : > { %v4977_v5 = vadd.f32 %v4976_v39, %v4914_v57  ;;  %v4018_v61 = vmul.f32 %v7476_v35, %v3508_v55  ;;  %v1321_v55 = vcvt.s32.f32 %v809_v13 }
 0x3e5   : > { %v4181_v60 = vpop.f32.mrf.mxu0 }
 0x3e6   : > { %v4182_v2 = vadd.f32 %v6918_v52, %v4181_v60  ;;  %v3340_v28 = vpop.f32.mrf.mxu2 }
 0x3e7   : > { %v3341_v54 = vadd.f32 %v3340_v28, %v3172_v43  ;;  %v819_v43 = vunpack.c.3.s8 %v6979_v17  ;;  %v4431_v17 = vpop.permute.xlu2 %4430 }
 0x3e8   : > { %v4718_v12 = vmul.f32 %v4421_v14, %v4182_v2  ;;  %v3174_v39 = vpop.f32.mrf.mxu1  ;;  %v7478_v2 = vld [vmem:[#allocation35_spill] sm:$0xff] }
 0x3e9   : > { %v3509_v23 = vpop.f32.mrf.mxu3  ;;  %v3175_v14 = vadd.f32 %v3174_v39, %v7478_v2  ;;  %v7012_v2 = vld [vmem:[%s5656_s17 + $0x2f0] sm:$0xff] }
 0x3ea   : > { %4782 = vst [vmem:[%s6940_s29 + $0x28] sm:$0xff] %v4718_v12  ;;  %v4845_v16 = vadd.f32 %v4844_v10, %v4718_v12  ;;  %v4915_v1 = vmul.f32 %v4718_v12, %v4718_v12  ;;  %v3510_v8 = vadd.f32 %v3509_v23, %v3341_v54  ;;  %v817_v10 = vunpack.c.3.s8 %v6972_v59 }
 0x3eb   : > { %3213 = vmatmul.bf16.gmra.mxu1 %v1657_v34  ;;  %3382 = vmatmul.bf16.gmra.mxu2 %v1658_v24  ;;  %v1330_v24 = vcvt.s32.f32 %v818_v49 }
 0x3ec   : > { %v4978_v25 = vadd.f32 %v4977_v5, %v4915_v1  ;;  %v4019_v31 = vmul.f32 %v7477_v51, %v3510_v8  ;;  %v810_v5 = vunpack.c.2.s8 %v6975_v0  ;;  %v1329_v12 = vcvt.s32.f32 %v817_v10  ;;  %v7479_v8 = vld [vmem:[#allocation36_spill] sm:$0xff] }
 0x3ed   : > { %v4184_v57 = vpop.f32.mrf.mxu0  ;;  %v1323_v1 = vcvt.s32.f32 %v811_v41  ;;  %v1331_v0 = vcvt.s32.f32 %v819_v43 }
 0x3ee   : > { %3551 = vmatmul.bf16.gmra.mxu3 %v1659_v7  ;;  %v4185_v27 = vadd.f32 %v6918_v52, %v4184_v57  ;;  %v4071_v56 = vpack.c.bf16 %v4019_v31, %v4018_v61  ;;  %v3343_v15 = vpop.f32.mrf.mxu2  ;;  %v1322_v23 = vcvt.s32.f32 %v810_v5  ;;  %v1665_v39 = vpack.c.bf16 %v1329_v12, %v1321_v55  ;;  %v4436_v55 = vpop.permute.xlu0 %4435 }
 0x3ef   : > { %v3344_v54 = vadd.f32 %v3343_v15, %v3175_v14 }
 0x3f0   : > { %v4719_v47 = vmul.f32 %v4426_v37, %v4185_v27  ;;  %4223 = vmatmul.bf16.gmra.mxu0 %v4071_v56  ;;  %v3176_v63 = vpop.f32.mrf.mxu1  ;;  %v1667_v37 = vpack.c.bf16 %v1331_v0, %v1323_v1  ;;  %v834_v1 = vunpack.c.1.s8 %v7012_v2 }
 0x3f1   : > { %v3512_v60 = vpop.f32.mrf.mxu3  ;;  %v3177_v35 = vadd.f32 %v3176_v63, %v7479_v8  ;;  %v7481_v63 = vld [vmem:[#allocation63_spill] sm:$0xff] }
 0x3f2   : > { %4783 = vst [vmem:[%s6940_s29 + $0x30] sm:$0xff] %v4719_v47  ;;  %v4846_v28 = vadd.f32 %v4845_v16, %v4719_v47  ;;  %v4916_v34 = vmul.f32 %v4719_v47, %v4719_v47  ;;  %v3513_v31 = vadd.f32 %v3512_v60, %v3344_v54  ;;  %v7480_v47 = vld [vmem:[#allocation29_spill] sm:$0xff]  ;;  %v7009_v60 = vld [vmem:[%s5656_s17 + $0x2e8] sm:$0xff] }
 0x3f3   : > { %v833_v54 = vunpack.c.1.s8 %v7009_v60 }
 0x3f4   : > { %v4979_v59 = vadd.f32 %v4978_v25, %v4916_v34  ;;  %v1666_v25 = vpack.c.bf16 %v1330_v24, %v1322_v23  ;;  %v4020_v5 = vmul.f32 %v7480_v47, %v3513_v31 }
 0x3f5   : > { %v4186_v7 = vpop.f32.mrf.mxu0 }
 0x3f6   : > { %v4187_v61 = vadd.f32 %v6918_v52, %v4186_v7  ;;  %v3345_v51 = vpop.f32.mrf.mxu2  ;;  %v826_v7 = vunpack.c.0.s8 %v7012_v2 }
 0x3f7   : > { %v3346_v57 = vadd.f32 %v3345_v51, %v3177_v35 }
 0x3f8   : > { %v4720_v16 = vmul.f32 %v4431_v17, %v4187_v61  ;;  %v3179_v56 = vpop.f32.mrf.mxu1  ;;  %v7482_v61 = vld [vmem:[#allocation37_spill] sm:$0xff] }
 0x3f9   : > { %v3514_v27 = vpop.f32.mrf.mxu3  ;;  %v3180_v17 = vadd.f32 %v3179_v56, %v7482_v61 }
 0x3fa   : > { %4784 = vst [vmem:[%s6940_s29 + $0x38] sm:$0xff] %v4720_v16  ;;  %v4847_v15 = vadd.f32 %v4846_v28, %v4720_v16  ;;  %v4917_v13 = vmul.f32 %v4720_v16, %v4720_v16  ;;  %v3515_v10 = vadd.f32 %v3514_v27, %v3346_v57  ;;  %v7016_v28 = vld [vmem:[%s5656_s17 + $0x2f8] sm:$0xff]  ;;  %v1345_v16 = vcvt.s32.f32 %v833_v54 }
 0x3fb   : > { %3218 = vmatmul.bf16.gmra.mxu1 %v1665_v39  ;;  %3387 = vmatmul.bf16.gmra.mxu2 %v1666_v25  ;;  %v827_v8 = vunpack.c.0.s8 %v7016_v28  ;;  %v835_v35 = vunpack.c.1.s8 %v7016_v28  ;;  %v1338_v25 = vcvt.s32.f32 %v826_v7 }
 0x3fc   : > { %v4980_v49 = vadd.f32 %v4979_v59, %v4917_v13  ;;  %v4021_v41 = vmul.f32 %v7481_v63, %v3515_v10  ;;  %v825_v59 = vunpack.c.0.s8 %v7009_v60 }
 0x3fd   : > { %v4189_v43 = vpop.f32.mrf.mxu0  ;;  %v1339_v10 = vcvt.s32.f32 %v827_v8  ;;  %v1347_v47 = vcvt.s32.f32 %v835_v35 }
 0x3fe   : > { %3556 = vmatmul.bf16.gmra.mxu3 %v1667_v37  ;;  %v4190_v14 = vadd.f32 %v6918_v52, %v4189_v43  ;;  %v4072_v34 = vpack.c.bf16 %v4021_v41, %v4020_v5  ;;  %v3348_v12 = vpop.f32.mrf.mxu2  ;;  %v1337_v31 = vcvt.s32.f32 %v825_v59  ;;  %v1346_v37 = vcvt.s32.f32 %v834_v1  ;;  %v7483_v5 = vld [vmem:[#allocation38_spill] sm:$0xff]  ;;  %v4441_v43 = vpop.permute.xlu1 %4440 }
 0x3ff   : > { %v3349_v27 = vadd.f32 %v3348_v12, %v3180_v17  ;;  %v1675_v12 = vpack.c.bf16 %v1347_v47, %v1339_v10  ;;  %v7484_v10 = vld [vmem:[#allocation39_spill] sm:$0xff] }
 0x400   : > { %v4721_v23 = vmul.f32 %v4436_v55, %v4190_v14  ;;  %4228 = vmatmul.bf16.gmra.mxu0 %v4072_v34  ;;  %v3181_v0 = vpop.f32.mrf.mxu1  ;;  %v1673_v56 = vpack.c.bf16 %v1345_v16, %v1337_v31  ;;  %v1674_v54 = vpack.c.bf16 %v1346_v37, %v1338_v25  ;;  %v841_v16 = vunpack.c.2.s8 %v7009_v60 }
 0x401   : > { %v3517_v24 = vpop.f32.mrf.mxu3  ;;  %v3182_v63 = vadd.f32 %v3181_v0, %v7483_v5  ;;  %v843_v37 = vunpack.c.2.s8 %v7016_v28 }
 0x402   : > { %4785 = vst [vmem:[%s6940_s29 + $0x40] sm:$0xff] %v4721_v23  ;;  %v4848_v51 = vadd.f32 %v4847_v15, %v4721_v23  ;;  %v4918_v39 = vmul.f32 %v4721_v23, %v4721_v23  ;;  %v3518_v34 = vadd.f32 %v3517_v24, %v3349_v27 }
 0x404   : > { %v4981_v57 = vadd.f32 %v4980_v49, %v4918_v39  ;;  %v4022_v8 = vmul.f32 %v6805_v42, %v3518_v34  ;;  %v4446_v39 = vpop.permute.xlu2 %4445  ;;  %v842_v42 = vunpack.c.2.s8 %v7012_v2 }
 0x405   : > { %v4191_v13 = vpop.f32.mrf.mxu0 }
 0x406   : > { %v4192_v41 = vadd.f32 %v6918_v52, %v4191_v13  ;;  %v3350_v14 = vpop.f32.mrf.mxu2  ;;  %v851_v13 = vunpack.c.3.s8 %v7016_v28  ;;  %v4451_v28 = vpop.permute.xlu0 %4450 }
 0x407   : > { %v3351_v55 = vadd.f32 %v3350_v14, %v3182_v63 }
 0x408   : > { %v4722_v15 = vmul.f32 %v4441_v43, %v4192_v41  ;;  %v3184_v49 = vpop.f32.mrf.mxu1  ;;  %v1353_v41 = vcvt.s32.f32 %v841_v16 }
 0x409   : > { %v3519_v59 = vpop.f32.mrf.mxu3  ;;  %v3185_v47 = vadd.f32 %v3184_v49, %v7484_v10  ;;  %v4456_v10 = vpop.permute.xlu1 %4455 }
 0x40a   : > { %4786 = vst [vmem:[%s6940_s29 + $0x48] sm:$0xff] %v4722_v15  ;;  %v4849_v23 = vadd.f32 %v4848_v51, %v4722_v15  ;;  %v4919_v7 = vmul.f32 %v4722_v15, %v4722_v15  ;;  %v3520_v1 = vadd.f32 %v3519_v59, %v3351_v55  ;;  %v849_v51 = vunpack.c.3.s8 %v7009_v60  ;;  %v7485_v59 = vld [vmem:[#allocation40_spill] sm:$0xff] }
 0x40b   : > { %3223 = vmatmul.bf16.gmra.mxu1 %v1673_v56  ;;  %3392 = vmatmul.bf16.gmra.mxu2 %v1674_v54  ;;  %v1354_v56 = vcvt.s32.f32 %v842_v42  ;;  %v1355_v55 = vcvt.s32.f32 %v843_v37 }
 0x40c   : > { %v4982_v35 = vadd.f32 %v4981_v57, %v4919_v7  ;;  %v4023_v0 = vmul.f32 %v6812_v48, %v3520_v1  ;;  %v850_v48 = vunpack.c.3.s8 %v7012_v2  ;;  %v1361_v43 = vcvt.s32.f32 %v849_v51 }
 0x40d   : > { %v4194_v61 = vpop.f32.mrf.mxu0  ;;  %v1363_v2 = vcvt.s32.f32 %v851_v13  ;;  %v7053_v13 = vld [vmem:[%s5656_s17 + $0x338] sm:$0xff] }
 0x40e   : > { %3561 = vmatmul.bf16.gmra.mxu3 %v1675_v12  ;;  %v4195_v24 = vadd.f32 %v6918_v52, %v4194_v61  ;;  %v4073_v17 = vpack.c.bf16 %v4023_v0, %v4022_v8  ;;  %v3353_v31 = vpop.f32.mrf.mxu2  ;;  %v1362_v34 = vcvt.s32.f32 %v850_v48  ;;  %v1681_v49 = vpack.c.bf16 %v1361_v43, %v1353_v41  ;;  %v7049_v48 = vld [vmem:[%s5656_s17 + $0x330] sm:$0xff] }
 0x40f   : > { %v3354_v14 = vadd.f32 %v3353_v31, %v3185_v47  ;;  %v858_v41 = vunpack.c.0.s8 %v7049_v48  ;;  %v866_v43 = vunpack.c.1.s8 %v7049_v48 }
 0x410   : > { %v4723_v27 = vmul.f32 %v4446_v39, %v4195_v24  ;;  %4233 = vmatmul.bf16.gmra.mxu0 %v4073_v17  ;;  %v3186_v57 = vpop.f32.mrf.mxu1  ;;  %v1683_v24 = vpack.c.bf16 %v1363_v2, %v1355_v55 }
 0x411   : > { %v3522_v25 = vpop.f32.mrf.mxu3  ;;  %v3187_v54 = vadd.f32 %v3186_v57, %v7485_v59 }
 0x412   : > { %4787 = vst [vmem:[%s6940_s29 + $0x50] sm:$0xff] %v4723_v27  ;;  %v4850_v5 = vadd.f32 %v4849_v23, %v4723_v27  ;;  %v4920_v63 = vmul.f32 %v4723_v27, %v4723_v27  ;;  %v3523_v1 = vadd.f32 %v3522_v25, %v3354_v14  ;;  %v7046_v25 = vld [vmem:[%s5656_s17 + $0x328] sm:$0xff]  ;;  %v859_v14 = vunpack.c.0.s8 %v7053_v13 }
 0x414   : > { %v4983_v60 = vadd.f32 %v4982_v35, %v4920_v63  ;;  %v1682_v35 = vpack.c.bf16 %v1362_v34, %v1354_v56  ;;  %v4024_v16 = vmul.f32 %v6808_v20, %v3523_v1  ;;  %v857_v20 = vunpack.c.0.s8 %v7046_v25  ;;  %v7486_v34 = vld [vmem:[#allocation41_spill] sm:$0xff] }
 0x415   : > { %v4196_v15 = vpop.f32.mrf.mxu0  ;;  %v867_v56 = vunpack.c.1.s8 %v7053_v13 }
 0x416   : > { %v4197_v12 = vadd.f32 %v6918_v52, %v4196_v15  ;;  %v3355_v7 = vpop.f32.mrf.mxu2  ;;  %v1369_v59 = vcvt.s32.f32 %v857_v20 }
 0x417   : > { %v3356_v8 = vadd.f32 %v3355_v7, %v3187_v54  ;;  %v1370_v7 = vcvt.s32.f32 %v858_v41  ;;  %v7488_v41 = vld [vmem:[#allocation64_spill] sm:$0xff] }
 0x418   : > { %v4724_v23 = vmul.f32 %v4451_v28, %v4197_v12  ;;  %v3189_v61 = vpop.f32.mrf.mxu1 }
 0x419   : > { %v3524_v0 = vpop.f32.mrf.mxu3  ;;  %v3190_v15 = vadd.f32 %v3189_v61, %v7486_v34 }
 0x41a   : > { %4788 = vst [vmem:[%s6940_s29 + $0x58] sm:$0xff] %v4724_v23  ;;  %v4851_v17 = vadd.f32 %v4850_v5, %v4724_v23  ;;  %v4921_v39 = vmul.f32 %v4724_v23, %v4724_v23  ;;  %v3525_v31 = vadd.f32 %v3524_v0, %v3356_v8  ;;  %v1371_v23 = vcvt.s32.f32 %v859_v14  ;;  %v7487_v0 = vld [vmem:[#allocation42_spill] sm:$0xff] }
 0x41b   : > { %3228 = vmatmul.bf16.gmra.mxu1 %v1681_v49  ;;  %3397 = vmatmul.bf16.gmra.mxu2 %v1682_v35  ;;  %v1378_v49 = vcvt.s32.f32 %v866_v43  ;;  %v1379_v8 = vcvt.s32.f32 %v867_v56  ;;  %v4466_v56 = vpop.permute.xlu0 %4465 }
 0x41c   : > { %v4984_v51 = vadd.f32 %v4983_v60, %v4921_v39  ;;  %v4025_v27 = vmul.f32 %v6814_v19, %v3525_v31  ;;  %v865_v19 = vunpack.c.1.s8 %v7046_v25  ;;  %v4461_v39 = vpop.permute.xlu2 %4460 }
 0x41d   : > { %v4199_v42 = vpop.f32.mrf.mxu0 }
 0x41e   : > { %3566 = vmatmul.bf16.gmra.mxu3 %v1683_v24  ;;  %v4200_v57 = vadd.f32 %v6918_v52, %v4199_v42  ;;  %v4074_v37 = vpack.c.bf16 %v4025_v27, %v4024_v16  ;;  %v3358_v47 = vpop.f32.mrf.mxu2  ;;  %v1377_v54 = vcvt.s32.f32 %v865_v19 }
 0x41f   : > { %v3359_v28 = vadd.f32 %v3358_v47, %v3190_v15  ;;  %v873_v15 = vunpack.c.2.s8 %v7046_v25 }
 0x420   : > { %v4725_v5 = vmul.f32 %v4456_v10, %v4200_v57  ;;  %4238 = vmatmul.bf16.gmra.mxu0 %v4074_v37  ;;  %v3191_v60 = vpop.f32.mrf.mxu1  ;;  %v1689_v61 = vpack.c.bf16 %v1377_v54, %v1369_v59  ;;  %v1690_v57 = vpack.c.bf16 %v1378_v49, %v1370_v7  ;;  %v1691_v37 = vpack.c.bf16 %v1379_v8, %v1371_v23  ;;  %v7489_v49 = vld [vmem:[#allocation43_spill] sm:$0xff] }
 0x421   : > { %v3527_v63 = vpop.f32.mrf.mxu3  ;;  %v3192_v35 = vadd.f32 %v3191_v60, %v7487_v0  ;;  %v882_v54 = vunpack.c.3.s8 %v7049_v48  ;;  %v883_v7 = vunpack.c.3.s8 %v7053_v13  ;;  %v1385_v0 = vcvt.s32.f32 %v873_v15  ;;  %v7492_v15 = vld [vmem:[#allocation66_spill] sm:$0xff] }
 0x422   : > { %4789 = vst [vmem:[%s6940_s29 + $0x60] sm:$0xff] %v4725_v5  ;;  %v4852_v55 = vadd.f32 %v4851_v17, %v4725_v5  ;;  %v4922_v2 = vmul.f32 %v4725_v5, %v4725_v5  ;;  %v3528_v16 = vadd.f32 %v3527_v63, %v3359_v28  ;;  %v875_v28 = vunpack.c.2.s8 %v7053_v13  ;;  %v4471_v13 = vpop.permute.xlu1 %4470 }
 0x424   : > { %v4985_v12 = vadd.f32 %v4984_v51, %v4922_v2  ;;  %v4026_v19 = vmul.f32 %v6820_v36, %v3528_v16  ;;  %v874_v36 = vunpack.c.2.s8 %v7049_v48  ;;  %v1387_v16 = vcvt.s32.f32 %v875_v28  ;;  %v7090_v28 = vld [vmem:[%s5656_s17 + $0x378] sm:$0xff] }
 0x425   : > { %v4201_v1 = vpop.f32.mrf.mxu0  ;;  %v1395_v48 = vcvt.s32.f32 %v883_v7  ;;  %v4476_v7 = vpop.permute.xlu2 %4475 }
 0x426   : > { %v4202_v24 = vadd.f32 %v6918_v52, %v4201_v1  ;;  %v3360_v31 = vpop.f32.mrf.mxu2 }
 0x427   : > { %v3361_v27 = vadd.f32 %v3360_v31, %v3192_v35  ;;  %v1394_v31 = vcvt.s32.f32 %v882_v54 }
 0x428   : > { %v4726_v17 = vmul.f32 %v4461_v39, %v4202_v24  ;;  %v3194_v51 = vpop.f32.mrf.mxu1  ;;  %v1386_v39 = vcvt.s32.f32 %v874_v36  ;;  %v7086_v36 = vld [vmem:[%s5656_s17 + $0x370] sm:$0xff] }
 0x429   : > { %v3529_v42 = vpop.f32.mrf.mxu3  ;;  %v3195_v1 = vadd.f32 %v3194_v51, %v7489_v49 }
 0x42a   : > { %4790 = vst [vmem:[%s6940_s29 + $0x68] sm:$0xff] %v4726_v17  ;;  %v4853_v10 = vadd.f32 %v4852_v55, %v4726_v17  ;;  %v4923_v47 = vmul.f32 %v4726_v17, %v4726_v17  ;;  %v3530_v20 = vadd.f32 %v3529_v42, %v3361_v27  ;;  %v881_v55 = vunpack.c.3.s8 %v7046_v25  ;;  %v7490_v17 = vld [vmem:[#allocation44_spill] sm:$0xff] }
 0x42b   : > { %3233 = vmatmul.bf16.gmra.mxu1 %v1689_v61  ;;  %3402 = vmatmul.bf16.gmra.mxu2 %v1690_v57 }
 0x42c   : > { %v4986_v5 = vadd.f32 %v4985_v12, %v4923_v47  ;;  %v4027_v43 = vmul.f32 %v7488_v41, %v3530_v20  ;;  %v1393_v35 = vcvt.s32.f32 %v881_v55  ;;  %v1699_v41 = vpack.c.bf16 %v1395_v48, %v1387_v16 }
 0x42d   : > { %v4204_v60 = vpop.f32.mrf.mxu0 }
 0x42e   : > { %3571 = vmatmul.bf16.gmra.mxu3 %v1691_v37  ;;  %v4205_v63 = vadd.f32 %v6918_v52, %v4204_v60  ;;  %v4075_v14 = vpack.c.bf16 %v4027_v43, %v4026_v19  ;;  %v3363_v34 = vpop.f32.mrf.mxu2  ;;  %v1697_v51 = vpack.c.bf16 %v1393_v35, %v1385_v0  ;;  %v1698_v19 = vpack.c.bf16 %v1394_v31, %v1386_v39 }
 0x42f   : > { %v3364_v24 = vadd.f32 %v3363_v34, %v3195_v1  ;;  %v890_v35 = vunpack.c.0.s8 %v7086_v36  ;;  %v891_v39 = vunpack.c.0.s8 %v7090_v28  ;;  %v899_v31 = vunpack.c.1.s8 %v7090_v28 }
 0x430   : > { %v4727_v2 = vmul.f32 %v4466_v56, %v4205_v63  ;;  %4243 = vmatmul.bf16.gmra.mxu0 %v4075_v14  ;;  %v3196_v12 = vpop.f32.mrf.mxu1  ;;  %v7491_v14 = vld [vmem:[#allocation30_spill] sm:$0xff] }
 0x431   : > { %v3532_v59 = vpop.f32.mrf.mxu3  ;;  %v3197_v27 = vadd.f32 %v3196_v12, %v7490_v17 }
 0x432   : > { %4791 = vst [vmem:[%s6940_s29 + $0x70] sm:$0xff] %v4727_v2  ;;  %v4854_v23 = vadd.f32 %v4853_v10, %v4727_v2  ;;  %v4924_v8 = vmul.f32 %v4727_v2, %v4727_v2  ;;  %v3533_v37 = vadd.f32 %v3532_v59, %v3364_v24  ;;  %v7083_v2 = vld [vmem:[%s5656_s17 + $0x368] sm:$0xff] }
 0x433   : > { %v889_v1 = vunpack.c.0.s8 %v7083_v2 }
 0x434   : > { %v4987_v25 = vadd.f32 %v4986_v5, %v4924_v8  ;;  %v4028_v56 = vmul.f32 %v7491_v14, %v3533_v37 }
 0x435   : > { %v4206_v61 = vpop.f32.mrf.mxu0 }
 0x436   : > { %v4207_v42 = vadd.f32 %v6918_v52, %v4206_v61  ;;  %v3365_v57 = vpop.f32.mrf.mxu2  ;;  %v7493_v61 = vld [vmem:[#allocation45_spill] sm:$0xff] }
 0x437   : > { %v3366_v47 = vadd.f32 %v3365_v57, %v3197_v27  ;;  %v1401_v27 = vcvt.s32.f32 %v889_v1  ;;  %v7495_v1 = vld [vmem:[#allocation65_spill] sm:$0xff] }
 0x438   : > { %v4728_v10 = vmul.f32 %v4471_v13, %v4207_v42  ;;  %v3199_v5 = vpop.f32.mrf.mxu1 }
 0x439   : > { %v3534_v20 = vpop.f32.mrf.mxu3  ;;  %v3200_v16 = vadd.f32 %v3199_v5, %v7493_v61 }
 0x43a   : > { %4792 = vst [vmem:[%s6940_s29 + $0x78] sm:$0xff] %v4728_v10  ;;  %v4855_v43 = vadd.f32 %v4854_v23, %v4728_v10  ;;  %v4925_v60 = vmul.f32 %v4728_v10, %v4728_v10  ;;  %v3535_v63 = vadd.f32 %v3534_v20, %v3366_v47  ;;  %v897_v23 = vunpack.c.1.s8 %v7083_v2 }
 0x43b   : > { %3238 = vmatmul.bf16.gmra.mxu1 %v1697_v51  ;;  %3407 = vmatmul.bf16.gmra.mxu2 %v1698_v19  ;;  %v1402_v51 = vcvt.s32.f32 %v890_v35  ;;  %v1403_v47 = vcvt.s32.f32 %v891_v39  ;;  %v1411_v20 = vcvt.s32.f32 %v899_v31  ;;  %v7494_v19 = vld [vmem:[#allocation46_spill] sm:$0xff]  ;;  %v7496_v35 = vld [vmem:[#allocation31_spill] sm:$0xff]  ;;  %v4486_v31 = vpop.permute.xlu1 %4485 }
 0x43c   : > { %v4988_v34 = vadd.f32 %v4987_v25, %v4925_v60  ;;  %v4029_v55 = vmul.f32 %v7492_v15, %v3535_v63  ;;  %v898_v25 = vunpack.c.1.s8 %v7086_v36  ;;  %v1409_v42 = vcvt.s32.f32 %v897_v23  ;;  %v4481_v63 = vpop.permute.xlu0 %4480 }
 0x43d   : > { %v4209_v59 = vpop.f32.mrf.mxu0 }
 0x43e   : > { %3576 = vmatmul.bf16.gmra.mxu3 %v1699_v41  ;;  %v4210_v54 = vadd.f32 %v6918_v52, %v4209_v59  ;;  %v4076_v12 = vpack.c.bf16 %v4029_v55, %v4028_v56  ;;  %v3368_v49 = vpop.f32.mrf.mxu2  ;;  %v1410_v37 = vcvt.s32.f32 %v898_v25  ;;  %v1705_v5 = vpack.c.bf16 %v1409_v42, %v1401_v27 }
 0x43f   : > { %v3369_v57 = vadd.f32 %v3368_v49, %v3200_v16  ;;  %v905_v16 = vunpack.c.2.s8 %v7083_v2  ;;  %v906_v42 = vunpack.c.2.s8 %v7086_v36 }
 0x440   : > { %v4729_v8 = vmul.f32 %v4476_v7, %v4210_v54  ;;  %4248 = vmatmul.bf16.gmra.mxu0 %v4076_v12  ;;  %v3201_v24 = vpop.f32.mrf.mxu1  ;;  %v1706_v59 = vpack.c.bf16 %v1410_v37, %v1402_v51  ;;  %v1707_v54 = vpack.c.bf16 %v1411_v20, %v1403_v47  ;;  %v907_v51 = vunpack.c.2.s8 %v7090_v28 }
 0x441   : > { %v3537_v0 = vpop.f32.mrf.mxu3  ;;  %v3202_v41 = vadd.f32 %v3201_v24, %v7494_v19  ;;  %v915_v37 = vunpack.c.3.s8 %v7090_v28  ;;  %v4491_v28 = vpop.permute.xlu2 %4490 }
 0x442   : > { %4793 = vst [vmem:[%s6940_s29 + $0x80] sm:$0xff] %v4729_v8  ;;  %v4856_v48 = vadd.f32 %v4855_v43, %v4729_v8  ;;  %v4926_v17 = vmul.f32 %v4729_v8, %v4729_v8  ;;  %v3538_v56 = vadd.f32 %v3537_v0, %v3369_v57 }
 0x444   : > { %v4989_v13 = vadd.f32 %v4988_v34, %v4926_v17  ;;  %v4030_v23 = vmul.f32 %v7495_v1, %v3538_v56 }
 0x445   : > { %v4211_v10 = vpop.f32.mrf.mxu0 }
 0x446   : > { %v4212_v60 = vadd.f32 %v6918_v52, %v4211_v10  ;;  %v3370_v14 = vpop.f32.mrf.mxu2  ;;  %v7497_v10 = vld [vmem:[#allocation6_spill] sm:$0xff] }
 0x447   : > { %v3371_v15 = vadd.f32 %v3370_v14, %v3202_v41  ;;  %v1417_v41 = vcvt.s32.f32 %v905_v16  ;;  %v1418_v14 = vcvt.s32.f32 %v906_v42  ;;  %v7132_v42 = vld [vmem:[%s5656_s17 + $0x3b8] sm:$0xff] }
 0x448   : > { %v4730_v43 = vmul.f32 %v4481_v63, %v4212_v60  ;;  %v3204_v34 = vpop.f32.mrf.mxu1 }
 0x449   : > { %v3539_v55 = vpop.f32.mrf.mxu3  ;;  %v3205_v47 = vadd.f32 %v3204_v34, %v7497_v10 }
 0x44a   : > { %4794 = vst [vmem:[%s6940_s29 + $0x88] sm:$0xff] %v4730_v43  ;;  %v4857_v12 = vadd.f32 %v4856_v48, %v4730_v43  ;;  %v4927_v7 = vmul.f32 %v4730_v43, %v4730_v43  ;;  %v3540_v49 = vadd.f32 %v3539_v55, %v3371_v15  ;;  %v913_v48 = vunpack.c.3.s8 %v7083_v2  ;;  %v7498_v15 = vld [vmem:[#allocation8_spill] sm:$0xff] }
 0x44b   : > { %3243 = vmatmul.bf16.gmra.mxu1 %v1705_v5  ;;  %3412 = vmatmul.bf16.gmra.mxu2 %v1706_v59  ;;  %v1419_v43 = vcvt.s32.f32 %v907_v51 }
 0x44c   : > { %v4990_v8 = vadd.f32 %v4989_v13, %v4927_v7  ;;  %v4031_v25 = vmul.f32 %v7496_v35, %v3540_v49  ;;  %v914_v13 = vunpack.c.3.s8 %v7086_v36  ;;  %v1425_v60 = vcvt.s32.f32 %v913_v48  ;;  %v7123_v48 = vld [vmem:[%s5656_s17 + $0x3b0] sm:$0xff] }
 0x44d   : > { %v4214_v24 = vpop.f32.mrf.mxu0  ;;  %v1427_v36 = vcvt.s32.f32 %v915_v37 }
 0x44e   : > { %3581 = vmatmul.bf16.gmra.mxu3 %v1707_v54  ;;  %v4215_v0 = vadd.f32 %v6918_v52, %v4214_v24  ;;  %v4077_v39 = vpack.c.bf16 %v4031_v25, %v4030_v23  ;;  %v3373_v61 = vpop.f32.mrf.mxu2  ;;  %v1426_v5 = vcvt.s32.f32 %v914_v13  ;;  %v1713_v34 = vpack.c.bf16 %v1425_v60, %v1417_v41 }
 0x44f   : > { %v3374_v63 = vadd.f32 %v3373_v61, %v3205_v47  ;;  %v1715_v35 = vpack.c.bf16 %v1427_v36, %v1419_v43  ;;  %v7120_v61 = vld [vmem:[%s5656_s17 + $0x3a8] sm:$0xff]  ;;  %v922_v47 = vunpack.c.0.s8 %v7123_v48  ;;  %v923_v41 = vunpack.c.0.s8 %v7132_v42 }
 0x450   : > { %v4731_v17 = vmul.f32 %v4486_v31, %v4215_v0  ;;  %4253 = vmatmul.bf16.gmra.mxu0 %v4077_v39  ;;  %v3206_v57 = vpop.f32.mrf.mxu1  ;;  %v1714_v23 = vpack.c.bf16 %v1426_v5, %v1418_v14  ;;  %v929_v51 = vunpack.c.1.s8 %v7120_v61  ;;  %v931_v60 = vunpack.c.1.s8 %v7132_v42 }
 0x451   : > { %v3542_v27 = vpop.f32.mrf.mxu3  ;;  %v3207_v55 = vadd.f32 %v3206_v57, %v7498_v15  ;;  %v921_v57 = vunpack.c.0.s8 %v7120_v61 }
 0x452   : > { %4795 = vst [vmem:[%s6940_s29 + $0x90] sm:$0xff] %v4731_v17  ;;  %v4858_v20 = vadd.f32 %v4857_v12, %v4731_v17  ;;  %v4928_v19 = vmul.f32 %v4731_v17, %v4731_v17  ;;  %v3543_v7 = vadd.f32 %v3542_v27, %v3374_v63  ;;  %v7128_v17 = vld [vmem:[%s7334_s3] ss:$0 sm:$0xff]  ;;  %v1441_v43 = vcvt.s32.f32 %v929_v51 }
 0x454   : > { %v4991_v2 = vadd.f32 %v4990_v8, %v4928_v19  ;;  %v4032_v39 = vmul.f32 %v6839_v62, %v3543_v7  ;;  %v7500_v7 = vld [vmem:[#allocation12_spill] sm:$0xff] }
 0x455   : > { %v4216_v56 = vpop.f32.mrf.mxu0 }
 0x456   : > { %v4217_v59 = vadd.f32 %v6918_v52, %v4216_v56  ;;  %v3375_v54 = vpop.f32.mrf.mxu2  ;;  %v1433_v56 = vcvt.s32.f32 %v921_v57 }
 0x457   : > { %v3376_v49 = vadd.f32 %v3375_v54, %v3207_v55  ;;  %v1434_v55 = vcvt.s32.f32 %v922_v47  ;;  %v1435_v54 = vcvt.s32.f32 %v923_v41  ;;  %v4506_v47 = vpop.permute.xlu2 %4505  ;;  %v945_v41 = vunpack.c.3.s8 %v7120_v61 }
 0x458   : > { %v4732_v12 = vmul.f32 %v4491_v28, %v4217_v59  ;;  %v3209_v8 = vpop.f32.mrf.mxu1 }
 0x459   : > { %v3544_v1 = vpop.f32.mrf.mxu3 }
 0x45a   : > { %4796 = vst [vmem:[%s6940_s29 + $0x98] sm:$0xff] %v4732_v12  ;;  %v4859_v25 = vadd.f32 %v4858_v20, %v4732_v12  ;;  %v4929_v24 = vmul.f32 %v4732_v12, %v4732_v12  ;;  %v3545_v0 = vadd.f32 %v3544_v1, %v3376_v49  ;;  %v930_v20 = vunpack.c.1.s8 %v7123_v48  ;;  %v4501_v1 = vpop.permute.xlu1 %4500 }
 0x45b   : > { %3248 = vmatmul.bf16.gmra.mxu1 %v1713_v34  ;;  %3417 = vmatmul.bf16.gmra.mxu2 %v1714_v23  ;;  %v1443_v34 = vcvt.s32.f32 %v931_v60 }
 0x45c   : > { %v4992_v52 = vadd.f32 %v4991_v2, %v4929_v24  ;;  %v4033_v31 = vmul.f32 %v6836_v50, %v3545_v0  ;;  %v4496_v50 = vpop.permute.xlu0 %4495  ;;  %v7499_v2 = vld [vmem:[#allocation10_spill] sm:$0xff]  ;;  %v1442_v59 = vcvt.s32.f32 %v930_v20 }
 0x45d   : > { %v4219_v16 = vpop.f32.mrf.mxu0  ;;  %v3210_v63 = vadd.f32 %v3209_v8, %v7499_v2  ;;  %v1721_v8 = vpack.c.bf16 %v1441_v43, %v1433_v56  ;;  %v7501_v56 = vld [vmem:[#allocation14_spill] sm:$0xff] }
 0x45e   : > { %3586 = vmatmul.bf16.gmra.mxu3 %v1715_v35  ;;  %v4220_v27 = vadd.f32 %v7128_v17, %v4219_v16  ;;  %v4078_v62 = vpack.c.bf16 %v4033_v31, %v4032_v39  ;;  %v3378_v13 = vpop.f32.mrf.mxu2  ;;  %v1722_v39 = vpack.c.bf16 %v1442_v59, %v1434_v55  ;;  %v1723_v31 = vpack.c.bf16 %v1443_v34, %v1435_v54  ;;  %v7502_v55 = vld [vmem:[#allocation16_spill] sm:$0xff]  ;;  %v7503_v59 = vld [vmem:[#allocation47_spill] sm:$0xff] }
 0x45f   : > { %v3379_v15 = vadd.f32 %v3378_v13, %v3210_v63  ;;  %v1457_v54 = vcvt.s32.f32 %v945_v41 }
 0x460   : > { %v4733_v37 = vmul.f32 %v4496_v50, %v4220_v27  ;;  %4258 = vmatmul.bf16.gmra.mxu0 %v4078_v62  ;;  %v3211_v19 = vpop.f32.mrf.mxu1 }
 0x461   : > { %v3547_v10 = vpop.f32.mrf.mxu3  ;;  %v3212_v12 = vadd.f32 %v3211_v19, %v7500_v7  ;;  %v937_v19 = vunpack.c.2.s8 %v7120_v61  ;;  %v3048_v61 = vadd.f32 %v7503_v59, %v7502_v55  ;;  %v7504_v55 = vld [vmem:[#allocation18_spill] sm:$0xff] }
 0x462   : > { %4797 = vst [vmem:[%s6940_s29 + $0xa0] sm:$0xff] %v4733_v37  ;;  %v4860_v14 = vadd.f32 %v4859_v25, %v4733_v37  ;;  %v4930_v5 = vmul.f32 %v4733_v37, %v4733_v37  ;;  %v3548_v35 = vadd.f32 %v3547_v10, %v3379_v15 }
 0x464   : > { %v4993_v36 = vadd.f32 %v4992_v52, %v4930_v5  ;;  %v4034_v50 = vmul.f32 %v6843_v32, %v3548_v35  ;;  %v938_v32 = vunpack.c.2.s8 %v7123_v48  ;;  %v947_v5 = vunpack.c.3.s8 %v7132_v42  ;;  %v4511_v35 = vpop.permute.xlu0 %4510 }
 0x465   : > { %v4221_v28 = vpop.f32.mrf.mxu0 }
 0x466   : > { %v4222_v49 = vadd.f32 %v7128_v17, %v4221_v28  ;;  %v3380_v23 = vpop.f32.mrf.mxu2  ;;  %v1449_v28 = vcvt.s32.f32 %v937_v19  ;;  %v7166_v19 = vld [vmem:[%s5656_s17 + $0x3f0] sm:$0xff] }
 0x467   : > { %v3381_v24 = vadd.f32 %v3380_v23, %v3212_v12  ;;  %v1450_v12 = vcvt.s32.f32 %v938_v32  ;;  %v1459_v23 = vcvt.s32.f32 %v947_v5  ;;  %v4516_v32 = vpop.permute.xlu1 %4515  ;;  %v954_v5 = vunpack.c.0.s8 %v7166_v19 }
 0x468   : > { %v4734_v25 = vmul.f32 %v4501_v1, %v4222_v49  ;;  %v3214_v52 = vpop.f32.mrf.mxu1 }
 0x469   : > { %v3549_v0 = vpop.f32.mrf.mxu3  ;;  %v3215_v43 = vadd.f32 %v3214_v52, %v7501_v56  ;;  %v962_v56 = vunpack.c.1.s8 %v7166_v19 }
 0x46a   : > { %4798 = vst [vmem:[%s6940_s29 + $0xa8] sm:$0xff] %v4734_v25  ;;  %v4861_v16 = vadd.f32 %v4860_v14, %v4734_v25  ;;  %v4931_v27 = vmul.f32 %v4734_v25, %v4734_v25  ;;  %v3550_v62 = vadd.f32 %v3549_v0, %v3381_v24  ;;  %v939_v14 = vunpack.c.2.s8 %v7132_v42 }
 0x46b   : > { %3253 = vmatmul.bf16.gmra.mxu1 %v1721_v8  ;;  %3422 = vmatmul.bf16.gmra.mxu2 %v1722_v39  ;;  %v1729_v24 = vpack.c.bf16 %v1457_v54, %v1449_v28  ;;  %v7505_v54 = vld [vmem:[#allocation20_spill] sm:$0xff] }
 0x46c   : > { %v4994_v13 = vadd.f32 %v4993_v36, %v4931_v27  ;;  %v4035_v57 = vmul.f32 %v6848_v6, %v3550_v62  ;;  %v946_v6 = vunpack.c.3.s8 %v7123_v48  ;;  %v1451_v1 = vcvt.s32.f32 %v939_v14 }
 0x46d   : > { %v4224_v51 = vpop.f32.mrf.mxu0 }
 0x46e   : > { %3591 = vmatmul.bf16.gmra.mxu3 %v1723_v31  ;;  %v4225_v37 = vadd.f32 %v7128_v17, %v4224_v51  ;;  %v4079_v10 = vpack.c.bf16 %v4035_v57, %v4034_v50  ;;  %v3383_v20 = vpop.f32.mrf.mxu2  ;;  %v1458_v49 = vcvt.s32.f32 %v946_v6  ;;  %v1731_v62 = vpack.c.bf16 %v1459_v23, %v1451_v1 }
 0x46f   : > { %v3384_v7 = vadd.f32 %v3383_v20, %v3215_v43  ;;  %v1466_v23 = vcvt.s32.f32 %v954_v5 }
 0x470   : > { %v4735_v60 = vmul.f32 %v4506_v47, %v4225_v37  ;;  %4263 = vmatmul.bf16.gmra.mxu0 %v4079_v10  ;;  %v3216_v63 = vpop.f32.mrf.mxu1  ;;  %v7163_v47 = vld [vmem:[%s5656_s17 + $0x3e8] sm:$0xff] }
 0x471   : > { %v3552_v2 = vpop.f32.mrf.mxu3  ;;  %v3217_v8 = vadd.f32 %v3216_v63, %v3048_v61  ;;  %v969_v5 = vunpack.c.2.s8 %v7163_v47 }
 0x472   : > { %4799 = vst [vmem:[%s6940_s29 + $0xb0] sm:$0xff] %v4735_v60  ;;  %v4862_v36 = vadd.f32 %v4861_v16, %v4735_v60  ;;  %v4932_v15 = vmul.f32 %v4735_v60, %v4735_v60  ;;  %v3553_v0 = vadd.f32 %v3552_v2, %v3384_v7  ;;  %v1730_v16 = vpack.c.bf16 %v1458_v49, %v1450_v12  ;;  %v7170_v2 = vld [vmem:[%s5656_s17 + $0x3f8] sm:$0xff] }
 0x474   : > { %v4995_v34 = vadd.f32 %v4994_v13, %v4932_v15  ;;  %v4036_v51 = vmul.f32 %v6845_v45, %v3553_v0  ;;  %v953_v45 = vunpack.c.0.s8 %v7163_v47  ;;  %v963_v15 = vunpack.c.1.s8 %v7170_v2 }
 0x475   : > { %v4226_v48 = vpop.f32.mrf.mxu0 }
 0x476   : > { %v4227_v42 = vadd.f32 %v7128_v17, %v4226_v48  ;;  %v3385_v25 = vpop.f32.mrf.mxu2  ;;  %v1465_v12 = vcvt.s32.f32 %v953_v45 }
 0x477   : > { %v3386_v52 = vadd.f32 %v3385_v25, %v3217_v8  ;;  %v1474_v8 = vcvt.s32.f32 %v962_v56  ;;  %v1475_v25 = vcvt.s32.f32 %v963_v15  ;;  %v977_v56 = vunpack.c.3.s8 %v7163_v47 }
 0x478   : > { %v4736_v39 = vmul.f32 %v4511_v35, %v4227_v42  ;;  %v3219_v27 = vpop.f32.mrf.mxu1 }
 0x479   : > { %v3554_v31 = vpop.f32.mrf.mxu3  ;;  %v3220_v59 = vadd.f32 %v3219_v27, %v7504_v55  ;;  %v971_v55 = vunpack.c.2.s8 %v7170_v2 }
 0x47a   : > { %4800 = vst [vmem:[%s6940_s29 + $0xb8] sm:$0xff] %v4736_v39  ;;  %v4863_v50 = vadd.f32 %v4862_v36, %v4736_v39  ;;  %v4933_v13 = vmul.f32 %v4736_v39, %v4736_v39  ;;  %v3555_v57 = vadd.f32 %v3554_v31, %v3386_v52  ;;  %v955_v36 = vunpack.c.0.s8 %v7170_v2  ;;  %v4521_v39 = vpop.permute.xlu2 %4520 }
 0x47b   : > { %3258 = vmatmul.bf16.gmra.mxu1 %v1729_v24  ;;  %3427 = vmatmul.bf16.gmra.mxu2 %v1730_v16 }
 0x47c   : > { %v4996_v37 = vadd.f32 %v4995_v34, %v4933_v13  ;;  %v4037_v10 = vmul.f32 %v6851_v46, %v3555_v57  ;;  %v961_v46 = vunpack.c.1.s8 %v7163_v47  ;;  %v7506_v34 = vld [vmem:[#allocation48_spill] sm:$0xff]  ;;  %v1467_v35 = vcvt.s32.f32 %v955_v36 }
 0x47d   : > { %v4229_v20 = vpop.f32.mrf.mxu0  ;;  %v3053_v7 = vadd.f32 %v7506_v34, %v7505_v54  ;;  %v1738_v13 = vpack.c.bf16 %v1474_v8, %v1466_v23 }
 0x47e   : > { %3596 = vmatmul.bf16.gmra.mxu3 %v1731_v62  ;;  %v4230_v41 = vadd.f32 %v7128_v17, %v4229_v20  ;;  %v4080_v60 = vpack.c.bf16 %v4037_v10, %v4036_v51  ;;  %v3388_v6 = vpop.f32.mrf.mxu2  ;;  %v1473_v49 = vcvt.s32.f32 %v961_v46  ;;  %v1739_v51 = vpack.c.bf16 %v1475_v25, %v1467_v35 }
 0x47f   : > { %v3389_v1 = vadd.f32 %v3388_v6, %v3220_v59  ;;  %v979_v59 = vunpack.c.3.s8 %v7170_v2  ;;  %v1483_v35 = vcvt.s32.f32 %v971_v55  ;;  %v7513_v55 = vld [vmem:[#allocation50_spill] sm:$0xff] }
 0x480   : > { %v4737_v63 = vmul.f32 %v4516_v32, %v4230_v41  ;;  %4268 = vmatmul.bf16.gmra.mxu0 %v4080_v60  ;;  %v3221_v43 = vpop.f32.mrf.mxu1  ;;  %v1737_v31 = vpack.c.bf16 %v1473_v49, %v1465_v12  ;;  %v7509_v12 = vld [vmem:[#allocation49_spill] sm:$0xff]  ;;  %v1481_v49 = vcvt.s32.f32 %v969_v5 }
 0x481   : > { %v3557_v14 = vpop.f32.mrf.mxu3  ;;  %v3222_v24 = vadd.f32 %v3221_v43, %v3053_v7  ;;  %v7508_v7 = vld [vmem:[#allocation24_spill] sm:$0xff]  ;;  %v1491_v25 = vcvt.s32.f32 %v979_v59 }
 0x482   : > { %4801 = vst [vmem:[%s6940_s29 + $0xc0] sm:$0xff] %v4737_v63  ;;  %v4864_v61 = vadd.f32 %v4863_v50, %v4737_v63  ;;  %v4934_v28 = vmul.f32 %v4737_v63, %v4737_v63  ;;  %v3558_v16 = vadd.f32 %v3557_v14, %v3389_v1  ;;  %v4526_v63 = vpop.permute.xlu0 %4525  ;;  %v3058_v47 = vadd.f32 %v7509_v12, %v7508_v7 }
 0x484   : > { %v4997_v48 = vadd.f32 %v4996_v37, %v4934_v28  ;;  %v4038_v41 = vmul.f32 %v6860_v3, %v3558_v16  ;;  %v970_v3 = vunpack.c.2.s8 %v7166_v19 }
 0x485   : > { %v4231_v42 = vpop.f32.mrf.mxu0 }
 0x486   : > { %v4232_v0 = vadd.f32 %v7128_v17, %v4231_v42  ;;  %v3390_v52 = vpop.f32.mrf.mxu2  ;;  %v1482_v8 = vcvt.s32.f32 %v970_v3 }
 0x487   : > { %v3391_v62 = vadd.f32 %v3390_v52, %v3222_v24 }
 0x488   : > { %v4738_v27 = vmul.f32 %v4521_v39, %v4232_v0  ;;  %v3224_v57 = vpop.f32.mrf.mxu1  ;;  %v4531_v0 = vpop.permute.xlu1 %4530 }
 0x489   : > { %v3559_v50 = vpop.f32.mrf.mxu3 }
 0x48a   : > { %4802 = vst [vmem:[%s6940_s29 + $0xc8] sm:$0xff] %v4738_v27  ;;  %v4865_v37 = vadd.f32 %v4864_v61, %v4738_v27  ;;  %v4935_v10 = vmul.f32 %v4738_v27, %v4738_v27  ;;  %v3560_v20 = vadd.f32 %v3559_v50, %v3391_v62  ;;  %v7507_v61 = vld [vmem:[#allocation22_spill] sm:$0xff]  ;;  %v4541_v12 = vpop.permute.xlu0 %4540 }
 0x48b   : > { %3263 = vmatmul.bf16.gmra.mxu1 %v1737_v31  ;;  %3432 = vmatmul.bf16.gmra.mxu2 %v1738_v13  ;;  %v3225_v28 = vadd.f32 %v3224_v57, %v7507_v61  ;;  %v1747_v57 = vpack.c.bf16 %v1491_v25, %v1483_v35  ;;  %v7514_v25 = vld [vmem:[#allocation68_spill] sm:$0xff] }
 0x48c   : > { %v4998_v60 = vadd.f32 %v4997_v48, %v4935_v10  ;;  %v4039_v32 = vmul.f32 %v6853_v26, %v3560_v20  ;;  %v978_v26 = vunpack.c.3.s8 %v7166_v19  ;;  %v1489_v48 = vcvt.s32.f32 %v977_v56  ;;  %v7510_v20 = vld [vmem:[#allocation67_spill] sm:$0xff] }
 0x48d   : > { %v4234_v6 = vpop.f32.mrf.mxu0 }
 0x48e   : > { %3601 = vmatmul.bf16.gmra.mxu3 %v1739_v51  ;;  %v4235_v45 = vadd.f32 %v7128_v17, %v4234_v6  ;;  %v4081_v46 = vpack.c.bf16 %v4039_v32, %v4038_v41  ;;  %v3393_v14 = vpop.f32.mrf.mxu2  ;;  %v1490_v42 = vcvt.s32.f32 %v978_v26  ;;  %v1745_v52 = vpack.c.bf16 %v1489_v48, %v1481_v49 }
 0x48f   : > { %v3394_v23 = vadd.f32 %v3393_v14, %v3225_v28 }
 0x490   : > { %v4739_v43 = vmul.f32 %v4526_v63, %v4235_v45  ;;  %4273 = vmatmul.bf16.gmra.mxu0 %v4081_v46  ;;  %v3226_v15 = vpop.f32.mrf.mxu1  ;;  %v1746_v50 = vpack.c.bf16 %v1490_v42, %v1482_v8  ;;  %v4536_v63 = vpop.permute.xlu2 %4535 }
 0x491   : > { %v3562_v36 = vpop.f32.mrf.mxu3  ;;  %v3227_v24 = vadd.f32 %v3226_v15, %v3058_v47 }
 0x492   : > { %4803 = vst [vmem:[%s6940_s29 + $0xd0] sm:$0xff] %v4739_v43  ;;  %v4866_v54 = vadd.f32 %v4865_v37, %v4739_v43  ;;  %v4936_v34 = vmul.f32 %v4739_v43, %v4739_v43  ;;  %v3563_v31 = vadd.f32 %v3562_v36, %v3394_v23  ;;  %v7511_v36 = vld [vmem:[#allocation26_spill] sm:$0xff] }
 0x494   : > { %v4999_v1 = vadd.f32 %v4998_v60, %v4936_v34  ;;  %v4040_v41 = vmul.f32 %v7510_v20, %v3563_v31  ;;  %v7516_v20 = vld [vmem:[#allocation3_spill] sm:$0xff] }
 0x495   : > { %v4236_v19 = vpop.f32.mrf.mxu0 }
 0x496   : > { %v4237_v2 = vadd.f32 %v7128_v17, %v4236_v19  ;;  %v3395_v39 = vpop.f32.mrf.mxu2 }
 0x497   : > { %v3396_v27 = vadd.f32 %v3395_v39, %v3227_v24 }
 0x498   : > { %v4740_v16 = vmul.f32 %v4531_v0, %v4237_v2  ;;  %v3229_v13 = vpop.f32.mrf.mxu1 }
 0x499   : > { %v3564_v62 = vpop.f32.mrf.mxu3  ;;  %v3230_v3 = vadd.f32 %v3229_v13, %v7511_v36 }
 0x49a   : > { %4804 = vst [vmem:[%s6940_s29 + $0xd8] sm:$0xff] %v4740_v16  ;;  %v4867_v51 = vadd.f32 %v4866_v54, %v4740_v16  ;;  %v4937_v37 = vmul.f32 %v4740_v16, %v4740_v16  ;;  %v3565_v10 = vadd.f32 %v3564_v62, %v3396_v27  ;;  %v4546_v16 = vpop.permute.xlu1 %4545 }
 0x49b   : > { %3268 = vmatmul.bf16.gmra.mxu1 %v1745_v52  ;;  %3437 = vmatmul.bf16.gmra.mxu2 %v1746_v50 }
 0x49c   : > { %v5000_v60 = vadd.f32 %v4999_v1, %v4937_v37  ;;  %v4041_v32 = vmul.f32 %v6868_v9, %v3565_v10  ;;  %v7512_v9 = vld [vmem:[#allocation28_spill] sm:$0xff] }
 0x49d   : > { %v4239_v6 = vpop.f32.mrf.mxu0  ;;  %v3063_v59 = vadd.f32 %v7513_v55, %v7512_v9 }
 0x49e   : > { %3606 = vmatmul.bf16.gmra.mxu3 %v1747_v57  ;;  %v4240_v45 = vadd.f32 %v7128_v17, %v4239_v6  ;;  %v4082_v46 = vpack.c.bf16 %v4041_v32, %v4040_v41  ;;  %v3398_v14 = vpop.f32.mrf.mxu2  ;;  %v7515_v57 = vld [vmem:[#allocation2_spill] sm:$0xff]  ;;  %v7517_v41 = vld [vmem:[#allocation51_spill] sm:$0xff] }
 0x49f   : > { %v3399_v28 = vadd.f32 %v3398_v14, %v3230_v3 }
 0x4a0   : > { %v4741_v5 = vmul.f32 %v4536_v63, %v4240_v45  ;;  %4278 = vmatmul.bf16.gmra.mxu0 %v4082_v46  ;;  %v3231_v43 = vpop.f32.mrf.mxu1  ;;  %v4551_v63 = vpop.permute.xlu2 %4550 }
 0x4a1   : > { %v3567_v56 = vpop.f32.mrf.mxu3  ;;  %v3232_v34 = vadd.f32 %v3231_v43, %v3063_v59 }
 0x4a2   : > { %4805 = vst [vmem:[%s6940_s29 + $0xe0] sm:$0xff] %v4741_v5  ;;  %v4868_v26 = vadd.f32 %v4867_v51, %v4741_v5  ;;  %v4938_v15 = vmul.f32 %v4741_v5, %v4741_v5  ;;  %v3568_v49 = vadd.f32 %v3567_v56, %v3399_v28 }
 0x4a4   : > { %v5001_v61 = vadd.f32 %v5000_v60, %v4938_v15  ;;  %v4042_v24 = vmul.f32 %v7514_v25, %v3568_v49  ;;  %v3068_v60 = vadd.f32 %v7517_v41, %v7516_v20 }
 0x4a5   : > { %v4241_v54 = vpop.f32.mrf.mxu0 }
 0x4a6   : > { %v4242_v7 = vadd.f32 %v7128_v17, %v4241_v54  ;;  %v3400_v47 = vpop.f32.mrf.mxu2 }
 0x4a7   : > { %v3401_v1 = vadd.f32 %v3400_v47, %v3232_v34 }
 0x4a8   : > { %v4742_v48 = vmul.f32 %v4541_v12, %v4242_v7  ;;  %v3234_v8 = vpop.f32.mrf.mxu1  ;;  %v4556_v7 = vpop.permute.xlu0 %4555 }
 0x4a9   : > { %v3569_v23 = vpop.f32.mrf.mxu3  ;;  %v3235_v51 = vadd.f32 %v3234_v8, %v7515_v57 }
 0x4aa   : > { %4806 = vst [vmem:[%s6940_s29 + $0xe8] sm:$0xff] %v4742_v48  ;;  %v4869_v42 = vadd.f32 %v4868_v26, %v4742_v48  ;;  %v4939_v19 = vmul.f32 %v4742_v48, %v4742_v48  ;;  %v3570_v35 = vadd.f32 %v3569_v23, %v3401_v1  ;;  %v7518_v1 = vld [vmem:[#allocation4_spill] sm:$0xff] }
 0x4ac   : > { %v5002_v2 = vadd.f32 %v5001_v61, %v4939_v19  ;;  %v4043_v0 = vmul.f32 %v6870_v22, %v3570_v35  ;;  %v7520_v19 = vld [vmem:[#allocation52_spill] sm:$0xff] }
 0x4ad   : > { %v4244_v39 = vpop.f32.mrf.mxu0 }
 0x4ae   : > { %v4245_v52 = vadd.f32 %v7128_v17, %v4244_v39  ;;  %v4083_v31 = vpack.c.bf16 %v4043_v0, %v4042_v24  ;;  %v3403_v27 = vpop.f32.mrf.mxu2  ;;  %v4561_v39 = vpop.permute.xlu1 %4560 }
 0x4af   : > { %v3404_v32 = vadd.f32 %v3403_v27, %v3235_v51 }
 0x4b0   : > { %v4743_v62 = vmul.f32 %v4546_v16, %v4245_v52  ;;  %4283 = vmatmul.bf16.gmra.mxu0 %v4083_v31  ;;  %v3236_v13 = vpop.f32.mrf.mxu1 }
 0x4b1   : > { %v3572_v50 = vpop.f32.mrf.mxu3  ;;  %v3237_v45 = vadd.f32 %v3236_v13, %v3068_v60 }
 0x4b2   : > { %4807 = vst [vmem:[%s6940_s29 + $0xf0] sm:$0xff] %v4743_v62  ;;  %v4870_v37 = vadd.f32 %v4869_v42, %v4743_v62  ;;  %v4940_v10 = vmul.f32 %v4743_v62, %v4743_v62  ;;  %v3573_v5 = vadd.f32 %v3572_v50, %v3404_v32  ;;  %v4566_v32 = vpop.permute.xlu2 %4565 }
 0x4b4   : > { %v5003_v22 = vadd.f32 %v5002_v2, %v4940_v10  ;;  %v4044_v55 = vmul.f32 %v6877_v11, %v3573_v5  ;;  %v7519_v11 = vld [vmem:[#allocation5_spill] sm:$0xff] }
 0x4b5   : > { %v4246_v6 = vpop.f32.mrf.mxu0  ;;  %v3073_v35 = vadd.f32 %v7520_v19, %v7519_v11 }
 0x4b6   : > { %v4247_v46 = vadd.f32 %v7128_v17, %v4246_v6  ;;  %v3405_v14 = vpop.f32.mrf.mxu2 }
 0x4b7   : > { %v3406_v43 = vadd.f32 %v3405_v14, %v3237_v45  ;;  %v7521_v14 = vld [vmem:[#allocation7_spill] sm:$0xff] }
 0x4b8   : > { %v4744_v56 = vmul.f32 %v4551_v63, %v4247_v46  ;;  %v3239_v3 = vpop.f32.mrf.mxu1 }
 0x4b9   : > { %v3574_v36 = vpop.f32.mrf.mxu3  ;;  %v3240_v23 = vadd.f32 %v3239_v3, %v7518_v1 }
 0x4ba   : > { %4808 = vst [vmem:[%s6940_s29 + $0xf8] sm:$0xff] %v4744_v56  ;;  %v4871_v26 = vadd.f32 %v4870_v37, %v4744_v56  ;;  %v4941_v15 = vmul.f32 %v4744_v56, %v4744_v56  ;;  %v3575_v9 = vadd.f32 %v3574_v36, %v3406_v43  ;;  %v7523_v36 = vld [vmem:[#allocation53_spill] sm:$0xff] }
 0x4bc   : > { %v5004_v59 = vadd.f32 %v5003_v22, %v4941_v15  ;;  %v4045_v61 = vmul.f32 %v6874_v4, %v3575_v9 }
 0x4bd   : > { %v4249_v28 = vpop.f32.mrf.mxu0 }
 0x4be   : > { %v4250_v54 = vadd.f32 %v7128_v17, %v4249_v28  ;;  %v4084_v34 = vpack.c.bf16 %v4045_v61, %v4044_v55  ;;  %v3408_v12 = vpop.f32.mrf.mxu2 }
 0x4bf   : > { %v3409_v25 = vadd.f32 %v3408_v12, %v3240_v23 }
 0x4c0   : > { %v4745_v47 = vmul.f32 %v4556_v7, %v4250_v54  ;;  %4288 = vmatmul.bf16.gmra.mxu0 %v4084_v34  ;;  %v3241_v48 = vpop.f32.mrf.mxu1 }
 0x4c1   : > { %v3577_v49 = vpop.f32.mrf.mxu3  ;;  %v3242_v2 = vadd.f32 %v3241_v48, %v3073_v35 }
 0x4c2   : > { %4809 = vst [vmem:[%s6940_s29 + $0x100] sm:$0xff] %v4745_v47  ;;  %v4872_v8 = vadd.f32 %v4871_v26, %v4745_v47  ;;  %v4942_v42 = vmul.f32 %v4745_v47, %v4745_v47  ;;  %v3578_v31 = vadd.f32 %v3577_v49, %v3409_v25 }
 0x4c4   : > { %v5005_v4 = vadd.f32 %v5004_v59, %v4942_v42  ;;  %v4046_v37 = vmul.f32 %v6879_v30, %v3578_v31  ;;  %v7522_v30 = vld [vmem:[#allocation9_spill] sm:$0xff]  ;;  %v4571_v59 = vpop.permute.xlu0 %4570 }
 0x4c5   : > { %v4251_v24 = vpop.f32.mrf.mxu0  ;;  %v3078_v3 = vadd.f32 %v7523_v36, %v7522_v30 }
 0x4c6   : > { %v4252_v0 = vadd.f32 %v7128_v17, %v4251_v24  ;;  %v3410_v52 = vpop.f32.mrf.mxu2 }
 0x4c7   : > { %v3411_v27 = vadd.f32 %v3410_v52, %v3242_v2 }
 0x4c8   : > { %v4746_v16 = vmul.f32 %v4561_v39, %v4252_v0  ;;  %v3244_v50 = vpop.f32.mrf.mxu1  ;;  %v7525_v39 = vld [vmem:[#allocation11_spill] sm:$0xff] }
 0x4c9   : > { %v3579_v62 = vpop.f32.mrf.mxu3  ;;  %v3245_v5 = vadd.f32 %v3244_v50, %v7521_v14 }
 0x4ca   : > { %4810 = vst [vmem:[%s6940_s29 + $0x108] sm:$0xff] %v4746_v16  ;;  %v4873_v13 = vadd.f32 %v4872_v8, %v4746_v16  ;;  %v4943_v57 = vmul.f32 %v4746_v16, %v4746_v16  ;;  %v3580_v51 = vadd.f32 %v3579_v62, %v3411_v27  ;;  %v7524_v8 = vld [vmem:[#allocation69_spill] sm:$0xff]  ;;  %v7527_v27 = vld [vmem:[#allocation54_spill] sm:$0xff] }
 0x4cc   : > { %v5006_v10 = vadd.f32 %v5005_v4, %v4943_v57  ;;  %v4047_v20 = vmul.f32 %v6887_v38, %v3580_v51  ;;  %v4576_v4 = vpop.permute.xlu1 %4575 }
 0x4cd   : > { %v4254_v41 = vpop.f32.mrf.mxu0 }
 0x4ce   : > { %v4255_v60 = vadd.f32 %v7128_v17, %v4254_v41  ;;  %v4085_v22 = vpack.c.bf16 %v4047_v20, %v4046_v37  ;;  %v3413_v6 = vpop.f32.mrf.mxu2 }
 0x4cf   : > { %v3414_v26 = vadd.f32 %v3413_v6, %v3245_v5 }
 0x4d0   : > { %v4747_v45 = vmul.f32 %v4566_v32, %v4255_v60  ;;  %4293 = vmatmul.bf16.gmra.mxu0 %v4085_v22  ;;  %v3246_v63 = vpop.f32.mrf.mxu1 }
 0x4d1   : > { %v3582_v46 = vpop.f32.mrf.mxu3  ;;  %v3247_v9 = vadd.f32 %v3246_v63, %v3078_v3 }
 0x4d2   : > { %4811 = vst [vmem:[%s6940_s29 + $0x110] sm:$0xff] %v4747_v45  ;;  %v4874_v56 = vadd.f32 %v4873_v13, %v4747_v45  ;;  %v4944_v43 = vmul.f32 %v4747_v45, %v4747_v45  ;;  %v3583_v28 = vadd.f32 %v3582_v46, %v3414_v26 }
 0x4d4   : > { %v5007_v38 = vadd.f32 %v5006_v10, %v4944_v43  ;;  %v4048_v1 = vmul.f32 %v6882_v44, %v3583_v28  ;;  %v7526_v44 = vld [vmem:[#allocation13_spill] sm:$0xff]  ;;  %v4581_v10 = vpop.permute.xlu2 %4580 }
 0x4d5   : > { %v4256_v15 = vpop.f32.mrf.mxu0  ;;  %v3083_v62 = vadd.f32 %v7527_v27, %v7526_v44 }
 0x4d6   : > { %v4257_v55 = vadd.f32 %v7128_v17, %v4256_v15  ;;  %v3415_v61 = vpop.f32.mrf.mxu2 }
 0x4d7   : > { %v3416_v34 = vadd.f32 %v3415_v61, %v3247_v9 }
 0x4d8   : > { %v4748_v54 = vmul.f32 %v4571_v59, %v4257_v55  ;;  %v3249_v12 = vpop.f32.mrf.mxu1  ;;  %v7529_v59 = vld [vmem:[#allocation15_spill] sm:$0xff] }
 0x4d9   : > { %v3584_v7 = vpop.f32.mrf.mxu3  ;;  %v3250_v52 = vadd.f32 %v3249_v12, %v7525_v39 }
 0x4da   : > { %4812 = vst [vmem:[%s6940_s29 + $0x118] sm:$0xff] %v4748_v54  ;;  %v4875_v47 = vadd.f32 %v4874_v56, %v4748_v54  ;;  %v4945_v49 = vmul.f32 %v4748_v54, %v4748_v54  ;;  %v3585_v48 = vadd.f32 %v3584_v7, %v3416_v34  ;;  %v7528_v56 = vld [vmem:[#allocation70_spill] sm:$0xff]  ;;  %v7531_v34 = vld [vmem:[#allocation55_spill] sm:$0xff] }
 0x4dc   : > { %v5008_v23 = vadd.f32 %v5007_v38, %v4945_v49  ;;  %v4049_v42 = vmul.f32 %v7524_v8, %v3585_v48  ;;  %v4586_v38 = vpop.permute.xlu0 %4585  ;;  %v4596_v27 = vpop.permute.xlu2 %4595 }
 0x4dd   : > { %v4259_v11 = vpop.f32.mrf.mxu0 }
 0x4de   : > { %v4260_v19 = vadd.f32 %v7128_v17, %v4259_v11  ;;  %v4086_v35 = vpack.c.bf16 %v4049_v42, %v4048_v1  ;;  %v3418_v25 = vpop.f32.mrf.mxu2 }
 0x4df   : > { %v3419_v13 = vadd.f32 %v3418_v25, %v3250_v52 }
 0x4e0   : > { %v4749_v24 = vmul.f32 %v4576_v4, %v4260_v19  ;;  %4298 = vmatmul.bf16.gmra.mxu0 %v4086_v35  ;;  %v3251_v0 = vpop.f32.mrf.mxu1 }
 0x4e1   : > { %v3587_v2 = vpop.f32.mrf.mxu3  ;;  %v3252_v51 = vadd.f32 %v3251_v0, %v3083_v62 }
 0x4e2   : > { %4813 = vst [vmem:[%s6940_s29 + $0x120] sm:$0xff] %v4749_v24  ;;  %v4876_v31 = vadd.f32 %v4875_v47, %v4749_v24  ;;  %v4946_v16 = vmul.f32 %v4749_v24, %v4749_v24  ;;  %v3588_v41 = vadd.f32 %v3587_v2, %v3419_v13 }
 0x4e4   : > { %v5009_v50 = vadd.f32 %v5008_v23, %v4946_v16  ;;  %v4050_v14 = vmul.f32 %v6897_v53, %v3588_v41  ;;  %v7530_v53 = vld [vmem:[#allocation17_spill] sm:$0xff]  ;;  %v4591_v23 = vpop.permute.xlu1 %4590  ;;  %v7534_v41 = vld [vmem:[#allocation56_spill] sm:$0xff] }
 0x4e5   : > { %v4261_v57 = vpop.f32.mrf.mxu0  ;;  %v3088_v7 = vadd.f32 %v7531_v34, %v7530_v53 }
 0x4e6   : > { %v4262_v37 = vadd.f32 %v7128_v17, %v4261_v57  ;;  %v3420_v20 = vpop.f32.mrf.mxu2 }
 0x4e7   : > { %v3421_v22 = vadd.f32 %v3420_v20, %v3252_v51  ;;  %v7532_v51 = vld [vmem:[#allocation19_spill] sm:$0xff] }
 0x4e8   : > { %v4750_v60 = vmul.f32 %v4581_v10, %v4262_v37  ;;  %v3254_v6 = vpop.f32.mrf.mxu1 }
 0x4e9   : > { %v3589_v32 = vpop.f32.mrf.mxu3  ;;  %v3255_v61 = vadd.f32 %v3254_v6, %v7529_v59 }
 0x4ea   : > { %4814 = vst [vmem:[%s6940_s29 + $0x128] sm:$0xff] %v4750_v60  ;;  %v4877_v45 = vadd.f32 %v4876_v31, %v4750_v60  ;;  %v4947_v46 = vmul.f32 %v4750_v60, %v4750_v60  ;;  %v3590_v63 = vadd.f32 %v3589_v32, %v3421_v22 }
 0x4ec   : > { %v5010_v5 = vadd.f32 %v5009_v50, %v4947_v46  ;;  %v4051_v43 = vmul.f32 %v7528_v56, %v3590_v63  ;;  %v4601_v46 = vpop.permute.xlu0 %4600 }
 0x4ed   : > { %v4264_v30 = vpop.f32.mrf.mxu0 }
 0x4ee   : > { %v4265_v36 = vadd.f32 %v7128_v17, %v4264_v30  ;;  %v4087_v3 = vpack.c.bf16 %v4051_v43, %v4050_v14  ;;  %v3423_v26 = vpop.f32.mrf.mxu2 }
 0x4ef   : > { %v3424_v47 = vadd.f32 %v3423_v26, %v3255_v61 }
 0x4f0   : > { %v4751_v15 = vmul.f32 %v4586_v38, %v4265_v36  ;;  %4303 = vmatmul.bf16.gmra.mxu0 %v4087_v3  ;;  %v3256_v55 = vpop.f32.mrf.mxu1 }
 0x4f1   : > { %v3592_v9 = vpop.f32.mrf.mxu3  ;;  %v3257_v48 = vadd.f32 %v3256_v55, %v3088_v7 }
 0x4f2   : > { %4815 = vst [vmem:[%s6940_s29 + $0x130] sm:$0xff] %v4751_v15  ;;  %v4878_v28 = vadd.f32 %v4877_v45, %v4751_v15  ;;  %v4948_v54 = vmul.f32 %v4751_v15, %v4751_v15  ;;  %v3593_v42 = vadd.f32 %v3592_v9, %v3424_v47 }
 0x4f4   : > { %v5011_v12 = vadd.f32 %v5010_v5, %v4948_v54  ;;  %v4052_v0 = vmul.f32 %v6899_v40, %v3593_v42  ;;  %v7533_v40 = vld [vmem:[#allocation21_spill] sm:$0xff] }
 0x4f5   : > { %v4266_v49 = vpop.f32.mrf.mxu0  ;;  %v3093_v60 = vadd.f32 %v7534_v41, %v7533_v40  ;;  %v7538_v40 = vld [vmem:[#allocation27_spill] sm:$0xff] }
 0x4f6   : > { %v4267_v1 = vadd.f32 %v7128_v17, %v4266_v49  ;;  %v3425_v8 = vpop.f32.mrf.mxu2 }
 0x4f7   : > { %v3426_v19 = vadd.f32 %v3425_v8, %v3257_v48 }
 0x4f8   : > { %v4752_v11 = vmul.f32 %v4591_v23, %v4267_v1  ;;  %v3259_v4 = vpop.f32.mrf.mxu1  ;;  %v7537_v1 = vld [vmem:[#allocation25_spill] sm:$0xff] }
 0x4f9   : > { %v3594_v35 = vpop.f32.mrf.mxu3  ;;  %v3260_v37 = vadd.f32 %v3259_v4, %v7532_v51  ;;  %v4616_v51 = vpop.permute.xlu0 %4615 }
 0x4fa   : > { %4816 = vst [vmem:[%s6940_s29 + $0x138] sm:$0xff] %v4752_v11  ;;  %v4879_v25 = vadd.f32 %v4878_v28, %v4752_v11  ;;  %v4949_v24 = vmul.f32 %v4752_v11, %v4752_v11  ;;  %v3595_v2 = vadd.f32 %v3594_v35, %v3426_v19  ;;  %v4606_v28 = vpop.permute.xlu1 %4605  ;;  %v4611_v35 = vpop.permute.xlu2 %4610 }
 0x4fc   : > { %v5012_v39 = vadd.f32 %v5011_v12, %v4949_v24  ;;  %v4053_v52 = vmul.f32 %v6905_v18, %v3595_v2  ;;  %v7535_v12 = vld [vmem:[#allocation23_spill] sm:$0xff] }
 0x4fd   : > { %v4269_v31 = vpop.f32.mrf.mxu0 }
 0x4fe   : > { %v4270_v16 = vadd.f32 %v7128_v17, %v4269_v31  ;;  %v4088_v44 = vpack.c.bf16 %v4053_v52, %v4052_v0  ;;  %v3428_v62 = vpop.f32.mrf.mxu2 }
 0x4ff   : > { %v3429_v22 = vadd.f32 %v3428_v62, %v3260_v37 }
 0x500   : > { %v4753_v50 = vmul.f32 %v4596_v27, %v4270_v16  ;;  %4308 = vmatmul.bf16.gmra.mxu0 %v4088_v44  ;;  %v3261_v57 = vpop.f32.mrf.mxu1 }
 0x501   : > { %v3597_v13 = vpop.f32.mrf.mxu3  ;;  %v3262_v6 = vadd.f32 %v3261_v57, %v3093_v60 }
 0x502   : > { %4817 = vst [vmem:[%s6940_s29 + $0x140] sm:$0xff] %v4753_v50  ;;  %v4880_v10 = vadd.f32 %v4879_v25, %v4753_v50  ;;  %v4950_v20 = vmul.f32 %v4753_v50, %v4753_v50  ;;  %v3598_v14 = vadd.f32 %v3597_v13, %v3429_v22 }
 0x504   : > { %v5013_v18 = vadd.f32 %v5012_v39, %v4950_v20  ;;  %v4054_v26 = vmul.f32 %v6901_v33, %v3598_v14  ;;  %v7536_v33 = vld [vmem:[#allocation57_spill] sm:$0xff] }
 0x505   : > { %v4271_v32 = vpop.f32.mrf.mxu0  ;;  %v3098_v23 = vadd.f32 %v7537_v1, %v7536_v33  ;;  %v7287_v1 = vld [vmem:[%s7334_s3] ss:$0 sm:$0xff] }
 0x506   : > { %v4272_v45 = vadd.f32 %v7128_v17, %v4271_v32  ;;  %v3430_v63 = vpop.f32.mrf.mxu2  ;;  %v7540_v32 = vld [vmem:[#allocation32_spill] sm:$0xff] }
 0x507   : > { %v3431_v56 = vadd.f32 %v3430_v63, %v3262_v6 }
 0x508   : > { %v4754_v5 = vmul.f32 %v4601_v46, %v4272_v45  ;;  %v3264_v30 = vpop.f32.mrf.mxu1 }
 0x509   : > { %v3599_v43 = vpop.f32.mrf.mxu3  ;;  %v3265_v47 = vadd.f32 %v3264_v30, %v7535_v12 }
 0x50a   : > { %4818 = vst [vmem:[%s6940_s29 + $0x148] sm:$0xff] %v4754_v5  ;;  %v4881_v36 = vadd.f32 %v4880_v10, %v4754_v5  ;;  %v4951_v3 = vmul.f32 %v4754_v5, %v4754_v5  ;;  %v3600_v38 = vadd.f32 %v3599_v43, %v3431_v56  ;;  %v4621_v5 = vpop.permute.xlu1 %4620 }
 0x50c   : > { %v5014_v15 = vadd.f32 %v5013_v18, %v4951_v3  ;;  %v4055_v9 = vmul.f32 %v6908_v29, %v3600_v38 }
 0x50d   : > { %v4274_v55 = vpop.f32.mrf.mxu0 }
 0x50e   : > { %v4275_v59 = vadd.f32 %v7128_v17, %v4274_v55  ;;  %v4089_v61 = vpack.c.bf16 %v4055_v9, %v4054_v26  ;;  %v3433_v54 = vpop.f32.mrf.mxu2  ;;  %v7541_v9 = vld [vmem:[#allocation71_spill] sm:$0xff] }
 0x50f   : > { %v3434_v8 = vadd.f32 %v3433_v54, %v3265_v47 }
 0x510   : > { %v4755_v53 = vmul.f32 %v4606_v28, %v4275_v59  ;;  %4313 = vmatmul.bf16.gmra.mxu0 %v4089_v61  ;;  %v3266_v7 = vpop.f32.mrf.mxu1  ;;  %v7542_v61 = vld [vmem:[#allocation72_spill] sm:$0xff] }
 0x511   : > { %v3602_v34 = vpop.f32.mrf.mxu3  ;;  %v3267_v11 = vadd.f32 %v3266_v7, %v3098_v23  ;;  %v4626_v7 = vpop.permute.xlu2 %4625 }
 0x512   : > { %4819 = vst [vmem:[%s6940_s29 + $0x150] sm:$0xff] %v4755_v53  ;;  %v4882_v49 = vadd.f32 %v4881_v36, %v4755_v53  ;;  %v4952_v48 = vmul.f32 %v4755_v53, %v4755_v53  ;;  %v3603_v25 = vadd.f32 %v3602_v34, %v3434_v8 }
 0x514   : > { %v5015_v29 = vadd.f32 %v5014_v15, %v4952_v48  ;;  %v4056_v44 = vmul.f32 %v6920_v21, %v3603_v25  ;;  %v7539_v21 = vld [vmem:[#allocation58_spill] sm:$0xff] }
 0x515   : > { %v4276_v42 = vpop.f32.mrf.mxu0  ;;  %v3103_v6 = vadd.f32 %v7540_v32, %v7539_v21 }
 0x516   : > { %v4277_v19 = vadd.f32 %v7128_v17, %v4276_v42  ;;  %v3435_v4 = vpop.f32.mrf.mxu2 }
 0x517   : > { %v3436_v2 = vadd.f32 %v3435_v4, %v3267_v11  ;;  %v4636_v4 = vpop.permute.xlu1 %4635 }
 0x518   : > { %v4756_v24 = vmul.f32 %v4611_v35, %v4277_v19  ;;  %v3269_v39 = vpop.f32.mrf.mxu1 }
 0x519   : > { %v3604_v0 = vpop.f32.mrf.mxu3  ;;  %v3270_v41 = vadd.f32 %v3269_v39, %v7538_v40 }
 0x51a   : > { %4820 = vst [vmem:[%s6940_s29 + $0x158] sm:$0xff] %v4756_v24  ;;  %v4883_v52 = vadd.f32 %v4882_v49, %v4756_v24  ;;  %v4953_v31 = vmul.f32 %v4756_v24, %v4756_v24  ;;  %v3605_v16 = vadd.f32 %v3604_v0, %v3436_v2 }
 0x51c   : > { %v5016_v27 = vadd.f32 %v5015_v29, %v4953_v31  ;;  %v4057_v62 = vmul.f32 %v6910_v58, %v3605_v16  ;;  %v4631_v29 = vpop.permute.xlu0 %4630  ;;  %v4641_v31 = vpop.permute.xlu2 %4640 }
 0x51d   : > { %v4279_v50 = vpop.f32.mrf.mxu0 }
 0x51e   : > { %v4280_v13 = vadd.f32 %v7128_v17, %v4279_v50  ;;  %v4090_v57 = vpack.c.bf16 %v4057_v62, %v4056_v44  ;;  %v3438_v37 = vpop.f32.mrf.mxu2 }
 0x51f   : > { %v3439_v45 = vadd.f32 %v3438_v37, %v3270_v41 }
 0x520   : > { %v4757_v10 = vmul.f32 %v4616_v51, %v4280_v13  ;;  %4318 = vmatmul.bf16.gmra.mxu0 %v4090_v57  ;;  %v3271_v22 = vpop.f32.mrf.mxu1 }
 0x521   : > { %v3607_v20 = vpop.f32.mrf.mxu3  ;;  %v3272_v63 = vadd.f32 %v3271_v22, %v3103_v6 }
 0x522   : > { %4821 = vst [vmem:[%s6940_s29 + $0x160] sm:$0xff] %v4757_v10  ;;  %v4884_v60 = vadd.f32 %v4883_v52, %v4757_v10  ;;  %v4954_v18 = vmul.f32 %v4757_v10, %v4757_v10  ;;  %v3608_v43 = vadd.f32 %v3607_v20, %v3439_v45 }
 0x524   : > { %v5017_v58 = vadd.f32 %v5016_v27, %v4954_v18  ;;  %v4058_v55 = vmul.f32 %v7541_v9, %v3608_v43  ;;  %v4646_v57 = vpop.permute.xlu0 %4645  ;;  %v4656_v45 = vpop.permute.xlu2 %4655 }
 0x525   : > { %v4281_v46 = vpop.f32.mrf.mxu0 }
 0x526   : > { %v4282_v14 = vadd.f32 %v7128_v17, %v4281_v46  ;;  %v3440_v56 = vpop.f32.mrf.mxu2 }
 0x527   : > { %v3441_v36 = vadd.f32 %v3440_v56, %v3272_v63 }
 0x528   : > { %v4758_v30 = vmul.f32 %v4621_v5, %v4282_v14 }
 0x529   : > { %v3609_v3 = vpop.f32.mrf.mxu3 }
 0x52a   : > { %4822 = vst [vmem:[%s6940_s29 + $0x168] sm:$0xff] %v4758_v30  ;;  %v4885_v38 = vadd.f32 %v4884_v60, %v4758_v30  ;;  %v4955_v26 = vmul.f32 %v4758_v30, %v4758_v30  ;;  %v3610_v15 = vadd.f32 %v3609_v3, %v3441_v36  ;;  %v4651_v60 = vpop.permute.xlu1 %4650 }
 0x52c   : > { %v5018_v59 = vadd.f32 %v5017_v58, %v4955_v26  ;;  %v4059_v28 = vmul.f32 %v7542_v61, %v3610_v15  ;;  %v4661_v30 = vpop.permute.xlu0 %4660  ;;  %v4671_v61 = vpop.permute.xlu2 %4670 }
 0x52d   : > { %v4284_v54 = vpop.f32.mrf.mxu0 }
 0x52e   : > { %v4285_v53 = vadd.f32 %v7128_v17, %v4284_v54  ;;  %v4091_v34 = vpack.c.bf16 %v4059_v28, %v4058_v55 }
 0x530   : > { %v4759_v12 = vmul.f32 %v4626_v7, %v4285_v53  ;;  %4323 = vmatmul.bf16.gmra.mxu0 %v4091_v34 }
 0x532   : > { %4823 = vst [vmem:[%s6940_s29 + $0x170] sm:$0xff] %v4759_v12  ;;  %v4886_v47 = vadd.f32 %v4885_v38, %v4759_v12  ;;  %v4956_v49 = vmul.f32 %v4759_v12, %v4759_v12  ;;  %v4666_v15 = vpop.permute.xlu1 %4665 }
 0x534   : > { %v5019_v48 = vadd.f32 %v5018_v59, %v4956_v49  ;;  %v4676_v34 = vpop.permute.xlu0 %4675 }
 0x535   : > { %v4286_v33 = vpop.f32.mrf.mxu0 }
 0x536   : > { %v4287_v23 = vadd.f32 %v7287_v1, %v4286_v33 }
 0x538   : > { %v4760_v8 = vmul.f32 %v4631_v29, %v4287_v23  ;;  %v4686_v29 = vpop.permute.xlu2 %4685 }
 0x53a   : > { %4824 = vst [vmem:[%s6940_s29 + $0x178] sm:$0xff] %v4760_v8  ;;  %v4887_v17 = vadd.f32 %v4886_v47, %v4760_v8  ;;  %v4957_v42 = vmul.f32 %v4760_v8, %v4760_v8  ;;  %v4681_v49 = vpop.permute.xlu1 %4680 }
 0x53c   : > { %v5020_v11 = vadd.f32 %v5019_v48, %v4957_v42 }
 0x53d   : > { %v4289_v19 = vpop.f32.mrf.mxu0 }
 0x53e   : > { %v4290_v35 = vadd.f32 %v7287_v1, %v4289_v19 }
 0x540   : > { %v4761_v25 = vmul.f32 %v4636_v4, %v4290_v35 }
 0x542   : > { %4825 = vst [vmem:[%s6940_s29 + $0x180] sm:$0xff] %v4761_v25  ;;  %v4888_v24 = vadd.f32 %v4887_v17, %v4761_v25  ;;  %v4958_v2 = vmul.f32 %v4761_v25, %v4761_v25  ;;  %v4696_v25 = vpop.permute.xlu1 %4695 }
 0x544   : > { %v5021_v0 = vadd.f32 %v5020_v11, %v4958_v2  ;;  %v4691_v11 = vpop.permute.xlu0 %4690 }
 0x545   : > { %v4291_v39 = vpop.f32.mrf.mxu0 }
 0x546   : > { %v4292_v52 = vadd.f32 %v7287_v1, %v4291_v39 }
 0x548   : > { %v4762_v16 = vmul.f32 %v4641_v31, %v4292_v52  ;;  %v4701_v31 = vpop.permute.xlu2 %4700 }
 0x54a   : > { %4826 = vst [vmem:[%s6940_s29 + $0x188] sm:$0xff] %v4762_v16  ;;  %v4889_v44 = vadd.f32 %v4888_v24, %v4762_v16  ;;  %v4959_v27 = vmul.f32 %v4762_v16, %v4762_v16 }
 0x54c   : > { %v5022_v62 = vadd.f32 %v5021_v0, %v4959_v27 }
 0x54d   : > { %v4294_v50 = vpop.f32.mrf.mxu0 }
 0x54e   : > { %v4295_v13 = vadd.f32 %v7287_v1, %v4294_v50 }
 0x550   : > { %v4763_v51 = vmul.f32 %v4646_v57, %v4295_v13 }
 0x552   : > { %4827 = vst [vmem:[%s6940_s29 + $0x190] sm:$0xff] %v4763_v51  ;;  %v4890_v37 = vadd.f32 %v4889_v44, %v4763_v51  ;;  %v4960_v10 = vmul.f32 %v4763_v51, %v4763_v51 }
 0x554   : > { %v5023_v20 = vadd.f32 %v5022_v62, %v4960_v10 }
 0x555   : > { %v4296_v40 = vpop.f32.mrf.mxu0 }
 0x556   : > { %v4297_v41 = vadd.f32 %v7287_v1, %v4296_v40 }
 0x558   : > { %v4764_v18 = vmul.f32 %v4651_v60, %v4297_v41 }
 0x55a   : > { %4828 = vst [vmem:[%s6940_s29 + $0x198] sm:$0xff] %v4764_v18  ;;  %v4891_v22 = vadd.f32 %v4890_v37, %v4764_v18  ;;  %v4961_v21 = vmul.f32 %v4764_v18, %v4764_v18 }
 0x55c   : > { %v5024_v32 = vadd.f32 %v5023_v20, %v4961_v21 }
 0x55d   : > { %v4299_v6 = vpop.f32.mrf.mxu0 }
 0x55e   : > { %v4300_v58 = vadd.f32 %v7287_v1, %v4299_v6 }
 0x560   : > { %v4765_v46 = vmul.f32 %v4656_v45, %v4300_v58 }
 0x562   : > { %4829 = vst [vmem:[%s6940_s29 + $0x1a0] sm:$0xff] %v4765_v46  ;;  %v4892_v63 = vadd.f32 %v4891_v22, %v4765_v46  ;;  %v4962_v14 = vmul.f32 %v4765_v46, %v4765_v46  ;;  %v4706_v22 = vpop.permute.xlu0 %4705 }
 0x564   : > { %v5025_v5 = vadd.f32 %v5024_v32, %v4962_v14 }
 0x565   : > { %v4301_v56 = vpop.f32.mrf.mxu0 }
 0x566   : > { %v4302_v43 = vadd.f32 %v7287_v1, %v4301_v56 }
 0x568   : > { %v4766_v36 = vmul.f32 %v4661_v30, %v4302_v43 }
 0x56a   : > { %4830 = vst [vmem:[%s6940_s29 + $0x1a8] sm:$0xff] %v4766_v36  ;;  %v4893_v3 = vadd.f32 %v4892_v63, %v4766_v36  ;;  %v4963_v2 = vmul.f32 %v4766_v36, %v4766_v36 }
 0x56c   : > { %v5026_v16 = vadd.f32 %v5025_v5, %v4963_v2 }
 0x56d   : > { %v4304_v38 = vpop.f32.mrf.mxu0 }
 0x56e   : > { %v4305_v26 = vadd.f32 %v7287_v1, %v4304_v38 }
 0x570   : > { %v4767_v9 = vmul.f32 %v4666_v15, %v4305_v26  ;;  %v4711_v26 = vpop.permute.xlu1 %4710 }
 0x572   : > { %4831 = vst [vmem:[%s6940_s29 + $0x1b0] sm:$0xff] %v4767_v9  ;;  %v4964_v39 = vmul.f32 %v4767_v9, %v4767_v9  ;;  %v4894_v44 = vadd.f32 %v4893_v3, %v4767_v9 }
 0x574   : > { %v5027_v50 = vadd.f32 %v5026_v16, %v4964_v39 }
 0x575   : > { %v4306_v55 = vpop.f32.mrf.mxu0 }
 0x576   : > { %v4307_v59 = vadd.f32 %v7287_v1, %v4306_v55 }
 0x578   : > { %v4768_v28 = vmul.f32 %v4671_v61, %v4307_v59 }
 0x57a   : > { %4832 = vst [vmem:[%s6940_s29 + $0x1b8] sm:$0xff] %v4768_v28  ;;  %v4965_v27 = vmul.f32 %v4768_v28, %v4768_v28  ;;  %v4895_v13 = vadd.f32 %v4894_v44, %v4768_v28 }
 0x57c   : > { %v5028_v51 = vadd.f32 %v5027_v50, %v4965_v27 }
 0x57d   : > { %v4309_v54 = vpop.f32.mrf.mxu0 }
 0x57e   : > { %v4310_v53 = vadd.f32 %v7287_v1, %v4309_v54 }
 0x580   : > { %v4769_v7 = vmul.f32 %v4676_v34, %v4310_v53 }
 0x582   : > { %4833 = vst [vmem:[%s6940_s29 + $0x1c0] sm:$0xff] %v4769_v7  ;;  %v4966_v57 = vmul.f32 %v4769_v7, %v4769_v7  ;;  %v4896_v37 = vadd.f32 %v4895_v13, %v4769_v7 }
 0x584   : > { %v5029_v40 = vadd.f32 %v5028_v51, %v4966_v57 }
 0x585   : > { %v4311_v12 = vpop.f32.mrf.mxu0 }
 0x586   : > { %v4312_v47 = vadd.f32 %v7287_v1, %v4311_v12  ;;  %v5043_v12 = vlaneseq }
 0x588   : > { %v4770_v48 = vmul.f32 %v4681_v49, %v4312_v47 }
 0x58a   : > { %4834 = vst [vmem:[%s6940_s29 + $0x1c8] sm:$0xff] %v4770_v48  ;;  %v4967_v10 = vmul.f32 %v4770_v48, %v4770_v48  ;;  %v4897_v41 = vadd.f32 %v4896_v37, %v4770_v48 }
 0x58c   : > { %v5030_v21 = vadd.f32 %v5029_v40, %v4967_v10 }
 0x58d   : > { %v4314_v33 = vpop.f32.mrf.mxu0 }
 0x58e   : > { %v4315_v23 = vadd.f32 %v7287_v1, %v4314_v33  ;;  %v5044_v33 = vshrl.u32 %v5043_v12, 7 }
 0x590   : > { %v4771_v8 = vmul.f32 %v4686_v29, %v4315_v23  ;;  %vm5046_vm0 = vcmp.eq.s32.totalorder %v5044_v33, 1  ;;  %vm5045_vm1 = vcmp.eq.s32.totalorder %v5044_v33, 0 }
 0x592   : > { %4835 = vst [vmem:[%s6940_s29 + $0x1d0] sm:$0xff] %v4771_v8  ;;  %v4968_v60 = vmul.f32 %v4771_v8, %v4771_v8  ;;  %v4898_v32 = vadd.f32 %v4897_v41, %v4771_v8 }
 0x594   : > { %v5031_v45 = vadd.f32 %v5030_v21, %v4968_v60 }
 0x595   : > { %v4316_v17 = vpop.f32.mrf.mxu0 }
 0x596   : > { %v4317_v42 = vadd.f32 %v7287_v1, %v4316_v17 }
 0x598   : > { %v4772_v19 = vmul.f32 %v4691_v11, %v4317_v42 }
 0x59a   : > { %4836 = vst [vmem:[%s6940_s29 + $0x1d8] sm:$0xff] %v4772_v19  ;;  %v4969_v6 = vmul.f32 %v4772_v19, %v4772_v19  ;;  %v4899_v46 = vadd.f32 %v4898_v32, %v4772_v19 }
 0x59c   : > { %v5032_v14 = vadd.f32 %v5031_v45, %v4969_v6 }
 0x59d   : > { %v4319_v35 = vpop.f32.mrf.mxu0 }
 0x59e   : > { %v4320_v4 = vadd.f32 %v7287_v1, %v4319_v35 }
 0x5a0   : > { %v4773_v24 = vmul.f32 %v4696_v25, %v4320_v4 }
 0x5a2   : > { %4837 = vst [vmem:[%s6940_s29 + $0x1e0] sm:$0xff] %v4773_v24  ;;  %v4970_v63 = vmul.f32 %v4773_v24, %v4773_v24  ;;  %v4900_v5 = vadd.f32 %v4899_v46, %v4773_v24 }
 0x5a4   : > { %v5033_v30 = vadd.f32 %v5032_v14, %v4970_v63 }
 0x5a5   : > { %v4321_v0 = vpop.f32.mrf.mxu0 }
 0x5a6   : > { %v4322_v52 = vadd.f32 %v7287_v1, %v4321_v0 }
 0x5a8   : > { %v4774_v62 = vmul.f32 %v4701_v31, %v4322_v52 }
 0x5aa   : > { %4838 = vst [vmem:[%s6940_s29 + $0x1e8] sm:$0xff] %v4774_v62  ;;  %v4971_v56 = vmul.f32 %v4774_v62, %v4774_v62  ;;  %v4901_v36 = vadd.f32 %v4900_v5, %v4774_v62 }
 0x5ac   : > { %v5034_v15 = vadd.f32 %v5033_v30, %v4971_v56 }
 0x5ad   : > { %v4324_v20 = vpop.f32.mrf.mxu0 }
 0x5ae   : > { %v4325_v18 = vadd.f32 %v7287_v1, %v4324_v20 }
 0x5b0   : > { %v4775_v58 = vmul.f32 %v4706_v22, %v4325_v18 }
 0x5b2   : > { %4839 = vst [vmem:[%s6940_s29 + $0x1f0] sm:$0xff] %v4775_v58  ;;  %v4972_v3 = vmul.f32 %v4775_v58, %v4775_v58  ;;  %v4902_v9 = vadd.f32 %v4901_v36, %v4775_v58 }
 0x5b4   : > { %v5035_v59 = vadd.f32 %v5034_v15, %v4972_v3 }
 0x5b5   : > { %v4326_v43 = vpop.f32.mrf.mxu0 }
 0x5b6   : > { %v4327_v38 = vadd.f32 %v7287_v1, %v4326_v43 }
 0x5b8   : > { %v4776_v55 = vmul.f32 %v4711_v26, %v4327_v38 }
 0x5ba   : > { %4840 = vst [vmem:[%s6940_s29 + $0x1f8] sm:$0xff] %v4776_v55  ;;  %v4903_v61 = vadd.f32 %v4902_v9, %v4776_v55  ;;  %v4973_v28 = vmul.f32 %v4776_v55, %v4776_v55 }
 0x5bc   : > { %v4904_v54 = vrot.slane %v4903_v61, 4  ;;  %v5036_v53 = vadd.f32 %v5035_v59, %v4973_v28 }
 0x5be   : > { %v4905_v34 = vadd.f32 %v4904_v54, %v4903_v61  ;;  %v5037_v7 = vrot.slane %v5036_v53, 4 }
 0x5c0   : > { %v4906_v47 = vrot.slane %v4905_v34, 2  ;;  %v5038_v49 = vadd.f32 %v5037_v7, %v5036_v53 }
 0x5c2   : > { %v4907_v48 = vadd.f32 %v4906_v47, %v4905_v34  ;;  %v5039_v1 = vrot.slane %v5038_v49, 2 }
 0x5c4   : > { %v5040_v23 = vadd.f32 %v5039_v1, %v5038_v49  ;;  %v4908_v29 = vrot.slane %v4907_v48, 1 }
 0x5c6   : > { %v5041_v8 = vrot.slane %v5040_v23, 1  ;;  %v4909_v42 = vadd.f32 %v4908_v29, %v4907_v48 }
 0x5c8   : > { %v5042_v17 = vadd.f32 %v5041_v8, %v5040_v23 }
 0x5ca   : > { %v5047_v11 = vsel %vm5046_vm0, %v5042_v17, 0.0 }
 0x5cb   : > { %v5048_v19 = vsel %vm5045_vm1, %v4909_v42, %v5047_v11 }
 0x5cc   : > { %5049 = vst [vmem:[%s339_s12] sm:$0xff] %v5048_v19 }
 0x5cd PF: > { %s18_s24 = sadd.s32 1, %s5584_s24  }
 0x5ce   : > { %p15_p6 = scmp.ge.s32.totalorder %s18_s24, 4  }
 0x5d0   :  { %17 = sbr.rel (!%p15_p6) target bundleno = 1 (0x1), region = 92 }

</bundles_post_ra>
